<compile_context>
chip_gen: v7x
topology: tpu7x:2x2x1
jax: 0.10.0
libtpu: 0.0.40
codegen_flags: <defaults>
</compile_context>

<pallas_src>
import functools

import jax
import jax.numpy as jnp
from jax import lax
from jax.experimental import pallas as pl
from jax.experimental.pallas import tpu as pltpu


_PREC = lax.Precision.HIGHEST


def _vmem_spec():
    return pl.BlockSpec(memory_space=pltpu.MemorySpace.VMEM)


def _dot(a, b):
    return jnp.dot(a, b, preferred_element_type=jnp.float32, precision=_PREC)


# ----------------------------- fused Pallas kernel ---------------------------

def _make_fused_kernel(B, Bp, T, L, V, E, H, O, n_layers):
    """Builds the fused forward kernel.

    Ref order (inputs, output, scratch):
      ids_ref    : (L, T*Bp, 1) int32  token ids split per slot, time-major rows
      extras_ref : (T*Bp, 2)    f32    [dates, amounts] per (t, padded b)
      emb_ref    : (V, E)       f32    embedding table
      per layer: wih_f_spread (Din, 8H), wih_b_spread (Din, 8H),
                 b_f_spread (1, 8H),  b_b_spread (1, 8H),  whh_blk (2H, 8H)
                 Din = E+2 for layer 0, else 2H.  Fused gate column layout is
                 [i_f i_b | f_f f_b | o_f o_b | g_f g_b]; each direction's
                 spread matrices hold zeros in the other direction's columns.
      fc: w1t (2H, H), b1 (1, H), w2t (H, O), b2 (1, O)
      out_ref    : (B, O) f32          logits
      scratch    : xwf/xwb (T*Bp, 8H), seq_f/seq_b (T*Bp, H)
    """
    TBp = T * Bp
    H2, H4, H6, H8 = 2 * H, 4 * H, 6 * H, 8 * H
    f32 = jnp.float32

    def kernel(*refs):
        ids_ref, extras_ref, emb_ref = refs[0], refs[1], refs[2]
        base = 3
        layer_refs = refs[base:base + 5 * n_layers]
        fc_base = base + 5 * n_layers
        w1t_ref, b1_ref, w2t_ref, b2_ref = refs[fc_base:fc_base + 4]
        out_ref = refs[fc_base + 4]
        xwf_ref, xwb_ref, seqf_ref, seqb_ref = refs[fc_base + 5:fc_base + 9]

        # ---- embedding(input_ids).sum(dim=2) as one-hot-count matmul (MXU) ----
        # TODO(synk): for production vocab sizes, tile the (V, E) table /
        # counts over a grid axis (or DMA row-gather) to bound VMEM.
        vid = lax.broadcasted_iota(jnp.int32, (TBp, V), 1)   # lane idx == vocab id
        counts = jnp.zeros((TBp, V), f32)
        for l in range(L):                                   # L static, unrolled
            counts = counts + jnp.where(ids_ref[l] == vid, 1.0, 0.0)
        emb_sum = _dot(counts, emb_ref[...])                 # (T*Bp, E)
        extras = extras_ref[...]                             # (T*Bp, 2)

        h = None
        for layer in range(n_layers):
            wf_ref, wb_ref, bf_ref, bb_ref, whh_ref = layer_refs[5 * layer:5 * layer + 5]

            # Hoisted input projection: whole-sequence matmuls, rows in TIME
            # order, written straight into the spread 8H-wide gate layout.
            # Layer 0 folds the [emb | dates | amounts] concat into row-split
            # matmuls; layers >= 1 fold the [fwd | bwd] concat the same way.
            if layer == 0:
                xwf_ref[...] = (_dot(emb_sum, wf_ref[0:E, :])
                                + _dot(extras, wf_ref[E:E + 2, :]) + bf_ref[...])
                xwb_ref[...] = (_dot(emb_sum, wb_ref[0:E, :])
                                + _dot(extras, wb_ref[E:E + 2, :]) + bb_ref[...])
            else:
                sf = seqf_ref[...]                            # (T*Bp, H)
                sb = seqb_ref[...]                            # (T*Bp, H)
                xwf_ref[...] = (_dot(sf, wf_ref[0:H, :])
                                + _dot(sb, wf_ref[H:H2, :]) + bf_ref[...])
                xwb_ref[...] = (_dot(sf, wb_ref[0:H, :])
                                + _dot(sb, wb_ref[H:H2, :]) + bb_ref[...])

            whh = whh_ref[...]                                # (2H, 8H), hoisted
            h = jnp.zeros((Bp, H2), f32)                      # packed [h_f | h_b]
            c = jnp.zeros((Bp, H2), f32)                      # packed [c_f | c_b]
            last = (layer == n_layers - 1)

            # Serial recurrence.  One fused matmul + one sigmoid region + two
            # tanh regions per step.  fwd reads time s, bwd reads time T-1-s.
            for s in range(T):
                tb = T - 1 - s
                g = _dot(h, whh)                              # (Bp, 8H)
                g = (g + xwf_ref[s * Bp:(s + 1) * Bp, :]
                       + xwb_ref[tb * Bp:(tb + 1) * Bp, :])
                sig = jax.nn.sigmoid(g[:, 0:H6])              # [i | f | o] packed
                gg = jnp.tanh(g[:, H6:H8])                    # [g_f | g_b]
                c = sig[:, H2:H4] * c + sig[:, 0:H2] * gg
                h = sig[:, H4:H6] * jnp.tanh(c)
                if not last:
                    # next-layer input at the matching ACTUAL time index,
                    # stored lane-dense at offset 0 in split buffers.
                    seqf_ref[s * Bp:(s + 1) * Bp, :] = h[:, 0:H]
                    seqb_ref[tb * Bp:(tb + 1) * Bp, :] = h[:, H:H2]

        # ---- fc head: Linear(2H -> H) -> ReLU -> Linear(H -> O) ---------------
        # packed final h == cat(hidden[-2], hidden[-1]); dropout is eval no-op.
        h1 = jnp.maximum(_dot(h, w1t_ref[...]) + b1_ref[...], 0.0)
        logits = _dot(h1, w2t_ref[...]) + b2_ref[...]
        out_ref[...] = logits[0:B, :]

    return kernel


# ------------------------------- parameter prep --------------------------------

def prepare_params(params):
    """One-time parameter prep (transposes, bias folding, gate-column
    permutation into the fused spread layout, block-diagonal W_hh)."""
    H = params["fc1_w"].shape[0]

    def spread_cols(w_t, direction):
        # w_t: (Din, 4H) with PyTorch gate column order [i, f, g, o].
        # Returns (Din, 8H) in fused layout [i_f i_b f_f f_b o_f o_b g_f g_b]
        # with zero columns for the other direction.
        i = w_t[:, 0:H]
        f = w_t[:, H:2 * H]
        g = w_t[:, 2 * H:3 * H]
        o = w_t[:, 3 * H:4 * H]
        z = jnp.zeros_like(i)
        blocks = ([i, z, f, z, o, z, g, z] if direction == 0
                  else [z, i, z, f, z, o, z, g])
        return jnp.concatenate(blocks, axis=1)

    layers = []
    for lp in params["lstm"]:
        wih_f, whh_f, bih_f, bhh_f = lp["fwd"]
        wih_b, whh_b, bih_b, bhh_b = lp["bwd"]
        wf = spread_cols(jnp.transpose(wih_f), 0)                  # (Din, 8H)
        wb = spread_cols(jnp.transpose(wih_b), 1)
        bf = spread_cols((bih_f + bhh_f).reshape(1, -1), 0)        # (1, 8H)
        bb = spread_cols((bih_b + bhh_b).reshape(1, -1), 1)
        whh_blk = jnp.concatenate(
            [spread_cols(jnp.transpose(whh_f), 0),
             spread_cols(jnp.transpose(whh_b), 1)], axis=0)        # (2H, 8H)
        layers.append((wf, wb, bf, bb, whh_blk))

    return {
        "embedding": params["embedding"],
        "hidden_dim": H,
        "layers": layers,
        "fc1_wt": jnp.transpose(params["fc1_w"]),
        "fc1_b": params["fc1_b"].reshape(1, -1),
        "fc2_wt": jnp.transpose(params["fc2_w"]),
        "fc2_b": params["fc2_b"].reshape(1, -1),
    }


# ---------------------------------- wrapper -------------------------------------

def simple_lstm_classifier_forward(prepped, dates, input_ids, amounts):
    """Inference-mode forward (label=None path): returns logits (B, output_dim)."""
    B, T, L = input_ids.shape
    V, E = prepped["embedding"].shape
    H = prepped["hidden_dim"]
    O = prepped["fc2_wt"].shape[1]
    n_layers = len(prepped["layers"])

    # Pad batch up to a full 8-row sublane tile so all per-step accesses inside
    # the kernel are tile-aligned.  Padded rows never reach the output.
    Bp = max(8, ((B + 7) // 8) * 8)
    TBp = T * Bp

    # Only glue left outside the kernel: time-major re-layout + batch padding.
    ids_tm = jnp.transpose(input_ids, (1, 0, 2)).astype(jnp.int32)     # (T, B, L)
    ids_p = jnp.zeros((T, Bp, L), jnp.int32).at[:, :B, :].set(ids_tm)
    ids_lm = jnp.transpose(ids_p.reshape(TBp, L))[:, :, None]          # (L, T*Bp, 1)

    extras_tm = jnp.stack([jnp.transpose(dates), jnp.transpose(amounts)],
                          axis=-1).astype(jnp.float32)                 # (T, B, 2)
    extras = (jnp.zeros((T, Bp, 2), jnp.float32)
              .at[:, :B, :].set(extras_tm).reshape(TBp, 2))

    args = [ids_lm, extras, prepped["embedding"]]
    for layer in prepped["layers"]:
        args.extend(layer)
    args.extend([prepped["fc1_wt"], prepped["fc1_b"],
                 prepped["fc2_wt"], prepped["fc2_b"]])

    scratch_shapes = [pltpu.VMEM((TBp, 8 * H), jnp.float32),   # xw fwd (spread)
                      pltpu.VMEM((TBp, 8 * H), jnp.float32),   # xw bwd (spread)
                      pltpu.VMEM((TBp, H), jnp.float32),       # seq fwd
                      pltpu.VMEM((TBp, H), jnp.float32)]       # seq bwd

    # Explicit scoped-VMEM budget (v5e's default is only 16 MiB).
    scratch_bytes = (2 * TBp * 8 * H + 2 * TBp * H) * 4
    arg_bytes = sum(int(a.size) * a.dtype.itemsize for a in args)
    footprint = arg_bytes + scratch_bytes + B * O * 4
    vmem_limit = int(min(2 * footprint + (16 << 20), 56 << 20))

    kernel = _make_fused_kernel(B, Bp, T, L, V, E, H, O, n_layers)
    return pl.pallas_call(
        kernel,
        out_shape=jax.ShapeDtypeStruct((B, O), jnp.float32),
        in_specs=[_vmem_spec() for _ in args],
        out_specs=_vmem_spec(),
        scratch_shapes=scratch_shapes,
        compiler_params=pltpu.CompilerParams(vmem_limit_bytes=vmem_limit),
    )(*args)
    # TODO(synk): training path (F.cross_entropy on label) not implemented;
    # only the label=None inference path is reproduced.
    # TODO(synk): add a batch grid axis with dimension_semantics=("parallel",)
    # to use v7x's second TensorCore once B spans multiple 8-row tiles.


# ------------------------------ pure-JAX reference ----------------------------

def reference_forward(params, dates, input_ids, amounts):
    """Plain-XLA reference matching the PyTorch module's inference path."""
    emb = jnp.take(params["embedding"], input_ids, axis=0)       # (B,T,L,E)
    x = jnp.concatenate([emb.sum(axis=2), dates[..., None], amounts[..., None]],
                        axis=-1)

    def run_dir(x_seq, w_ih, w_hh, b_ih, b_hh, reverse):
        Bq, Tq, _ = x_seq.shape
        Hh = w_hh.shape[1]
        h = jnp.zeros((Bq, Hh), jnp.float32)
        c = jnp.zeros((Bq, Hh), jnp.float32)
        outs = [None] * Tq
        order = range(Tq - 1, -1, -1) if reverse else range(Tq)
        for t in order:
            g = x_seq[:, t, :] @ w_ih.T + h @ w_hh.T + b_ih + b_hh
            i = jax.nn.sigmoid(g[:, :Hh])
            f = jax.nn.sigmoid(g[:, Hh:2 * Hh])
            gg = jnp.tanh(g[:, 2 * Hh:3 * Hh])
            o = jax.nn.sigmoid(g[:, 3 * Hh:])
            c = f * c + i * gg
            h = o * jnp.tanh(c)
            outs[t] = h
        return jnp.stack(outs, axis=1), h

    h_fin = None
    for lp in params["lstm"]:
        f_seq, f_h = run_dir(x, *lp["fwd"], reverse=False)
        b_seq, b_h = run_dir(x, *lp["bwd"], reverse=True)
        x = jnp.concatenate([f_seq, b_seq], axis=-1)
        h_fin = jnp.concatenate([f_h, b_h], axis=-1)
    h1 = jax.nn.relu(h_fin @ params["fc1_w"].T + params["fc1_b"])
    return h1 @ params["fc2_w"].T + params["fc2_b"]


# ------------------------------ params ----------------------------------------

def init_params(key, vocab_size, embedding_dim, hidden_dim, output_dim, n_layers):
    ks = iter(jax.random.split(key, 8 * n_layers + 8))

    def u(k, shape, fan):
        bound = 1.0 / jnp.sqrt(jnp.asarray(fan, jnp.float32))
        return jax.random.uniform(k, shape, jnp.float32, -bound, bound)

    params = {
        "embedding": jax.random.normal(next(ks), (vocab_size, embedding_dim),
                                       jnp.float32),
        "lstm": [],
    }
    in_dim = embedding_dim + 2
    for _ in range(n_layers):
        layer_p = {}
        for direction in ("fwd", "bwd"):
            w_ih = u(next(ks), (4 * hidden_dim, in_dim), hidden_dim)
            w_hh = u(next(ks), (4 * hidden_dim, hidden_dim), hidden_dim)
            b_ih = u(next(ks), (4 * hidden_dim,), hidden_dim)
            b_hh = u(next(ks), (4 * hidden_dim,), hidden_dim)
            layer_p[direction] = (w_ih, w_hh, b_ih, b_hh)
        params["lstm"].append(layer_p)
        in_dim = 2 * hidden_dim
    params["fc1_w"] = u(next(ks), (hidden_dim, 2 * hidden_dim), 2 * hidden_dim)
    params["fc1_b"] = u(next(ks), (hidden_dim,), 2 * hidden_dim)
    params["fc2_w"] = u(next(ks), (output_dim, hidden_dim), hidden_dim)
    params["fc2_b"] = u(next(ks), (output_dim,), hidden_dim)
    return params


# ------------------------------- main ------------------------------------------

if __name__ == "__main__":
    B, T, L = 2, 8, 6              # batch, max_transactions, max_length
    vocab_size = 50
    embedding_dim = 16
    hidden_dim = 32
    output_dim = 4
    n_layers = 2

    root = jax.random.PRNGKey(0)
    k_param, k_ids, k_dates, k_amts = jax.random.split(root, 4)

    params = init_params(k_param, vocab_size, embedding_dim, hidden_dim,
                         output_dim, n_layers)
    prepped = prepare_params(params)

    input_ids = jax.random.randint(k_ids, (B, T, L), 0, vocab_size,
                                   dtype=jnp.int32)
    dates = jax.random.uniform(k_dates, (B, T), jnp.float32)
    amounts = jax.random.normal(k_amts, (B, T), jnp.float32)

    fwd = jax.jit(functools.partial(simple_lstm_classifier_forward, prepped))
    logits = fwd(dates, input_ids, amounts)
    jax.block_until_ready(logits)

    assert logits.shape == (B, output_dim), logits.shape
    assert logits.dtype == jnp.float32

    with jax.default_matmul_precision("highest"):
        ref = reference_forward(params, dates, input_ids, amounts)
    assert jnp.allclose(logits, ref, atol=1e-2, rtol=1e-2), (logits, ref)

    print("KERNEL_OK")
</pallas_src>

<mosaic_0001>
module attributes {stable_mosaic.version = 11 : i64} {
  func.func @kernel(%arg0: memref<6x64x1xi32, #tpu.memory_space<vmem>>, %arg1: memref<64x2xf32, #tpu.memory_space<vmem>>, %arg2: memref<50x16xf32, #tpu.memory_space<vmem>>, %arg3: memref<18x256xf32, #tpu.memory_space<vmem>>, %arg4: memref<18x256xf32, #tpu.memory_space<vmem>>, %arg5: memref<1x256xf32, #tpu.memory_space<vmem>>, %arg6: memref<1x256xf32, #tpu.memory_space<vmem>>, %arg7: memref<64x256xf32, #tpu.memory_space<vmem>>, %arg8: memref<64x256xf32, #tpu.memory_space<vmem>>, %arg9: memref<64x256xf32, #tpu.memory_space<vmem>>, %arg10: memref<1x256xf32, #tpu.memory_space<vmem>>, %arg11: memref<1x256xf32, #tpu.memory_space<vmem>>, %arg12: memref<64x256xf32, #tpu.memory_space<vmem>>, %arg13: memref<64x32xf32, #tpu.memory_space<vmem>>, %arg14: memref<1x32xf32, #tpu.memory_space<vmem>>, %arg15: memref<32x4xf32, #tpu.memory_space<vmem>>, %arg16: memref<1x4xf32, #tpu.memory_space<vmem>>, %arg17: memref<2x4xf32, #tpu.memory_space<vmem>>, %arg18: memref<64x256xf32, #tpu.memory_space<vmem>>, %arg19: memref<64x256xf32, #tpu.memory_space<vmem>>, %arg20: memref<64x32xf32, #tpu.memory_space<vmem>>, %arg21: memref<64x32xf32, #tpu.memory_space<vmem>>) attributes {dimension_semantics = [], scalar_prefetch = 0 : i64, scratch_operands = 4 : i64, tpu.core_type = #tpu.core_type<tc>} {
    %0 = tpu.iota {dimensions = array<i32: 1>} : vector<64x50xi32>
    %cst = arith.constant 0.000000e+00 : f32
    %1 = vector.broadcast %cst : f32 to vector<64x50xf32>
    %c0 = arith.constant 0 : index
    %c0_0 = arith.constant 0 : index
    %c0_1 = arith.constant 0 : index
    %2 = vector.load %arg0[%c0, %c0_0, %c0_1] : memref<6x64x1xi32, #tpu.memory_space<vmem>>, vector<1x64x1xi32>
    %3 = vector.shape_cast %2 : vector<1x64x1xi32> to vector<64x1xi32>
    %4 = vector.broadcast %3 : vector<64x1xi32> to vector<64x50xi32>
    %5 = arith.cmpi eq, %4, %0 : vector<64x50xi32>
    %cst_2 = arith.constant 1.000000e+00 : f32
    %cst_3 = arith.constant 0.000000e+00 : f32
    %6 = vector.broadcast %cst_2 : f32 to vector<64x50xf32>
    %7 = vector.broadcast %cst_3 : f32 to vector<64x50xf32>
    %8 = arith.select %5, %6, %7 : vector<64x50xi1>, vector<64x50xf32>
    %9 = arith.addf %1, %8 : vector<64x50xf32>
    %c1 = arith.constant 1 : index
    %c0_4 = arith.constant 0 : index
    %c0_5 = arith.constant 0 : index
    %10 = vector.load %arg0[%c1, %c0_4, %c0_5] : memref<6x64x1xi32, #tpu.memory_space<vmem>>, vector<1x64x1xi32>
    %11 = vector.shape_cast %10 : vector<1x64x1xi32> to vector<64x1xi32>
    %12 = vector.broadcast %11 : vector<64x1xi32> to vector<64x50xi32>
    %13 = arith.cmpi eq, %12, %0 : vector<64x50xi32>
    %cst_6 = arith.constant 1.000000e+00 : f32
    %cst_7 = arith.constant 0.000000e+00 : f32
    %14 = vector.broadcast %cst_6 : f32 to vector<64x50xf32>
    %15 = vector.broadcast %cst_7 : f32 to vector<64x50xf32>
    %16 = arith.select %13, %14, %15 : vector<64x50xi1>, vector<64x50xf32>
    %17 = arith.addf %9, %16 : vector<64x50xf32>
    %c2 = arith.constant 2 : index
    %c0_8 = arith.constant 0 : index
    %c0_9 = arith.constant 0 : index
    %18 = vector.load %arg0[%c2, %c0_8, %c0_9] : memref<6x64x1xi32, #tpu.memory_space<vmem>>, vector<1x64x1xi32>
    %19 = vector.shape_cast %18 : vector<1x64x1xi32> to vector<64x1xi32>
    %20 = vector.broadcast %19 : vector<64x1xi32> to vector<64x50xi32>
    %21 = arith.cmpi eq, %20, %0 : vector<64x50xi32>
    %cst_10 = arith.constant 1.000000e+00 : f32
    %cst_11 = arith.constant 0.000000e+00 : f32
    %22 = vector.broadcast %cst_10 : f32 to vector<64x50xf32>
    %23 = vector.broadcast %cst_11 : f32 to vector<64x50xf32>
    %24 = arith.select %21, %22, %23 : vector<64x50xi1>, vector<64x50xf32>
    %25 = arith.addf %17, %24 : vector<64x50xf32>
    %c3 = arith.constant 3 : index
    %c0_12 = arith.constant 0 : index
    %c0_13 = arith.constant 0 : index
    %26 = vector.load %arg0[%c3, %c0_12, %c0_13] : memref<6x64x1xi32, #tpu.memory_space<vmem>>, vector<1x64x1xi32>
    %27 = vector.shape_cast %26 : vector<1x64x1xi32> to vector<64x1xi32>
    %28 = vector.broadcast %27 : vector<64x1xi32> to vector<64x50xi32>
    %29 = arith.cmpi eq, %28, %0 : vector<64x50xi32>
    %cst_14 = arith.constant 1.000000e+00 : f32
    %cst_15 = arith.constant 0.000000e+00 : f32
    %30 = vector.broadcast %cst_14 : f32 to vector<64x50xf32>
    %31 = vector.broadcast %cst_15 : f32 to vector<64x50xf32>
    %32 = arith.select %29, %30, %31 : vector<64x50xi1>, vector<64x50xf32>
    %33 = arith.addf %25, %32 : vector<64x50xf32>
    %c4 = arith.constant 4 : index
    %c0_16 = arith.constant 0 : index
    %c0_17 = arith.constant 0 : index
    %34 = vector.load %arg0[%c4, %c0_16, %c0_17] : memref<6x64x1xi32, #tpu.memory_space<vmem>>, vector<1x64x1xi32>
    %35 = vector.shape_cast %34 : vector<1x64x1xi32> to vector<64x1xi32>
    %36 = vector.broadcast %35 : vector<64x1xi32> to vector<64x50xi32>
    %37 = arith.cmpi eq, %36, %0 : vector<64x50xi32>
    %cst_18 = arith.constant 1.000000e+00 : f32
    %cst_19 = arith.constant 0.000000e+00 : f32
    %38 = vector.broadcast %cst_18 : f32 to vector<64x50xf32>
    %39 = vector.broadcast %cst_19 : f32 to vector<64x50xf32>
    %40 = arith.select %37, %38, %39 : vector<64x50xi1>, vector<64x50xf32>
    %41 = arith.addf %33, %40 : vector<64x50xf32>
    %c5 = arith.constant 5 : index
    %c0_20 = arith.constant 0 : index
    %c0_21 = arith.constant 0 : index
    %42 = vector.load %arg0[%c5, %c0_20, %c0_21] : memref<6x64x1xi32, #tpu.memory_space<vmem>>, vector<1x64x1xi32>
    %43 = vector.shape_cast %42 : vector<1x64x1xi32> to vector<64x1xi32>
    %44 = vector.broadcast %43 : vector<64x1xi32> to vector<64x50xi32>
    %45 = arith.cmpi eq, %44, %0 : vector<64x50xi32>
    %cst_22 = arith.constant 1.000000e+00 : f32
    %cst_23 = arith.constant 0.000000e+00 : f32
    %46 = vector.broadcast %cst_22 : f32 to vector<64x50xf32>
    %47 = vector.broadcast %cst_23 : f32 to vector<64x50xf32>
    %48 = arith.select %45, %46, %47 : vector<64x50xi1>, vector<64x50xf32>
    %49 = arith.addf %41, %48 : vector<64x50xf32>
    %c0_24 = arith.constant 0 : index
    %c0_25 = arith.constant 0 : index
    %50 = vector.load %arg2[%c0_24, %c0_25] : memref<50x16xf32, #tpu.memory_space<vmem>>, vector<50x16xf32>
    %cst_26 = arith.constant dense<0.000000e+00> : vector<64x16xf32>
    %51 = tpu.matmul %49, %50, %cst_26 {dimension_numbers = #tpu.dot_dimension_numbers<[1], [0], [0], [1], [0, 0, 1, 1], [], []>, precision = #tpu.contract_precision<fp32>} : vector<64x50xf32>, vector<50x16xf32>, vector<64x16xf32> -> vector<64x16xf32>
    %c0_27 = arith.constant 0 : index
    %c0_28 = arith.constant 0 : index
    %52 = vector.load %arg1[%c0_27, %c0_28] : memref<64x2xf32, #tpu.memory_space<vmem>>, vector<64x2xf32>
    %c0_29 = arith.constant 0 : index
    %c0_30 = arith.constant 0 : index
    %53 = vector.load %arg3[%c0_29, %c0_30] : memref<18x256xf32, #tpu.memory_space<vmem>>, vector<16x256xf32>
    %cst_31 = arith.constant dense<0.000000e+00> : vector<64x256xf32>
    %54 = tpu.matmul %51, %53, %cst_31 {dimension_numbers = #tpu.dot_dimension_numbers<[1], [0], [0], [1], [0, 0, 1, 1], [], []>, precision = #tpu.contract_precision<fp32>} : vector<64x16xf32>, vector<16x256xf32>, vector<64x256xf32> -> vector<64x256xf32>
    %c16 = arith.constant 16 : index
    %c0_32 = arith.constant 0 : index
    %55 = vector.load %arg3[%c16, %c0_32] : memref<18x256xf32, #tpu.memory_space<vmem>>, vector<2x256xf32>
    %cst_33 = arith.constant dense<0.000000e+00> : vector<64x256xf32>
    %56 = tpu.matmul %52, %55, %cst_33 {dimension_numbers = #tpu.dot_dimension_numbers<[1], [0], [0], [1], [0, 0, 1, 1], [], []>, precision = #tpu.contract_precision<fp32>} : vector<64x2xf32>, vector<2x256xf32>, vector<64x256xf32> -> vector<64x256xf32>
    %57 = arith.addf %54, %56 : vector<64x256xf32>
    %c0_34 = arith.constant 0 : index
    %c0_35 = arith.constant 0 : index
    %58 = vector.load %arg5[%c0_34, %c0_35] : memref<1x256xf32, #tpu.memory_space<vmem>>, vector<1x256xf32>
    %59 = vector.broadcast %58 : vector<1x256xf32> to vector<64x256xf32>
    %60 = arith.addf %57, %59 : vector<64x256xf32>
    %c0_36 = arith.constant 0 : index
    %c0_37 = arith.constant 0 : index
    %61 = vector.load %arg18[%c0_36, %c0_37] : memref<64x256xf32, #tpu.memory_space<vmem>>, vector<64x256xf32>
    tpu.vector_store %arg18[%c0_36, %c0_37], %60 {strides = array<i32>} : memref<64x256xf32, #tpu.memory_space<vmem>>, vector<64x256xf32>,
    %c0_38 = arith.constant 0 : index
    %c0_39 = arith.constant 0 : index
    %62 = vector.load %arg4[%c0_38, %c0_39] : memref<18x256xf32, #tpu.memory_space<vmem>>, vector<16x256xf32>
    %cst_40 = arith.constant dense<0.000000e+00> : vector<64x256xf32>
    %63 = tpu.matmul %51, %62, %cst_40 {dimension_numbers = #tpu.dot_dimension_numbers<[1], [0], [0], [1], [0, 0, 1, 1], [], []>, precision = #tpu.contract_precision<fp32>} : vector<64x16xf32>, vector<16x256xf32>, vector<64x256xf32> -> vector<64x256xf32>
    %c16_41 = arith.constant 16 : index
    %c0_42 = arith.constant 0 : index
    %64 = vector.load %arg4[%c16_41, %c0_42] : memref<18x256xf32, #tpu.memory_space<vmem>>, vector<2x256xf32>
    %cst_43 = arith.constant dense<0.000000e+00> : vector<64x256xf32>
    %65 = tpu.matmul %52, %64, %cst_43 {dimension_numbers = #tpu.dot_dimension_numbers<[1], [0], [0], [1], [0, 0, 1, 1], [], []>, precision = #tpu.contract_precision<fp32>} : vector<64x2xf32>, vector<2x256xf32>, vector<64x256xf32> -> vector<64x256xf32>
    %66 = arith.addf %63, %65 : vector<64x256xf32>
    %c0_44 = arith.constant 0 : index
    %c0_45 = arith.constant 0 : index
    %67 = vector.load %arg6[%c0_44, %c0_45] : memref<1x256xf32, #tpu.memory_space<vmem>>, vector<1x256xf32>
    %68 = vector.broadcast %67 : vector<1x256xf32> to vector<64x256xf32>
    %69 = arith.addf %66, %68 : vector<64x256xf32>
    %c0_46 = arith.constant 0 : index
    %c0_47 = arith.constant 0 : index
    %70 = vector.load %arg19[%c0_46, %c0_47] : memref<64x256xf32, #tpu.memory_space<vmem>>, vector<64x256xf32>
    tpu.vector_store %arg19[%c0_46, %c0_47], %69 {strides = array<i32>} : memref<64x256xf32, #tpu.memory_space<vmem>>, vector<64x256xf32>,
    %c0_48 = arith.constant 0 : index
    %c0_49 = arith.constant 0 : index
    %71 = vector.load %arg7[%c0_48, %c0_49] : memref<64x256xf32, #tpu.memory_space<vmem>>, vector<64x256xf32>
    %cst_50 = arith.constant 0.000000e+00 : f32
    %72 = vector.broadcast %cst_50 : f32 to vector<8x64xf32>
    %cst_51 = arith.constant 0.000000e+00 : f32
    %73 = vector.broadcast %cst_51 : f32 to vector<8x64xf32>
    %cst_52 = arith.constant dense<0.000000e+00> : vector<8x256xf32>
    %74 = tpu.matmul %72, %71, %cst_52 {dimension_numbers = #tpu.dot_dimension_numbers<[1], [0], [0], [1], [0, 0, 1, 1], [], []>, precision = #tpu.contract_precision<fp32>} : vector<8x64xf32>, vector<64x256xf32>, vector<8x256xf32> -> vector<8x256xf32>
    %c0_53 = arith.constant 0 : index
    %c0_54 = arith.constant 0 : index
    %75 = vector.load %arg18[%c0_53, %c0_54] : memref<64x256xf32, #tpu.memory_space<vmem>>, vector<8x256xf32>
    %76 = arith.addf %74, %75 : vector<8x256xf32>
    %c56 = arith.constant 56 : index
    %c0_55 = arith.constant 0 : index
    %77 = vector.load %arg19[%c56, %c0_55] : memref<64x256xf32, #tpu.memory_space<vmem>>, vector<8x256xf32>
    %78 = arith.addf %76, %77 : vector<8x256xf32>
    %79 = vector.extract_strided_slice %78 {offsets = [0, 0], sizes = [8, 192], strides = [1, 1]} : vector<8x256xf32> to vector<8x192xf32>
    %80 = arith.negf %79 : vector<8x192xf32>
    %81 = math.exp %80 : vector<8x192xf32>
    %cst_56 = arith.constant 1.000000e+00 : f32
    %82 = vector.broadcast %cst_56 : f32 to vector<8x192xf32>
    %83 = arith.addf %82, %81 : vector<8x192xf32>
    %84 = arith.divf %82, %83 : vector<8x192xf32>
    %85 = vector.extract_strided_slice %78 {offsets = [0, 192], sizes = [8, 64], strides = [1, 1]} : vector<8x256xf32> to vector<8x64xf32>
    %86 = math.tanh %85 : vector<8x64xf32>
    %87 = vector.extract_strided_slice %84 {offsets = [0, 64], sizes = [8, 64], strides = [1, 1]} : vector<8x192xf32> to vector<8x64xf32>
    %88 = arith.mulf %87, %73 : vector<8x64xf32>
    %89 = vector.extract_strided_slice %84 {offsets = [0, 0], sizes = [8, 64], strides = [1, 1]} : vector<8x192xf32> to vector<8x64xf32>
    %90 = arith.mulf %89, %86 : vector<8x64xf32>
    %91 = arith.addf %88, %90 : vector<8x64xf32>
    %92 = vector.extract_strided_slice %84 {offsets = [0, 128], sizes = [8, 64], strides = [1, 1]} : vector<8x192xf32> to vector<8x64xf32>
    %93 = math.tanh %91 : vector<8x64xf32>
    %94 = arith.mulf %92, %93 : vector<8x64xf32>
    %95 = vector.extract_strided_slice %94 {offsets = [0, 0], sizes = [8, 32], strides = [1, 1]} : vector<8x64xf32> to vector<8x32xf32>
    %c0_57 = arith.constant 0 : index
    %c0_58 = arith.constant 0 : index
    %96 = vector.load %arg20[%c0_57, %c0_58] : memref<64x32xf32, #tpu.memory_space<vmem>>, vector<8x32xf32>
    tpu.vector_store %arg20[%c0_57, %c0_58], %95 {strides = array<i32>} : memref<64x32xf32, #tpu.memory_space<vmem>>, vector<8x32xf32>,
    %97 = vector.extract_strided_slice %94 {offsets = [0, 32], sizes = [8, 32], strides = [1, 1]} : vector<8x64xf32> to vector<8x32xf32>
    %c56_59 = arith.constant 56 : index
    %c0_60 = arith.constant 0 : index
    %98 = vector.load %arg21[%c56_59, %c0_60] : memref<64x32xf32, #tpu.memory_space<vmem>>, vector<8x32xf32>
    tpu.vector_store %arg21[%c56_59, %c0_60], %97 {strides = array<i32>} : memref<64x32xf32, #tpu.memory_space<vmem>>, vector<8x32xf32>,
    %cst_61 = arith.constant dense<0.000000e+00> : vector<8x256xf32>
    %99 = tpu.matmul %94, %71, %cst_61 {dimension_numbers = #tpu.dot_dimension_numbers<[1], [0], [0], [1], [0, 0, 1, 1], [], []>, precision = #tpu.contract_precision<fp32>} : vector<8x64xf32>, vector<64x256xf32>, vector<8x256xf32> -> vector<8x256xf32>
    %c8 = arith.constant 8 : index
    %c0_62 = arith.constant 0 : index
    %100 = vector.load %arg18[%c8, %c0_62] : memref<64x256xf32, #tpu.memory_space<vmem>>, vector<8x256xf32>
    %101 = arith.addf %99, %100 : vector<8x256xf32>
    %c48 = arith.constant 48 : index
    %c0_63 = arith.constant 0 : index
    %102 = vector.load %arg19[%c48, %c0_63] : memref<64x256xf32, #tpu.memory_space<vmem>>, vector<8x256xf32>
    %103 = arith.addf %101, %102 : vector<8x256xf32>
    %104 = vector.extract_strided_slice %103 {offsets = [0, 0], sizes = [8, 192], strides = [1, 1]} : vector<8x256xf32> to vector<8x192xf32>
    %105 = arith.negf %104 : vector<8x192xf32>
    %106 = math.exp %105 : vector<8x192xf32>
    %cst_64 = arith.constant 1.000000e+00 : f32
    %107 = vector.broadcast %cst_64 : f32 to vector<8x192xf32>
    %108 = arith.addf %107, %106 : vector<8x192xf32>
    %109 = arith.divf %107, %108 : vector<8x192xf32>
    %110 = vector.extract_strided_slice %103 {offsets = [0, 192], sizes = [8, 64], strides = [1, 1]} : vector<8x256xf32> to vector<8x64xf32>
    %111 = math.tanh %110 : vector<8x64xf32>
    %112 = vector.extract_strided_slice %109 {offsets = [0, 64], sizes = [8, 64], strides = [1, 1]} : vector<8x192xf32> to vector<8x64xf32>
    %113 = arith.mulf %112, %91 : vector<8x64xf32>
    %114 = vector.extract_strided_slice %109 {offsets = [0, 0], sizes = [8, 64], strides = [1, 1]} : vector<8x192xf32> to vector<8x64xf32>
    %115 = arith.mulf %114, %111 : vector<8x64xf32>
    %116 = arith.addf %113, %115 : vector<8x64xf32>
    %117 = vector.extract_strided_slice %109 {offsets = [0, 128], sizes = [8, 64], strides = [1, 1]} : vector<8x192xf32> to vector<8x64xf32>
    %118 = math.tanh %116 : vector<8x64xf32>
    %119 = arith.mulf %117, %118 : vector<8x64xf32>
    %120 = vector.extract_strided_slice %119 {offsets = [0, 0], sizes = [8, 32], strides = [1, 1]} : vector<8x64xf32> to vector<8x32xf32>
    %c8_65 = arith.constant 8 : index
    %c0_66 = arith.constant 0 : index
    %121 = vector.load %arg20[%c8_65, %c0_66] : memref<64x32xf32, #tpu.memory_space<vmem>>, vector<8x32xf32>
    tpu.vector_store %arg20[%c8_65, %c0_66], %120 {strides = array<i32>} : memref<64x32xf32, #tpu.memory_space<vmem>>, vector<8x32xf32>,
    %122 = vector.extract_strided_slice %119 {offsets = [0, 32], sizes = [8, 32], strides = [1, 1]} : vector<8x64xf32> to vector<8x32xf32>
    %c48_67 = arith.constant 48 : index
    %c0_68 = arith.constant 0 : index
    %123 = vector.load %arg21[%c48_67, %c0_68] : memref<64x32xf32, #tpu.memory_space<vmem>>, vector<8x32xf32>
    tpu.vector_store %arg21[%c48_67, %c0_68], %122 {strides = array<i32>} : memref<64x32xf32, #tpu.memory_space<vmem>>, vector<8x32xf32>,
    %cst_69 = arith.constant dense<0.000000e+00> : vector<8x256xf32>
    %124 = tpu.matmul %119, %71, %cst_69 {dimension_numbers = #tpu.dot_dimension_numbers<[1], [0], [0], [1], [0, 0, 1, 1], [], []>, precision = #tpu.contract_precision<fp32>} : vector<8x64xf32>, vector<64x256xf32>, vector<8x256xf32> -> vector<8x256xf32>
    %c16_70 = arith.constant 16 : index
    %c0_71 = arith.constant 0 : index
    %125 = vector.load %arg18[%c16_70, %c0_71] : memref<64x256xf32, #tpu.memory_space<vmem>>, vector<8x256xf32>
    %126 = arith.addf %124, %125 : vector<8x256xf32>
    %c40 = arith.constant 40 : index
    %c0_72 = arith.constant 0 : index
    %127 = vector.load %arg19[%c40, %c0_72] : memref<64x256xf32, #tpu.memory_space<vmem>>, vector<8x256xf32>
    %128 = arith.addf %126, %127 : vector<8x256xf32>
    %129 = vector.extract_strided_slice %128 {offsets = [0, 0], sizes = [8, 192], strides = [1, 1]} : vector<8x256xf32> to vector<8x192xf32>
    %130 = arith.negf %129 : vector<8x192xf32>
    %131 = math.exp %130 : vector<8x192xf32>
    %cst_73 = arith.constant 1.000000e+00 : f32
    %132 = vector.broadcast %cst_73 : f32 to vector<8x192xf32>
    %133 = arith.addf %132, %131 : vector<8x192xf32>
    %134 = arith.divf %132, %133 : vector<8x192xf32>
    %135 = vector.extract_strided_slice %128 {offsets = [0, 192], sizes = [8, 64], strides = [1, 1]} : vector<8x256xf32> to vector<8x64xf32>
    %136 = math.tanh %135 : vector<8x64xf32>
    %137 = vector.extract_strided_slice %134 {offsets = [0, 64], sizes = [8, 64], strides = [1, 1]} : vector<8x192xf32> to vector<8x64xf32>
    %138 = arith.mulf %137, %116 : vector<8x64xf32>
    %139 = vector.extract_strided_slice %134 {offsets = [0, 0], sizes = [8, 64], strides = [1, 1]} : vector<8x192xf32> to vector<8x64xf32>
    %140 = arith.mulf %139, %136 : vector<8x64xf32>
    %141 = arith.addf %138, %140 : vector<8x64xf32>
    %142 = vector.extract_strided_slice %134 {offsets = [0, 128], sizes = [8, 64], strides = [1, 1]} : vector<8x192xf32> to vector<8x64xf32>
    %143 = math.tanh %141 : vector<8x64xf32>
    %144 = arith.mulf %142, %143 : vector<8x64xf32>
    %145 = vector.extract_strided_slice %144 {offsets = [0, 0], sizes = [8, 32], strides = [1, 1]} : vector<8x64xf32> to vector<8x32xf32>
    %c16_74 = arith.constant 16 : index
    %c0_75 = arith.constant 0 : index
    %146 = vector.load %arg20[%c16_74, %c0_75] : memref<64x32xf32, #tpu.memory_space<vmem>>, vector<8x32xf32>
    tpu.vector_store %arg20[%c16_74, %c0_75], %145 {strides = array<i32>} : memref<64x32xf32, #tpu.memory_space<vmem>>, vector<8x32xf32>,
    %147 = vector.extract_strided_slice %144 {offsets = [0, 32], sizes = [8, 32], strides = [1, 1]} : vector<8x64xf32> to vector<8x32xf32>
    %c40_76 = arith.constant 40 : index
    %c0_77 = arith.constant 0 : index
    %148 = vector.load %arg21[%c40_76, %c0_77] : memref<64x32xf32, #tpu.memory_space<vmem>>, vector<8x32xf32>
    tpu.vector_store %arg21[%c40_76, %c0_77], %147 {strides = array<i32>} : memref<64x32xf32, #tpu.memory_space<vmem>>, vector<8x32xf32>,
    %cst_78 = arith.constant dense<0.000000e+00> : vector<8x256xf32>
    %149 = tpu.matmul %144, %71, %cst_78 {dimension_numbers = #tpu.dot_dimension_numbers<[1], [0], [0], [1], [0, 0, 1, 1], [], []>, precision = #tpu.contract_precision<fp32>} : vector<8x64xf32>, vector<64x256xf32>, vector<8x256xf32> -> vector<8x256xf32>
    %c24 = arith.constant 24 : index
    %c0_79 = arith.constant 0 : index
    %150 = vector.load %arg18[%c24, %c0_79] : memref<64x256xf32, #tpu.memory_space<vmem>>, vector<8x256xf32>
    %151 = arith.addf %149, %150 : vector<8x256xf32>
    %c32 = arith.constant 32 : index
    %c0_80 = arith.constant 0 : index
    %152 = vector.load %arg19[%c32, %c0_80] : memref<64x256xf32, #tpu.memory_space<vmem>>, vector<8x256xf32>
    %153 = arith.addf %151, %152 : vector<8x256xf32>
    %154 = vector.extract_strided_slice %153 {offsets = [0, 0], sizes = [8, 192], strides = [1, 1]} : vector<8x256xf32> to vector<8x192xf32>
    %155 = arith.negf %154 : vector<8x192xf32>
    %156 = math.exp %155 : vector<8x192xf32>
    %cst_81 = arith.constant 1.000000e+00 : f32
    %157 = vector.broadcast %cst_81 : f32 to vector<8x192xf32>
    %158 = arith.addf %157, %156 : vector<8x192xf32>
    %159 = arith.divf %157, %158 : vector<8x192xf32>
    %160 = vector.extract_strided_slice %153 {offsets = [0, 192], sizes = [8, 64], strides = [1, 1]} : vector<8x256xf32> to vector<8x64xf32>
    %161 = math.tanh %160 : vector<8x64xf32>
    %162 = vector.extract_strided_slice %159 {offsets = [0, 64], sizes = [8, 64], strides = [1, 1]} : vector<8x192xf32> to vector<8x64xf32>
    %163 = arith.mulf %162, %141 : vector<8x64xf32>
    %164 = vector.extract_strided_slice %159 {offsets = [0, 0], sizes = [8, 64], strides = [1, 1]} : vector<8x192xf32> to vector<8x64xf32>
    %165 = arith.mulf %164, %161 : vector<8x64xf32>
    %166 = arith.addf %163, %165 : vector<8x64xf32>
    %167 = vector.extract_strided_slice %159 {offsets = [0, 128], sizes = [8, 64], strides = [1, 1]} : vector<8x192xf32> to vector<8x64xf32>
    %168 = math.tanh %166 : vector<8x64xf32>
    %169 = arith.mulf %167, %168 : vector<8x64xf32>
    %170 = vector.extract_strided_slice %169 {offsets = [0, 0], sizes = [8, 32], strides = [1, 1]} : vector<8x64xf32> to vector<8x32xf32>
    %c24_82 = arith.constant 24 : index
    %c0_83 = arith.constant 0 : index
    %171 = vector.load %arg20[%c24_82, %c0_83] : memref<64x32xf32, #tpu.memory_space<vmem>>, vector<8x32xf32>
    tpu.vector_store %arg20[%c24_82, %c0_83], %170 {strides = array<i32>} : memref<64x32xf32, #tpu.memory_space<vmem>>, vector<8x32xf32>,
    %172 = vector.extract_strided_slice %169 {offsets = [0, 32], sizes = [8, 32], strides = [1, 1]} : vector<8x64xf32> to vector<8x32xf32>
    %c32_84 = arith.constant 32 : index
    %c0_85 = arith.constant 0 : index
    %173 = vector.load %arg21[%c32_84, %c0_85] : memref<64x32xf32, #tpu.memory_space<vmem>>, vector<8x32xf32>
    tpu.vector_store %arg21[%c32_84, %c0_85], %172 {strides = array<i32>} : memref<64x32xf32, #tpu.memory_space<vmem>>, vector<8x32xf32>,
    %cst_86 = arith.constant dense<0.000000e+00> : vector<8x256xf32>
    %174 = tpu.matmul %169, %71, %cst_86 {dimension_numbers = #tpu.dot_dimension_numbers<[1], [0], [0], [1], [0, 0, 1, 1], [], []>, precision = #tpu.contract_precision<fp32>} : vector<8x64xf32>, vector<64x256xf32>, vector<8x256xf32> -> vector<8x256xf32>
    %c32_87 = arith.constant 32 : index
    %c0_88 = arith.constant 0 : index
    %175 = vector.load %arg18[%c32_87, %c0_88] : memref<64x256xf32, #tpu.memory_space<vmem>>, vector<8x256xf32>
    %176 = arith.addf %174, %175 : vector<8x256xf32>
    %c24_89 = arith.constant 24 : index
    %c0_90 = arith.constant 0 : index
    %177 = vector.load %arg19[%c24_89, %c0_90] : memref<64x256xf32, #tpu.memory_space<vmem>>, vector<8x256xf32>
    %178 = arith.addf %176, %177 : vector<8x256xf32>
    %179 = vector.extract_strided_slice %178 {offsets = [0, 0], sizes = [8, 192], strides = [1, 1]} : vector<8x256xf32> to vector<8x192xf32>
    %180 = arith.negf %179 : vector<8x192xf32>
    %181 = math.exp %180 : vector<8x192xf32>
    %cst_91 = arith.constant 1.000000e+00 : f32
    %182 = vector.broadcast %cst_91 : f32 to vector<8x192xf32>
    %183 = arith.addf %182, %181 : vector<8x192xf32>
    %184 = arith.divf %182, %183 : vector<8x192xf32>
    %185 = vector.extract_strided_slice %178 {offsets = [0, 192], sizes = [8, 64], strides = [1, 1]} : vector<8x256xf32> to vector<8x64xf32>
    %186 = math.tanh %185 : vector<8x64xf32>
    %187 = vector.extract_strided_slice %184 {offsets = [0, 64], sizes = [8, 64], strides = [1, 1]} : vector<8x192xf32> to vector<8x64xf32>
    %188 = arith.mulf %187, %166 : vector<8x64xf32>
    %189 = vector.extract_strided_slice %184 {offsets = [0, 0], sizes = [8, 64], strides = [1, 1]} : vector<8x192xf32> to vector<8x64xf32>
    %190 = arith.mulf %189, %186 : vector<8x64xf32>
    %191 = arith.addf %188, %190 : vector<8x64xf32>
    %192 = vector.extract_strided_slice %184 {offsets = [0, 128], sizes = [8, 64], strides = [1, 1]} : vector<8x192xf32> to vector<8x64xf32>
    %193 = math.tanh %191 : vector<8x64xf32>
    %194 = arith.mulf %192, %193 : vector<8x64xf32>
    %195 = vector.extract_strided_slice %194 {offsets = [0, 0], sizes = [8, 32], strides = [1, 1]} : vector<8x64xf32> to vector<8x32xf32>
    %c32_92 = arith.constant 32 : index
    %c0_93 = arith.constant 0 : index
    %196 = vector.load %arg20[%c32_92, %c0_93] : memref<64x32xf32, #tpu.memory_space<vmem>>, vector<8x32xf32>
    tpu.vector_store %arg20[%c32_92, %c0_93], %195 {strides = array<i32>} : memref<64x32xf32, #tpu.memory_space<vmem>>, vector<8x32xf32>,
    %197 = vector.extract_strided_slice %194 {offsets = [0, 32], sizes = [8, 32], strides = [1, 1]} : vector<8x64xf32> to vector<8x32xf32>
    %c24_94 = arith.constant 24 : index
    %c0_95 = arith.constant 0 : index
    %198 = vector.load %arg21[%c24_94, %c0_95] : memref<64x32xf32, #tpu.memory_space<vmem>>, vector<8x32xf32>
    tpu.vector_store %arg21[%c24_94, %c0_95], %197 {strides = array<i32>} : memref<64x32xf32, #tpu.memory_space<vmem>>, vector<8x32xf32>,
    %cst_96 = arith.constant dense<0.000000e+00> : vector<8x256xf32>
    %199 = tpu.matmul %194, %71, %cst_96 {dimension_numbers = #tpu.dot_dimension_numbers<[1], [0], [0], [1], [0, 0, 1, 1], [], []>, precision = #tpu.contract_precision<fp32>} : vector<8x64xf32>, vector<64x256xf32>, vector<8x256xf32> -> vector<8x256xf32>
    %c40_97 = arith.constant 40 : index
    %c0_98 = arith.constant 0 : index
    %200 = vector.load %arg18[%c40_97, %c0_98] : memref<64x256xf32, #tpu.memory_space<vmem>>, vector<8x256xf32>
    %201 = arith.addf %199, %200 : vector<8x256xf32>
    %c16_99 = arith.constant 16 : index
    %c0_100 = arith.constant 0 : index
    %202 = vector.load %arg19[%c16_99, %c0_100] : memref<64x256xf32, #tpu.memory_space<vmem>>, vector<8x256xf32>
    %203 = arith.addf %201, %202 : vector<8x256xf32>
    %204 = vector.extract_strided_slice %203 {offsets = [0, 0], sizes = [8, 192], strides = [1, 1]} : vector<8x256xf32> to vector<8x192xf32>
    %205 = arith.negf %204 : vector<8x192xf32>
    %206 = math.exp %205 : vector<8x192xf32>
    %cst_101 = arith.constant 1.000000e+00 : f32
    %207 = vector.broadcast %cst_101 : f32 to vector<8x192xf32>
    %208 = arith.addf %207, %206 : vector<8x192xf32>
    %209 = arith.divf %207, %208 : vector<8x192xf32>
    %210 = vector.extract_strided_slice %203 {offsets = [0, 192], sizes = [8, 64], strides = [1, 1]} : vector<8x256xf32> to vector<8x64xf32>
    %211 = math.tanh %210 : vector<8x64xf32>
    %212 = vector.extract_strided_slice %209 {offsets = [0, 64], sizes = [8, 64], strides = [1, 1]} : vector<8x192xf32> to vector<8x64xf32>
    %213 = arith.mulf %212, %191 : vector<8x64xf32>
    %214 = vector.extract_strided_slice %209 {offsets = [0, 0], sizes = [8, 64], strides = [1, 1]} : vector<8x192xf32> to vector<8x64xf32>
    %215 = arith.mulf %214, %211 : vector<8x64xf32>
    %216 = arith.addf %213, %215 : vector<8x64xf32>
    %217 = vector.extract_strided_slice %209 {offsets = [0, 128], sizes = [8, 64], strides = [1, 1]} : vector<8x192xf32> to vector<8x64xf32>
    %218 = math.tanh %216 : vector<8x64xf32>
    %219 = arith.mulf %217, %218 : vector<8x64xf32>
    %220 = vector.extract_strided_slice %219 {offsets = [0, 0], sizes = [8, 32], strides = [1, 1]} : vector<8x64xf32> to vector<8x32xf32>
    %c40_102 = arith.constant 40 : index
    %c0_103 = arith.constant 0 : index
    %221 = vector.load %arg20[%c40_102, %c0_103] : memref<64x32xf32, #tpu.memory_space<vmem>>, vector<8x32xf32>
    tpu.vector_store %arg20[%c40_102, %c0_103], %220 {strides = array<i32>} : memref<64x32xf32, #tpu.memory_space<vmem>>, vector<8x32xf32>,
    %222 = vector.extract_strided_slice %219 {offsets = [0, 32], sizes = [8, 32], strides = [1, 1]} : vector<8x64xf32> to vector<8x32xf32>
    %c16_104 = arith.constant 16 : index
    %c0_105 = arith.constant 0 : index
    %223 = vector.load %arg21[%c16_104, %c0_105] : memref<64x32xf32, #tpu.memory_space<vmem>>, vector<8x32xf32>
    tpu.vector_store %arg21[%c16_104, %c0_105], %222 {strides = array<i32>} : memref<64x32xf32, #tpu.memory_space<vmem>>, vector<8x32xf32>,
    %cst_106 = arith.constant dense<0.000000e+00> : vector<8x256xf32>
    %224 = tpu.matmul %219, %71, %cst_106 {dimension_numbers = #tpu.dot_dimension_numbers<[1], [0], [0], [1], [0, 0, 1, 1], [], []>, precision = #tpu.contract_precision<fp32>} : vector<8x64xf32>, vector<64x256xf32>, vector<8x256xf32> -> vector<8x256xf32>
    %c48_107 = arith.constant 48 : index
    %c0_108 = arith.constant 0 : index
    %225 = vector.load %arg18[%c48_107, %c0_108] : memref<64x256xf32, #tpu.memory_space<vmem>>, vector<8x256xf32>
    %226 = arith.addf %224, %225 : vector<8x256xf32>
    %c8_109 = arith.constant 8 : index
    %c0_110 = arith.constant 0 : index
    %227 = vector.load %arg19[%c8_109, %c0_110] : memref<64x256xf32, #tpu.memory_space<vmem>>, vector<8x256xf32>
    %228 = arith.addf %226, %227 : vector<8x256xf32>
    %229 = vector.extract_strided_slice %228 {offsets = [0, 0], sizes = [8, 192], strides = [1, 1]} : vector<8x256xf32> to vector<8x192xf32>
    %230 = arith.negf %229 : vector<8x192xf32>
    %231 = math.exp %230 : vector<8x192xf32>
    %cst_111 = arith.constant 1.000000e+00 : f32
    %232 = vector.broadcast %cst_111 : f32 to vector<8x192xf32>
    %233 = arith.addf %232, %231 : vector<8x192xf32>
    %234 = arith.divf %232, %233 : vector<8x192xf32>
    %235 = vector.extract_strided_slice %228 {offsets = [0, 192], sizes = [8, 64], strides = [1, 1]} : vector<8x256xf32> to vector<8x64xf32>
    %236 = math.tanh %235 : vector<8x64xf32>
    %237 = vector.extract_strided_slice %234 {offsets = [0, 64], sizes = [8, 64], strides = [1, 1]} : vector<8x192xf32> to vector<8x64xf32>
    %238 = arith.mulf %237, %216 : vector<8x64xf32>
    %239 = vector.extract_strided_slice %234 {offsets = [0, 0], sizes = [8, 64], strides = [1, 1]} : vector<8x192xf32> to vector<8x64xf32>
    %240 = arith.mulf %239, %236 : vector<8x64xf32>
    %241 = arith.addf %238, %240 : vector<8x64xf32>
    %242 = vector.extract_strided_slice %234 {offsets = [0, 128], sizes = [8, 64], strides = [1, 1]} : vector<8x192xf32> to vector<8x64xf32>
    %243 = math.tanh %241 : vector<8x64xf32>
    %244 = arith.mulf %242, %243 : vector<8x64xf32>
    %245 = vector.extract_strided_slice %244 {offsets = [0, 0], sizes = [8, 32], strides = [1, 1]} : vector<8x64xf32> to vector<8x32xf32>
    %c48_112 = arith.constant 48 : index
    %c0_113 = arith.constant 0 : index
    %246 = vector.load %arg20[%c48_112, %c0_113] : memref<64x32xf32, #tpu.memory_space<vmem>>, vector<8x32xf32>
    tpu.vector_store %arg20[%c48_112, %c0_113], %245 {strides = array<i32>} : memref<64x32xf32, #tpu.memory_space<vmem>>, vector<8x32xf32>,
    %247 = vector.extract_strided_slice %244 {offsets = [0, 32], sizes = [8, 32], strides = [1, 1]} : vector<8x64xf32> to vector<8x32xf32>
    %c8_114 = arith.constant 8 : index
    %c0_115 = arith.constant 0 : index
    %248 = vector.load %arg21[%c8_114, %c0_115] : memref<64x32xf32, #tpu.memory_space<vmem>>, vector<8x32xf32>
    tpu.vector_store %arg21[%c8_114, %c0_115], %247 {strides = array<i32>} : memref<64x32xf32, #tpu.memory_space<vmem>>, vector<8x32xf32>,
    %cst_116 = arith.constant dense<0.000000e+00> : vector<8x256xf32>
    %249 = tpu.matmul %244, %71, %cst_116 {dimension_numbers = #tpu.dot_dimension_numbers<[1], [0], [0], [1], [0, 0, 1, 1], [], []>, precision = #tpu.contract_precision<fp32>} : vector<8x64xf32>, vector<64x256xf32>, vector<8x256xf32> -> vector<8x256xf32>
    %c56_117 = arith.constant 56 : index
    %c0_118 = arith.constant 0 : index
    %250 = vector.load %arg18[%c56_117, %c0_118] : memref<64x256xf32, #tpu.memory_space<vmem>>, vector<8x256xf32>
    %251 = arith.addf %249, %250 : vector<8x256xf32>
    %c0_119 = arith.constant 0 : index
    %c0_120 = arith.constant 0 : index
    %252 = vector.load %arg19[%c0_119, %c0_120] : memref<64x256xf32, #tpu.memory_space<vmem>>, vector<8x256xf32>
    %253 = arith.addf %251, %252 : vector<8x256xf32>
    %254 = vector.extract_strided_slice %253 {offsets = [0, 0], sizes = [8, 192], strides = [1, 1]} : vector<8x256xf32> to vector<8x192xf32>
    %255 = arith.negf %254 : vector<8x192xf32>
    %256 = math.exp %255 : vector<8x192xf32>
    %cst_121 = arith.constant 1.000000e+00 : f32
    %257 = vector.broadcast %cst_121 : f32 to vector<8x192xf32>
    %258 = arith.addf %257, %256 : vector<8x192xf32>
    %259 = arith.divf %257, %258 : vector<8x192xf32>
    %260 = vector.extract_strided_slice %253 {offsets = [0, 192], sizes = [8, 64], strides = [1, 1]} : vector<8x256xf32> to vector<8x64xf32>
    %261 = math.tanh %260 : vector<8x64xf32>
    %262 = vector.extract_strided_slice %259 {offsets = [0, 64], sizes = [8, 64], strides = [1, 1]} : vector<8x192xf32> to vector<8x64xf32>
    %263 = arith.mulf %262, %241 : vector<8x64xf32>
    %264 = vector.extract_strided_slice %259 {offsets = [0, 0], sizes = [8, 64], strides = [1, 1]} : vector<8x192xf32> to vector<8x64xf32>
    %265 = arith.mulf %264, %261 : vector<8x64xf32>
    %266 = arith.addf %263, %265 : vector<8x64xf32>
    %267 = vector.extract_strided_slice %259 {offsets = [0, 128], sizes = [8, 64], strides = [1, 1]} : vector<8x192xf32> to vector<8x64xf32>
    %268 = math.tanh %266 : vector<8x64xf32>
    %269 = arith.mulf %267, %268 : vector<8x64xf32>
    %270 = vector.extract_strided_slice %269 {offsets = [0, 0], sizes = [8, 32], strides = [1, 1]} : vector<8x64xf32> to vector<8x32xf32>
    %c56_122 = arith.constant 56 : index
    %c0_123 = arith.constant 0 : index
    %271 = vector.load %arg20[%c56_122, %c0_123] : memref<64x32xf32, #tpu.memory_space<vmem>>, vector<8x32xf32>
    tpu.vector_store %arg20[%c56_122, %c0_123], %270 {strides = array<i32>} : memref<64x32xf32, #tpu.memory_space<vmem>>, vector<8x32xf32>,
    %272 = vector.extract_strided_slice %269 {offsets = [0, 32], sizes = [8, 32], strides = [1, 1]} : vector<8x64xf32> to vector<8x32xf32>
    %c0_124 = arith.constant 0 : index
    %c0_125 = arith.constant 0 : index
    %273 = vector.load %arg21[%c0_124, %c0_125] : memref<64x32xf32, #tpu.memory_space<vmem>>, vector<8x32xf32>
    tpu.vector_store %arg21[%c0_124, %c0_125], %272 {strides = array<i32>} : memref<64x32xf32, #tpu.memory_space<vmem>>, vector<8x32xf32>,
    %c0_126 = arith.constant 0 : index
    %c0_127 = arith.constant 0 : index
    %274 = vector.load %arg20[%c0_126, %c0_127] : memref<64x32xf32, #tpu.memory_space<vmem>>, vector<64x32xf32>
    %c0_128 = arith.constant 0 : index
    %c0_129 = arith.constant 0 : index
    %275 = vector.load %arg21[%c0_128, %c0_129] : memref<64x32xf32, #tpu.memory_space<vmem>>, vector<64x32xf32>
    %c0_130 = arith.constant 0 : index
    %c0_131 = arith.constant 0 : index
    %276 = vector.load %arg8[%c0_130, %c0_131] : memref<64x256xf32, #tpu.memory_space<vmem>>, vector<32x256xf32>
    %cst_132 = arith.constant dense<0.000000e+00> : vector<64x256xf32>
    %277 = tpu.matmul %274, %276, %cst_132 {dimension_numbers = #tpu.dot_dimension_numbers<[1], [0], [0], [1], [0, 0, 1, 1], [], []>, precision = #tpu.contract_precision<fp32>} : vector<64x32xf32>, vector<32x256xf32>, vector<64x256xf32> -> vector<64x256xf32>
    %c32_133 = arith.constant 32 : index
    %c0_134 = arith.constant 0 : index
    %278 = vector.load %arg8[%c32_133, %c0_134] : memref<64x256xf32, #tpu.memory_space<vmem>>, vector<32x256xf32>
    %cst_135 = arith.constant dense<0.000000e+00> : vector<64x256xf32>
    %279 = tpu.matmul %275, %278, %cst_135 {dimension_numbers = #tpu.dot_dimension_numbers<[1], [0], [0], [1], [0, 0, 1, 1], [], []>, precision = #tpu.contract_precision<fp32>} : vector<64x32xf32>, vector<32x256xf32>, vector<64x256xf32> -> vector<64x256xf32>
    %280 = arith.addf %277, %279 : vector<64x256xf32>
    %c0_136 = arith.constant 0 : index
    %c0_137 = arith.constant 0 : index
    %281 = vector.load %arg10[%c0_136, %c0_137] : memref<1x256xf32, #tpu.memory_space<vmem>>, vector<1x256xf32>
    %282 = vector.broadcast %281 : vector<1x256xf32> to vector<64x256xf32>
    %283 = arith.addf %280, %282 : vector<64x256xf32>
    %c0_138 = arith.constant 0 : index
    %c0_139 = arith.constant 0 : index
    %284 = vector.load %arg18[%c0_138, %c0_139] : memref<64x256xf32, #tpu.memory_space<vmem>>, vector<64x256xf32>
    tpu.vector_store %arg18[%c0_138, %c0_139], %283 {strides = array<i32>} : memref<64x256xf32, #tpu.memory_space<vmem>>, vector<64x256xf32>,
    %c0_140 = arith.constant 0 : index
    %c0_141 = arith.constant 0 : index
    %285 = vector.load %arg9[%c0_140, %c0_141] : memref<64x256xf32, #tpu.memory_space<vmem>>, vector<32x256xf32>
    %cst_142 = arith.constant dense<0.000000e+00> : vector<64x256xf32>
    %286 = tpu.matmul %274, %285, %cst_142 {dimension_numbers = #tpu.dot_dimension_numbers<[1], [0], [0], [1], [0, 0, 1, 1], [], []>, precision = #tpu.contract_precision<fp32>} : vector<64x32xf32>, vector<32x256xf32>, vector<64x256xf32> -> vector<64x256xf32>
    %c32_143 = arith.constant 32 : index
    %c0_144 = arith.constant 0 : index
    %287 = vector.load %arg9[%c32_143, %c0_144] : memref<64x256xf32, #tpu.memory_space<vmem>>, vector<32x256xf32>
    %cst_145 = arith.constant dense<0.000000e+00> : vector<64x256xf32>
    %288 = tpu.matmul %275, %287, %cst_145 {dimension_numbers = #tpu.dot_dimension_numbers<[1], [0], [0], [1], [0, 0, 1, 1], [], []>, precision = #tpu.contract_precision<fp32>} : vector<64x32xf32>, vector<32x256xf32>, vector<64x256xf32> -> vector<64x256xf32>
    %289 = arith.addf %286, %288 : vector<64x256xf32>
    %c0_146 = arith.constant 0 : index
    %c0_147 = arith.constant 0 : index
    %290 = vector.load %arg11[%c0_146, %c0_147] : memref<1x256xf32, #tpu.memory_space<vmem>>, vector<1x256xf32>
    %291 = vector.broadcast %290 : vector<1x256xf32> to vector<64x256xf32>
    %292 = arith.addf %289, %291 : vector<64x256xf32>
    %c0_148 = arith.constant 0 : index
    %c0_149 = arith.constant 0 : index
    %293 = vector.load %arg19[%c0_148, %c0_149] : memref<64x256xf32, #tpu.memory_space<vmem>>, vector<64x256xf32>
    tpu.vector_store %arg19[%c0_148, %c0_149], %292 {strides = array<i32>} : memref<64x256xf32, #tpu.memory_space<vmem>>, vector<64x256xf32>,
    %c0_150 = arith.constant 0 : index
    %c0_151 = arith.constant 0 : index
    %294 = vector.load %arg12[%c0_150, %c0_151] : memref<64x256xf32, #tpu.memory_space<vmem>>, vector<64x256xf32>
    %cst_152 = arith.constant 0.000000e+00 : f32
    %295 = vector.broadcast %cst_152 : f32 to vector<8x64xf32>
    %cst_153 = arith.constant 0.000000e+00 : f32
    %296 = vector.broadcast %cst_153 : f32 to vector<8x64xf32>
    %cst_154 = arith.constant dense<0.000000e+00> : vector<8x256xf32>
    %297 = tpu.matmul %295, %294, %cst_154 {dimension_numbers = #tpu.dot_dimension_numbers<[1], [0], [0], [1], [0, 0, 1, 1], [], []>, precision = #tpu.contract_precision<fp32>} : vector<8x64xf32>, vector<64x256xf32>, vector<8x256xf32> -> vector<8x256xf32>
    %c0_155 = arith.constant 0 : index
    %c0_156 = arith.constant 0 : index
    %298 = vector.load %arg18[%c0_155, %c0_156] : memref<64x256xf32, #tpu.memory_space<vmem>>, vector<8x256xf32>
    %299 = arith.addf %297, %298 : vector<8x256xf32>
    %c56_157 = arith.constant 56 : index
    %c0_158 = arith.constant 0 : index
    %300 = vector.load %arg19[%c56_157, %c0_158] : memref<64x256xf32, #tpu.memory_space<vmem>>, vector<8x256xf32>
    %301 = arith.addf %299, %300 : vector<8x256xf32>
    %302 = vector.extract_strided_slice %301 {offsets = [0, 0], sizes = [8, 192], strides = [1, 1]} : vector<8x256xf32> to vector<8x192xf32>
    %303 = arith.negf %302 : vector<8x192xf32>
    %304 = math.exp %303 : vector<8x192xf32>
    %cst_159 = arith.constant 1.000000e+00 : f32
    %305 = vector.broadcast %cst_159 : f32 to vector<8x192xf32>
    %306 = arith.addf %305, %304 : vector<8x192xf32>
    %307 = arith.divf %305, %306 : vector<8x192xf32>
    %308 = vector.extract_strided_slice %301 {offsets = [0, 192], sizes = [8, 64], strides = [1, 1]} : vector<8x256xf32> to vector<8x64xf32>
    %309 = math.tanh %308 : vector<8x64xf32>
    %310 = vector.extract_strided_slice %307 {offsets = [0, 64], sizes = [8, 64], strides = [1, 1]} : vector<8x192xf32> to vector<8x64xf32>
    %311 = arith.mulf %310, %296 : vector<8x64xf32>
    %312 = vector.extract_strided_slice %307 {offsets = [0, 0], sizes = [8, 64], strides = [1, 1]} : vector<8x192xf32> to vector<8x64xf32>
    %313 = arith.mulf %312, %309 : vector<8x64xf32>
    %314 = arith.addf %311, %313 : vector<8x64xf32>
    %315 = vector.extract_strided_slice %307 {offsets = [0, 128], sizes = [8, 64], strides = [1, 1]} : vector<8x192xf32> to vector<8x64xf32>
    %316 = math.tanh %314 : vector<8x64xf32>
    %317 = arith.mulf %315, %316 : vector<8x64xf32>
    %cst_160 = arith.constant dense<0.000000e+00> : vector<8x256xf32>
    %318 = tpu.matmul %317, %294, %cst_160 {dimension_numbers = #tpu.dot_dimension_numbers<[1], [0], [0], [1], [0, 0, 1, 1], [], []>, precision = #tpu.contract_precision<fp32>} : vector<8x64xf32>, vector<64x256xf32>, vector<8x256xf32> -> vector<8x256xf32>
    %c8_161 = arith.constant 8 : index
    %c0_162 = arith.constant 0 : index
    %319 = vector.load %arg18[%c8_161, %c0_162] : memref<64x256xf32, #tpu.memory_space<vmem>>, vector<8x256xf32>
    %320 = arith.addf %318, %319 : vector<8x256xf32>
    %c48_163 = arith.constant 48 : index
    %c0_164 = arith.constant 0 : index
    %321 = vector.load %arg19[%c48_163, %c0_164] : memref<64x256xf32, #tpu.memory_space<vmem>>, vector<8x256xf32>
    %322 = arith.addf %320, %321 : vector<8x256xf32>
    %323 = vector.extract_strided_slice %322 {offsets = [0, 0], sizes = [8, 192], strides = [1, 1]} : vector<8x256xf32> to vector<8x192xf32>
    %324 = arith.negf %323 : vector<8x192xf32>
    %325 = math.exp %324 : vector<8x192xf32>
    %cst_165 = arith.constant 1.000000e+00 : f32
    %326 = vector.broadcast %cst_165 : f32 to vector<8x192xf32>
    %327 = arith.addf %326, %325 : vector<8x192xf32>
    %328 = arith.divf %326, %327 : vector<8x192xf32>
    %329 = vector.extract_strided_slice %322 {offsets = [0, 192], sizes = [8, 64], strides = [1, 1]} : vector<8x256xf32> to vector<8x64xf32>
    %330 = math.tanh %329 : vector<8x64xf32>
    %331 = vector.extract_strided_slice %328 {offsets = [0, 64], sizes = [8, 64], strides = [1, 1]} : vector<8x192xf32> to vector<8x64xf32>
    %332 = arith.mulf %331, %314 : vector<8x64xf32>
    %333 = vector.extract_strided_slice %328 {offsets = [0, 0], sizes = [8, 64], strides = [1, 1]} : vector<8x192xf32> to vector<8x64xf32>
    %334 = arith.mulf %333, %330 : vector<8x64xf32>
    %335 = arith.addf %332, %334 : vector<8x64xf32>
    %336 = vector.extract_strided_slice %328 {offsets = [0, 128], sizes = [8, 64], strides = [1, 1]} : vector<8x192xf32> to vector<8x64xf32>
    %337 = math.tanh %335 : vector<8x64xf32>
    %338 = arith.mulf %336, %337 : vector<8x64xf32>
    %cst_166 = arith.constant dense<0.000000e+00> : vector<8x256xf32>
    %339 = tpu.matmul %338, %294, %cst_166 {dimension_numbers = #tpu.dot_dimension_numbers<[1], [0], [0], [1], [0, 0, 1, 1], [], []>, precision = #tpu.contract_precision<fp32>} : vector<8x64xf32>, vector<64x256xf32>, vector<8x256xf32> -> vector<8x256xf32>
    %c16_167 = arith.constant 16 : index
    %c0_168 = arith.constant 0 : index
    %340 = vector.load %arg18[%c16_167, %c0_168] : memref<64x256xf32, #tpu.memory_space<vmem>>, vector<8x256xf32>
    %341 = arith.addf %339, %340 : vector<8x256xf32>
    %c40_169 = arith.constant 40 : index
    %c0_170 = arith.constant 0 : index
    %342 = vector.load %arg19[%c40_169, %c0_170] : memref<64x256xf32, #tpu.memory_space<vmem>>, vector<8x256xf32>
    %343 = arith.addf %341, %342 : vector<8x256xf32>
    %344 = vector.extract_strided_slice %343 {offsets = [0, 0], sizes = [8, 192], strides = [1, 1]} : vector<8x256xf32> to vector<8x192xf32>
    %345 = arith.negf %344 : vector<8x192xf32>
    %346 = math.exp %345 : vector<8x192xf32>
    %cst_171 = arith.constant 1.000000e+00 : f32
    %347 = vector.broadcast %cst_171 : f32 to vector<8x192xf32>
    %348 = arith.addf %347, %346 : vector<8x192xf32>
    %349 = arith.divf %347, %348 : vector<8x192xf32>
    %350 = vector.extract_strided_slice %343 {offsets = [0, 192], sizes = [8, 64], strides = [1, 1]} : vector<8x256xf32> to vector<8x64xf32>
    %351 = math.tanh %350 : vector<8x64xf32>
    %352 = vector.extract_strided_slice %349 {offsets = [0, 64], sizes = [8, 64], strides = [1, 1]} : vector<8x192xf32> to vector<8x64xf32>
    %353 = arith.mulf %352, %335 : vector<8x64xf32>
    %354 = vector.extract_strided_slice %349 {offsets = [0, 0], sizes = [8, 64], strides = [1, 1]} : vector<8x192xf32> to vector<8x64xf32>
    %355 = arith.mulf %354, %351 : vector<8x64xf32>
    %356 = arith.addf %353, %355 : vector<8x64xf32>
    %357 = vector.extract_strided_slice %349 {offsets = [0, 128], sizes = [8, 64], strides = [1, 1]} : vector<8x192xf32> to vector<8x64xf32>
    %358 = math.tanh %356 : vector<8x64xf32>
    %359 = arith.mulf %357, %358 : vector<8x64xf32>
    %cst_172 = arith.constant dense<0.000000e+00> : vector<8x256xf32>
    %360 = tpu.matmul %359, %294, %cst_172 {dimension_numbers = #tpu.dot_dimension_numbers<[1], [0], [0], [1], [0, 0, 1, 1], [], []>, precision = #tpu.contract_precision<fp32>} : vector<8x64xf32>, vector<64x256xf32>, vector<8x256xf32> -> vector<8x256xf32>
    %c24_173 = arith.constant 24 : index
    %c0_174 = arith.constant 0 : index
    %361 = vector.load %arg18[%c24_173, %c0_174] : memref<64x256xf32, #tpu.memory_space<vmem>>, vector<8x256xf32>
    %362 = arith.addf %360, %361 : vector<8x256xf32>
    %c32_175 = arith.constant 32 : index
    %c0_176 = arith.constant 0 : index
    %363 = vector.load %arg19[%c32_175, %c0_176] : memref<64x256xf32, #tpu.memory_space<vmem>>, vector<8x256xf32>
    %364 = arith.addf %362, %363 : vector<8x256xf32>
    %365 = vector.extract_strided_slice %364 {offsets = [0, 0], sizes = [8, 192], strides = [1, 1]} : vector<8x256xf32> to vector<8x192xf32>
    %366 = arith.negf %365 : vector<8x192xf32>
    %367 = math.exp %366 : vector<8x192xf32>
    %cst_177 = arith.constant 1.000000e+00 : f32
    %368 = vector.broadcast %cst_177 : f32 to vector<8x192xf32>
    %369 = arith.addf %368, %367 : vector<8x192xf32>
    %370 = arith.divf %368, %369 : vector<8x192xf32>
    %371 = vector.extract_strided_slice %364 {offsets = [0, 192], sizes = [8, 64], strides = [1, 1]} : vector<8x256xf32> to vector<8x64xf32>
    %372 = math.tanh %371 : vector<8x64xf32>
    %373 = vector.extract_strided_slice %370 {offsets = [0, 64], sizes = [8, 64], strides = [1, 1]} : vector<8x192xf32> to vector<8x64xf32>
    %374 = arith.mulf %373, %356 : vector<8x64xf32>
    %375 = vector.extract_strided_slice %370 {offsets = [0, 0], sizes = [8, 64], strides = [1, 1]} : vector<8x192xf32> to vector<8x64xf32>
    %376 = arith.mulf %375, %372 : vector<8x64xf32>
    %377 = arith.addf %374, %376 : vector<8x64xf32>
    %378 = vector.extract_strided_slice %370 {offsets = [0, 128], sizes = [8, 64], strides = [1, 1]} : vector<8x192xf32> to vector<8x64xf32>
    %379 = math.tanh %377 : vector<8x64xf32>
    %380 = arith.mulf %378, %379 : vector<8x64xf32>
    %cst_178 = arith.constant dense<0.000000e+00> : vector<8x256xf32>
    %381 = tpu.matmul %380, %294, %cst_178 {dimension_numbers = #tpu.dot_dimension_numbers<[1], [0], [0], [1], [0, 0, 1, 1], [], []>, precision = #tpu.contract_precision<fp32>} : vector<8x64xf32>, vector<64x256xf32>, vector<8x256xf32> -> vector<8x256xf32>
    %c32_179 = arith.constant 32 : index
    %c0_180 = arith.constant 0 : index
    %382 = vector.load %arg18[%c32_179, %c0_180] : memref<64x256xf32, #tpu.memory_space<vmem>>, vector<8x256xf32>
    %383 = arith.addf %381, %382 : vector<8x256xf32>
    %c24_181 = arith.constant 24 : index
    %c0_182 = arith.constant 0 : index
    %384 = vector.load %arg19[%c24_181, %c0_182] : memref<64x256xf32, #tpu.memory_space<vmem>>, vector<8x256xf32>
    %385 = arith.addf %383, %384 : vector<8x256xf32>
    %386 = vector.extract_strided_slice %385 {offsets = [0, 0], sizes = [8, 192], strides = [1, 1]} : vector<8x256xf32> to vector<8x192xf32>
    %387 = arith.negf %386 : vector<8x192xf32>
    %388 = math.exp %387 : vector<8x192xf32>
    %cst_183 = arith.constant 1.000000e+00 : f32
    %389 = vector.broadcast %cst_183 : f32 to vector<8x192xf32>
    %390 = arith.addf %389, %388 : vector<8x192xf32>
    %391 = arith.divf %389, %390 : vector<8x192xf32>
    %392 = vector.extract_strided_slice %385 {offsets = [0, 192], sizes = [8, 64], strides = [1, 1]} : vector<8x256xf32> to vector<8x64xf32>
    %393 = math.tanh %392 : vector<8x64xf32>
    %394 = vector.extract_strided_slice %391 {offsets = [0, 64], sizes = [8, 64], strides = [1, 1]} : vector<8x192xf32> to vector<8x64xf32>
    %395 = arith.mulf %394, %377 : vector<8x64xf32>
    %396 = vector.extract_strided_slice %391 {offsets = [0, 0], sizes = [8, 64], strides = [1, 1]} : vector<8x192xf32> to vector<8x64xf32>
    %397 = arith.mulf %396, %393 : vector<8x64xf32>
    %398 = arith.addf %395, %397 : vector<8x64xf32>
    %399 = vector.extract_strided_slice %391 {offsets = [0, 128], sizes = [8, 64], strides = [1, 1]} : vector<8x192xf32> to vector<8x64xf32>
    %400 = math.tanh %398 : vector<8x64xf32>
    %401 = arith.mulf %399, %400 : vector<8x64xf32>
    %cst_184 = arith.constant dense<0.000000e+00> : vector<8x256xf32>
    %402 = tpu.matmul %401, %294, %cst_184 {dimension_numbers = #tpu.dot_dimension_numbers<[1], [0], [0], [1], [0, 0, 1, 1], [], []>, precision = #tpu.contract_precision<fp32>} : vector<8x64xf32>, vector<64x256xf32>, vector<8x256xf32> -> vector<8x256xf32>
    %c40_185 = arith.constant 40 : index
    %c0_186 = arith.constant 0 : index
    %403 = vector.load %arg18[%c40_185, %c0_186] : memref<64x256xf32, #tpu.memory_space<vmem>>, vector<8x256xf32>
    %404 = arith.addf %402, %403 : vector<8x256xf32>
    %c16_187 = arith.constant 16 : index
    %c0_188 = arith.constant 0 : index
    %405 = vector.load %arg19[%c16_187, %c0_188] : memref<64x256xf32, #tpu.memory_space<vmem>>, vector<8x256xf32>
    %406 = arith.addf %404, %405 : vector<8x256xf32>
    %407 = vector.extract_strided_slice %406 {offsets = [0, 0], sizes = [8, 192], strides = [1, 1]} : vector<8x256xf32> to vector<8x192xf32>
    %408 = arith.negf %407 : vector<8x192xf32>
    %409 = math.exp %408 : vector<8x192xf32>
    %cst_189 = arith.constant 1.000000e+00 : f32
    %410 = vector.broadcast %cst_189 : f32 to vector<8x192xf32>
    %411 = arith.addf %410, %409 : vector<8x192xf32>
    %412 = arith.divf %410, %411 : vector<8x192xf32>
    %413 = vector.extract_strided_slice %406 {offsets = [0, 192], sizes = [8, 64], strides = [1, 1]} : vector<8x256xf32> to vector<8x64xf32>
    %414 = math.tanh %413 : vector<8x64xf32>
    %415 = vector.extract_strided_slice %412 {offsets = [0, 64], sizes = [8, 64], strides = [1, 1]} : vector<8x192xf32> to vector<8x64xf32>
    %416 = arith.mulf %415, %398 : vector<8x64xf32>
    %417 = vector.extract_strided_slice %412 {offsets = [0, 0], sizes = [8, 64], strides = [1, 1]} : vector<8x192xf32> to vector<8x64xf32>
    %418 = arith.mulf %417, %414 : vector<8x64xf32>
    %419 = arith.addf %416, %418 : vector<8x64xf32>
    %420 = vector.extract_strided_slice %412 {offsets = [0, 128], sizes = [8, 64], strides = [1, 1]} : vector<8x192xf32> to vector<8x64xf32>
    %421 = math.tanh %419 : vector<8x64xf32>
    %422 = arith.mulf %420, %421 : vector<8x64xf32>
    %cst_190 = arith.constant dense<0.000000e+00> : vector<8x256xf32>
    %423 = tpu.matmul %422, %294, %cst_190 {dimension_numbers = #tpu.dot_dimension_numbers<[1], [0], [0], [1], [0, 0, 1, 1], [], []>, precision = #tpu.contract_precision<fp32>} : vector<8x64xf32>, vector<64x256xf32>, vector<8x256xf32> -> vector<8x256xf32>
    %c48_191 = arith.constant 48 : index
    %c0_192 = arith.constant 0 : index
    %424 = vector.load %arg18[%c48_191, %c0_192] : memref<64x256xf32, #tpu.memory_space<vmem>>, vector<8x256xf32>
    %425 = arith.addf %423, %424 : vector<8x256xf32>
    %c8_193 = arith.constant 8 : index
    %c0_194 = arith.constant 0 : index
    %426 = vector.load %arg19[%c8_193, %c0_194] : memref<64x256xf32, #tpu.memory_space<vmem>>, vector<8x256xf32>
    %427 = arith.addf %425, %426 : vector<8x256xf32>
    %428 = vector.extract_strided_slice %427 {offsets = [0, 0], sizes = [8, 192], strides = [1, 1]} : vector<8x256xf32> to vector<8x192xf32>
    %429 = arith.negf %428 : vector<8x192xf32>
    %430 = math.exp %429 : vector<8x192xf32>
    %cst_195 = arith.constant 1.000000e+00 : f32
    %431 = vector.broadcast %cst_195 : f32 to vector<8x192xf32>
    %432 = arith.addf %431, %430 : vector<8x192xf32>
    %433 = arith.divf %431, %432 : vector<8x192xf32>
    %434 = vector.extract_strided_slice %427 {offsets = [0, 192], sizes = [8, 64], strides = [1, 1]} : vector<8x256xf32> to vector<8x64xf32>
    %435 = math.tanh %434 : vector<8x64xf32>
    %436 = vector.extract_strided_slice %433 {offsets = [0, 64], sizes = [8, 64], strides = [1, 1]} : vector<8x192xf32> to vector<8x64xf32>
    %437 = arith.mulf %436, %419 : vector<8x64xf32>
    %438 = vector.extract_strided_slice %433 {offsets = [0, 0], sizes = [8, 64], strides = [1, 1]} : vector<8x192xf32> to vector<8x64xf32>
    %439 = arith.mulf %438, %435 : vector<8x64xf32>
    %440 = arith.addf %437, %439 : vector<8x64xf32>
    %441 = vector.extract_strided_slice %433 {offsets = [0, 128], sizes = [8, 64], strides = [1, 1]} : vector<8x192xf32> to vector<8x64xf32>
    %442 = math.tanh %440 : vector<8x64xf32>
    %443 = arith.mulf %441, %442 : vector<8x64xf32>
    %cst_196 = arith.constant dense<0.000000e+00> : vector<8x256xf32>
    %444 = tpu.matmul %443, %294, %cst_196 {dimension_numbers = #tpu.dot_dimension_numbers<[1], [0], [0], [1], [0, 0, 1, 1], [], []>, precision = #tpu.contract_precision<fp32>} : vector<8x64xf32>, vector<64x256xf32>, vector<8x256xf32> -> vector<8x256xf32>
    %c56_197 = arith.constant 56 : index
    %c0_198 = arith.constant 0 : index
    %445 = vector.load %arg18[%c56_197, %c0_198] : memref<64x256xf32, #tpu.memory_space<vmem>>, vector<8x256xf32>
    %446 = arith.addf %444, %445 : vector<8x256xf32>
    %c0_199 = arith.constant 0 : index
    %c0_200 = arith.constant 0 : index
    %447 = vector.load %arg19[%c0_199, %c0_200] : memref<64x256xf32, #tpu.memory_space<vmem>>, vector<8x256xf32>
    %448 = arith.addf %446, %447 : vector<8x256xf32>
    %449 = vector.extract_strided_slice %448 {offsets = [0, 0], sizes = [8, 192], strides = [1, 1]} : vector<8x256xf32> to vector<8x192xf32>
    %450 = arith.negf %449 : vector<8x192xf32>
    %451 = math.exp %450 : vector<8x192xf32>
    %cst_201 = arith.constant 1.000000e+00 : f32
    %452 = vector.broadcast %cst_201 : f32 to vector<8x192xf32>
    %453 = arith.addf %452, %451 : vector<8x192xf32>
    %454 = arith.divf %452, %453 : vector<8x192xf32>
    %455 = vector.extract_strided_slice %448 {offsets = [0, 192], sizes = [8, 64], strides = [1, 1]} : vector<8x256xf32> to vector<8x64xf32>
    %456 = math.tanh %455 : vector<8x64xf32>
    %457 = vector.extract_strided_slice %454 {offsets = [0, 64], sizes = [8, 64], strides = [1, 1]} : vector<8x192xf32> to vector<8x64xf32>
    %458 = arith.mulf %457, %440 : vector<8x64xf32>
    %459 = vector.extract_strided_slice %454 {offsets = [0, 0], sizes = [8, 64], strides = [1, 1]} : vector<8x192xf32> to vector<8x64xf32>
    %460 = arith.mulf %459, %456 : vector<8x64xf32>
    %461 = arith.addf %458, %460 : vector<8x64xf32>
    %462 = vector.extract_strided_slice %454 {offsets = [0, 128], sizes = [8, 64], strides = [1, 1]} : vector<8x192xf32> to vector<8x64xf32>
    %463 = math.tanh %461 : vector<8x64xf32>
    %464 = arith.mulf %462, %463 : vector<8x64xf32>
    %c0_202 = arith.constant 0 : index
    %c0_203 = arith.constant 0 : index
    %465 = vector.load %arg13[%c0_202, %c0_203] : memref<64x32xf32, #tpu.memory_space<vmem>>, vector<64x32xf32>
    %cst_204 = arith.constant dense<0.000000e+00> : vector<8x32xf32>
    %466 = tpu.matmul %464, %465, %cst_204 {dimension_numbers = #tpu.dot_dimension_numbers<[1], [0], [0], [1], [0, 0, 1, 1], [], []>, precision = #tpu.contract_precision<fp32>} : vector<8x64xf32>, vector<64x32xf32>, vector<8x32xf32> -> vector<8x32xf32>
    %c0_205 = arith.constant 0 : index
    %c0_206 = arith.constant 0 : index
    %467 = vector.load %arg14[%c0_205, %c0_206] : memref<1x32xf32, #tpu.memory_space<vmem>>, vector<1x32xf32>
    %468 = vector.broadcast %467 : vector<1x32xf32> to vector<8x32xf32>
    %469 = arith.addf %466, %468 : vector<8x32xf32>
    %cst_207 = arith.constant 0.000000e+00 : f32
    %470 = vector.broadcast %cst_207 : f32 to vector<8x32xf32>
    %471 = arith.maximumf %469, %470 : vector<8x32xf32>
    %c0_208 = arith.constant 0 : index
    %c0_209 = arith.constant 0 : index
    %472 = vector.load %arg15[%c0_208, %c0_209] : memref<32x4xf32, #tpu.memory_space<vmem>>, vector<32x4xf32>
    %cst_210 = arith.constant dense<0.000000e+00> : vector<8x4xf32>
    %473 = tpu.matmul %471, %472, %cst_210 {dimension_numbers = #tpu.dot_dimension_numbers<[1], [0], [0], [1], [0, 0, 1, 1], [], []>, precision = #tpu.contract_precision<fp32>} : vector<8x32xf32>, vector<32x4xf32>, vector<8x4xf32> -> vector<8x4xf32>
    %c0_211 = arith.constant 0 : index
    %c0_212 = arith.constant 0 : index
    %474 = vector.load %arg16[%c0_211, %c0_212] : memref<1x4xf32, #tpu.memory_space<vmem>>, vector<1x4xf32>
    %475 = vector.broadcast %474 : vector<1x4xf32> to vector<8x4xf32>
    %476 = arith.addf %473, %475 : vector<8x4xf32>
    %477 = vector.extract_strided_slice %476 {offsets = [0, 0], sizes = [2, 4], strides = [1, 1]} : vector<8x4xf32> to vector<2x4xf32>
    %c0_213 = arith.constant 0 : index
    %c0_214 = arith.constant 0 : index
    %478 = vector.load %arg17[%c0_213, %c0_214] : memref<2x4xf32, #tpu.memory_space<vmem>>, vector<2x4xf32>
    tpu.vector_store %arg17[%c0_213, %c0_214], %477 {strides = array<i32>} : memref<2x4xf32, #tpu.memory_space<vmem>>, vector<2x4xf32>,
    return
  }
}

</mosaic_0001>

<bundles_post_ra>
// kernel: simple_lstm_classifier_forward.1
= control target key start
LH: loop header
LB: loop body
LE: loop exit
PB: predicated region body
PF: predicated region fallthrough
CT: control target
= control target key end

     0   :  { %s29081_s0 = inlined_call_operand.vmem [shape: s32[6,64,1], index: 0, kind: input, shape index: {}]   ;;  %s29082_s1 = inlined_call_operand.vmem [shape: f32[64,2], index: 1, kind: input, shape index: {}]   ;;  %s29083_s2 = inlined_call_operand.vmem [shape: f32[50,16], index: 2, kind: input, shape index: {}]   ;;  %s29084_s3 = inlined_call_operand.vmem [shape: f32[18,256], index: 3, kind: input, shape index: {}]   ;;  %s29085_s4 = inlined_call_operand.vmem [shape: f32[18,256], index: 4, kind: input, shape index: {}]   ;;  %s29086_s5 = inlined_call_operand.hbm [shape: f32[1,256], index: 5, kind: input, shape index: {}]   ;;  %s29087_s6 = inlined_call_operand.hbm [shape: f32[1,256], index: 6, kind: input, shape index: {}]   ;;  %s29088_s7 = inlined_call_operand.vmem [shape: f32[64,256], index: 7, kind: input, shape index: {}]   ;;  %s29089_s8 = inlined_call_operand.vmem [shape: f32[64,256], index: 8, kind: input, shape index: {}]   ;;  %s29090_s9 = inlined_call_operand.vmem [shape: f32[64,256], index: 9, kind: input, shape index: {}]   ;;  %s29091_s10 = inlined_call_operand.hbm [shape: f32[1,256], index: 10, kind: input, shape index: {}]   ;;  %s29092_s11 = inlined_call_operand.vmem [shape: f32[1,256], index: 11, kind: input, shape index: {}]   ;;  %s29093_s12 = inlined_call_operand.vmem [shape: f32[64,256], index: 12, kind: input, shape index: {}]   ;;  %s29094_s13 = inlined_call_operand.vmem [shape: f32[64,32], index: 13, kind: input, shape index: {}]   ;;  %s29095_s14 = inlined_call_operand.vmem [shape: f32[1,32], index: 14, kind: input, shape index: {}]   ;;  %s29096_s15 = inlined_call_operand.vmem [shape: f32[32,4], index: 15, kind: input, shape index: {}]   ;;  %s29097_s16 = inlined_call_operand.vmem [shape: f32[1,4], index: 16, kind: input, shape index: {}]   ;;  %s29098_s17 = inlined_call_operand.hbm [shape: f32[2,4], index: 17, kind: output, shape index: {}]  }
   0x1   :  { %29178 = sst [smem:[#allocation47_spill]] %s29081_s0 }
   0x2   :  { %29179 = sst [smem:[#allocation48_spill]] %s29082_s1 }
   0x3   :  { %22 = vsyncpa [#allocation7], 0 }
   0x4   :  { %23 = vsyncpa [#allocation10], 0 }
   0x5   :  { %24 = vsyncpa [#allocation8], 0  ;;  %s24495_s24 = smov [#allocation9]   ;;  %s24496_s26 = smov [#allocation6]  }
   0x6   :  { %s51_s25 = sshll.u32 %s24495_s24, 4  ;;  %s41_s27 = sshll.u32 %s24496_s26, 4  ;;  %s52_s25 = int_to_ptr.vmem [resolvable:$true] %s51_s25  ;;  %s42_s27 = int_to_ptr.vmem [resolvable:$true] %s41_s27 }
   0x7   :  { %s24401_s0 = scalar_lea.hbm %s29087_s6, 32 }
   0x8   :  { %p24402_p0 = scmp.ne.s32.totalorder %s29087_s6, %s24401_s0  ;;  %p24405_p1 = scmp.lt.u32.totalorder %s24401_s0, %s29087_s6 }
   0xa   :  { %p24407_p2 = pnand %p24405_p1, %p24402_p0 }
   0xc   :  { %24410 = shalt.err (!%p24407_p2)
}
   0xd   :  { %s24411_s20 = scalar_lea.vmem %s52_s25, 32  ;;  %p24416_p4 = scmp.lt.s32.totalorder %s52_s25, %s52_s25 }
   0xe   :  { %p24412_p3 = scmp.ne.s32.totalorder %s52_s25, %s24411_s20  ;;  %p24417_p5 = scmp.lt.s32.totalorder %s24411_s20, %s24411_s20 }
  0x10   :  { %p24418_p6 = por %p24417_p5, %p24416_p4 }
  0x12   :  { %p24419_p7 = pnand %p24418_p6, %p24412_p3 }
  0x14   :  { %24422 = shalt.err (!%p24419_p7)
}
  0x15   :  { %54 = dma.hbm_to_vmem [thread:$0]  %s29087_s6, 32, %s52_s25, [#allocation10]  }
  0x16   :  { %s24423_s26 = scalar_lea.hbm %s29086_s5, 32 }
  0x17   :  { %p24424_p8 = scmp.ne.s32.totalorder %s29086_s5, %s24423_s26  ;;  %p24427_p9 = scmp.lt.u32.totalorder %s24423_s26, %s29086_s5 }
  0x19   :  { %p24429_p10 = pnand %p24427_p9, %p24424_p8 }
  0x1b   :  { %24432 = shalt.err (!%p24429_p10)
}
  0x1c   :  { %s24433_s18 = scalar_lea.vmem %s42_s27, 32  ;;  %p24438_p12 = scmp.lt.s32.totalorder %s42_s27, %s42_s27 }
  0x1d   :  { %p24434_p11 = scmp.ne.s32.totalorder %s42_s27, %s24433_s18  ;;  %p24439_p13 = scmp.lt.s32.totalorder %s24433_s18, %s24433_s18 }
  0x1f   :  { %p24440_p0 = por %p24439_p13, %p24438_p12 }
  0x21   :  { %p24441_p1 = pnand %p24440_p0, %p24434_p11 }
  0x23   :  { %24444 = shalt.err (!%p24441_p1)
}
  0x24   :  { %44 = dma.hbm_to_vmem [thread:$0]  %s29086_s5, 32, %s42_s27, [#allocation7]  }
  0x25   :  { %s24497_s19 = smov [#allocation11]   ;;  %s24445_s22 = scalar_lea.hbm %s29091_s10, 32 }
  0x26   :  { %s67_s1 = sshll.u32 %s24497_s19, 4  ;;  %p24446_p2 = scmp.ne.s32.totalorder %s29091_s10, %s24445_s22  ;;  %s68_s1 = int_to_ptr.vmem [resolvable:$true] %s67_s1 }
  0x27   :  { %p24449_p3 = scmp.lt.u32.totalorder %s24445_s22, %s29091_s10 }
  0x29   :  { %p24451_p4 = pnand %p24449_p3, %p24446_p2 }
  0x2b   :  { %24454 = shalt.err (!%p24451_p4)
}
  0x2c   :  { %s24455_s29 = scalar_lea.vmem %s68_s1, 32  ;;  %p24460_p6 = scmp.lt.s32.totalorder %s68_s1, %s68_s1 }
  0x2d   :  { %p24456_p5 = scmp.ne.s32.totalorder %s68_s1, %s24455_s29  ;;  %p24461_p7 = scmp.lt.s32.totalorder %s24455_s29, %s24455_s29 }
  0x2f   :  { %p24462_p8 = por %p24461_p7, %p24460_p6 }
  0x31   :  { %p24463_p9 = pnand %p24462_p8, %p24456_p5 }
  0x33   :  { %24466 = shalt.err (!%p24463_p9)
}
  0x34   :  { %70 = dma.hbm_to_vmem [thread:$0]  %s29091_s10, 32, %s68_s1, [#allocation10]  }
  0x35   :  { %24489 = dma.done.wait [#allocation7], 32  }
  0x36   :  { %24490 = vsyncadd [#allocation7], 4294967264 }
  0x37   :  { %24491 = dma.done.wait [#allocation10], 64  }
  0x38   :  { %24492 = vsyncadd [#allocation10], 4294967232  ;;  %v24498_v0 = vmov 0   ;;  %v29108_v1 = vmov 0.0   ;;  %s29180_s18 = sld [smem:[#allocation47_spill]]  ;;  %v24701_v24 = vld [vmem:[%s29083_s2] sm:$0xff] }
  0x39   :  { %24206 = vset.pattern.permute.xlu1 %v24498_v0  ;;  %24205 = vset.pattern.permute.xlu0 %v24498_v0  ;;  %v24706_v25 = vld [vmem:[%s29083_s2 + $0x8] sm:$0xff]  ;;  %v472_v28 = vand.u32 4294901760, %v24701_v24  ;;  %v24725_v31 = vld [vmem:[%s29083_s2 + $0x10] sm:$0xff]  ;;  %v24730_v32 = vld [vmem:[%s29083_s2 + $0x18] sm:$0xff]  ;;  %vm467_vm0 = vcmask 1041408   ;;  %vm442_vm11 = vcmask 408576  }
  0x3a   :  { %1451 = vmatprep.mubr.f32.mxu1 %v29108_v1  ;;  %v475_v29 = vand.u32 4294901760, %v24706_v25  ;;  %v478_v35 = vand.u32 4294901760, %v24725_v31  ;;  %v481_v36 = vand.u32 4294901760, %v24730_v32  ;;  %v24751_v38 = vld [vmem:[%s29083_s2 + $0x20] sm:$0xff]  ;;  %v24756_v39 = vld [vmem:[%s29083_s2 + $0x28] sm:$0xff]  ;;  %s29181_s23 = sld [smem:[#allocation48_spill]] }
  0x3b   :  { %v484_v42 = vand.u32 4294901760, %v24751_v38  ;;  %v487_v43 = vand.u32 4294901760, %v24756_v39  ;;  %v441_v47 = vld [vmem:[%s29083_s2 + $0x30] sm:$0x3]  ;;  %s24501_s0 = smov 96  }
  0x3c   :  { %v24720_v30 = vpack.c.bf16 %v475_v29, %v472_v28  ;;  %v24746_v37 = vpack.c.bf16 %v481_v36, %v478_v35  ;;  %v24786_v48 = vsel %vm467_vm0, %v441_v47, 0 }
  0x3d   :  { %v24772_v44 = vpack.c.bf16 %v487_v43, %v484_v42  ;;  %v24789_v49 = vand.u32 4294901760, %v24786_v48 }
  0x3e   :  { %v95_v2 = vld [vmem:[%s29180_s18 + $0x8] sm:$0xff]  ;;  %v94_v3 = vld [vmem:[%s29180_s18] sm:$0xff]  ;;  %v20601_v8 = vld [vmem:[%s29180_s18 + $0x50] sm:$0xff]  ;;  %21184 = vmatprep.subr.bf16.mxu0 %v24720_v30 }
  0x3f   :  { %106 = vperm.xlu1 %24206, %v95_v2   ;;  %103 = vperm.xlu0 %24205, %v94_v3   ;;  %v20600_v4 = vld [vmem:[%s29180_s18 + $0x48] sm:$0xff]  ;;  %v20599_v5 = vld [vmem:[%s29180_s18 + $0x40] sm:$0xff]  ;;  %v96_v9 = vld [vmem:[%s29180_s18 + $0x10] sm:$0xff]  ;;  %v625_v3 = vsub.f32 %v24701_v24, %v472_v28 }
  0x40   :  { %v20608_v6 = vld [vmem:[%s29180_s18 + $0x88] sm:$0xff]  ;;  %v20607_v7 = vld [vmem:[%s29180_s18 + $0x80] sm:$0xff]  ;;  %v97_v10 = vld [vmem:[%s29180_s18 + $0x18] sm:$0xff]  ;;  %21186 = vmatpush3.bf16.msra.mxu0 %v24720_v30 }
  0x41   :  { %v20615_v11 = vld [vmem:[%s29180_s18 + $0xc0] sm:$0xff]  ;;  %v20616_v12 = vld [vmem:[%s29180_s18 + $0xc8] sm:$0xff]  ;;  %v20602_v13 = vld [vmem:[%s29180_s18 + $0x58] sm:$0xff]  ;;  %21188 = vmatprep.subr.bf16.mxu0 %v24746_v37 }
  0x42   :  { %v20623_v14 = vld [vmem:[%s29180_s18 + $0x100] sm:$0xff]  ;;  %v20609_v15 = vld [vmem:[%s29180_s18 + $0x90] sm:$0xff]  ;;  %v20624_v16 = vld [vmem:[%s29180_s18 + $0x108] sm:$0xff] }
  0x43   :  { %163 = vperm.xlu1 %24206, %v20600_v4   ;;  %160 = vperm.xlu0 %24205, %v20599_v5   ;;  %v20610_v17 = vld [vmem:[%s29180_s18 + $0x98] sm:$0xff]  ;;  %v20603_v18 = vld [vmem:[%s29180_s18 + $0x60] sm:$0xff]  ;;  %v20617_v21 = vld [vmem:[%s29180_s18 + $0xd0] sm:$0xff]  ;;  %v632_v4 = vsub.f32 %v24706_v25, %v475_v29 }
  0x44   :  { %v98_v19 = vld [vmem:[%s29180_s18 + $0x20] sm:$0xff]  ;;  %v20604_v22 = vld [vmem:[%s29180_s18 + $0x68] sm:$0xff]  ;;  %v20618_v27 = vld [vmem:[%s29180_s18 + $0xd8] sm:$0xff]  ;;  %21190 = vmatpush3.bf16.msra.mxu0 %v24746_v37 }
  0x45   :  { %v20631_v20 = vld [vmem:[%s29180_s18 + $0x140] sm:$0xff]  ;;  %v99_v23 = vld [vmem:[%s29180_s18 + $0x28] sm:$0xff]  ;;  %v20625_v33 = vld [vmem:[%s29180_s18 + $0x110] sm:$0xff]  ;;  %21192 = vmatprep.subr.bf16.mxu0 %v24772_v44 }
  0x46   :  { %v20632_v26 = vld [vmem:[%s29180_s18 + $0x148] sm:$0xff]  ;;  %v20611_v34 = vld [vmem:[%s29180_s18 + $0xa0] sm:$0xff]  ;;  %v20626_v40 = vld [vmem:[%s29180_s18 + $0x118] sm:$0xff] }
  0x47   :  { %220 = vperm.xlu1 %24206, %v20608_v6   ;;  %217 = vperm.xlu0 %24205, %v20607_v7   ;;  %v20612_v41 = vld [vmem:[%s29180_s18 + $0xa8] sm:$0xff]  ;;  %v20605_v45 = vld [vmem:[%s29180_s18 + $0x70] sm:$0xff]  ;;  %v20619_v51 = vld [vmem:[%s29180_s18 + $0xe0] sm:$0xff]  ;;  %v626_v7 = vand.u32 4294901760, %v625_v3 }
  0x48   :  { %v100_v46 = vld [vmem:[%s29180_s18 + $0x30] sm:$0xff]  ;;  %21194 = vmatpush3.bf16.msra.mxu0 %v24772_v44  ;;  %v20606_v52 = vld [vmem:[%s29180_s18 + $0x78] sm:$0xff]  ;;  %v20620_v55 = vld [vmem:[%s29180_s18 + $0xe8] sm:$0xff] }
  0x49   :  { %v20633_v50 = vld [vmem:[%s29180_s18 + $0x150] sm:$0xff]  ;;  %20859 = vmatprep.subr.mxu0 %v24789_v49  ;;  %v101_v53 = vld [vmem:[%s29180_s18 + $0x38] sm:$0xff]  ;;  %v20627_v56 = vld [vmem:[%s29180_s18 + $0x120] sm:$0xff] }
  0x4a   :  { %v20634_v54 = vld [vmem:[%s29180_s18 + $0x158] sm:$0xff]  ;;  %v20613_v57 = vld [vmem:[%s29180_s18 + $0xb0] sm:$0xff]  ;;  %v20628_v58 = vld [vmem:[%s29180_s18 + $0x128] sm:$0xff] }
  0x4b   :  { %166 = vperm.xlu1 %24206, %v20601_v8   ;;  %109 = vperm.xlu0 %24205, %v96_v9   ;;  %v20614_v59 = vld [vmem:[%s29180_s18 + $0xb8] sm:$0xff]  ;;  %v20635_v60 = vld [vmem:[%s29180_s18 + $0x160] sm:$0xff]  ;;  %v20621_v61 = vld [vmem:[%s29180_s18 + $0xf0] sm:$0xff]  ;;  %v633_v8 = vand.u32 4294901760, %v632_v4  ;;  %v627_v9 = vsub.f32 %v625_v3, %v626_v7 }
  0x4c   :  { %20860 = vmatpush3.msra.mxu0 %v24789_v49  ;;  %v20636_v62 = vld [vmem:[%s29180_s18 + $0x168] sm:$0xff]  ;;  %v20622_v63 = vld [vmem:[%s29180_s18 + $0xf8] sm:$0xff]  ;;  %v20629_v2 = vld [vmem:[%s29180_s18 + $0x130] sm:$0xff] }
  0x4d   :  { %v20630_v0 = vld [vmem:[%s29180_s18 + $0x138] sm:$0xff]  ;;  %v20637_v6 = vld [vmem:[%s29180_s18 + $0x170] sm:$0xff] }
  0x4e   :  { %v20638_v5 = vld [vmem:[%s29180_s18 + $0x178] sm:$0xff] }
  0x4f   :  { %112 = vperm.xlu1 %24206, %v97_v10   ;;  %274 = vperm.xlu0 %24205, %v20615_v11   ;;  %v634_v10 = vsub.f32 %v632_v4, %v633_v8  ;;  %v639_v11 = vsub.f32 %v24725_v31, %v478_v35 }
  0x53   :  { %277 = vperm.xlu1 %24206, %v20616_v12   ;;  %169 = vperm.xlu0 %24205, %v20602_v13   ;;  %v646_v12 = vsub.f32 %v24730_v32, %v481_v36  ;;  %v628_v13 = vand.u32 4294901760, %v627_v9 }
  0x57   :  { %331 = vperm.xlu1 %24206, %v20623_v14   ;;  %223 = vperm.xlu0 %24205, %v20609_v15   ;;  %v635_v14 = vand.u32 4294901760, %v634_v10  ;;  %v640_v15 = vand.u32 4294901760, %v639_v11 }
  0x5b   :  { %334 = vperm.xlu1 %24206, %v20624_v16   ;;  %226 = vperm.xlu0 %24205, %v20610_v17   ;;  %v647_v16 = vand.u32 4294901760, %v646_v12  ;;  %v24859_v17 = vpack.c.bf16 %v635_v14, %v628_v13 }
  0x5d   :  { %21196 = vmatprep.subr.bf16.mxu0 %v24859_v17 }
  0x5f   :  { %172 = vperm.xlu1 %24206, %v20603_v18   ;;  %115 = vperm.xlu0 %24205, %v98_v19   ;;  %v641_v18 = vsub.f32 %v639_v11, %v640_v15  ;;  %v653_v19 = vsub.f32 %v24751_v38, %v484_v42 }
  0x63   :  { %388 = vperm.xlu1 %24206, %v20631_v20   ;;  %280 = vperm.xlu0 %24205, %v20617_v21   ;;  %v660_v20 = vsub.f32 %v24756_v39, %v487_v43  ;;  %v648_v21 = vsub.f32 %v646_v12, %v647_v16 }
  0x65   :  { %v661_v24 = vand.u32 4294901760, %v660_v20  ;;  %v649_v25 = vand.u32 4294901760, %v648_v21  ;;  %v24876_v35 = vpack.c.bf16 %v660_v20, %v653_v19 }
  0x67   :  { %175 = vperm.xlu1 %24206, %v20604_v22   ;;  %118 = vperm.xlu0 %24205, %v99_v23   ;;  %v642_v22 = vand.u32 4294901760, %v641_v18  ;;  %v654_v23 = vand.u32 4294901760, %v653_v19 }
  0x69   :  { %v24868_v28 = vpack.c.bf16 %v649_v25, %v642_v22 }
  0x6b   :  { %391 = vperm.xlu1 %24206, %v20632_v26   ;;  %283 = vperm.xlu0 %24205, %v20618_v27   ;;  %v655_v26 = vsub.f32 %v653_v19, %v654_v23  ;;  %v662_v27 = vsub.f32 %v660_v20, %v661_v24 }
  0x6d   :  { %v656_v29 = vand.u32 4294901760, %v655_v26  ;;  %v663_v31 = vand.u32 4294901760, %v662_v27 }
  0x6f   :  { %337 = vperm.xlu1 %24206, %v20625_v33   ;;  %229 = vperm.xlu0 %24205, %v20611_v34   ;;  %v24870_v32 = vpack.c.bf16 %v663_v31, %v656_v29  ;;  %v24872_v33 = vpack.c.bf16 %v632_v4, %v625_v3  ;;  %v24874_v34 = vpack.c.bf16 %v646_v12, %v639_v11 }
  0x73   :  { %340 = vperm.xlu1 %24206, %v20626_v40   ;;  %232 = vperm.xlu0 %24205, %v20612_v41  }
  0x77   :  { %178 = vperm.xlu1 %24206, %v20605_v45   ;;  %121 = vperm.xlu0 %24205, %v100_v46   ;;  %v24882_v46 = vpack.c.bf16 %v633_v8, %v626_v7 }
  0x7b   :  { %394 = vperm.xlu1 %24206, %v20633_v50   ;;  %286 = vperm.xlu0 %24205, %v20619_v51   ;;  %v24886_v51 = vpack.c.bf16 %v647_v16, %v640_v15 }
  0x7f   :  { %181 = vperm.xlu1 %24206, %v20606_v52   ;;  %124 = vperm.xlu0 %24205, %v101_v53   ;;  %v29101_v52 = vlaneseq }
  0x83   :  { %397 = vperm.xlu1 %24206, %v20634_v54   ;;  %289 = vperm.xlu0 %24205, %v20620_v55   ;;  %v24890_v55 = vpack.c.bf16 %v661_v24, %v654_v23  ;;  %v24931_v23 = vsub.f32 %v24786_v48, %v24789_v49 }
  0x87   :  { %343 = vperm.xlu1 %24206, %v20627_v56   ;;  %235 = vperm.xlu0 %24205, %v20613_v57   ;;  %v24893_v56 = vand.u32 127, %v29101_v52 }
  0x8b   :  { %346 = vperm.xlu1 %24206, %v20628_v58   ;;  %238 = vperm.xlu0 %24205, %v20614_v59  }
  0x8f   :  { %400 = vperm.xlu1 %24206, %v20635_v60   ;;  %292 = vperm.xlu0 %24205, %v20621_v61  }
  0x93   :  { %403 = vperm.xlu1 %24206, %v20636_v62   ;;  %295 = vperm.xlu0 %24205, %v20622_v63  }
  0x97   :  { %352 = vperm.xlu1 %24206, %v20630_v0   ;;  %349 = vperm.xlu0 %24205, %v20629_v2  }
  0x9b   :  { %409 = vperm.xlu1 %24206, %v20638_v5   ;;  %406 = vperm.xlu0 %24205, %v20637_v6  }
  0xbe   :  { %v107_v36 = vpop.permute.xlu1 %106  ;;  %v104_v38 = vpop.permute.xlu0 %103 }
  0xbf   :  { %vm126_vm2 = vcmp.eq.s32.totalorder %v104_v38, %v24893_v56  ;;  %vm127_vm7 = vcmp.eq.s32.totalorder %v107_v36, %v24893_v56  ;;  %v24941_v38 = vand.u32 4294901760, %v24931_v23 }
  0xc0   :  { %v134_v62 = vsel %vm126_vm2, 1.0, %v29108_v1  ;;  %v135_v12 = vsel %vm127_vm7, 1.0, %v29108_v1 }
  0xc2   :  { %v164_v39 = vpop.permute.xlu1 %163  ;;  %v161_v40 = vpop.permute.xlu0 %160 }
  0xc3   :  { %vm183_vm1 = vcmp.eq.s32.totalorder %v161_v40, %v24893_v56  ;;  %vm184_vm6 = vcmp.eq.s32.totalorder %v164_v39, %v24893_v56 }
  0xc4   :  { %v191_v59 = vsel %vm183_vm1, 1.0, %v29108_v1  ;;  %v192_v8 = vsel %vm184_vm6, 1.0, %v29108_v1 }
  0xc5   :  { %v199_v0 = vadd.f32 %v191_v59, %v134_v62  ;;  %v200_v15 = vadd.f32 %v192_v8, %v135_v12 }
  0xc6   :  { %v221_v41 = vpop.permute.xlu1 %220  ;;  %v218_v42 = vpop.permute.xlu0 %217 }
  0xc7   :  { %vm240_vm3 = vcmp.eq.s32.totalorder %v218_v42, %v24893_v56  ;;  %vm241_vm8 = vcmp.eq.s32.totalorder %v221_v41, %v24893_v56 }
  0xc8   :  { %v248_v63 = vsel %vm240_vm3, 1.0, %v29108_v1  ;;  %v249_v13 = vsel %vm241_vm8, 1.0, %v29108_v1 }
  0xc9   :  { %v256_v5 = vadd.f32 %v248_v63, %v199_v0  ;;  %v257_v21 = vadd.f32 %v249_v13, %v200_v15 }
  0xca   :  { %v24878_v43 = vpop.permute.xlu1 %166  ;;  %v24880_v45 = vpop.permute.xlu0 %109 }
  0xcb   :  { %vm185_vm14 = vcmp.eq.s32.totalorder %v24878_v43, %v24893_v56  ;;  %vm128_vm15 = vcmp.eq.s32.totalorder %v24880_v45, %v24893_v56 }
  0xcc   :  { %v136_v45 = vsel %vm128_vm15, 1.0, %v29108_v1 }
  0xce   :  { %v24884_v47 = vpop.permute.xlu1 %112  ;;  %v275_v50 = vpop.permute.xlu0 %274 }
  0xcf   :  { %vm297_vm4 = vcmp.eq.s32.totalorder %v275_v50, %v24893_v56  ;;  %vm129_vm2 = vcmp.eq.s32.totalorder %v24884_v47, %v24893_v56 }
  0xd0   :  { %v305_v2 = vsel %vm297_vm4, 1.0, %v29108_v1  ;;  %v137_v47 = vsel %vm129_vm2, 1.0, %v29108_v1  ;;  %vm1310_vm2 = vcmask 15360  }
  0xd1   :  { %v313_v7 = vadd.f32 %v305_v2, %v256_v5 }
  0xd2   :  { %v278_v53 = vpop.permute.xlu1 %277  ;;  %v24888_v54 = vpop.permute.xlu0 %169 }
  0xd3   :  { %vm298_vm9 = vcmp.eq.s32.totalorder %v278_v53, %v24893_v56  ;;  %vm186_vm1 = vcmp.eq.s32.totalorder %v24888_v54, %v24893_v56 }
  0xd4   :  { %v306_v18 = vsel %vm298_vm9, 1.0, %v29108_v1  ;;  %v194_v54 = vsel %vm186_vm1, 1.0, %v29108_v1 }
  0xd5   :  { %v314_v26 = vadd.f32 %v306_v18, %v257_v21 }
  0xd6   :  { %v332_v57 = vpop.permute.xlu1 %331  ;;  %v24895_v58 = vpop.permute.xlu0 %223 }
  0xd7   :  { %vm354_vm5 = vcmp.eq.s32.totalorder %v332_v57, %v24893_v56  ;;  %v669_v57 = vsub.f32 %v24931_v23, %v24941_v38  ;;  %vm242_vm3 = vcmp.eq.s32.totalorder %v24895_v58, %v24893_v56 }
  0xd8   :  { %v362_v6 = vsel %vm354_vm5, 1.0, %v29108_v1  ;;  %v250_v58 = vsel %vm242_vm3, 1.0, %v29108_v1 }
  0xd9   :  { %v370_v11 = vadd.f32 %v362_v6, %v313_v7  ;;  %v24972_v2 = vand.u32 4294901760, %v669_v57  ;;  %v202_v7 = vadd.f32 %v194_v54, %v137_v47 }
  0xda   :  { %v335_v60 = vpop.permute.xlu1 %334  ;;  %v24901_v61 = vpop.permute.xlu0 %226 }
  0xdb   :  { %vm355_vm12 = vcmp.eq.s32.totalorder %v335_v60, %v24893_v56  ;;  %v193_v60 = vsel %vm185_vm14, 1.0, %v29108_v1  ;;  %vm243_vm4 = vcmp.eq.s32.totalorder %v24901_v61, %v24893_v56 }
  0xdc   :  { %v363_v24 = vsel %vm355_vm12, 1.0, %v29108_v1  ;;  %v201_v5 = vadd.f32 %v193_v60, %v136_v45  ;;  %v251_v61 = vsel %vm243_vm4, 1.0, %v29108_v1 }
  0xdd   :  { %v371_v36 = vadd.f32 %v363_v24, %v314_v26  ;;  %v259_v15 = vadd.f32 %v251_v61, %v202_v7 }
  0xde   :  { %v24908_v3 = vpop.permute.xlu1 %172  ;;  %v24910_v4 = vpop.permute.xlu0 %115 }
  0xdf   :  { %vm187_vm6 = vcmp.eq.s32.totalorder %v24908_v3, %v24893_v56  ;;  %vm130_vm7 = vcmp.eq.s32.totalorder %v24910_v4, %v24893_v56 }
  0xe0   :  { %v195_v4 = vsel %vm187_vm6, 1.0, %v29108_v1  ;;  %v138_v12 = vsel %vm130_vm7, 1.0, %v29108_v1 }
  0xe1   :  { %v203_v26 = vadd.f32 %v195_v4, %v138_v12 }
  0xe2   :  { %v389_v9 = vpop.permute.xlu1 %388  ;;  %v281_v10 = vpop.permute.xlu0 %280 }
  0xe3   :  { %vm411_vm10 = vcmp.eq.s32.totalorder %v389_v9, %v24893_v56  ;;  %vm299_vm5 = vcmp.eq.s32.totalorder %v281_v10, %v24893_v56 }
  0xe4   :  { %v419_v14 = vsel %vm411_vm10, 1.0, %v29108_v1  ;;  %v307_v8 = vsel %vm299_vm5, 1.0, %v29108_v1 }
  0xe5   :  { %v427_v16 = vadd.f32 %v419_v14, %v370_v11  ;;  %v258_v11 = vadd.f32 %v250_v58, %v201_v5 }
  0xe6   :  { %v24924_v19 = vpop.permute.xlu1 %175  ;;  %v24926_v20 = vpop.permute.xlu0 %118 }
  0xe7   :  { %v444_v22 = vsel %vm442_vm11, %v427_v16, 0  ;;  %vm188_vm9 = vcmp.eq.s32.totalorder %v24924_v19, %v24893_v56  ;;  %vm131_vm10 = vcmp.eq.s32.totalorder %v24926_v20, %v24893_v56  ;;  %v315_v16 = vadd.f32 %v307_v8, %v258_v11 }
  0xe8   :  { %v24934_v25 = vand.u32 4294901760, %v444_v22  ;;  %v196_v18 = vsel %vm188_vm9, 1.0, %v29108_v1  ;;  %v139_v19 = vsel %vm131_vm10, 1.0, %v29108_v1 }
  0xe9   :  { %v204_v54 = vadd.f32 %v196_v18, %v139_v19 }
  0xea   :  { %v392_v27 = vpop.permute.xlu1 %391  ;;  %v284_v29 = vpop.permute.xlu0 %283  ;;  %v24937_v31 = vsub.f32 %v444_v22, %v24934_v25 }
  0xeb   :  { %vm412_vm13 = vcmp.eq.s32.totalorder %v392_v27, %v24893_v56  ;;  %vm300_vm12 = vcmp.eq.s32.totalorder %v284_v29, %v24893_v56  ;;  %v1309_v29 = vld [vmem:[%s29084_s3 + $0x28] sm:$0x3] }
  0xec   :  { %v420_v39 = vsel %vm412_vm13, 1.0, %v29108_v1  ;;  %v29106_v48 = vand.u32 4294901760, %v24937_v31  ;;  %v308_v20 = vsel %vm300_vm12, 1.0, %v29108_v1 }
  0xed   :  { %v428_v40 = vadd.f32 %v420_v39, %v371_v36  ;;  %v1308_v36 = vld [vmem:[%s29084_s3 + $0x20] sm:$0x3] }
  0xee   :  { %v338_v41 = vpop.permute.xlu1 %337  ;;  %v230_v42 = vpop.permute.xlu0 %229  ;;  %v546_v50 = vsub.f32 %v24937_v31, %v29106_v48  ;;  %v1300_v39 = vld [vmem:[%s29181_s23 + $0x20] sm:$0xff] }
  0xef   :  { %v447_v53 = vsel %vm442_vm11, %v428_v40, 0  ;;  %vm356_vm8 = vcmp.eq.s32.totalorder %v338_v41, %v24893_v56  ;;  %vm244_vm13 = vcmp.eq.s32.totalorder %v230_v42, %v24893_v56  ;;  %v1336_v42 = vsel %vm467_vm0, %v1308_v36, 0 }
  0xf0   :  { %v24957_v59 = vand.u32 4294901760, %v447_v53  ;;  %v547_v43 = vand.u32 4294901760, %v546_v50  ;;  %v364_v13 = vsel %vm356_vm8, 1.0, %v29108_v1  ;;  %v252_v21 = vsel %vm244_vm13, 1.0, %v29108_v1  ;;  %v1301_v50 = vld [vmem:[%s29181_s23 + $0x28] sm:$0xff] }
  0xf1   :  { %v372_v27 = vadd.f32 %v364_v13, %v315_v16  ;;  %v25037_v45 = vand.u32 4294901760, %v1336_v42  ;;  %v25039_v5 = vadd.f32 %v252_v21, %v203_v26  ;;  %v1324_v7 = vsel %vm1310_vm2, %v1300_v39, 0 }
  0xf2   :  { %v24967_v62 = vsub.f32 %v447_v53, %v24957_v59  ;;  %v341_v63 = vpop.permute.xlu1 %340  ;;  %20861 = vmatprep.mubr.f32.mxu0 %v547_v43  ;;  %v233_v0 = vpop.permute.xlu0 %232  ;;  %v1302_v53 = vld [vmem:[%s29181_s23 + $0x30] sm:$0xff] }
  0xf3   :  { %vm357_vm14 = vcmp.eq.s32.totalorder %v341_v63, %v24893_v56  ;;  %vm245_vm15 = vcmp.eq.s32.totalorder %v233_v0, %v24893_v56  ;;  %v316_v63 = vadd.f32 %v308_v20, %v259_v15  ;;  %v1303_v0 = vld [vmem:[%s29181_s23 + $0x38] sm:$0xff]  ;;  %v1330_v11 = vsel %vm1310_vm2, %v1302_v53, 0 }
  0xf4   :  { %v29105_v6 = vand.u32 4294901760, %v24967_v62  ;;  %v365_v40 = vsel %vm357_vm14, 1.0, %v29108_v1  ;;  %v253_v57 = vsel %vm245_vm15, 1.0, %v29108_v1  ;;  %v25069_v15 = vsub.f32 %v1336_v42, %v25037_v45 }
  0xf5   :  { %v373_v4 = vadd.f32 %v365_v40, %v316_v63  ;;  %v25057_v12 = vadd.f32 %v253_v57, %v204_v54  ;;  %v1333_v16 = vsel %vm1310_vm2, %v1303_v0, 0  ;;  %v25080_v26 = vand.u32 4294901760, %v1330_v11 }
  0xf6   :  { %v24986_v9 = vpop.permute.xlu1 %178  ;;  %v24988_v10 = vpop.permute.xlu0 %121  ;;  %v556_v3 = vsub.f32 %v24967_v62, %v29105_v6  ;;  %v25101_v42 = vand.u32 4294901760, %v1333_v16 }
  0xf7   :  { %vm189_vm3 = vcmp.eq.s32.totalorder %v24986_v9, %v24893_v56  ;;  %vm132_vm4 = vcmp.eq.s32.totalorder %v24988_v10, %v24893_v56  ;;  %v25112_v63 = vsub.f32 %v1330_v11, %v25080_v26 }
  0xf8   :  { %v557_v14 = vand.u32 4294901760, %v556_v3  ;;  %v1327_v3 = vsel %vm1310_vm2, %v1301_v50, 0  ;;  %v140_v0 = vsel %vm132_vm4, 1.0, %v29108_v1 }
  0xfa   :  { %v395_v22 = vpop.permute.xlu1 %394  ;;  %20862 = vmatmul.mubr.f32.vlgmr.msra.gmra.mrb[0].mxu0 %v557_v14  ;;  %v25006_v24 = vpop.permute.xlu0 %286  ;;  %v25063_v14 = vand.u32 4294901760, %v1324_v7 }
  0xfb   :  { %vm413_vm1 = vcmp.eq.s32.totalorder %v395_v22, %v24893_v56  ;;  %21198 = vmatpush3.bf16.msra.mxu0 %v24859_v17  ;;  %v1339_v17 = vsel %vm467_vm0, %v1309_v29, 0  ;;  %v25078_v22 = vand.u32 4294901760, %v1327_v3  ;;  %v29102_v29 = vand.u32 4294901760, %v25069_v15 }
  0xfc   :  { %v421_v41 = vsel %vm413_vm1, 1.0, %v29108_v1  ;;  %21200 = vmatprep.subr.bf16.mxu0 %v24868_v28  ;;  %v25035_v60 = vand.u32 4294901760, %v1339_v17  ;;  %v25076_v21 = vsub.f32 %v1324_v7, %v25063_v14  ;;  %vm301_vm6 = vcmp.eq.s32.totalorder %v25006_v24, %v24893_v56 }
  0xfd   :  { %v429_v43 = vadd.f32 %v421_v41, %v372_v27  ;;  %v25109_v54 = vsub.f32 %v1327_v3, %v25078_v22  ;;  %v197_v7 = vsel %vm189_vm3, 1.0, %v29108_v1 }
  0xfe   :  { %v25041_v47 = vpop.permute.xlu1 %181  ;;  %v25043_v58 = vpop.permute.xlu0 %124  ;;  %23139 = vmatprep.subr.mxu1 %v25035_v60  ;;  %v25053_v8 = vsub.f32 %v1339_v17, %v25035_v60  ;;  %v25096_v40 = vand.u32 4294901760, %v25076_v21  ;;  %v1505_v17 = vsub.f32 %v25069_v15, %v29102_v29 }
  0xff   :  { %v450_v61 = vsel %vm442_vm11, %v429_v43, 0  ;;  %21202 = vmatpush3.bf16.msra.mxu0 %v24868_v28  ;;  %23140 = vmatpush1.msra.mxu1 %v25037_v45  ;;  %vm190_vm8 = vcmp.eq.s32.totalorder %v25041_v47, %v24893_v56  ;;  %vm133_vm9 = vcmp.eq.s32.totalorder %v25043_v58, %v24893_v56  ;;  %v25139_v24 = vand.u32 4294901760, %v25109_v54 }
 0x100   :  { %v25059_v13 = vand.u32 4294901760, %v450_v61  ;;  %21204 = vmatprep.subr.bf16.mxu0 %v24870_v32  ;;  %v29107_v28 = vand.u32 4294901760, %v25053_v8  ;;  %v1455_v43 = vsub.f32 %v25076_v21, %v25096_v40 }
 0x102   :  { %v25073_v18 = vsub.f32 %v450_v61, %v25059_v13  ;;  %v398_v19 = vpop.permute.xlu1 %397  ;;  %v290_v20 = vpop.permute.xlu0 %289  ;;  %v1499_v27 = vsub.f32 %v25053_v8, %v29107_v28  ;;  %v309_v61 = vsel %vm301_vm6, 1.0, %v29108_v1  ;;  %v25136_v10 = vand.u32 4294901760, %v1455_v43 }
 0x103   :  { %vm414_vm5 = vcmp.eq.s32.totalorder %v398_v19, %v24893_v56  ;;  %21206 = vmatpush3.bf16.msra.mxu0 %v24870_v32  ;;  %vm302_vm10 = vcmp.eq.s32.totalorder %v290_v20, %v24893_v56  ;;  %v198_v43 = vsel %vm190_vm8, 1.0, %v29108_v1 }
 0x104   :  { %v422_v36 = vsel %vm414_vm5, 1.0, %v29108_v1  ;;  %v29104_v39 = vand.u32 4294901760, %v25073_v18  ;;  %20885 = vmatprep.subr.mxu0 %v24972_v2  ;;  %v1500_v32 = vand.u32 4294901760, %v1499_v27  ;;  %29182 = vst [vmem:[#allocation16_spill] sm:$0xff] %v25136_v10  ;;  %1457 = vmatmul.mubr.f32.vlgmr.msra.gmra.mrb[0].mxu1 %v25136_v10 }
 0x105   :  { %v430_v41 = vadd.f32 %v422_v36, %v373_v4  ;;  %v1506_v4 = vand.u32 4294901760, %v1505_v17  ;;  %v25146_v36 = vand.u32 4294901760, %v25112_v63  ;;  %1462 = vmatprep.mubr.f32.mxu1 %v29108_v1 }
 0x106   :  { %v344_v50 = vpop.permute.xlu1 %343  ;;  %v236_v53 = vpop.permute.xlu0 %235  ;;  %v566_v57 = vsub.f32 %v25073_v18, %v29104_v39  ;;  %1501 = vmatprep.subr.mxu1 %v1500_v32  ;;  %v317_v32 = vadd.f32 %v309_v61, %v25039_v5  ;;  %v141_v5 = vsel %vm133_vm9, 1.0, %v29108_v1  ;;  %v310_v61 = vsel %vm302_vm10, 1.0, %v29108_v1 }
 0x107   :  { %v453_v3 = vsel %vm442_vm11, %v430_v41, 0  ;;  %20886 = vmatpush3.msra.mxu0 %v24972_v2  ;;  %vm358_vm7 = vcmp.eq.s32.totalorder %v344_v50, %v24893_v56  ;;  %v25149_v41 = vsub.f32 %v1333_v16, %v25101_v42  ;;  %1507 = vmatpush1.msra.mxu1 %v1506_v4  ;;  %v1477_v50 = vsub.f32 %v25112_v63, %v25146_v36 }
 0x108   :  { %v25128_v11 = vand.u32 4294901760, %v453_v3  ;;  %v567_v9 = vand.u32 4294901760, %v566_v57  ;;  %21208 = vmatprep.subr.bf16.mxu0 %v24872_v33  ;;  %v366_v17 = vsel %vm358_vm7, 1.0, %v29108_v1  ;;  %v1466_v57 = vsub.f32 %v25109_v54, %v25139_v24  ;;  %1629 = vmatprep.subr.mxu1 %v25053_v8 }
 0x109   :  { %vm246_vm13 = vcmp.eq.s32.totalorder %v236_v53, %v24893_v56  ;;  %v374_v58 = vadd.f32 %v366_v17, %v317_v32  ;;  %v1296_v17 = vld [vmem:[%s29181_s23] sm:$0xff]  ;;  %v318_v52 = vadd.f32 %v310_v61, %v25057_v12  ;;  %vm24503_vm9 = vmmov 0  }
 0x10a   :  { %v25142_v2 = vsub.f32 %v453_v3, %v25128_v11  ;;  %v347_v19 = vpop.permute.xlu1 %346  ;;  %20864 = vmatprep.mubr.f32.mxu0 %v567_v9  ;;  %v239_v27 = vpop.permute.xlu0 %238  ;;  %v25175_v47 = vand.u32 4294901760, %v1466_v57  ;;  %v25178_v3 = vand.u32 4294901760, %v25149_v41  ;;  %v25189_v57 = vand.u32 4294901760, %v1477_v50 }
 0x10b   :  { %vm359_vm12 = vcmp.eq.s32.totalorder %v347_v19, %v24893_v56  ;;  %vm247_vm14 = vcmp.eq.s32.totalorder %v239_v27, %v24893_v56  ;;  %v254_v50 = vsel %vm246_vm13, 1.0, %v29108_v1  ;;  %vm20581_vm10 = vcmask 25600  }
 0x10c   :  { %v29103_v16 = vand.u32 4294901760, %v25142_v2  ;;  %29183 = vst [vmem:[#allocation17_spill] sm:$0xff] %v25175_v47  ;;  %v367_v9 = vsel %vm359_vm12, 1.0, %v29108_v1  ;;  %1468 = vmatmul.mubr.f32.gmra.mrb[2].mxu1 %v25175_v47  ;;  %29184 = vst [vmem:[#allocation18_spill] sm:$0xff] %v25189_v57  ;;  %v1488_v32 = vsub.f32 %v25149_v41, %v25178_v3  ;;  %v255_v48 = vsel %vm247_vm14, 1.0, %v29108_v1 }
 0x10d   :  { %1473 = vmatprep.mubr.f32.mxu1 %v29108_v1  ;;  %v375_v6 = vadd.f32 %v367_v9, %v318_v52 }
 0x10e   :  { %v401_v4 = vpop.permute.xlu1 %400  ;;  %v293_v19 = vpop.permute.xlu0 %292  ;;  %v576_v20 = vsub.f32 %v25142_v2, %v29103_v16  ;;  %v25213_v52 = vand.u32 4294901760, %v1488_v32 }
 0x10f   :  { %vm415_vm15 = vcmp.eq.s32.totalorder %v401_v4, %v24893_v56  ;;  %vm303_vm1 = vcmp.eq.s32.totalorder %v293_v19, %v24893_v56  ;;  %v205_v4 = vadd.f32 %v197_v7, %v140_v0  ;;  %v206_v19 = vadd.f32 %v198_v43, %v141_v5 }
 0x110   :  { %v423_v29 = vsel %vm415_vm15, 1.0, %v29108_v1  ;;  %v577_v16 = vand.u32 4294901760, %v576_v20  ;;  %v311_v28 = vsel %vm303_vm1, 1.0, %v29108_v1  ;;  %v25207_v20 = vsel %vm1310_vm2, %v1296_v17, 0  ;;  %1479 = vmatmul.mubr.f32.gmra.mrb[4].mxu1 %v25189_v57  ;;  %29185 = vst [vmem:[#allocation19_spill] sm:$0xff] %v25213_v52 }
 0x111   :  { %v431_v39 = vadd.f32 %v423_v29, %v374_v58  ;;  %v1297_v29 = vld [vmem:[%s29181_s23 + $0x8] sm:$0xff]  ;;  %v262_v53 = vadd.f32 %v254_v50, %v205_v4  ;;  %1484 = vmatprep.mubr.f32.mxu1 %v29108_v1  ;;  %v25227_v17 = vand.u32 4294901760, %v25207_v20  ;;  %v1298_v50 = vld [vmem:[%s29181_s23 + $0x10] sm:$0xff] }
 0x112   :  { %v404_v12 = vpop.permute.xlu1 %403  ;;  %20865 = vmatmul.mubr.f32.gmra.mrb[2].mxu0 %v577_v16  ;;  %v296_v61 = vpop.permute.xlu0 %295  ;;  %v25230_v4 = vsel %vm1310_vm2, %v1297_v29, 0  ;;  %v25253_v29 = vld [vmem:[%s29084_s3 + $0x18] sm:$0xff] }
 0x113   :  { %v456_v7 = vsel %vm442_vm11, %v431_v39, 0  ;;  %vm416_vm3 = vcmp.eq.s32.totalorder %v404_v12, %v24893_v56  ;;  %vm304_vm4 = vcmp.eq.s32.totalorder %v296_v61, %v24893_v56  ;;  %v263_v39 = vadd.f32 %v255_v48, %v206_v19 }
 0x114   :  { %v25218_v0 = vand.u32 4294901760, %v456_v7  ;;  %v424_v27 = vsel %vm416_vm3, 1.0, %v29108_v1  ;;  %v312_v43 = vsel %vm304_vm4, 1.0, %v29108_v1  ;;  %v319_v58 = vadd.f32 %v311_v28, %v262_v53  ;;  %1490 = vmatmul.mubr.f32.gmra.mrb[6].mxu1 %v25213_v52 }
 0x115   :  { %v432_v5 = vadd.f32 %v424_v27, %v375_v6  ;;  %v320_v48 = vadd.f32 %v312_v43, %v263_v39  ;;  %1570 = vmatprep.mubr.f32.mxu1 %v29108_v1  ;;  %v25256_v53 = vand.u32 4294901760, %v25230_v4  ;;  %v25259_v27 = vsel %vm1310_vm2, %v1298_v50, 0  ;;  %v1299_v50 = vld [vmem:[%s29181_s23 + $0x18] sm:$0xff] }
 0x116   :  { %v25224_v16 = vsub.f32 %v456_v7, %v25218_v0  ;;  %v353_v9 = vpop.permute.xlu1 %352  ;;  %v350_v32 = vpop.permute.xlu0 %349  ;;  %v25248_v7 = vld [vmem:[%s29084_s3 + $0x8] sm:$0xff] }
 0x117   :  { %v459_v12 = vsel %vm442_vm11, %v432_v5, 0  ;;  %vm361_vm5 = vcmp.eq.s32.totalorder %v353_v9, %v24893_v56  ;;  %vm360_vm6 = vcmp.eq.s32.totalorder %v350_v32, %v24893_v56  ;;  %v29111_v43 = vand.u32 4294901760, %v25248_v7 }
 0x118   :  { %v25239_v6 = vand.u32 4294901760, %v459_v12  ;;  %v369_v28 = vsel %vm361_vm5, 1.0, %v29108_v1  ;;  %v368_v19 = vsel %vm360_vm6, 1.0, %v29108_v1  ;;  %v29112_v61 = vand.u32 4294901760, %v25224_v16  ;;  %1572 = vmatmul.mubr.f32.vlgmr.msra.gmra.mrb[8].mxu1 %v25227_v17 }
 0x119   :  { %v377_v5 = vadd.f32 %v369_v28, %v320_v48  ;;  %v376_v9 = vadd.f32 %v368_v19, %v319_v58  ;;  %v25280_v58 = vld [vmem:[%s29084_s3] sm:$0xff]  ;;  %v29187_v48 = vmov 0.0   ;;  %1632 = vmatpush1.msra.mxu1 %v25069_v15 }
 0x11a   :  { %v25263_v39 = vsub.f32 %v459_v12, %v25239_v6  ;;  %v410_v32 = vpop.permute.xlu1 %409  ;;  %v407_v1 = vpop.permute.xlu0 %406  ;;  %v586_v52 = vsub.f32 %v25224_v16, %v29112_v61  ;;  %v25275_v12 = vsub.f32 %v25248_v7, %v29111_v43  ;;  %1577 = vmatprep.mubr.f32.mxu1 %v29187_v48  ;;  %1761 = vmatprep.subr.mxu1 %v25035_v60  ;;  %v29118_v57 = vand.u32 4294901760, %v25280_v58 }
 0x11b   :  { %vm418_vm7 = vcmp.eq.s32.totalorder %v410_v32, %v24893_v56  ;;  %vm417_vm8 = vcmp.eq.s32.totalorder %v407_v1, %v24893_v56  ;;  %v25290_v56 = vld [vmem:[%s29084_s3 + $0x10] sm:$0xff] }
 0x11c   :  { %29186 = vst [vmem:[#allocation20_spill] sm:$0xff] %v25275_v12  ;;  %v426_v28 = vsel %vm418_vm7, 1.0, %v29187_v48  ;;  %v425_v19 = vsel %vm417_vm8, 1.0, %v29187_v48  ;;  %v587_v32 = vand.u32 4294901760, %v586_v52  ;;  %v29188_v52 = vand.u32 4294901760, %v25253_v29  ;;  %1579 = vmatmul.mubr.f32.gmra.mrb[10].mxu1 %v25256_v53 }
 0x11d   :  { %v434_v43 = vadd.f32 %v426_v28, %v377_v5  ;;  %v433_v61 = vadd.f32 %v425_v19, %v376_v9  ;;  %v29190_v47 = vand.u32 4294901760, %v25263_v39  ;;  %v25306_v5 = vand.u32 4294901760, %v25259_v27  ;;  %1584 = vmatprep.mubr.f32.mxu1 %v29187_v48 }
 0x11e   :  { %v25299_v1 = vsub.f32 %v25253_v29, %v29188_v52  ;;  %20867 = vmatprep.mubr.f32.mxu0 %v587_v32  ;;  %v29120_v19 = vand.u32 4294901760, %v25290_v56  ;;  %v25315_v52 = vsub.f32 %v25280_v58, %v29118_v57 }
 0x11f   :  { %v596_v10 = vsub.f32 %v25263_v39, %v29190_v47  ;;  %v465_v9 = vsel %vm442_vm11, %v434_v43, 0  ;;  %v462_v28 = vsel %vm442_vm11, %v433_v61, 0  ;;  %v1321_v43 = vsel %vm1310_vm2, %v1299_v50, 0 }
 0x120   :  { %29189 = vst [vmem:[#allocation21_spill] sm:$0xff] %v25299_v1  ;;  %29191 = vst [vmem:[#allocation22_spill] sm:$0xff] %v25315_v52  ;;  %v25317_v32 = vand.u32 4294901760, %v465_v9  ;;  %v25319_v1 = vand.u32 4294901760, %v462_v28  ;;  %v25326_v61 = vsub.f32 %v25290_v56, %v29120_v19  ;;  %1586 = vmatmul.mubr.f32.gmra.mrb[12].mxu1 %v25306_v5  ;;  %v25335_v52 = vand.u32 4294901760, %v1321_v43 }
 0x121   :  { %v597_v47 = vand.u32 4294901760, %v596_v10  ;;  %1591 = vmatprep.mubr.f32.mxu1 %v29187_v48  ;;  %vm2149_vm11 = vcmask 130048   ;;  %vm5453_vm2 = vcmask 261120  }
 0x122   :  { %v25329_v12 = vsub.f32 %v465_v9, %v25317_v32  ;;  %v25332_v57 = vsub.f32 %v462_v28, %v25319_v1 }
 0x123   :  { %20868 = vmatmul.mubr.f32.gmra.mrb[4].mxu0 %v597_v47 }
 0x124   :  { %v605_v10 = vand.u32 4294901760, %v25332_v57  ;;  %v615_v50 = vand.u32 4294901760, %v25329_v12  ;;  %1593 = vmatmul.mubr.f32.gmra.mrb[14].mxu1 %v25335_v52 }
 0x125   :  { %1598 = vmatprep.mubr.f32.mxu1 %v29187_v48 }
 0x126   :  { %v606_v19 = vsub.f32 %v25332_v57, %v605_v10  ;;  %v616_v9 = vsub.f32 %v25329_v12, %v615_v50 }
 0x128   :  { %v607_v28 = vand.u32 4294901760, %v606_v19  ;;  %v617_v47 = vand.u32 4294901760, %v616_v9  ;;  %1600 = vmatmul.mubr.f32.gmra.mrb[0].mxu1 %v25063_v14 }
 0x129   :  { %1605 = vmatprep.mubr.f32.mxu1 %v29187_v48 }
 0x12a   :  { %20870 = vmatprep.mubr.f32.mxu0 %v607_v28 }
 0x12b   :  { %20871 = vmatmul.mubr.f32.gmra.mrb[6].mxu0 %v617_v47 }
 0x12c   :  { %20887 = vmatprep.mubr.f32.mxu0 %v24934_v25  ;;  %1607 = vmatmul.mubr.f32.gmra.mrb[2].mxu1 %v25078_v22 }
 0x12d   :  { %1612 = vmatprep.mubr.f32.mxu1 %v29187_v48 }
 0x12f   :  { %20888 = vmatmul.mubr.f32.vlgmr.msra.gmra.mrb[0].mxu0 %v24957_v59 }
 0x130   :  { %21210 = vmatpush3.bf16.msra.mxu0 %v24872_v33  ;;  %20890 = vmatprep.mubr.f32.mxu0 %v25059_v13  ;;  %v25367_v33 = vsub.f32 %v25207_v20, %v25227_v17  ;;  %v25390_v20 = vsub.f32 %v25259_v27, %v25306_v5  ;;  %v29195_v27 = vand.u32 4294901760, %v25073_v18 }
 0x131   :  { %21212 = vmatprep.subr.bf16.mxu0 %v24874_v34  ;;  %1614 = vmatmul.mubr.f32.gmra.mrb[4].mxu1 %v25080_v26 }
 0x132   :  { %1619 = vmatprep.mubr.f32.mxu1 %v29187_v48 }
 0x133   :  { %20891 = vmatmul.mubr.f32.gmra.mrb[2].mxu0 %v25128_v11 }
 0x134   :  { %21214 = vmatpush3.bf16.msra.mxu0 %v24874_v34  ;;  %20893 = vmatprep.mubr.f32.mxu0 %v25218_v0  ;;  %v25377_v34 = vsub.f32 %v25230_v4, %v25256_v53  ;;  %v29194_v4 = vand.u32 4294901760, %v24967_v62 }
 0x135   :  { %21216 = vmatprep.subr.bf16.mxu0 %v24876_v35  ;;  %1621 = vmatmul.mubr.f32.gmra.mrb[6].mxu1 %v25101_v42 }
 0x136   :  { %1695 = vmatprep.mubr.f32.mxu1 %v29187_v48 }
 0x137   :  { %20894 = vmatmul.mubr.f32.gmra.mrb[4].mxu0 %v25239_v6 }
 0x138   :  { %21218 = vmatpush3.bf16.msra.mxu0 %v24876_v35  ;;  %20896 = vmatprep.mubr.f32.mxu0 %v25319_v1  ;;  %v29192_v35 = vand.u32 4294901760, %v25053_v8  ;;  %v29193_v8 = vand.u32 4294901760, %v24937_v31 }
 0x139   :  { %20911 = vmatprep.subr.mxu0 %v24931_v23  ;;  %1698 = vmatmul.mubr.f32.vlgmr.msra.gmra.mrb[8].mxu1 %v25367_v33 }
 0x13a   :  { %1763 = vmatpush1.msra.mxu1 %v25037_v45  ;;  %1703 = vmatprep.mubr.f32.mxu1 %v29187_v48 }
 0x13b   :  { %20897 = vmatmul.mubr.f32.gmra.mrb[6].mxu0 %v25317_v32  ;;  %1902 = vmatprep.subr.mxu1 %v29192_v35 }
 0x13c   :  { %20912 = vmatpush3.msra.mxu0 %v24931_v23  ;;  %20913 = vmatprep.mubr.f32.mxu0 %v24937_v31  ;;  %v25399_v23 = vsub.f32 %v1321_v43, %v25335_v52  ;;  %v29196_v31 = vand.u32 4294901760, %v25142_v2 }
 0x13d   :  { %21220 = vmatprep.subr.bf16.mxu0 %v24720_v30  ;;  %1706 = vmatmul.mubr.f32.gmra.mrb[10].mxu1 %v25377_v34 }
 0x13e   :  { %1711 = vmatprep.mubr.f32.mxu1 %v29187_v48 }
 0x13f   :  { %20914 = vmatmul.mubr.f32.vlgmr.msra.gmra.mrb[0].mxu0 %v24967_v62  ;;  %v29197_v62 = vand.u32 4294901760, %v25224_v16 }
 0x140   :  { %21222 = vmatpush3.bf16.msra.mxu0 %v24720_v30  ;;  %20916 = vmatprep.mubr.f32.mxu0 %v25073_v18  ;;  %v25438_v18 = vand.u32 4294901760, %v25367_v33 }
 0x141   :  { %21224 = vmatprep.subr.bf16.mxu0 %v24746_v37  ;;  %1714 = vmatmul.mubr.f32.gmra.mrb[12].mxu1 %v25390_v20 }
 0x142   :  { %1719 = vmatprep.mubr.f32.mxu1 %v29187_v48 }
 0x143   :  { %20917 = vmatmul.mubr.f32.gmra.mrb[2].mxu0 %v25142_v2  ;;  %v25461_v2 = vand.u32 4294901760, %v25390_v20 }
 0x144   :  { %21226 = vmatpush3.bf16.msra.mxu0 %v24746_v37  ;;  %20919 = vmatprep.mubr.f32.mxu0 %v25224_v16 }
 0x145   :  { %21228 = vmatprep.subr.bf16.mxu0 %v24772_v44  ;;  %1722 = vmatmul.mubr.f32.gmra.mrb[14].mxu1 %v25399_v23 }
 0x146   :  { %1727 = vmatprep.mubr.f32.mxu1 %v29187_v48 }
 0x147   :  { %20920 = vmatmul.mubr.f32.gmra.mrb[4].mxu0 %v25263_v39 }
 0x148   :  { %21230 = vmatpush3.bf16.msra.mxu0 %v24772_v44  ;;  %20922 = vmatprep.mubr.f32.mxu0 %v25332_v57 }
 0x149   :  { %20937 = vmatprep.subr.mxu0 %v24789_v49  ;;  %1730 = vmatmul.mubr.f32.gmra.mrb[0].mxu1 %v25076_v21 }
 0x14a   :  { %1735 = vmatprep.mubr.f32.mxu1 %v29187_v48 }
 0x14b   :  { %20923 = vmatmul.mubr.f32.gmra.mrb[6].mxu0 %v25329_v12 }
 0x14c   :  { %20938 = vmatpush3.msra.mxu0 %v24789_v49  ;;  %20939 = vmatprep.mubr.f32.mxu0 %v29193_v8 }
 0x14d   :  { %21232 = vmatprep.subr.bf16.mxu0 %v24882_v46  ;;  %1738 = vmatmul.mubr.f32.gmra.mrb[2].mxu1 %v25109_v54 }
 0x14e   :  { %1743 = vmatprep.mubr.f32.mxu1 %v29187_v48 }
 0x14f   :  { %20940 = vmatmul.mubr.f32.vlgmr.msra.gmra.mrb[0].mxu0 %v29194_v4 }
 0x150   :  { %21234 = vmatpush3.bf16.msra.mxu0 %v24882_v46  ;;  %20942 = vmatprep.mubr.f32.mxu0 %v29195_v27  ;;  %v29198_v46 = vand.u32 4294901760, %v25263_v39 }
 0x151   :  { %21236 = vmatprep.subr.bf16.mxu0 %v24886_v51  ;;  %1746 = vmatmul.mubr.f32.gmra.mrb[4].mxu1 %v25112_v63 }
 0x152   :  { %1751 = vmatprep.mubr.f32.mxu1 %v29187_v48 }
 0x153   :  { %20943 = vmatmul.mubr.f32.gmra.mrb[2].mxu0 %v29196_v31 }
 0x154   :  { %21238 = vmatpush3.bf16.msra.mxu0 %v24886_v51  ;;  %20945 = vmatprep.mubr.f32.mxu0 %v29197_v62  ;;  %v25449_v51 = vand.u32 4294901760, %v25377_v34 }
 0x155   :  { %21240 = vmatprep.subr.bf16.mxu0 %v24890_v55  ;;  %1754 = vmatmul.mubr.f32.gmra.mrb[6].mxu1 %v25149_v41 }
 0x156   :  { %1826 = vmatprep.mubr.f32.mxu1 %v29187_v48 }
 0x157   :  { %20946 = vmatmul.mubr.f32.gmra.mrb[4].mxu0 %v29198_v46 }
 0x158   :  { %21242 = vmatpush3.bf16.msra.mxu0 %v24890_v55  ;;  %20948 = vmatprep.mubr.f32.mxu0 %v605_v10  ;;  %v29199_v55 = vand.u32 4294901760, %v25069_v15 }
 0x159   :  { %20963 = vmatprep.subr.mxu0 %v24941_v38  ;;  %1830 = vmatmul.mubr.f32.vlgmr.msra.gmra.mrb[8].mxu1 %v25438_v18 }
 0x15a   :  { %1906 = vmatpush1.msra.mxu1 %v29199_v55  ;;  %1835 = vmatprep.mubr.f32.mxu1 %v29187_v48 }
 0x15b   :  { %20949 = vmatmul.mubr.f32.gmra.mrb[6].mxu0 %v615_v50  ;;  %2027 = vmatprep.subr.mxu1 %v25035_v60 }
 0x15c   :  { %20964 = vmatpush3.msra.mxu0 %v24941_v38  ;;  %20965 = vmatprep.mubr.f32.mxu0 %v24934_v25  ;;  %v25470_v38 = vand.u32 4294901760, %v25399_v23 }
 0x15d   :  { %21244 = vmatprep.subr.bf16.mxu0 %v24720_v30  ;;  %1839 = vmatmul.mubr.f32.gmra.mrb[10].mxu1 %v25449_v51 }
 0x15e   :  { %1844 = vmatprep.mubr.f32.mxu1 %v29187_v48 }
 0x15f   :  { %20966 = vmatmul.mubr.f32.vlgmr.msra.gmra.mrb[0].mxu0 %v24957_v59 }
 0x160   :  { %21246 = vmatpush3.bf16.msra.mxu0 %v24720_v30  ;;  %20968 = vmatprep.mubr.f32.mxu0 %v25059_v13  ;;  %v29200_v30 = vand.u32 4294901760, %v25248_v7 }
 0x161   :  { %21248 = vmatprep.subr.bf16.mxu0 %v24746_v37  ;;  %1848 = vmatmul.mubr.f32.gmra.mrb[12].mxu1 %v25461_v2 }
 0x162   :  { %1853 = vmatprep.mubr.f32.mxu1 %v29187_v48 }
 0x163   :  { %20969 = vmatmul.mubr.f32.gmra.mrb[2].mxu0 %v25128_v11 }
 0x164   :  { %21250 = vmatpush3.bf16.msra.mxu0 %v24746_v37  ;;  %20971 = vmatprep.mubr.f32.mxu0 %v25218_v0  ;;  %v29201_v37 = vand.u32 4294901760, %v25253_v29 }
 0x165   :  { %21252 = vmatprep.subr.bf16.mxu0 %v24772_v44  ;;  %1857 = vmatmul.mubr.f32.gmra.mrb[14].mxu1 %v25470_v38 }
 0x166   :  { %1862 = vmatprep.mubr.f32.mxu1 %v29187_v48 }
 0x167   :  { %20972 = vmatmul.mubr.f32.gmra.mrb[4].mxu0 %v25239_v6 }
 0x168   :  { %21254 = vmatpush3.bf16.msra.mxu0 %v24772_v44  ;;  %20974 = vmatprep.mubr.f32.mxu0 %v25319_v1  ;;  %v25505_v44 = vpack.c.bf16 %v29201_v37, %v29200_v30 }
 0x169   :  { %20989 = vmatprep.subr.mxu0 %v24789_v49  ;;  %1866 = vmatmul.mubr.f32.gmra.mrb[0].mxu1 %v25096_v40 }
 0x16a   :  { %1871 = vmatprep.mubr.f32.mxu1 %v29187_v48 }
 0x16b   :  { %20975 = vmatmul.mubr.f32.gmra.mrb[6].mxu0 %v25317_v32 }
 0x16c   :  { %20990 = vmatpush3.msra.mxu0 %v24789_v49  ;;  %20991 = vmatprep.mubr.f32.mxu0 %v24934_v25  ;;  %v29202_v49 = vand.u32 4294901760, %v25280_v58  ;;  %v29203_v25 = vand.u32 4294901760, %v25290_v56 }
 0x16d   :  { %1342 = vmatprep.subr.mxu0 %v25035_v60  ;;  %1875 = vmatmul.mubr.f32.gmra.mrb[2].mxu1 %v25139_v24  ;;  %v29204_v60 = vld [vmem:[#allocation20_spill] sm:$0xff] }
 0x16e   :  { %1880 = vmatprep.mubr.f32.mxu1 %v29187_v48 }
 0x16f   :  { %20992 = vmatmul.mubr.f32.vlgmr.msra.gmra.mrb[0].mxu0 %v24957_v59  ;;  %v25531_v59 = vpack.c.bf16 %v29203_v25, %v29202_v49 }
 0x170   :  { %20994 = vmatprep.mubr.f32.mxu0 %v25059_v13  ;;  %1344 = vmatpush1.msra.mxu0 %v25037_v45  ;;  %v29205_v13 = vld [vmem:[#allocation21_spill] sm:$0xff] }
 0x171   :  { %1884 = vmatmul.mubr.f32.gmra.mrb[4].mxu1 %v25146_v36  ;;  %v29123_v15 = vand.u32 4294901760, %v29205_v13 }
 0x172   :  { %1889 = vmatprep.mubr.f32.mxu1 %v29187_v48 }
 0x173   :  { %20995 = vmatmul.mubr.f32.gmra.mrb[2].mxu0 %v25128_v11  ;;  %v29206_v11 = vld [vmem:[#allocation22_spill] sm:$0xff] }
 0x174   :  { %20997 = vmatprep.mubr.f32.mxu0 %v25218_v0  ;;  %v29122_v57 = vand.u32 4294901760, %v29206_v11  ;;  %v29121_v0 = vand.u32 4294901760, %v25326_v61 }
 0x175   :  { %1893 = vmatmul.mubr.f32.gmra.mrb[6].mxu1 %v25178_v3 }
 0x176   :  { %1969 = vmatprep.mubr.f32.mxu1 %v29187_v48  ;;  %v2340_v7 = vsub.f32 %v29206_v11, %v29122_v57  ;;  %v2352_v29 = vsub.f32 %v25326_v61, %v29121_v0 }
 0x177   :  { %20998 = vmatmul.mubr.f32.gmra.mrb[4].mxu0 %v25239_v6  ;;  %v2346_v6 = vsub.f32 %v29205_v13, %v29123_v15 }
 0x178   :  { %21000 = vmatprep.mubr.f32.mxu0 %v25319_v1  ;;  %v2341_v58 = vand.u32 4294901760, %v2340_v7  ;;  %v2353_v1 = vand.u32 4294901760, %v2352_v29 }
 0x179   :  { %1971 = vmatmul.mubr.f32.vlgmr.msra.gmra.mrb[8].mxu1 %v25227_v17  ;;  %v2347_v12 = vand.u32 4294901760, %v2346_v6 }
 0x17a   :  { %2029 = vmatpush1.msra.mxu1 %v25037_v45  ;;  %1976 = vmatprep.mubr.f32.mxu1 %v29187_v48  ;;  %v29124_v45 = vand.u32 4294901760, %v29204_v60  ;;  %v21261_v19 = vpack.c.bf16 %v2353_v1, %v2341_v58 }
 0x17b   :  { %21001 = vmatmul.mubr.f32.gmra.mrb[6].mxu0 %v25317_v32  ;;  %21256 = vmatprep.subr.bf16.mxu1 %v25505_v44  ;;  %v21263_v32 = vpack.c.bf16 %v29205_v13, %v29204_v60 }
 0x17c   :  { %1407 = vmatprep.mubr.f32.mxu0 %v29187_v48  ;;  %v2334_v16 = vsub.f32 %v29204_v60, %v29124_v45 }
 0x17d   :  { %1978 = vmatmul.mubr.f32.gmra.mrb[10].mxu1 %v25256_v53 }
 0x17e   :  { %1983 = vmatprep.mubr.f32.mxu1 %v29187_v48  ;;  %v2335_v39 = vand.u32 4294901760, %v2334_v16 }
 0x180   :  { %v21259_v56 = vpack.c.bf16 %v2347_v12, %v2335_v39 }
 0x181   :  { %1985 = vmatmul.mubr.f32.gmra.mrb[12].mxu1 %v25306_v5 }
 0x182   :  { %1990 = vmatprep.mubr.f32.mxu1 %v29187_v48 }
 0x185   :  { %1992 = vmatmul.mubr.f32.gmra.mrb[14].mxu1 %v25335_v52 }
 0x186   :  { %1997 = vmatprep.mubr.f32.mxu1 %v29187_v48 }
 0x189   :  { %1999 = vmatmul.mubr.f32.gmra.mrb[0].mxu1 %v25063_v14 }
 0x18a   :  { %2004 = vmatprep.mubr.f32.mxu1 %v29187_v48 }
 0x18d   :  { %2006 = vmatmul.mubr.f32.gmra.mrb[2].mxu1 %v25078_v22 }
 0x18e   :  { %2011 = vmatprep.mubr.f32.mxu1 %v29187_v48 }
 0x191   :  { %2013 = vmatmul.mubr.f32.gmra.mrb[4].mxu1 %v25080_v26 }
 0x192   :  { %2018 = vmatprep.mubr.f32.mxu1 %v29187_v48 }
 0x195   :  { %2020 = vmatmul.mubr.f32.gmra.mrb[6].mxu1 %v25101_v42 }
 0x196   :  { %2092 = vmatprep.mubr.f32.mxu1 %v29187_v48 }
 0x199   :  { %2094 = vmatmul.mubr.f32.vlgmr.msra.gmra.mrb[8].mxu1 %v25227_v17 }
 0x19a   :  { %21258 = vmatpush1.bf16.msra.mxu1 %v25531_v59  ;;  %2099 = vmatprep.mubr.f32.mxu1 %v29187_v48 }
 0x19b   :  { %21260 = vmatprep.subr.bf16.mxu1 %v21259_v56 }
 0x19d   :  { %2101 = vmatmul.mubr.f32.gmra.mrb[10].mxu1 %v25256_v53 }
 0x19e   :  { %2106 = vmatprep.mubr.f32.mxu1 %v29187_v48 }
 0x1a1   :  { %2108 = vmatmul.mubr.f32.gmra.mrb[12].mxu1 %v25306_v5 }
 0x1a2   :  { %2113 = vmatprep.mubr.f32.mxu1 %v29187_v48 }
 0x1a5   :  { %2115 = vmatmul.mubr.f32.gmra.mrb[14].mxu1 %v25335_v52 }
 0x1a6   :  { %2120 = vmatprep.mubr.f32.mxu1 %v29187_v48 }
 0x1a9   :  { %2122 = vmatmul.mubr.f32.gmra.mrb[0].mxu1 %v25063_v14 }
 0x1aa   :  { %2127 = vmatprep.mubr.f32.mxu1 %v29187_v48 }
 0x1ad   :  { %2129 = vmatmul.mubr.f32.gmra.mrb[2].mxu1 %v25078_v22 }
 0x1ae   :  { %2134 = vmatprep.mubr.f32.mxu1 %v29187_v48 }
 0x1b1   :  { %2136 = vmatmul.mubr.f32.gmra.mrb[4].mxu1 %v25080_v26 }
 0x1b2   :  { %2141 = vmatprep.mubr.f32.mxu1 %v29187_v48 }
 0x1b5   :  { %2143 = vmatmul.mubr.f32.gmra.mrb[6].mxu1 %v25101_v42 }
 0x1b6   :  { %2242 = vmatprep.mubr.f32.mxu1 %v29187_v48 }
 0x242   :  { %v20993_v10 = vpop.f32.mrb[0].mxu0 }
 0x243   :  { %v2154_v50 = vsel %vm2149_vm11, %v20993_v10, 0  ;;  %v1250_v9 = vpop.f32.mrb[1].mxu0 }
 0x244   :  { %v25571_v28 = vand.u32 4294901760, %v2154_v50  ;;  %v2151_v47 = vsel %vm2149_vm11, %v1250_v9, 0 }
 0x245   :  { %v25574_v35 = vand.u32 4294901760, %v2151_v47 }
 0x246   :  { %v25577_v8 = vsub.f32 %v2154_v50, %v25571_v28  ;;  %v20996_v4 = vpop.f32.mrb[2].mxu0 }
 0x247   :  { %v25580_v27 = vsub.f32 %v2151_v47, %v25574_v35  ;;  %v2160_v31 = vsel %vm2149_vm11, %v20996_v4, 0  ;;  %v1262_v62 = vpop.f32.mrb[3].mxu0 }
 0x248   :  { %v25583_v46 = vand.u32 4294901760, %v2160_v31  ;;  %v2157_v55 = vsel %vm2149_vm11, %v1262_v62, 0  ;;  %v25587_v30 = vand.u32 4294901760, %v25577_v8 }
 0x249   :  { %v25590_v37 = vand.u32 4294901760, %v25580_v27  ;;  %v25592_v49 = vand.u32 4294901760, %v2157_v55 }
 0x24a   :  { %v20999_v25 = vpop.f32.mrb[4].mxu0  ;;  %v25600_v29 = vsub.f32 %v2160_v31, %v25583_v46  ;;  %v2257_v12 = vsub.f32 %v25577_v8, %v25587_v30 }
 0x24b   :  { %v2246_v16 = vsub.f32 %v25580_v27, %v25590_v37  ;;  %v25597_v6 = vsub.f32 %v2157_v55, %v25592_v49  ;;  %v1274_v7 = vpop.f32.mrb[5].mxu0  ;;  %v2166_v1 = vsel %vm2149_vm11, %v20999_v25, 0 }
 0x24c   :  { %v2163_v39 = vsel %vm2149_vm11, %v1274_v7, 0  ;;  %v25614_v47 = vand.u32 4294901760, %v2166_v1  ;;  %v25618_v4 = vand.u32 4294901760, %v25600_v29  ;;  %v25623_v62 = vand.u32 4294901760, %v2257_v12 }
 0x24d   :  { %v25605_v58 = vand.u32 4294901760, %v2246_v16  ;;  %v25608_v56 = vand.u32 4294901760, %v2163_v39  ;;  %v25611_v10 = vand.u32 4294901760, %v25597_v6 }
 0x24e   :  { %v21002_v50 = vpop.f32.mrb[6].mxu0  ;;  %v2279_v16 = vsub.f32 %v25600_v29, %v25618_v4 }
 0x24f   :  { %v1286_v9 = vpop.f32.mrb[7].mxu0  ;;  %2248 = vmatmul.mubr.f32.vlgmr.msra.gmra.mrb[8].mxu1 %v25605_v58  ;;  %v25621_v31 = vsub.f32 %v2163_v39, %v25608_v56  ;;  %v2268_v55 = vsub.f32 %v25597_v6, %v25611_v10  ;;  %v2172_v7 = vsel %vm2149_vm11, %v21002_v50, 0 }
 0x250   :  { %21262 = vmatpush1.bf16.msra.mxu1 %v21261_v19  ;;  %2253 = vmatprep.mubr.f32.mxu1 %v29187_v48  ;;  %v2169_v25 = vsel %vm2149_vm11, %v1286_v9, 0  ;;  %v25630_v19 = vsub.f32 %v2166_v1, %v25614_v47  ;;  %v25644_v9 = vand.u32 4294901760, %v2172_v7  ;;  %v25650_v0 = vand.u32 4294901760, %v2279_v16 }
 0x251   :  { %21264 = vmatprep.subr.bf16.mxu1 %v21263_v32  ;;  %v25636_v39 = vand.u32 4294901760, %v2169_v25  ;;  %v25638_v12 = vand.u32 4294901760, %v2268_v55  ;;  %v25641_v32 = vand.u32 4294901760, %v25621_v31 }
 0x252   :  { %29207 = vst [vmem:[#allocation20_spill] sm:$0xff] %v25650_v0  ;;  %v25655_v55 = vand.u32 4294901760, %v25630_v19  ;;  %v25660_v57 = vsub.f32 %v2172_v7, %v25644_v9 }
 0x253   :  { %2259 = vmatmul.mubr.f32.gmra.mrb[10].mxu1 %v25623_v62  ;;  %v25648_v1 = vsub.f32 %v2169_v25, %v25636_v39  ;;  %v2290_v50 = vsub.f32 %v25621_v31, %v25641_v32 }
 0x254   :  { %2264 = vmatprep.mubr.f32.mxu1 %v29187_v48  ;;  %v2301_v25 = vsub.f32 %v25630_v19, %v25655_v55  ;;  %v25676_v7 = vand.u32 4294901760, %v25660_v57 }
 0x255   :  { %v25662_v15 = vand.u32 4294901760, %v2290_v50  ;;  %v25667_v16 = vand.u32 4294901760, %v25648_v1 }
 0x256   :  { %v25671_v45 = vand.u32 4294901760, %v2301_v25  ;;  %29209 = vst [vmem:[#allocation22_spill] sm:$0xff] %v25676_v7 }
 0x257   :  { %2270 = vmatmul.mubr.f32.gmra.mrb[12].mxu1 %v25638_v12  ;;  %v2312_v43 = vsub.f32 %v25648_v1, %v25667_v16 }
 0x258   :  { %2275 = vmatprep.mubr.f32.mxu1 %v29187_v48  ;;  %29208 = vst [vmem:[#allocation21_spill] sm:$0xff] %v25671_v45 }
 0x259   :  { %v25680_v50 = vand.u32 4294901760, %v2312_v43  ;;  %v29214_v43 = vand.u32 4294901760, %v29205_v13 }
 0x25b   :  { %2281 = vmatmul.mubr.f32.gmra.mrb[14].mxu1 %v25650_v0  ;;  %29210 = vst [vmem:[#allocation23_spill] sm:$0xff] %v25680_v50  ;;  %v2323_v0 = vsub.f32 %v25660_v57, %v25676_v7 }
 0x25c   :  { %2286 = vmatprep.mubr.f32.mxu1 %v29187_v48 }
 0x25d   :  { %v25686_v25 = vand.u32 4294901760, %v2323_v0  ;;  %v29213_v0 = vand.u32 4294901760, %v29204_v60  ;;  %v1422_v60 = vsub.f32 %v25377_v34, %v25449_v51 }
 0x25f   :  { %2292 = vmatmul.mubr.f32.gmra.mrb[0].mxu1 %v25662_v15  ;;  %29211 = vst [vmem:[#allocation24_spill] sm:$0xff] %v25686_v25  ;;  %v25727_v13 = vand.u32 4294901760, %v1422_v60  ;;  %v29215_v60 = vand.u32 4294901760, %v29206_v11 }
 0x260   :  { %2297 = vmatprep.mubr.f32.mxu1 %v29187_v48 }
 0x263   :  { %2303 = vmatmul.mubr.f32.gmra.mrb[2].mxu1 %v25671_v45  ;;  %v29212_v45 = vpack.c.bf16 %v25326_v61, %v29206_v11 }
 0x264   :  { %2308 = vmatprep.mubr.f32.mxu1 %v29187_v48 }
 0x267   :  { %2314 = vmatmul.mubr.f32.gmra.mrb[4].mxu1 %v25680_v50 }
 0x268   :  { %2319 = vmatprep.mubr.f32.mxu1 %v29187_v48 }
 0x26b   :  { %2325 = vmatmul.mubr.f32.gmra.mrb[6].mxu1 %v25686_v25  ;;  %v21271_v25 = vpack.c.bf16 %v29214_v43, %v29213_v0  ;;  %v1444_v0 = vsub.f32 %v25399_v23, %v25470_v38 }
 0x26c   :  { %2415 = vmatprep.mubr.f32.mxu1 %v29187_v48 }
 0x26d   :  { %v25743_v43 = vand.u32 4294901760, %v1444_v0 }
 0x26f   :  { %2417 = vmatmul.mubr.f32.vlgmr.msra.gmra.mrb[8].mxu1 %v25574_v35 }
 0x270   :  { %21266 = vmatpush1.bf16.msra.mxu1 %v29212_v45  ;;  %2422 = vmatprep.mubr.f32.mxu1 %v29187_v48  ;;  %v1411_v45 = vsub.f32 %v25367_v33, %v25438_v18 }
 0x271   :  { %21268 = vmatprep.subr.bf16.mxu1 %v25505_v44 }
 0x272   :  { %v25717_v50 = vand.u32 4294901760, %v1411_v45  ;;  %v1433_v45 = vsub.f32 %v25390_v20, %v25461_v2 }
 0x273   :  { %2424 = vmatmul.mubr.f32.gmra.mrb[10].mxu1 %v25571_v28 }
 0x274   :  { %2429 = vmatprep.mubr.f32.mxu1 %v29187_v48  ;;  %1413 = vmatmul.mubr.f32.vlgmr.msra.gmra.mrb[8].mxu0 %v25717_v50 }
 0x275   :  { %1418 = vmatprep.mubr.f32.mxu0 %v29187_v48 }
 0x277   :  { %2431 = vmatmul.mubr.f32.gmra.mrb[12].mxu1 %v25592_v49 }
 0x278   :  { %2436 = vmatprep.mubr.f32.mxu1 %v29187_v48  ;;  %1424 = vmatmul.mubr.f32.gmra.mrb[10].mxu0 %v25727_v13 }
 0x279   :  { %1429 = vmatprep.mubr.f32.mxu0 %v29187_v48 }
 0x27b   :  { %2438 = vmatmul.mubr.f32.gmra.mrb[14].mxu1 %v25583_v46 }
 0x27c   :  { %2443 = vmatprep.mubr.f32.mxu1 %v29187_v48 }
 0x27f   :  { %2445 = vmatmul.mubr.f32.gmra.mrb[0].mxu1 %v25608_v56 }
 0x280   :  { %2450 = vmatprep.mubr.f32.mxu1 %v29187_v48 }
 0x283   :  { %2452 = vmatmul.mubr.f32.gmra.mrb[2].mxu1 %v25614_v47 }
 0x284   :  { %2457 = vmatprep.mubr.f32.mxu1 %v29187_v48 }
 0x287   :  { %2459 = vmatmul.mubr.f32.gmra.mrb[4].mxu1 %v25636_v39 }
 0x288   :  { %2464 = vmatprep.mubr.f32.mxu1 %v29187_v48 }
 0x28b   :  { %2466 = vmatmul.mubr.f32.gmra.mrb[6].mxu1 %v25644_v9 }
 0x28c   :  { %2544 = vmatprep.mubr.f32.mxu1 %v29187_v48 }
 0x28f   :  { %2547 = vmatmul.mubr.f32.vlgmr.msra.gmra.mrb[8].mxu1 %v25580_v27 }
 0x290   :  { %21270 = vmatpush1.bf16.msra.mxu1 %v25531_v59  ;;  %2552 = vmatprep.mubr.f32.mxu1 %v29187_v48 }
 0x291   :  { %21272 = vmatprep.subr.bf16.mxu1 %v21271_v25  ;;  %v25735_v25 = vand.u32 4294901760, %v1433_v45  ;;  %v29216_v45 = vand.u32 4294901760, %v25326_v61  ;;  %v3057_v61 = vld [vmem:[%s29085_s4 + $0x28] sm:$0x3] }
 0x293   :  { %2555 = vmatmul.mubr.f32.gmra.mrb[10].mxu1 %v25577_v8  ;;  %1435 = vmatmul.mubr.f32.gmra.mrb[12].mxu0 %v25735_v25  ;;  %v21273_v0 = vpack.c.bf16 %v29216_v45, %v29215_v60  ;;  %v3056_v45 = vld [vmem:[%s29085_s4 + $0x20] sm:$0x3] }
 0x294   :  { %2560 = vmatprep.mubr.f32.mxu1 %v29187_v48  ;;  %1440 = vmatprep.mubr.f32.mxu0 %v29187_v48 }
 0x297   :  { %2563 = vmatmul.mubr.f32.gmra.mrb[12].mxu1 %v25597_v6  ;;  %1446 = vmatmul.mubr.f32.gmra.mrb[14].mxu0 %v25743_v43 }
 0x298   :  { %2568 = vmatprep.mubr.f32.mxu1 %v29187_v48  ;;  %10425 = vmatprep.mubr.f32.mxu0 %v29187_v48 }
 0x29b   :  { %2571 = vmatmul.mubr.f32.gmra.mrb[14].mxu1 %v25600_v29 }
 0x29c   :  { %2576 = vmatprep.mubr.f32.mxu1 %v29187_v48 }
 0x29f   :  { %2579 = vmatmul.mubr.f32.gmra.mrb[0].mxu1 %v25621_v31 }
 0x2a0   :  { %2584 = vmatprep.mubr.f32.mxu1 %v29187_v48 }
 0x2a3   :  { %2587 = vmatmul.mubr.f32.gmra.mrb[2].mxu1 %v25630_v19 }
 0x2a4   :  { %2592 = vmatprep.mubr.f32.mxu1 %v29187_v48 }
 0x2a7   :  { %2595 = vmatmul.mubr.f32.gmra.mrb[4].mxu1 %v25648_v1 }
 0x2a8   :  { %2600 = vmatprep.mubr.f32.mxu1 %v29187_v48 }
 0x2ab   :  { %2603 = vmatmul.mubr.f32.gmra.mrb[6].mxu1 %v25660_v57 }
 0x2ac   :  { %2677 = vmatprep.mubr.f32.mxu1 %v29187_v48 }
 0x2af   :  { %2681 = vmatmul.mubr.f32.vlgmr.msra.gmra.mrb[8].mxu1 %v25590_v37 }
 0x2b0   :  { %21274 = vmatpush1.bf16.msra.mxu1 %v21273_v0  ;;  %2686 = vmatprep.mubr.f32.mxu1 %v29187_v48  ;;  %v3059_v0 = vsel %vm467_vm0, %v3056_v45, 0 }
 0x2b1   :  { %21276 = vmatprep.subr.bf16.mxu1 %v25505_v44  ;;  %v3062_v44 = vsel %vm467_vm0, %v3057_v61, 0  ;;  %vm4768_vm0 = vcmask 523264  }
 0x2b2   :  { %v25780_v11 = vand.u32 4294901760, %v3062_v44 }
 0x2b3   :  { %2690 = vmatmul.mubr.f32.gmra.mrb[10].mxu1 %v25587_v30 }
 0x2b4   :  { %2695 = vmatprep.mubr.f32.mxu1 %v29187_v48 }
 0x2b7   :  { %2699 = vmatmul.mubr.f32.gmra.mrb[12].mxu1 %v25611_v10 }
 0x2b8   :  { %2704 = vmatprep.mubr.f32.mxu1 %v29187_v48 }
 0x2bb   :  { %2708 = vmatmul.mubr.f32.gmra.mrb[14].mxu1 %v25618_v4 }
 0x2bc   :  { %2713 = vmatprep.mubr.f32.mxu1 %v29187_v48 }
 0x2bf   :  { %2717 = vmatmul.mubr.f32.gmra.mrb[0].mxu1 %v25641_v32 }
 0x2c0   :  { %2722 = vmatprep.mubr.f32.mxu1 %v29187_v48 }
 0x2c3   :  { %2726 = vmatmul.mubr.f32.gmra.mrb[2].mxu1 %v25655_v55 }
 0x2c4   :  { %2731 = vmatprep.mubr.f32.mxu1 %v29187_v48 }
 0x2c7   :  { %2735 = vmatmul.mubr.f32.gmra.mrb[4].mxu1 %v25667_v16 }
 0x2c8   :  { %2740 = vmatprep.mubr.f32.mxu1 %v29187_v48 }
 0x2cb   :  { %2744 = vmatmul.mubr.f32.gmra.mrb[6].mxu1 %v25676_v7 }
 0x2cc   :  { %2826 = vmatprep.mubr.f32.mxu1 %v29187_v48 }
 0x2cf   :  { %2828 = vmatmul.mubr.f32.vlgmr.msra.gmra.mrb[8].mxu1 %v25574_v35 }
 0x2d0   :  { %21278 = vmatpush1.bf16.msra.mxu1 %v25531_v59  ;;  %2833 = vmatprep.mubr.f32.mxu1 %v29187_v48  ;;  %v25795_v59 = vsub.f32 %v3062_v44, %v25780_v11  ;;  %v25811_v44 = vand.u32 4294901760, %v3059_v0 }
 0x2d1   :  { %3065 = vmatprep.subr.mxu1 %v25780_v11 }
 0x2d2   :  { %v29130_v60 = vand.u32 4294901760, %v25795_v59 }
 0x2d3   :  { %2835 = vmatmul.mubr.f32.gmra.mrb[10].mxu1 %v25571_v28 }
 0x2d4   :  { %2840 = vmatprep.mubr.f32.mxu1 %v29187_v48  ;;  %v3222_v61 = vsub.f32 %v25795_v59, %v29130_v60 }
 0x2d6   :  { %v3223_v7 = vand.u32 4294901760, %v3222_v61 }
 0x2d7   :  { %2842 = vmatmul.mubr.f32.gmra.mrb[12].mxu1 %v25592_v49 }
 0x2d8   :  { %2847 = vmatprep.mubr.f32.mxu1 %v29187_v48 }
 0x2db   :  { %2849 = vmatmul.mubr.f32.gmra.mrb[14].mxu1 %v25583_v46 }
 0x2dc   :  { %2854 = vmatprep.mubr.f32.mxu1 %v29187_v48 }
 0x2df   :  { %2856 = vmatmul.mubr.f32.gmra.mrb[0].mxu1 %v25608_v56 }
 0x2e0   :  { %2861 = vmatprep.mubr.f32.mxu1 %v29187_v48 }
 0x2e3   :  { %2863 = vmatmul.mubr.f32.gmra.mrb[2].mxu1 %v25614_v47 }
 0x2e4   :  { %2868 = vmatprep.mubr.f32.mxu1 %v29187_v48 }
 0x2e7   :  { %2870 = vmatmul.mubr.f32.gmra.mrb[4].mxu1 %v25636_v39 }
 0x2e8   :  { %2875 = vmatprep.mubr.f32.mxu1 %v29187_v48 }
 0x2eb   :  { %2877 = vmatmul.mubr.f32.gmra.mrb[6].mxu1 %v25644_v9 }
 0x2ec   :  { %2951 = vmatprep.mubr.f32.mxu1 %v29187_v48 }
 0x2ef   :  { %2953 = vmatmul.mubr.f32.vlgmr.msra.gmra.mrb[8].mxu1 %v25574_v35 }
 0x2f0   :  { %3067 = vmatpush1.msra.mxu1 %v25811_v44  ;;  %2958 = vmatprep.mubr.f32.mxu1 %v29187_v48 }
 0x2f1   :  { %3224 = vmatprep.subr.mxu1 %v3223_v7  ;;  %v25826_v7 = vsub.f32 %v3059_v0, %v25811_v44  ;;  %v29217_v0 = vld [vmem:[#allocation16_spill] sm:$0xff] }
 0x2f3   :  { %2960 = vmatmul.mubr.f32.gmra.mrb[10].mxu1 %v25571_v28  ;;  %v3227_v45 = vand.u32 4294901760, %v25826_v7 }
 0x2f4   :  { %2965 = vmatprep.mubr.f32.mxu1 %v29187_v48 }
 0x2f5   :  { %v3228_v61 = vsub.f32 %v25826_v7, %v3227_v45 }
 0x2f7   :  { %2967 = vmatmul.mubr.f32.gmra.mrb[12].mxu1 %v25592_v49  ;;  %v3229_v60 = vand.u32 4294901760, %v3228_v61 }
 0x2f8   :  { %2972 = vmatprep.mubr.f32.mxu1 %v29187_v48 }
 0x2fb   :  { %2974 = vmatmul.mubr.f32.gmra.mrb[14].mxu1 %v25583_v46 }
 0x2fc   :  { %2979 = vmatprep.mubr.f32.mxu1 %v29187_v48 }
 0x2ff   :  { %2981 = vmatmul.mubr.f32.gmra.mrb[0].mxu1 %v25608_v56 }
 0x300   :  { %2986 = vmatprep.mubr.f32.mxu1 %v29187_v48 }
 0x303   :  { %2988 = vmatmul.mubr.f32.gmra.mrb[2].mxu1 %v25614_v47 }
 0x304   :  { %2993 = vmatprep.mubr.f32.mxu1 %v29187_v48 }
 0x307   :  { %2995 = vmatmul.mubr.f32.gmra.mrb[4].mxu1 %v25636_v39 }
 0x308   :  { %3000 = vmatprep.mubr.f32.mxu1 %v29187_v48 }
 0x30b   :  { %3002 = vmatmul.mubr.f32.gmra.mrb[6].mxu1 %v25644_v9 }
 0x30c   :  { %3130 = vmatprep.mubr.f32.mxu1 %v29187_v48 }
 0x313   :  { %3136 = vmatmul.mubr.f32.vlgmr.msra.gmra.mrb[6].mxu1 %v25717_v50  ;;  %v29218_v50 = vld [vmem:[#allocation17_spill] sm:$0xff] }
 0x314   :  { %3230 = vmatpush1.msra.mxu1 %v3229_v60  ;;  %3141 = vmatprep.mubr.f32.mxu1 %v29187_v48  ;;  %v29219_v60 = vld [vmem:[#allocation18_spill] sm:$0xff] }
 0x315   :  { %3352 = vmatprep.subr.mxu1 %v25795_v59 }
 0x317   :  { %3147 = vmatmul.mubr.f32.gmra.mrb[4].mxu1 %v25727_v13  ;;  %v29220_v13 = vld [vmem:[#allocation19_spill] sm:$0xff] }
 0x318   :  { %3152 = vmatprep.mubr.f32.mxu1 %v29187_v48 }
 0x31b   :  { %3158 = vmatmul.mubr.f32.gmra.mrb[2].mxu1 %v25735_v25  ;;  %v29221_v25 = vand.u32 4294901760, %v25795_v59 }
 0x31c   :  { %3163 = vmatprep.mubr.f32.mxu1 %v29187_v48 }
 0x31f   :  { %3169 = vmatmul.mubr.f32.gmra.mrb[0].mxu1 %v25743_v43 }
 0x320   :  { %3174 = vmatprep.mubr.f32.mxu1 %v29187_v48 }
 0x323   :  { %3180 = vmatmul.mubr.f32.gmra.mrb[14].mxu1 %v29217_v0  ;;  %v29227_v0 = vlaneseq }
 0x324   :  { %3185 = vmatprep.mubr.f32.mxu1 %v29187_v48 }
 0x327   :  { %3191 = vmatmul.mubr.f32.gmra.mrb[12].mxu1 %v29218_v50  ;;  %v26103_v50 = vshrl.u32 %v29227_v0, 7 }
 0x328   :  { %3196 = vmatprep.mubr.f32.mxu1 %v29187_v48 }
 0x32b   :  { %3202 = vmatmul.mubr.f32.gmra.mrb[10].mxu1 %v29219_v60  ;;  %v26109_v60 = vld [vmem:[%s29088_s7 + $0x10] sm:$0xff] }
 0x32c   :  { %3207 = vmatprep.mubr.f32.mxu1 %v29187_v48 }
 0x32f   :  { %3213 = vmatmul.mubr.f32.gmra.mrb[8].mxu1 %v29220_v13  ;;  %v12149_v13 = vld [vmem:[#allocation11] sm:$0x3] }
 0x330   :  { %3293 = vmatprep.mubr.f32.mxu1 %v29187_v48 }
 0x333   :  { %3295 = vmatmul.mubr.f32.vlgmr.msra.gmra.mrb[6].mxu1 %v25227_v17 }
 0x334   :  { %3355 = vmatpush1.msra.mxu1 %v25826_v7  ;;  %3300 = vmatprep.mubr.f32.mxu1 %v29187_v48 }
 0x335   :  { %3484 = vmatprep.subr.mxu1 %v25780_v11 }
 0x337   :  { %3302 = vmatmul.mubr.f32.gmra.mrb[4].mxu1 %v25256_v53 }
 0x338   :  { %3307 = vmatprep.mubr.f32.mxu1 %v29187_v48 }
 0x33b   :  { %3309 = vmatmul.mubr.f32.gmra.mrb[2].mxu1 %v25306_v5 }
 0x33c   :  { %3314 = vmatprep.mubr.f32.mxu1 %v29187_v48 }
 0x33f   :  { %3316 = vmatmul.mubr.f32.gmra.mrb[0].mxu1 %v25335_v52 }
 0x340   :  { %3321 = vmatprep.mubr.f32.mxu1 %v29187_v48 }
 0x343   :  { %3323 = vmatmul.mubr.f32.gmra.mrb[14].mxu1 %v25063_v14 }
 0x344   :  { %3328 = vmatprep.mubr.f32.mxu1 %v29187_v48 }
 0x347   :  { %3330 = vmatmul.mubr.f32.gmra.mrb[12].mxu1 %v25078_v22 }
 0x348   :  { %3335 = vmatprep.mubr.f32.mxu1 %v29187_v48 }
 0x34b   :  { %3337 = vmatmul.mubr.f32.gmra.mrb[10].mxu1 %v25080_v26 }
 0x34c   :  { %3342 = vmatprep.mubr.f32.mxu1 %v29187_v48 }
 0x34f   :  { %3344 = vmatmul.mubr.f32.gmra.mrb[8].mxu1 %v25101_v42 }
 0x350   :  { %3418 = vmatprep.mubr.f32.mxu1 %v29187_v48 }
 0x353   :  { %3421 = vmatmul.mubr.f32.vlgmr.msra.gmra.mrb[6].mxu1 %v25367_v33 }
 0x354   :  { %3486 = vmatpush1.msra.mxu1 %v25811_v44  ;;  %3426 = vmatprep.mubr.f32.mxu1 %v29187_v48 }
 0x355   :  { %3625 = vmatprep.subr.mxu1 %v29221_v25  ;;  %v13981_v25 = vld [vmem:[%s29092_s11] sm:$0x3] }
 0x357   :  { %3429 = vmatmul.mubr.f32.gmra.mrb[4].mxu1 %v25377_v34  ;;  %v3052_v34 = vld [vmem:[%s29085_s4] sm:$0xff] }
 0x358   :  { %3434 = vmatprep.mubr.f32.mxu1 %v29187_v48 }
 0x35b   :  { %3437 = vmatmul.mubr.f32.gmra.mrb[2].mxu1 %v25390_v20  ;;  %v3054_v20 = vld [vmem:[%s29085_s4 + $0x10] sm:$0xff] }
 0x35c   :  { %3442 = vmatprep.mubr.f32.mxu1 %v29187_v48 }
 0x35f   :  { %3445 = vmatmul.mubr.f32.gmra.mrb[0].mxu1 %v25399_v23 }
 0x360   :  { %3450 = vmatprep.mubr.f32.mxu1 %v29187_v48 }
 0x363   :  { %3453 = vmatmul.mubr.f32.gmra.mrb[14].mxu1 %v25076_v21  ;;  %v3053_v21 = vld [vmem:[%s29085_s4 + $0x8] sm:$0xff] }
 0x364   :  { %3458 = vmatprep.mubr.f32.mxu1 %v29187_v48 }
 0x367   :  { %3461 = vmatmul.mubr.f32.gmra.mrb[12].mxu1 %v25109_v54  ;;  %v3055_v54 = vld [vmem:[%s29085_s4 + $0x18] sm:$0xff]  ;;  %s24504_s4 = smov [#allocation12]  }
 0x368   :  { %3466 = vmatprep.mubr.f32.mxu1 %v29187_v48 }
 0x36b   :  { %3469 = vmatmul.mubr.f32.gmra.mrb[10].mxu1 %v25112_v63  ;;  %v3872_v63 = vand.u32 4294901760, %v3053_v21 }
 0x36c   :  { %3474 = vmatprep.mubr.f32.mxu1 %v29187_v48 }
 0x36f   :  { %3477 = vmatmul.mubr.f32.gmra.mrb[8].mxu1 %v25149_v41 }
 0x370   :  { %3549 = vmatprep.mubr.f32.mxu1 %v29187_v48 }
 0x373   :  { %3553 = vmatmul.mubr.f32.vlgmr.msra.gmra.mrb[6].mxu1 %v25438_v18 }
 0x374   :  { %3629 = vmatpush1.msra.mxu1 %v3227_v45  ;;  %3558 = vmatprep.mubr.f32.mxu1 %v29187_v48 }
 0x375   :  { %3750 = vmatprep.subr.mxu1 %v25780_v11 }
 0x377   :  { %3562 = vmatmul.mubr.f32.gmra.mrb[4].mxu1 %v25449_v51  ;;  %v3874_v51 = vand.u32 4294901760, %v3052_v34 }
 0x378   :  { %3567 = vmatprep.mubr.f32.mxu1 %v29187_v48 }
 0x37b   :  { %3571 = vmatmul.mubr.f32.gmra.mrb[2].mxu1 %v25461_v2  ;;  %v3878_v2 = vand.u32 4294901760, %v3054_v20 }
 0x37c   :  { %3576 = vmatprep.mubr.f32.mxu1 %v29187_v48 }
 0x37d   :  { %v25950_v11 = vpack.c.bf16 %v3878_v2, %v3874_v51  ;;  %v25962_v7 = vsub.f32 %v3054_v20, %v3878_v2  ;;  %v26157_v2 = vld [vmem:[%s29088_s7 + $0x58] sm:$0xff] }
 0x37f   :  { %3580 = vmatmul.mubr.f32.gmra.mrb[0].mxu1 %v25470_v38 }
 0x380   :  { %3585 = vmatprep.mubr.f32.mxu1 %v29187_v48 }
 0x383   :  { %3589 = vmatmul.mubr.f32.gmra.mrb[14].mxu1 %v25096_v40  ;;  %v3876_v40 = vand.u32 4294901760, %v3055_v54 }
 0x384   :  { %3594 = vmatprep.mubr.f32.mxu1 %v29187_v48 }
 0x385   :  { %v25926_v41 = vsub.f32 %v3055_v54, %v3876_v40  ;;  %v26117_v54 = vsub.s32 0, %v26103_v50 }
 0x387   :  { %3598 = vmatmul.mubr.f32.gmra.mrb[12].mxu1 %v25139_v24  ;;  %v25912_v24 = vpack.c.bf16 %v3876_v40, %v3872_v63  ;;  %v4043_v33 = vand.u32 4294901760, %v25926_v41  ;;  %v26123_v40 = vld [vmem:[%s29088_s7 + $0x28] sm:$0xff] }
 0x388   :  { %3603 = vmatprep.mubr.f32.mxu1 %v29187_v48  ;;  %v4780_v20 = vand.u32 4294901760, %v26123_v40 }
 0x389   :  { %v4044_v18 = vsub.f32 %v25926_v41, %v4043_v33 }
 0x38a   :  { %v26242_v0 = vsub.f32 %v26123_v40, %v4780_v20 }
 0x38b   :  { %3607 = vmatmul.mubr.f32.gmra.mrb[10].mxu1 %v25146_v36  ;;  %v25924_v36 = vsub.f32 %v3053_v21, %v3872_v63  ;;  %v4045_v43 = vand.u32 4294901760, %v4044_v18  ;;  %v4756_v18 = vld [vmem:[%s29088_s7 + $0x30] sm:$0xff] }
 0x38c   :  { %3612 = vmatprep.mubr.f32.mxu1 %v29187_v48 }
 0x38d   :  { %v21287_v61 = vpack.c.bf16 %v25926_v41, %v25924_v36 }
 0x38f   :  { %3616 = vmatmul.mubr.f32.gmra.mrb[8].mxu1 %v25178_v3  ;;  %v4031_v3 = vand.u32 4294901760, %v25924_v36 }
 0x390   :  { %3692 = vmatprep.mubr.f32.mxu1 %v29187_v48 }
 0x391   :  { %v4032_v23 = vsub.f32 %v25924_v36, %v4031_v3  ;;  %v4778_v36 = vand.u32 4294901760, %v26109_v60 }
 0x393   :  { %3694 = vmatmul.mubr.f32.vlgmr.msra.gmra.mrb[6].mxu1 %v25227_v17  ;;  %v4033_v38 = vand.u32 4294901760, %v4032_v23 }
 0x394   :  { %3752 = vmatpush1.msra.mxu1 %v25811_v44  ;;  %3699 = vmatprep.mubr.f32.mxu1 %v29187_v48  ;;  %v25960_v44 = vsub.f32 %v3052_v34, %v3874_v51  ;;  %v26142_v34 = vld [vmem:[%s29088_s7 + $0x20] sm:$0xff]  ;;  %v26152_v51 = vld [vmem:[%s29088_s7 + $0x48] sm:$0xff] }
 0x395   :  { %21280 = vmatprep.subr.bf16.mxu1 %v25912_v24  ;;  %v21283_v59 = vpack.c.bf16 %v4045_v43, %v4033_v38 }
 0x397   :  { %3701 = vmatmul.mubr.f32.gmra.mrb[4].mxu1 %v25256_v53 }
 0x398   :  { %3706 = vmatprep.mubr.f32.mxu1 %v29187_v48 }
 0x39b   :  { %3708 = vmatmul.mubr.f32.gmra.mrb[2].mxu1 %v25306_v5 }
 0x39c   :  { %3713 = vmatprep.mubr.f32.mxu1 %v29187_v48 }
 0x39f   :  { %3715 = vmatmul.mubr.f32.gmra.mrb[0].mxu1 %v25335_v52 }
 0x3a0   :  { %3720 = vmatprep.mubr.f32.mxu1 %v29187_v48 }
 0x3a3   :  { %3722 = vmatmul.mubr.f32.gmra.mrb[14].mxu1 %v25063_v14 }
 0x3a4   :  { %3727 = vmatprep.mubr.f32.mxu1 %v29187_v48 }
 0x3a7   :  { %3729 = vmatmul.mubr.f32.gmra.mrb[12].mxu1 %v25078_v22 }
 0x3a8   :  { %3734 = vmatprep.mubr.f32.mxu1 %v29187_v48 }
 0x3ab   :  { %3736 = vmatmul.mubr.f32.gmra.mrb[10].mxu1 %v25080_v26 }
 0x3ac   :  { %3741 = vmatprep.mubr.f32.mxu1 %v29187_v48 }
 0x3af   :  { %3743 = vmatmul.mubr.f32.gmra.mrb[8].mxu1 %v25101_v42 }
 0x3b0   :  { %3815 = vmatprep.mubr.f32.mxu1 %v29187_v48 }
 0x3b3   :  { %3817 = vmatmul.mubr.f32.vlgmr.msra.gmra.mrb[6].mxu1 %v25227_v17  ;;  %v4037_v17 = vand.u32 4294901760, %v25960_v44 }
 0x3b4   :  { %21282 = vmatpush1.bf16.msra.mxu1 %v25950_v11  ;;  %3822 = vmatprep.mubr.f32.mxu1 %v29187_v48 }
 0x3b5   :  { %21284 = vmatprep.subr.bf16.mxu1 %v21283_v59  ;;  %v4786_v59 = vand.u32 4294901760, %v4756_v18 }
 0x3b7   :  { %3824 = vmatmul.mubr.f32.gmra.mrb[4].mxu1 %v25256_v53  ;;  %v4049_v53 = vand.u32 4294901760, %v25962_v7 }
 0x3b8   :  { %3829 = vmatprep.mubr.f32.mxu1 %v29187_v48 }
 0x3bb   :  { %3831 = vmatmul.mubr.f32.gmra.mrb[2].mxu1 %v25306_v5  ;;  %v4038_v5 = vsub.f32 %v25960_v44, %v4037_v17 }
 0x3bc   :  { %3836 = vmatprep.mubr.f32.mxu1 %v29187_v48 }
 0x3bf   :  { %3838 = vmatmul.mubr.f32.gmra.mrb[0].mxu1 %v25335_v52  ;;  %v4050_v52 = vsub.f32 %v25962_v7, %v4049_v53 }
 0x3c0   :  { %3843 = vmatprep.mubr.f32.mxu1 %v29187_v48 }
 0x3c1   :  { %v4051_v45 = vand.u32 4294901760, %v4050_v52  ;;  %v26179_v52 = vld [vmem:[%s29088_s7 + $0x68] sm:$0xff] }
 0x3c3   :  { %3845 = vmatmul.mubr.f32.gmra.mrb[14].mxu1 %v25063_v14  ;;  %v4039_v14 = vand.u32 4294901760, %v4038_v5  ;;  %v4760_v5 = vld [vmem:[%s29088_s7 + $0x50] sm:$0xff] }
 0x3c4   :  { %3850 = vmatprep.mubr.f32.mxu1 %v29187_v48 }
 0x3c7   :  { %3852 = vmatmul.mubr.f32.gmra.mrb[12].mxu1 %v25078_v22  ;;  %v21285_v22 = vpack.c.bf16 %v4051_v45, %v4039_v14  ;;  %v26184_v14 = vld [vmem:[%s29088_s7 + $0x78] sm:$0xff] }
 0x3c8   :  { %3857 = vmatprep.mubr.f32.mxu1 %v29187_v48 }
 0x3cb   :  { %3859 = vmatmul.mubr.f32.gmra.mrb[10].mxu1 %v25080_v26  ;;  %v29222_v26 = vld [vmem:[#allocation20_spill] sm:$0xff] }
 0x3cc   :  { %3864 = vmatprep.mubr.f32.mxu1 %v29187_v48 }
 0x3cf   :  { %3866 = vmatmul.mubr.f32.gmra.mrb[8].mxu1 %v25101_v42  ;;  %v29223_v42 = vld [vmem:[#allocation21_spill] sm:$0xff] }
 0x3d0   :  { %3940 = vmatprep.mubr.f32.mxu1 %v29187_v48 }
 0x3d3   :  { %3946 = vmatmul.mubr.f32.vlgmr.msra.gmra.mrb[6].mxu1 %v25605_v58  ;;  %v29224_v58 = vld [vmem:[#allocation23_spill] sm:$0xff] }
 0x3d4   :  { %21286 = vmatpush1.bf16.msra.mxu1 %v21285_v22  ;;  %3951 = vmatprep.mubr.f32.mxu1 %v29187_v48 }
 0x3d5   :  { %21288 = vmatprep.subr.bf16.mxu1 %v21287_v61 }
 0x3d7   :  { %3957 = vmatmul.mubr.f32.gmra.mrb[4].mxu1 %v25623_v62  ;;  %v29225_v62 = vld [vmem:[#allocation24_spill] sm:$0xff] }
 0x3d8   :  { %3962 = vmatprep.mubr.f32.mxu1 %v29187_v48 }
 0x3db   :  { %3968 = vmatmul.mubr.f32.gmra.mrb[2].mxu1 %v25638_v12  ;;  %v21289_v12 = vpack.c.bf16 %v25962_v7, %v25960_v44  ;;  %v4788_v44 = vand.u32 4294901760, %v26152_v51  ;;  %v4792_v7 = vand.u32 4294901760, %v26157_v2 }
 0x3dc   :  { %3973 = vmatprep.mubr.f32.mxu1 %v29187_v48 }
 0x3dd   :  { %v26191_v22 = vpack.c.bf16 %v4792_v7, %v4788_v44  ;;  %v26260_v40 = vsub.f32 %v26152_v51, %v4788_v44 }
 0x3df   :  { %3979 = vmatmul.mubr.f32.gmra.mrb[0].mxu1 %v29222_v26  ;;  %v4794_v26 = vand.u32 4294901760, %v4760_v5 }
 0x3e0   :  { %3984 = vmatprep.mubr.f32.mxu1 %v29187_v48 }
 0x3e3   :  { %3990 = vmatmul.mubr.f32.gmra.mrb[14].mxu1 %v25662_v15  ;;  %v21295_v15 = vpack.c.bf16 %v4043_v33, %v4031_v3  ;;  %v12154_v3 = vrot.slane %v12149_v13, %v26117_v54  ;;  %v13986_v33 = vrot.slane %v13981_v25, %v26117_v54 }
 0x3e4   :  { %3995 = vmatprep.mubr.f32.mxu1 %v29187_v48 }
 0x3e5   :  { %v26159_v38 = vadd.f32 %v13986_v33, %v12154_v3 }
 0x3e7   :  { %4001 = vmatmul.mubr.f32.gmra.mrb[12].mxu1 %v29223_v42  ;;  %29228 = vst [vmem:[#allocation16_spill] sm:$0xff] %v26159_v38  ;;  %v4796_v42 = vand.u32 4294901760, %v26179_v52 }
 0x3e8   :  { %4006 = vmatprep.mubr.f32.mxu1 %v29187_v48 }
 0x3eb   :  { %4012 = vmatmul.mubr.f32.gmra.mrb[10].mxu1 %v29224_v58  ;;  %v4800_v58 = vand.u32 4294901760, %v26184_v14 }
 0x3ec   :  { %4017 = vmatprep.mubr.f32.mxu1 %v29187_v48 }
 0x3ef   :  { %4023 = vmatmul.mubr.f32.gmra.mrb[8].mxu1 %v29225_v62  ;;  %v26204_v62 = vld [vmem:[%s29088_s7 + $0x70] sm:$0xff] }
 0x3f0   :  { %4113 = vmatprep.mubr.f32.mxu1 %v29187_v48 }
 0x3f3   :  { %4115 = vmatmul.mubr.f32.vlgmr.msra.gmra.mrb[6].mxu1 %v25574_v35 }
 0x3f4   :  { %21290 = vmatpush1.bf16.msra.mxu1 %v21289_v12  ;;  %4120 = vmatprep.mubr.f32.mxu1 %v29187_v48 }
 0x3f5   :  { %21292 = vmatprep.subr.bf16.mxu1 %v25912_v24 }
 0x3f7   :  { %4122 = vmatmul.mubr.f32.gmra.mrb[4].mxu1 %v25571_v28 }
 0x3f8   :  { %4127 = vmatprep.mubr.f32.mxu1 %v29187_v48 }
 0x3fb   :  { %4129 = vmatmul.mubr.f32.gmra.mrb[2].mxu1 %v25592_v49 }
 0x3fc   :  { %4134 = vmatprep.mubr.f32.mxu1 %v29187_v48 }
 0x3ff   :  { %4136 = vmatmul.mubr.f32.gmra.mrb[0].mxu1 %v25583_v46 }
 0x400   :  { %4141 = vmatprep.mubr.f32.mxu1 %v29187_v48 }
 0x403   :  { %4143 = vmatmul.mubr.f32.gmra.mrb[14].mxu1 %v25608_v56 }
 0x404   :  { %4148 = vmatprep.mubr.f32.mxu1 %v29187_v48 }
 0x407   :  { %4150 = vmatmul.mubr.f32.gmra.mrb[12].mxu1 %v25614_v47 }
 0x408   :  { %4155 = vmatprep.mubr.f32.mxu1 %v29187_v48 }
 0x40b   :  { %4157 = vmatmul.mubr.f32.gmra.mrb[10].mxu1 %v25636_v39 }
 0x40c   :  { %4162 = vmatprep.mubr.f32.mxu1 %v29187_v48 }
 0x40f   :  { %4164 = vmatmul.mubr.f32.gmra.mrb[8].mxu1 %v25644_v9 }
 0x410   :  { %4242 = vmatprep.mubr.f32.mxu1 %v29187_v48 }
 0x413   :  { %4245 = vmatmul.mubr.f32.vlgmr.msra.gmra.mrb[6].mxu1 %v25580_v27  ;;  %v4753_v27 = vld [vmem:[%s29088_s7 + $0x18] sm:$0xff] }
 0x414   :  { %21294 = vmatpush1.bf16.msra.mxu1 %v25950_v11  ;;  %4250 = vmatprep.mubr.f32.mxu1 %v29187_v48 }
 0x415   :  { %21296 = vmatprep.subr.bf16.mxu1 %v21295_v15 }
 0x417   :  { %4253 = vmatmul.mubr.f32.gmra.mrb[4].mxu1 %v25577_v8  ;;  %v21297_v8 = vpack.c.bf16 %v4049_v53, %v4037_v17  ;;  %v4758_v53 = vld [vmem:[%s29088_s7 + $0x40] sm:$0xff] }
 0x418   :  { %4258 = vmatprep.mubr.f32.mxu1 %v29187_v48  ;;  %v4790_v61 = vand.u32 4294901760, %v4758_v53 }
 0x41b   :  { %4261 = vmatmul.mubr.f32.gmra.mrb[2].mxu1 %v25597_v6  ;;  %v4776_v6 = vand.u32 4294901760, %v4753_v27 }
 0x41c   :  { %4266 = vmatprep.mubr.f32.mxu1 %v29187_v48 }
 0x41f   :  { %4269 = vmatmul.mubr.f32.gmra.mrb[0].mxu1 %v25600_v29 }
 0x420   :  { %4274 = vmatprep.mubr.f32.mxu1 %v29187_v48 }
 0x423   :  { %4277 = vmatmul.mubr.f32.gmra.mrb[14].mxu1 %v25621_v31  ;;  %v26058_v31 = vsub.f32 %v4753_v27, %v4776_v6  ;;  %v4802_v27 = vand.u32 4294901760, %v26204_v62 }
 0x424   :  { %4282 = vmatprep.mubr.f32.mxu1 %v29187_v48 }
 0x427   :  { %4285 = vmatmul.mubr.f32.gmra.mrb[12].mxu1 %v25630_v19  ;;  %v4878_v19 = vand.u32 4294901760, %v26058_v31 }
 0x428   :  { %4290 = vmatprep.mubr.f32.mxu1 %v29187_v48 }
 0x429   :  { %v4879_v15 = vsub.f32 %v26058_v31, %v4878_v19 }
 0x42b   :  { %4293 = vmatmul.mubr.f32.gmra.mrb[10].mxu1 %v25648_v1  ;;  %v26096_v1 = vld [vmem:[%s29088_s7] sm:$0xff] }
 0x42c   :  { %4298 = vmatprep.mubr.f32.mxu1 %v29187_v48  ;;  %v4774_v63 = vand.u32 4294901760, %v26096_v1 }
 0x42e   :  { %v26162_v43 = vpack.c.bf16 %v4778_v36, %v4774_v63 }
 0x42f   :  { %4301 = vmatmul.mubr.f32.gmra.mrb[8].mxu1 %v25660_v57  ;;  %v4751_v57 = vld [vmem:[%s29088_s7 + $0x8] sm:$0xff] }
 0x430   :  { %4375 = vmatprep.mubr.f32.mxu1 %v29187_v48 }
 0x433   :  { %4379 = vmatmul.mubr.f32.vlgmr.msra.gmra.mrb[6].mxu1 %v25590_v37  ;;  %v4772_v37 = vand.u32 4294901760, %v4751_v57 }
 0x434   :  { %21298 = vmatpush1.bf16.msra.mxu1 %v21297_v8  ;;  %4384 = vmatprep.mubr.f32.mxu1 %v29187_v48  ;;  %v26215_v8 = vpack.c.bf16 %v4794_v26, %v4790_v61 }
 0x435   :  { %21300 = vmatprep.subr.bf16.mxu1 %v25912_v24  ;;  %v26056_v29 = vsub.f32 %v4751_v57, %v4772_v37  ;;  %v26128_v24 = vld [vmem:[%s29088_s7 + $0x38] sm:$0xff] }
 0x436   :  { %v4784_v23 = vand.u32 4294901760, %v26128_v24 }
 0x437   :  { %4388 = vmatmul.mubr.f32.gmra.mrb[4].mxu1 %v25587_v30  ;;  %v4866_v30 = vand.u32 4294901760, %v26056_v29 }
 0x438   :  { %4393 = vmatprep.mubr.f32.mxu1 %v29187_v48  ;;  %v26168_v17 = vpack.c.bf16 %v4784_v23, %v4780_v20  ;;  %v26245_v13 = vsub.f32 %v26128_v24, %v4784_v23  ;;  %v26263_v24 = vsub.f32 %v26157_v2, %v4792_v7  ;;  %v26281_v23 = vsub.f32 %v4758_v53, %v4790_v61 }
 0x439   :  { %v4867_v12 = vsub.f32 %v26056_v29, %v4866_v30  ;;  %v26288_v2 = vsub.f32 %v26179_v52, %v4796_v42 }
 0x43a   :  { %v4926_v51 = vand.u32 4294901760, %v26263_v24  ;;  %v4920_v52 = vand.u32 4294901760, %v26281_v23 }
 0x43b   :  { %4397 = vmatmul.mubr.f32.gmra.mrb[2].mxu1 %v25611_v10  ;;  %v26070_v10 = vpack.c.bf16 %v4878_v19, %v4866_v30  ;;  %v4880_v30 = vand.u32 4294901760, %v4879_v15 }
 0x43c   :  { %4402 = vmatprep.mubr.f32.mxu1 %v29187_v48 }
 0x43f   :  { %4406 = vmatmul.mubr.f32.gmra.mrb[0].mxu1 %v25618_v4  ;;  %v29226_v4 = vld [vmem:[#allocation22_spill] sm:$0xff] }
 0x440   :  { %4411 = vmatprep.mubr.f32.mxu1 %v29187_v48 }
 0x443   :  { %4415 = vmatmul.mubr.f32.gmra.mrb[14].mxu1 %v25641_v32  ;;  %v26078_v32 = vpack.c.bf16 %v4776_v6, %v4772_v37  ;;  %v26220_v37 = vpack.c.bf16 %v4800_v58, %v4796_v42  ;;  %v4868_v6 = vand.u32 4294901760, %v4867_v12  ;;  %v4927_v42 = vsub.f32 %v26263_v24, %v4926_v51 }
 0x444   :  { %4420 = vmatprep.mubr.f32.mxu1 %v29187_v48 }
 0x445   :  { %v26228_v19 = vpack.c.bf16 %v4880_v30, %v4868_v6 }
 0x447   :  { %4424 = vmatmul.mubr.f32.gmra.mrb[12].mxu1 %v25655_v55  ;;  %v26098_v55 = vpop.f32.mrb[8].mxu0 }
 0x448   :  { %4429 = vmatprep.mubr.f32.mxu1 %v29187_v48  ;;  %v26114_v21 = vpop.f32.mrb[9].mxu0 }
 0x44b   :  { %4433 = vmatmul.mubr.f32.gmra.mrb[10].mxu1 %v25667_v16  ;;  %v26100_v16 = vld [vmem:[#allocation6] sm:$0x3] }
 0x44c   :  { %4438 = vmatprep.mubr.f32.mxu1 %v29187_v48  ;;  %v26134_v41 = vrot.slane %v26100_v16, %v26117_v54 }
 0x44f   :  { %4442 = vmatmul.mubr.f32.gmra.mrb[8].mxu1 %v29226_v4  ;;  %v26238_v4 = vsub.f32 %v26109_v60, %v4778_v36  ;;  %v4902_v60 = vand.u32 4294901760, %v26245_v13 }
 0x450   :  { %4524 = vmatprep.mubr.f32.mxu1 %v29187_v48 }
 0x451   :  { %v4884_v25 = vand.u32 4294901760, %v26238_v4  ;;  %v4903_v33 = vsub.f32 %v26245_v13, %v4902_v60 }
 0x453   :  { %4526 = vmatmul.mubr.f32.vlgmr.msra.gmra.mrb[6].mxu1 %v25574_v35  ;;  %v4885_v36 = vsub.f32 %v26238_v4, %v4884_v25  ;;  %v4904_v12 = vand.u32 4294901760, %v4903_v33  ;;  %v4928_v33 = vand.u32 4294901760, %v4927_v42 }
 0x454   :  { %21302 = vmatpush1.bf16.msra.mxu1 %v25950_v11  ;;  %4531 = vmatprep.mubr.f32.mxu1 %v29187_v48  ;;  %v4782_v11 = vand.u32 4294901760, %v26142_v34 }
 0x455   :  { %21304 = vmatprep.subr.bf16.mxu1 %v26078_v32  ;;  %v4886_v44 = vand.u32 4294901760, %v4885_v36 }
 0x456   :  { %v26189_v45 = vpack.c.bf16 %v4786_v59, %v4782_v11 }
 0x457   :  { %4533 = vmatmul.mubr.f32.gmra.mrb[4].mxu1 %v25571_v28 }
 0x458   :  { %4538 = vmatprep.mubr.f32.mxu1 %v29187_v48 }
 0x45b   :  { %4540 = vmatmul.mubr.f32.gmra.mrb[2].mxu1 %v25592_v49 }
 0x45c   :  { %4545 = vmatprep.mubr.f32.mxu1 %v29187_v48 }
 0x45f   :  { %4547 = vmatmul.mubr.f32.gmra.mrb[0].mxu1 %v25583_v46 }
 0x460   :  { %4552 = vmatprep.mubr.f32.mxu1 %v29187_v48 }
 0x463   :  { %4554 = vmatmul.mubr.f32.gmra.mrb[14].mxu1 %v25608_v56 }
 0x464   :  { %4559 = vmatprep.mubr.f32.mxu1 %v29187_v48 }
 0x467   :  { %4561 = vmatmul.mubr.f32.gmra.mrb[12].mxu1 %v25614_v47 }
 0x468   :  { %4566 = vmatprep.mubr.f32.mxu1 %v29187_v48 }
 0x46b   :  { %4568 = vmatmul.mubr.f32.gmra.mrb[10].mxu1 %v25636_v39 }
 0x46c   :  { %4573 = vmatprep.mubr.f32.mxu1 %v29187_v48 }
 0x46f   :  { %4575 = vmatmul.mubr.f32.gmra.mrb[8].mxu1 %v25644_v9 }
 0x470   :  { %4649 = vmatprep.mubr.f32.mxu1 %v29187_v48 }
 0x473   :  { %4651 = vmatmul.mubr.f32.vlgmr.msra.gmra.mrb[6].mxu1 %v25574_v35  ;;  %v26199_v35 = vld [vmem:[%s29088_s7 + $0x60] sm:$0xff]  ;;  %s24500_s7 = smov 64  }
 0x474   :  { %21306 = vmatpush1.bf16.msra.mxu1 %v26162_v43  ;;  %4656 = vmatprep.mubr.f32.mxu1 %v29187_v48  ;;  %v4798_v57 = vand.u32 4294901760, %v26199_v35 }
 0x475   :  { %21308 = vmatprep.subr.bf16.mxu1 %v26168_v17 }
 0x476   :  { %v26304_v61 = vsub.f32 %v26199_v35, %v4798_v57 }
 0x477   :  { %4658 = vmatmul.mubr.f32.gmra.mrb[4].mxu1 %v25571_v28  ;;  %v26225_v28 = vpack.c.bf16 %v4802_v27, %v4798_v57 }
 0x478   :  { %4663 = vmatprep.mubr.f32.mxu1 %v29187_v48  ;;  %21310 = vmatpush1.bf16.msra.mxu1 %v26189_v45 }
 0x479   :  { %21312 = vmatprep.subr.bf16.mxu1 %v26191_v22 }
 0x47b   :  { %4665 = vmatmul.mubr.f32.gmra.mrb[2].mxu1 %v25592_v49  ;;  %v26235_v49 = vsub.f32 %v26096_v1, %v4774_v63  ;;  %v4890_v1 = vand.u32 4294901760, %v26242_v0  ;;  %v26256_v63 = vsub.f32 %v4756_v18, %v4786_v59  ;;  %v26283_v18 = vsub.f32 %v4760_v5, %v4794_v26 }
 0x47c   :  { %4670 = vmatprep.mubr.f32.mxu1 %v29187_v48  ;;  %21314 = vmatpush1.bf16.msra.mxu1 %v26215_v8 }
 0x47d   :  { %21316 = vmatprep.subr.bf16.mxu1 %v26220_v37  ;;  %v4891_v3 = vsub.f32 %v26242_v0, %v4890_v1  ;;  %v4908_v20 = vand.u32 4294901760, %v26256_v63 }
 0x47f   :  { %4672 = vmatmul.mubr.f32.gmra.mrb[0].mxu1 %v25583_v46  ;;  %v4872_v46 = vand.u32 4294901760, %v26235_v49  ;;  %v4892_v7 = vand.u32 4294901760, %v4891_v3  ;;  %v4909_v5 = vsub.f32 %v26256_v63, %v4908_v20 }
 0x480   :  { %4677 = vmatprep.mubr.f32.mxu1 %v29187_v48  ;;  %21318 = vmatpush1.bf16.msra.mxu1 %v26225_v28 }
 0x481   :  { %21320 = vmatprep.subr.bf16.mxu1 %v26228_v19  ;;  %v26319_v30 = vpack.c.bf16 %v4904_v12, %v4892_v7  ;;  %v4910_v57 = vand.u32 4294901760, %v4909_v5 }
 0x483   :  { %4679 = vmatmul.mubr.f32.gmra.mrb[14].mxu1 %v25608_v56  ;;  %v26254_v56 = vsub.f32 %v26142_v34, %v4782_v11  ;;  %v26291_v11 = vsub.f32 %v26184_v14, %v4800_v58  ;;  %v4932_v14 = vand.u32 4294901760, %v26283_v18  ;;  %v4938_v58 = vand.u32 4294901760, %v26288_v2 }
 0x484   :  { %4684 = vmatprep.mubr.f32.mxu1 %v29187_v48 }
 0x485   :  { %v4896_v34 = vand.u32 4294901760, %v26254_v56  ;;  %v29131_v15 = vand.u32 4294901760, %v26291_v11 }
 0x487   :  { %4686 = vmatmul.mubr.f32.gmra.mrb[12].mxu1 %v25614_v47  ;;  %v4873_v47 = vsub.f32 %v26235_v49, %v4872_v46  ;;  %v4897_v53 = vsub.f32 %v26254_v56, %v4896_v34 }
 0x488   :  { %4691 = vmatprep.mubr.f32.mxu1 %v29187_v48 }
 0x489   :  { %v4874_v59 = vand.u32 4294901760, %v4873_v47  ;;  %v4898_v35 = vand.u32 4294901760, %v4897_v53  ;;  %v29132_v47 = vand.u32 4294901760, %v26304_v61 }
 0x48b   :  { %4693 = vmatmul.mubr.f32.gmra.mrb[10].mxu1 %v25636_v39  ;;  %v4914_v39 = vand.u32 4294901760, %v26260_v40  ;;  %v26317_v6 = vpack.c.bf16 %v4886_v44, %v4874_v59  ;;  %v4939_v59 = vsub.f32 %v26288_v2, %v4938_v58  ;;  %v4951_v44 = vsub.f32 %v26291_v11, %v29131_v15 }
 0x48c   :  { %4698 = vmatprep.mubr.f32.mxu1 %v29187_v48  ;;  %v26336_v7 = vpack.c.bf16 %v4910_v57, %v4898_v35  ;;  %v4945_v5 = vsub.f32 %v26304_v61, %v29132_v47 }
 0x48d   :  { %v4915_v26 = vsub.f32 %v26260_v40, %v4914_v39  ;;  %v4940_v35 = vand.u32 4294901760, %v4939_v59  ;;  %v4952_v57 = vand.u32 4294901760, %v4951_v44  ;;  %v26371_v59 = vpack.c.bf16 %v26245_v13, %v26242_v0 }
 0x48e   :  { %v26393_v44 = vpack.c.bf16 %v26291_v11, %v26288_v2  ;;  %v26446_v0 = vpack.c.bf16 %v4932_v14, %v4920_v52  ;;  %v29229_v13 = vand.u32 4294901760, %v26291_v11 }
 0x48f   :  { %4700 = vmatmul.mubr.f32.gmra.mrb[8].mxu1 %v25644_v9  ;;  %v26307_v9 = vsub.f32 %v26204_v62, %v4802_v27  ;;  %v4921_v62 = vsub.f32 %v26281_v23, %v4920_v52  ;;  %v4933_v27 = vsub.f32 %v26283_v18, %v4932_v14  ;;  %v4916_v3 = vand.u32 4294901760, %v4915_v26 }
 0x490   :  { %4852 = vmatprep.mubr.f32.mxu1 %v29187_v48  ;;  %v26353_v47 = vpack.c.bf16 %v4952_v57, %v4940_v35  ;;  %v26510_v57 = vpop.f32.mrb[10].mxu0 }
 0x491   :  { %v29133_v36 = vand.u32 4294901760, %v26307_v9  ;;  %v4922_v12 = vand.u32 4294901760, %v4921_v62  ;;  %v4934_v53 = vand.u32 4294901760, %v4933_v27  ;;  %v26347_v42 = vpack.c.bf16 %v4928_v33, %v4916_v3 }
 0x492   :  { %v4946_v27 = vand.u32 4294901760, %v4945_v5  ;;  %v26361_v3 = vpack.c.bf16 %v26058_v31, %v26056_v29  ;;  %v26366_v33 = vpack.c.bf16 %v26238_v4, %v26235_v49  ;;  %v26377_v29 = vpack.c.bf16 %v26256_v63, %v26254_v56 }
 0x493   :  { %v4957_v26 = vsub.f32 %v26307_v9, %v29133_v36  ;;  %v26350_v62 = vpack.c.bf16 %v4934_v53, %v4922_v12  ;;  %v26383_v31 = vpack.c.bf16 %v26263_v24, %v26260_v40  ;;  %v26398_v12 = vpack.c.bf16 %v26307_v9, %v26304_v61  ;;  %v4706_v40 = vld [vmem:[#allocation9] sm:$0x3] }
 0x494   :  { %v26416_v53 = vpack.c.bf16 %v4884_v25, %v4872_v46  ;;  %v26423_v5 = vpack.c.bf16 %v4902_v60, %v4890_v1  ;;  %v26431_v49 = vpack.c.bf16 %v4908_v20, %v4896_v34  ;;  %v26439_v4 = vpack.c.bf16 %v4926_v51, %v4914_v39 }
 0x495   :  { %v4958_v15 = vand.u32 4294901760, %v4957_v26  ;;  %v26453_v46 = vpack.c.bf16 %v29229_v13, %v4938_v58  ;;  %v29230_v25 = vand.u32 4294901760, %v26304_v61  ;;  %v29231_v1 = vand.u32 4294901760, %v26307_v9 }
 0x496   :  { %v26486_v56 = vsub.s32 1, %v26103_v50  ;;  %v23141_v24 = vadd.f32 %v26134_v41, %v26098_v55  ;;  %v26495_v34 = vrot.slane %v4706_v40, %v26117_v54 }
 0x497   :  { %4858 = vmatmul.mubr.f32.vlgmr.msra.gmra.mrb[8].mxu1 %v29187_v48  ;;  %v26356_v36 = vpack.c.bf16 %v4958_v15, %v4946_v27  ;;  %v26388_v15 = vpack.c.bf16 %v26283_v18, %v26281_v23  ;;  %v26460_v60 = vpack.c.bf16 %v29231_v1, %v29230_v25  ;;  %v26512_v27 = vpop.f32.mrb[11].mxu0 }
 0x498   :  { %21322 = vmatpush1.bf16.msra.mxu1 %v26317_v6  ;;  %5008 = vmatprep.mubr.f32.mxu1 %v29187_v48  ;;  %29232 = vst [vmem:[#allocation17_spill] sm:$0xff] %v26486_v56  ;;  %v26490_v63 = vrot.slane %v26100_v16, %v26486_v56  ;;  %v26500_v23 = vrot.slane %v4706_v40, %v26486_v56 }
 0x499   :  { %21324 = vmatprep.subr.bf16.mxu1 %v26319_v30  ;;  %v23142_v50 = vadd.f32 %v23141_v24, %v26495_v34 }
 0x49a   :  { %v23144_v20 = vadd.f32 %v26490_v63, %v26114_v21 }
 0x49c   :  { %21326 = vmatpush1.bf16.msra.mxu1 %v26336_v7  ;;  %v23145_v18 = vadd.f32 %v23144_v20, %v26500_v23 }
 0x49d   :  { %21328 = vmatprep.subr.bf16.mxu1 %v26347_v42 }
 0x4a0   :  { %21330 = vmatpush1.bf16.msra.mxu1 %v26350_v62 }
 0x4a1   :  { %21332 = vmatprep.subr.bf16.mxu1 %v26353_v47 }
 0x4a4   :  { %21334 = vmatpush1.bf16.msra.mxu1 %v26356_v36 }
 0x4a5   :  { %21336 = vmatprep.subr.bf16.mxu1 %v26361_v3 }
 0x4a7   :  { %5010 = vmatmul.mubr.f32.vlgmr.msra.gmra.mrb[8].mxu1 %v29187_v48 }
 0x4a8   :  { %21338 = vmatpush1.bf16.msra.mxu1 %v26366_v33  ;;  %5112 = vmatprep.mubr.f32.mxu1 %v29187_v48 }
 0x4a9   :  { %21340 = vmatprep.subr.bf16.mxu1 %v26371_v59 }
 0x4ac   :  { %21342 = vmatpush1.bf16.msra.mxu1 %v26377_v29 }
 0x4ad   :  { %21344 = vmatprep.subr.bf16.mxu1 %v26383_v31 }
 0x4b0   :  { %21346 = vmatpush1.bf16.msra.mxu1 %v26388_v15 }
 0x4b1   :  { %21348 = vmatprep.subr.bf16.mxu1 %v26393_v44 }
 0x4b4   :  { %21350 = vmatpush1.bf16.msra.mxu1 %v26398_v12 }
 0x4b5   :  { %21352 = vmatprep.subr.bf16.mxu1 %v26078_v32 }
 0x4b7   :  { %5115 = vmatmul.mubr.f32.vlgmr.msra.gmra.mrb[8].mxu1 %v29187_v48 }
 0x4b8   :  { %21354 = vmatpush1.bf16.msra.mxu1 %v26162_v43  ;;  %5201 = vmatprep.mubr.f32.mxu1 %v29187_v48 }
 0x4b9   :  { %21356 = vmatprep.subr.bf16.mxu1 %v26168_v17 }
 0x4bc   :  { %21358 = vmatpush1.bf16.msra.mxu1 %v26189_v45 }
 0x4bd   :  { %21360 = vmatprep.subr.bf16.mxu1 %v26191_v22 }
 0x4c0   :  { %21362 = vmatpush1.bf16.msra.mxu1 %v26215_v8 }
 0x4c1   :  { %21364 = vmatprep.subr.bf16.mxu1 %v26220_v37 }
 0x4c4   :  { %21366 = vmatpush1.bf16.msra.mxu1 %v26225_v28 }
 0x4c5   :  { %21368 = vmatprep.subr.bf16.mxu1 %v26070_v10 }
 0x4c7   :  { %5205 = vmatmul.mubr.f32.vlgmr.msra.gmra.mrb[8].mxu1 %v29187_v48 }
 0x4c8   :  { %21370 = vmatpush1.bf16.msra.mxu1 %v26416_v53  ;;  %5323 = vmatprep.mubr.f32.mxu1 %v29187_v48 }
 0x4c9   :  { %21372 = vmatprep.subr.bf16.mxu1 %v26423_v5 }
 0x4cc   :  { %21374 = vmatpush1.bf16.msra.mxu1 %v26431_v49 }
 0x4cd   :  { %21376 = vmatprep.subr.bf16.mxu1 %v26439_v4 }
 0x4d0   :  { %21378 = vmatpush1.bf16.msra.mxu1 %v26446_v0 }
 0x4d1   :  { %21380 = vmatprep.subr.bf16.mxu1 %v26453_v46 }
 0x4d4   :  { %21382 = vmatpush1.bf16.msra.mxu1 %v26460_v60 }
 0x4d5   :  { %21384 = vmatprep.subr.bf16.mxu1 %v26078_v32 }
 0x4d7   :  { %5325 = vmatmul.mubr.f32.vlgmr.msra.gmra.mrb[8].mxu1 %v29187_v48 }
 0x4d8   :  { %21386 = vmatpush1.bf16.msra.mxu1 %v26162_v43  ;;  %5411 = vmatprep.mubr.f32.mxu1 %v29187_v48 }
 0x4d9   :  { %21388 = vmatprep.subr.bf16.mxu1 %v26168_v17 }
 0x4dc   :  { %21390 = vmatpush1.bf16.msra.mxu1 %v26189_v45 }
 0x4dd   :  { %21392 = vmatprep.subr.bf16.mxu1 %v26191_v22 }
 0x4e0   :  { %21394 = vmatpush1.bf16.msra.mxu1 %v26215_v8 }
 0x4e1   :  { %21396 = vmatprep.subr.bf16.mxu1 %v26220_v37 }
 0x4e4   :  { %21398 = vmatpush1.bf16.msra.mxu1 %v26225_v28 }
 0x4e5   :  { %21400 = vmatprep.subr.bf16.mxu1 %v26078_v32 }
 0x4e7   :  { %5413 = vmatmul.mubr.f32.vlgmr.msra.gmra.mrb[8].mxu1 %v29187_v48 }
 0x4e8   :  { %21402 = vmatpush1.bf16.msra.mxu1 %v26162_v43  ;;  %5544 = vmatprep.mubr.f32.mxu1 %v29187_v48 }
 0x4e9   :  { %21404 = vmatprep.subr.bf16.mxu1 %v26168_v17 }
 0x4ec   :  { %21406 = vmatpush1.bf16.msra.mxu1 %v26189_v45 }
 0x4ed   :  { %21408 = vmatprep.subr.bf16.mxu1 %v26191_v22 }
 0x4f0   :  { %21410 = vmatpush1.bf16.msra.mxu1 %v26215_v8 }
 0x4f1   :  { %21412 = vmatprep.subr.bf16.mxu1 %v26220_v37 }
 0x4f4   :  { %21414 = vmatpush1.bf16.msra.mxu1 %v26225_v28 }
 0x4f5   :  { %21416 = vmatprep.subr.bf16.mxu1 %v26228_v19 }
 0x5ba   :  { %v5414_v39 = vpop.f32.mrb[8].mxu1 }
 0x5bb   :  { %v23143_v16 = vadd.f32 %v23142_v50, %v5414_v39  ;;  %v5416_v51 = vpop.f32.mrb[9].mxu1 }
 0x5bc   :  { %v23146_v2 = vadd.f32 %v23145_v18, %v5416_v51 }
 0x5bd   :  { %v20639_v55 = vmul.f32 -1.442695, %v23143_v16 }
 0x5be   :  { %24207 = vtanh.f32 %v23146_v2  ;;  %v20640_v13 = vmul.f32 -1.442695, %v23146_v2 }
 0x5bf   :  { %24209 = vpow2.f32 %v20639_v55  ;;  %v23150_v55 = vadd.f32 %v26490_v63, %v26512_v27 }
 0x5c8   :  { %v24208_v11 = vpop.eup %24207 }
 0x5c9   :  { %5438 = vrot.lane.b32.xlu0 %v24208_v11, %s24500_s7  ;;  %v24210_v54 = vpop.eup %24209  ;;  %v23147_v11 = vadd.f32 %v26134_v41, %v26510_v57 }
 0x5ca   :  { %v5429_v21 = vadd.f32 1.0, %v24210_v54 }
 0x5cb   :  { %v23148_v54 = vadd.f32 %v23147_v11, %v26495_v34 }
 0x5cc   :  { %24211 = vrcp.f32 %v5429_v21  ;;  %v23151_v21 = vadd.f32 %v23150_v55, %v26500_v23 }
 0x5d6   :  { %v24212_v52 = vpop.eup %24211 }
 0x5d7   :  { %v5436_v9 = vmul.f32 0.0, %v24212_v52 }
 0x63b   :  { %v5439_v14 = vpop.permute.xlu0 %5438 }
 0x63c   :  { %v5441_v61 = vmul.f32 %v24212_v52, %v5439_v14 }
 0x63e   :  { %5443 = vrot.lane.b32.xlu1 %v5441_v61, %s24500_s7 }
 0x6b0   :  { %v5444_v58 = vpop.permute.xlu1 %5443 }
 0x6b1   :  { %v26506_v26 = vadd.f32 %v5444_v58, %v5436_v9 }
 0x6b3   :  { %24213 = vtanh.f32 %v26506_v26 }
 0x6b4   :  { %24215 = vpow2.f32 %v20640_v13 }
 0x6bd   :  { %v24214_v35 = vpop.eup %24213 }
 0x6be   :  { %5449 = vrot.lane.b32.xlu0 %v24214_v35, %s24500_s7  ;;  %v24216_v25 = vpop.eup %24215 }
 0x6bf   :  { %v5430_v1 = vadd.f32 1.0, %v24216_v25 }
 0x6c1   :  { %24217 = vrcp.f32 %v5430_v1 }
 0x6cb   :  { %v24218_v40 = vpop.eup %24217 }
 0x730   :  { %v5450_v24 = vpop.permute.xlu0 %5449 }
 0x731   :  { %v26514_v20 = vmul.f32 %v24218_v40, %v5450_v24 }
 0x733   :  { %5454 = vst.msk [vmem:[#allocation4] sm:$0xff] %vm5453_vm2, %v26514_v20  ;;  %v5462_v50 = vsel %vm4768_vm0, %v26514_v20, 0 }
 0x734   :  { %v5545_v18 = vand.u32 4294901760, %v5462_v50 }
 0x736   :  { %v5546_v39 = vsub.f32 %v5462_v50, %v5545_v18 }
 0x738   :  { %v5547_v16 = vand.u32 4294901760, %v5546_v39 }
 0x73a   :  { %v5548_v51 = vsub.f32 %v5546_v39, %v5547_v16 }
 0x73c   :  { %v5549_v2 = vand.u32 4294901760, %v5548_v51 }
 0x73e   :  { %5550 = vmatmul.mubr.f32.vlgmr.msra.gmra.mrb[10].mxu1 %v5549_v2 }
 0x73f   :  { %21418 = vmatpush1.bf16.msra.mxu1 %v26317_v6  ;;  %5700 = vmatprep.mubr.f32.mxu1 %v29187_v48 }
 0x740   :  { %21420 = vmatprep.subr.bf16.mxu1 %v26319_v30 }
 0x743   :  { %21422 = vmatpush1.bf16.msra.mxu1 %v26336_v7 }
 0x744   :  { %21424 = vmatprep.subr.bf16.mxu1 %v26347_v42 }
 0x747   :  { %21426 = vmatpush1.bf16.msra.mxu1 %v26350_v62 }
 0x748   :  { %21428 = vmatprep.subr.bf16.mxu1 %v26353_v47 }
 0x74b   :  { %21430 = vmatpush1.bf16.msra.mxu1 %v26356_v36 }
 0x74c   :  { %21432 = vmatprep.subr.bf16.mxu1 %v26361_v3 }
 0x74e   :  { %5702 = vmatmul.mubr.f32.vlgmr.msra.gmra.mrb[10].mxu1 %v5545_v18 }
 0x74f   :  { %21434 = vmatpush1.bf16.msra.mxu1 %v26366_v33  ;;  %5804 = vmatprep.mubr.f32.mxu1 %v29187_v48 }
 0x750   :  { %21436 = vmatprep.subr.bf16.mxu1 %v26371_v59 }
 0x753   :  { %21438 = vmatpush1.bf16.msra.mxu1 %v26377_v29 }
 0x754   :  { %21440 = vmatprep.subr.bf16.mxu1 %v26383_v31 }
 0x757   :  { %21442 = vmatpush1.bf16.msra.mxu1 %v26388_v15 }
 0x758   :  { %21444 = vmatprep.subr.bf16.mxu1 %v26393_v44 }
 0x75b   :  { %21446 = vmatpush1.bf16.msra.mxu1 %v26398_v12 }
 0x75c   :  { %21448 = vmatprep.subr.bf16.mxu1 %v26078_v32 }
 0x75e   :  { %5807 = vmatmul.mubr.f32.vlgmr.msra.gmra.mrb[10].mxu1 %v5546_v39  ;;  %v26587_v39 = vpop.f32.mrb[12].mxu0 }
 0x75f   :  { %21450 = vmatpush1.bf16.msra.mxu1 %v26162_v43  ;;  %5893 = vmatprep.mubr.f32.mxu1 %v29187_v48 }
 0x760   :  { %21452 = vmatprep.subr.bf16.mxu1 %v26168_v17 }
 0x763   :  { %21454 = vmatpush1.bf16.msra.mxu1 %v26189_v45 }
 0x764   :  { %21456 = vmatprep.subr.bf16.mxu1 %v26191_v22 }
 0x767   :  { %21458 = vmatpush1.bf16.msra.mxu1 %v26215_v8 }
 0x768   :  { %21460 = vmatprep.subr.bf16.mxu1 %v26220_v37 }
 0x76b   :  { %21462 = vmatpush1.bf16.msra.mxu1 %v26225_v28 }
 0x76c   :  { %21464 = vmatprep.subr.bf16.mxu1 %v26070_v10 }
 0x76e   :  { %5897 = vmatmul.mubr.f32.vlgmr.msra.gmra.mrb[10].mxu1 %v5547_v16  ;;  %v26589_v16 = vpop.f32.mrb[13].mxu0 }
 0x76f   :  { %21466 = vmatpush1.bf16.msra.mxu1 %v26416_v53  ;;  %6015 = vmatprep.mubr.f32.mxu1 %v29187_v48 }
 0x770   :  { %21468 = vmatprep.subr.bf16.mxu1 %v26423_v5 }
 0x773   :  { %21470 = vmatpush1.bf16.msra.mxu1 %v26431_v49 }
 0x774   :  { %21472 = vmatprep.subr.bf16.mxu1 %v26439_v4 }
 0x777   :  { %21474 = vmatpush1.bf16.msra.mxu1 %v26446_v0 }
 0x778   :  { %21476 = vmatprep.subr.bf16.mxu1 %v26453_v46 }
 0x77b   :  { %21478 = vmatpush1.bf16.msra.mxu1 %v26460_v60 }
 0x77c   :  { %21480 = vmatprep.subr.bf16.mxu1 %v26078_v32 }
 0x77e   :  { %6017 = vmatmul.mubr.f32.vlgmr.msra.gmra.mrb[10].mxu1 %v5545_v18 }
 0x77f   :  { %21482 = vmatpush1.bf16.msra.mxu1 %v26162_v43  ;;  %6103 = vmatprep.mubr.f32.mxu1 %v29187_v48 }
 0x780   :  { %21484 = vmatprep.subr.bf16.mxu1 %v26168_v17 }
 0x783   :  { %21486 = vmatpush1.bf16.msra.mxu1 %v26189_v45 }
 0x784   :  { %21488 = vmatprep.subr.bf16.mxu1 %v26191_v22 }
 0x787   :  { %21490 = vmatpush1.bf16.msra.mxu1 %v26215_v8 }
 0x788   :  { %21492 = vmatprep.subr.bf16.mxu1 %v26220_v37 }
 0x78b   :  { %21494 = vmatpush1.bf16.msra.mxu1 %v26225_v28 }
 0x78c   :  { %21496 = vmatprep.subr.bf16.mxu1 %v26078_v32 }
 0x78e   :  { %6105 = vmatmul.mubr.f32.vlgmr.msra.gmra.mrb[10].mxu1 %v5545_v18 }
 0x78f   :  { %21498 = vmatpush1.bf16.msra.mxu1 %v26162_v43  ;;  %6235 = vmatprep.mubr.f32.mxu1 %v29187_v48 }
 0x790   :  { %21500 = vmatprep.subr.bf16.mxu1 %v26168_v17 }
 0x793   :  { %21502 = vmatpush1.bf16.msra.mxu1 %v26189_v45 }
 0x794   :  { %21504 = vmatprep.subr.bf16.mxu1 %v26191_v22 }
 0x797   :  { %21506 = vmatpush1.bf16.msra.mxu1 %v26215_v8 }
 0x798   :  { %21508 = vmatprep.subr.bf16.mxu1 %v26220_v37 }
 0x79b   :  { %21510 = vmatpush1.bf16.msra.mxu1 %v26225_v28 }
 0x79c   :  { %21512 = vmatprep.subr.bf16.mxu1 %v26228_v19 }
 0x861   :  { %v6106_v52 = vpop.f32.mrb[10].mxu1 }
 0x862   :  { %v23149_v14 = vadd.f32 %v23148_v54, %v6106_v52  ;;  %v6108_v61 = vpop.f32.mrb[11].mxu1 }
 0x863   :  { %v23152_v9 = vadd.f32 %v23151_v21, %v6108_v61 }
 0x864   :  { %v20641_v35 = vmul.f32 -1.442695, %v23149_v14 }
 0x865   :  { %24219 = vtanh.f32 %v23152_v9  ;;  %v20642_v51 = vmul.f32 -1.442695, %v23152_v9  ;;  %v23153_v9 = vadd.f32 %v26134_v41, %v26587_v39 }
 0x866   :  { %24221 = vpow2.f32 %v20641_v35 }
 0x86f   :  { %v24220_v58 = vpop.eup %24219 }
 0x870   :  { %6130 = vrot.lane.b32.xlu1 %v24220_v58, %s24500_s7  ;;  %v24222_v13 = vpop.eup %24221 }
 0x871   :  { %v6121_v25 = vadd.f32 1.0, %v24222_v13  ;;  %v23156_v13 = vadd.f32 %v26490_v63, %v26589_v16 }
 0x873   :  { %24223 = vrcp.f32 %v6121_v25  ;;  %v23154_v25 = vadd.f32 %v23153_v9, %v26495_v34 }
 0x87d   :  { %v24224_v57 = vpop.eup %24223 }
 0x87e   :  { %v6128_v40 = vmul.f32 %v24224_v57, %v26506_v26 }
 0x8e2   :  { %v6131_v1 = vpop.permute.xlu1 %6130 }
 0x8e3   :  { %v6133_v27 = vmul.f32 %v24224_v57, %v6131_v1  ;;  %v23157_v57 = vadd.f32 %v23156_v13, %v26500_v23 }
 0x8e5   :  { %6135 = vrot.lane.b32.xlu0 %v6133_v27, %s24500_s7 }
 0x957   :  { %v6136_v24 = vpop.permute.xlu0 %6135 }
 0x958   :  { %v26583_v50 = vadd.f32 %v6136_v24, %v6128_v40 }
 0x95a   :  { %24225 = vtanh.f32 %v26583_v50 }
 0x95b   :  { %24227 = vpow2.f32 %v20642_v51 }
 0x964   :  { %v24226_v18 = vpop.eup %24225 }
 0x965   :  { %6141 = vrot.lane.b32.xlu1 %v24226_v18, %s24500_s7  ;;  %v24228_v2 = vpop.eup %24227 }
 0x966   :  { %v6122_v11 = vadd.f32 1.0, %v24228_v2 }
 0x968   :  { %24229 = vrcp.f32 %v6122_v11 }
 0x972   :  { %v24230_v55 = vpop.eup %24229 }
 0x9d7   :  { %v6142_v54 = vpop.permute.xlu1 %6141 }
 0x9d8   :  { %v26591_v26 = vmul.f32 %v24230_v55, %v6142_v54 }
 0x9da   :  { %6145 = vst.msk [vmem:[#allocation4 + $0x8] sm:$0xff] %vm5453_vm2, %v26591_v26  ;;  %v6153_v21 = vsel %vm4768_vm0, %v26591_v26, 0 }
 0x9db   :  { %v6236_v52 = vand.u32 4294901760, %v6153_v21 }
 0x9dd   :  { %v6237_v14 = vsub.f32 %v6153_v21, %v6236_v52 }
 0x9df   :  { %v6238_v61 = vand.u32 4294901760, %v6237_v14 }
 0x9e1   :  { %v6239_v58 = vsub.f32 %v6237_v14, %v6238_v61 }
 0x9e3   :  { %v6240_v35 = vand.u32 4294901760, %v6239_v58 }
 0x9e5   :  { %6241 = vmatmul.mubr.f32.vlgmr.msra.gmra.mrb[12].mxu1 %v6240_v35 }
 0x9e6   :  { %21514 = vmatpush1.bf16.msra.mxu1 %v26317_v6  ;;  %6391 = vmatprep.mubr.f32.mxu1 %v29187_v48 }
 0x9e7   :  { %21516 = vmatprep.subr.bf16.mxu1 %v26319_v30 }
 0x9ea   :  { %21518 = vmatpush1.bf16.msra.mxu1 %v26336_v7 }
 0x9eb   :  { %21520 = vmatprep.subr.bf16.mxu1 %v26347_v42 }
 0x9ee   :  { %21522 = vmatpush1.bf16.msra.mxu1 %v26350_v62 }
 0x9ef   :  { %21524 = vmatprep.subr.bf16.mxu1 %v26353_v47 }
 0x9f2   :  { %21526 = vmatpush1.bf16.msra.mxu1 %v26356_v36 }
 0x9f3   :  { %21528 = vmatprep.subr.bf16.mxu1 %v26361_v3 }
 0x9f5   :  { %6393 = vmatmul.mubr.f32.vlgmr.msra.gmra.mrb[12].mxu1 %v6236_v52 }
 0x9f6   :  { %21530 = vmatpush1.bf16.msra.mxu1 %v26366_v33  ;;  %6495 = vmatprep.mubr.f32.mxu1 %v29187_v48 }
 0x9f7   :  { %21532 = vmatprep.subr.bf16.mxu1 %v26371_v59 }
 0x9fa   :  { %21534 = vmatpush1.bf16.msra.mxu1 %v26377_v29 }
 0x9fb   :  { %21536 = vmatprep.subr.bf16.mxu1 %v26383_v31 }
 0x9fe   :  { %21538 = vmatpush1.bf16.msra.mxu1 %v26388_v15 }
 0x9ff   :  { %21540 = vmatprep.subr.bf16.mxu1 %v26393_v44 }
 0xa02   :  { %21542 = vmatpush1.bf16.msra.mxu1 %v26398_v12 }
 0xa03   :  { %21544 = vmatprep.subr.bf16.mxu1 %v26078_v32 }
 0xa05   :  { %6498 = vmatmul.mubr.f32.vlgmr.msra.gmra.mrb[12].mxu1 %v6237_v14 }
 0xa06   :  { %21546 = vmatpush1.bf16.msra.mxu1 %v26162_v43  ;;  %6584 = vmatprep.mubr.f32.mxu1 %v29187_v48 }
 0xa07   :  { %21548 = vmatprep.subr.bf16.mxu1 %v26168_v17 }
 0xa0a   :  { %21550 = vmatpush1.bf16.msra.mxu1 %v26189_v45 }
 0xa0b   :  { %21552 = vmatprep.subr.bf16.mxu1 %v26191_v22 }
 0xa0e   :  { %21554 = vmatpush1.bf16.msra.mxu1 %v26215_v8 }
 0xa0f   :  { %21556 = vmatprep.subr.bf16.mxu1 %v26220_v37 }
 0xa12   :  { %21558 = vmatpush1.bf16.msra.mxu1 %v26225_v28 }
 0xa13   :  { %21560 = vmatprep.subr.bf16.mxu1 %v26070_v10 }
 0xa15   :  { %6588 = vmatmul.mubr.f32.vlgmr.msra.gmra.mrb[12].mxu1 %v6238_v61  ;;  %v26664_v61 = vpop.f32.mrb[14].mxu0 }
 0xa16   :  { %21562 = vmatpush1.bf16.msra.mxu1 %v26416_v53  ;;  %6706 = vmatprep.mubr.f32.mxu1 %v29187_v48  ;;  %v26666_v58 = vpop.f32.mrb[15].mxu0 }
 0xa17   :  { %21564 = vmatprep.subr.bf16.mxu1 %v26423_v5 }
 0xa1a   :  { %21566 = vmatpush1.bf16.msra.mxu1 %v26431_v49 }
 0xa1b   :  { %21568 = vmatprep.subr.bf16.mxu1 %v26439_v4 }
 0xa1e   :  { %21570 = vmatpush1.bf16.msra.mxu1 %v26446_v0 }
 0xa1f   :  { %21572 = vmatprep.subr.bf16.mxu1 %v26453_v46 }
 0xa22   :  { %21574 = vmatpush1.bf16.msra.mxu1 %v26460_v60 }
 0xa23   :  { %21576 = vmatprep.subr.bf16.mxu1 %v26078_v32 }
 0xa25   :  { %6708 = vmatmul.mubr.f32.vlgmr.msra.gmra.mrb[12].mxu1 %v6236_v52 }
 0xa26   :  { %21578 = vmatpush1.bf16.msra.mxu1 %v26162_v43  ;;  %6794 = vmatprep.mubr.f32.mxu1 %v29187_v48 }
 0xa27   :  { %21580 = vmatprep.subr.bf16.mxu1 %v26168_v17 }
 0xa2a   :  { %21582 = vmatpush1.bf16.msra.mxu1 %v26189_v45 }
 0xa2b   :  { %21584 = vmatprep.subr.bf16.mxu1 %v26191_v22 }
 0xa2e   :  { %21586 = vmatpush1.bf16.msra.mxu1 %v26215_v8 }
 0xa2f   :  { %21588 = vmatprep.subr.bf16.mxu1 %v26220_v37 }
 0xa32   :  { %21590 = vmatpush1.bf16.msra.mxu1 %v26225_v28 }
 0xa33   :  { %21592 = vmatprep.subr.bf16.mxu1 %v26078_v32 }
 0xa35   :  { %6796 = vmatmul.mubr.f32.vlgmr.msra.gmra.mrb[12].mxu1 %v6236_v52 }
 0xa36   :  { %21594 = vmatpush1.bf16.msra.mxu1 %v26162_v43  ;;  %6926 = vmatprep.mubr.f32.mxu1 %v29187_v48 }
 0xa37   :  { %21596 = vmatprep.subr.bf16.mxu1 %v26168_v17 }
 0xa3a   :  { %21598 = vmatpush1.bf16.msra.mxu1 %v26189_v45 }
 0xa3b   :  { %21600 = vmatprep.subr.bf16.mxu1 %v26191_v22 }
 0xa3e   :  { %21602 = vmatpush1.bf16.msra.mxu1 %v26215_v8 }
 0xa3f   :  { %21604 = vmatprep.subr.bf16.mxu1 %v26220_v37 }
 0xa42   :  { %21606 = vmatpush1.bf16.msra.mxu1 %v26225_v28 }
 0xa43   :  { %21608 = vmatprep.subr.bf16.mxu1 %v26228_v19 }
 0xb08   :  { %v6797_v1 = vpop.f32.mrb[12].mxu1 }
 0xb09   :  { %v23155_v27 = vadd.f32 %v23154_v25, %v6797_v1  ;;  %v6799_v40 = vpop.f32.mrb[13].mxu1 }
 0xb0a   :  { %v23158_v24 = vadd.f32 %v23157_v57, %v6799_v40 }
 0xb0b   :  { %v20643_v51 = vmul.f32 -1.442695, %v23155_v27 }
 0xb0c   :  { %24231 = vtanh.f32 %v23158_v24  ;;  %v20644_v35 = vmul.f32 -1.442695, %v23158_v24  ;;  %v23159_v24 = vadd.f32 %v26134_v41, %v26664_v61 }
 0xb0d   :  { %24233 = vpow2.f32 %v20643_v51 }
 0xb16   :  { %v24232_v18 = vpop.eup %24231 }
 0xb17   :  { %6821 = vrot.lane.b32.xlu0 %v24232_v18, %s24500_s7  ;;  %v24234_v2 = vpop.eup %24233 }
 0xb18   :  { %v6812_v11 = vadd.f32 1.0, %v24234_v2 }
 0xb1a   :  { %24235 = vrcp.f32 %v6812_v11  ;;  %v23162_v11 = vadd.f32 %v26490_v63, %v26666_v58 }
 0xb24   :  { %v24236_v39 = vpop.eup %24235 }
 0xb25   :  { %v6819_v54 = vmul.f32 %v24236_v39, %v26583_v50 }
 0xb89   :  { %v6822_v55 = vpop.permute.xlu0 %6821 }
 0xb8a   :  { %v6824_v16 = vmul.f32 %v24236_v39, %v6822_v55  ;;  %v23160_v39 = vadd.f32 %v23159_v24, %v26495_v34  ;;  %v23163_v55 = vadd.f32 %v23162_v11, %v26500_v23 }
 0xb8c   :  { %6826 = vrot.lane.b32.xlu1 %v6824_v16, %s24500_s7 }
 0xbfe   :  { %v6827_v21 = vpop.permute.xlu1 %6826 }
 0xbff   :  { %v26660_v52 = vadd.f32 %v6827_v21, %v6819_v54 }
 0xc01   :  { %24237 = vtanh.f32 %v26660_v52 }
 0xc02   :  { %24239 = vpow2.f32 %v20644_v35 }
 0xc0b   :  { %v24238_v14 = vpop.eup %24237 }
 0xc0c   :  { %6832 = vrot.lane.b32.xlu0 %v24238_v14, %s24500_s7  ;;  %v24240_v9 = vpop.eup %24239 }
 0xc0d   :  { %v6813_v13 = vadd.f32 1.0, %v24240_v9 }
 0xc0f   :  { %24241 = vrcp.f32 %v6813_v13 }
 0xc19   :  { %v24242_v25 = vpop.eup %24241 }
 0xc7e   :  { %v6833_v57 = vpop.permute.xlu0 %6832 }
 0xc7f   :  { %v26668_v50 = vmul.f32 %v24242_v25, %v6833_v57 }
 0xc81   :  { %6836 = vst.msk [vmem:[#allocation4 + $0x10] sm:$0xff] %vm5453_vm2, %v26668_v50  ;;  %v6844_v1 = vsel %vm4768_vm0, %v26668_v50, 0 }
 0xc82   :  { %v6927_v27 = vand.u32 4294901760, %v6844_v1 }
 0xc84   :  { %v6928_v40 = vsub.f32 %v6844_v1, %v6927_v27 }
 0xc86   :  { %v6929_v18 = vand.u32 4294901760, %v6928_v40 }
 0xc88   :  { %v6930_v51 = vsub.f32 %v6928_v40, %v6929_v18 }
 0xc8a   :  { %v6931_v2 = vand.u32 4294901760, %v6930_v51 }
 0xc8c   :  { %6932 = vmatmul.mubr.f32.vlgmr.msra.gmra.mrb[14].mxu1 %v6931_v2 }
 0xc8d   :  { %21610 = vmatpush1.bf16.msra.mxu1 %v26317_v6  ;;  %7082 = vmatprep.mubr.f32.mxu1 %v29187_v48 }
 0xc8e   :  { %21612 = vmatprep.subr.bf16.mxu1 %v26319_v30 }
 0xc91   :  { %21614 = vmatpush1.bf16.msra.mxu1 %v26336_v7 }
 0xc92   :  { %21616 = vmatprep.subr.bf16.mxu1 %v26347_v42 }
 0xc95   :  { %21618 = vmatpush1.bf16.msra.mxu1 %v26350_v62 }
 0xc96   :  { %21620 = vmatprep.subr.bf16.mxu1 %v26353_v47 }
 0xc99   :  { %21622 = vmatpush1.bf16.msra.mxu1 %v26356_v36 }
 0xc9a   :  { %21624 = vmatprep.subr.bf16.mxu1 %v26361_v3 }
 0xc9c   :  { %7084 = vmatmul.mubr.f32.vlgmr.msra.gmra.mrb[14].mxu1 %v6927_v27 }
 0xc9d   :  { %21626 = vmatpush1.bf16.msra.mxu1 %v26366_v33  ;;  %7186 = vmatprep.mubr.f32.mxu1 %v29187_v48 }
 0xc9e   :  { %21628 = vmatprep.subr.bf16.mxu1 %v26371_v59 }
 0xca1   :  { %21630 = vmatpush1.bf16.msra.mxu1 %v26377_v29 }
 0xca2   :  { %21632 = vmatprep.subr.bf16.mxu1 %v26383_v31 }
 0xca5   :  { %21634 = vmatpush1.bf16.msra.mxu1 %v26388_v15 }
 0xca6   :  { %21636 = vmatprep.subr.bf16.mxu1 %v26393_v44 }
 0xca9   :  { %21638 = vmatpush1.bf16.msra.mxu1 %v26398_v12 }
 0xcaa   :  { %21640 = vmatprep.subr.bf16.mxu1 %v26078_v32 }
 0xcac   :  { %7189 = vmatmul.mubr.f32.vlgmr.msra.gmra.mrb[14].mxu1 %v6928_v40 }
 0xcad   :  { %21642 = vmatpush1.bf16.msra.mxu1 %v26162_v43  ;;  %7275 = vmatprep.mubr.f32.mxu1 %v29187_v48 }
 0xcae   :  { %21644 = vmatprep.subr.bf16.mxu1 %v26168_v17 }
 0xcb1   :  { %21646 = vmatpush1.bf16.msra.mxu1 %v26189_v45 }
 0xcb2   :  { %21648 = vmatprep.subr.bf16.mxu1 %v26191_v22 }
 0xcb5   :  { %21650 = vmatpush1.bf16.msra.mxu1 %v26215_v8 }
 0xcb6   :  { %21652 = vmatprep.subr.bf16.mxu1 %v26220_v37 }
 0xcb9   :  { %21654 = vmatpush1.bf16.msra.mxu1 %v26225_v28 }
 0xcba   :  { %21656 = vmatprep.subr.bf16.mxu1 %v26070_v10 }
 0xcbc   :  { %7279 = vmatmul.mubr.f32.vlgmr.msra.gmra.mrb[14].mxu1 %v6929_v18 }
 0xcbd   :  { %21658 = vmatpush1.bf16.msra.mxu1 %v26416_v53  ;;  %7397 = vmatprep.mubr.f32.mxu1 %v29187_v48 }
 0xcbe   :  { %21660 = vmatprep.subr.bf16.mxu1 %v26423_v5 }
 0xcc1   :  { %21662 = vmatpush1.bf16.msra.mxu1 %v26431_v49 }
 0xcc2   :  { %21664 = vmatprep.subr.bf16.mxu1 %v26439_v4 }
 0xcc5   :  { %21666 = vmatpush1.bf16.msra.mxu1 %v26446_v0 }
 0xcc6   :  { %21668 = vmatprep.subr.bf16.mxu1 %v26453_v46 }
 0xcc9   :  { %21670 = vmatpush1.bf16.msra.mxu1 %v26460_v60 }
 0xcca   :  { %21672 = vmatprep.subr.bf16.mxu1 %v26078_v32 }
 0xccc   :  { %7399 = vmatmul.mubr.f32.vlgmr.msra.gmra.mrb[14].mxu1 %v6927_v27 }
 0xccd   :  { %21674 = vmatpush1.bf16.msra.mxu1 %v26162_v43  ;;  %7485 = vmatprep.mubr.f32.mxu1 %v29187_v48 }
 0xcce   :  { %21676 = vmatprep.subr.bf16.mxu1 %v26168_v17 }
 0xcd1   :  { %21678 = vmatpush1.bf16.msra.mxu1 %v26189_v45 }
 0xcd2   :  { %21680 = vmatprep.subr.bf16.mxu1 %v26191_v22 }
 0xcd5   :  { %21682 = vmatpush1.bf16.msra.mxu1 %v26215_v8 }
 0xcd6   :  { %21684 = vmatprep.subr.bf16.mxu1 %v26220_v37 }
 0xcd9   :  { %21686 = vmatpush1.bf16.msra.mxu1 %v26225_v28 }
 0xcda   :  { %21688 = vmatprep.subr.bf16.mxu1 %v26078_v32 }
 0xcdc   :  { %7487 = vmatmul.mubr.f32.vlgmr.msra.gmra.mrb[14].mxu1 %v6927_v27 }
 0xcdd   :  { %21690 = vmatpush1.bf16.msra.mxu1 %v26162_v43  ;;  %7617 = vmatprep.mubr.f32.mxu1 %v29187_v48 }
 0xcde   :  { %21692 = vmatprep.subr.bf16.mxu1 %v26168_v17 }
 0xce1   :  { %21694 = vmatpush1.bf16.msra.mxu1 %v26189_v45 }
 0xce2   :  { %21696 = vmatprep.subr.bf16.mxu1 %v26191_v22 }
 0xce5   :  { %21698 = vmatpush1.bf16.msra.mxu1 %v26215_v8 }
 0xce6   :  { %21700 = vmatprep.subr.bf16.mxu1 %v26220_v37 }
 0xce9   :  { %21702 = vmatpush1.bf16.msra.mxu1 %v26225_v28 }
 0xcea   :  { %21704 = vmatprep.subr.bf16.mxu1 %v26228_v19 }
 0xdaf   :  { %v7488_v16 = vpop.f32.mrb[14].mxu1 }
 0xdb0   :  { %v23161_v54 = vadd.f32 %v23160_v39, %v7488_v16  ;;  %v7490_v21 = vpop.f32.mrb[15].mxu1 }
 0xdb1   :  { %v23164_v14 = vadd.f32 %v23163_v55, %v7490_v21 }
 0xdb2   :  { %v20645_v9 = vmul.f32 -1.442695, %v23161_v54 }
 0xdb3   :  { %24243 = vtanh.f32 %v23164_v14  ;;  %v20646_v51 = vmul.f32 -1.442695, %v23164_v14  ;;  %v26803_v14 = vadd.f32 %v26500_v23, %v26490_v63 }
 0xdb4   :  { %24245 = vpow2.f32 %v20645_v9 }
 0xdbd   :  { %v24244_v35 = vpop.eup %24243 }
 0xdbe   :  { %7512 = vrot.lane.b32.xlu1 %v24244_v35, %s24500_s7  ;;  %v24246_v13 = vpop.eup %24245 }
 0xdbf   :  { %v7503_v25 = vadd.f32 1.0, %v24246_v13 }
 0xdc1   :  { %24247 = vrcp.f32 %v7503_v25 }
 0xdcb   :  { %v24248_v61 = vpop.eup %24247 }
 0xdcc   :  { %v7510_v1 = vmul.f32 %v24248_v61, %v26660_v52 }
 0xe30   :  { %v7513_v57 = vpop.permute.xlu1 %7512 }
 0xe31   :  { %v7515_v58 = vmul.f32 %v24248_v61, %v7513_v57 }
 0xe33   :  { %7517 = vrot.lane.b32.xlu0 %v7515_v58, %s24500_s7  ;;  %v26809_v58 = vadd.f32 %v26495_v34, %v26134_v41 }
 0xea5   :  { %v7518_v27 = vpop.permute.xlu0 %7517 }
 0xea6   :  { %v26737_v40 = vadd.f32 %v7518_v27, %v7510_v1 }
 0xea8   :  { %24249 = vtanh.f32 %v26737_v40 }
 0xea9   :  { %24251 = vpow2.f32 %v20646_v51 }
 0xeb2   :  { %v24250_v18 = vpop.eup %24249 }
 0xeb3   :  { %7523 = vrot.lane.b32.xlu1 %v24250_v18, %s24500_s7  ;;  %v24252_v2 = vpop.eup %24251 }
 0xeb4   :  { %v7504_v24 = vadd.f32 1.0, %v24252_v2 }
 0xeb6   :  { %24253 = vrcp.f32 %v7504_v24 }
 0xec0   :  { %v24254_v11 = vpop.eup %24253 }
 0xf25   :  { %v7524_v39 = vpop.permute.xlu1 %7523 }
 0xf26   :  { %v26741_v55 = vmul.f32 %v24254_v11, %v7524_v39 }
 0xf28   :  { %7527 = vst.msk [vmem:[#allocation4 + $0x18] sm:$0xff] %vm5453_vm2, %v26741_v55  ;;  %v7535_v52 = vsel %vm4768_vm0, %v26741_v55, 0 }
 0xf29   :  { %v7618_v16 = vand.u32 4294901760, %v7535_v52 }
 0xf2b   :  { %v7619_v54 = vsub.f32 %v7535_v52, %v7618_v16 }
 0xf2d   :  { %v7620_v21 = vand.u32 4294901760, %v7619_v54 }
 0xf2f   :  { %v7621_v35 = vsub.f32 %v7619_v54, %v7620_v21 }
 0xf31   :  { %v7622_v9 = vand.u32 4294901760, %v7621_v35 }
 0xf33   :  { %7623 = vmatmul.mubr.f32.vlgmr.msra.gmra.mrb[0].mxu1 %v7622_v9 }
 0xf34   :  { %21706 = vmatpush1.bf16.msra.mxu1 %v26317_v6  ;;  %7773 = vmatprep.mubr.f32.mxu1 %v29187_v48 }
 0xf35   :  { %21708 = vmatprep.subr.bf16.mxu1 %v26319_v30 }
 0xf38   :  { %21710 = vmatpush1.bf16.msra.mxu1 %v26336_v7 }
 0xf39   :  { %21712 = vmatprep.subr.bf16.mxu1 %v26347_v42 }
 0xf3c   :  { %21714 = vmatpush1.bf16.msra.mxu1 %v26350_v62 }
 0xf3d   :  { %21716 = vmatprep.subr.bf16.mxu1 %v26353_v47 }
 0xf40   :  { %21718 = vmatpush1.bf16.msra.mxu1 %v26356_v36 }
 0xf41   :  { %21720 = vmatprep.subr.bf16.mxu1 %v26361_v3 }
 0xf43   :  { %7775 = vmatmul.mubr.f32.vlgmr.msra.gmra.mrb[0].mxu1 %v7618_v16 }
 0xf44   :  { %21722 = vmatpush1.bf16.msra.mxu1 %v26366_v33  ;;  %7877 = vmatprep.mubr.f32.mxu1 %v29187_v48 }
 0xf45   :  { %21724 = vmatprep.subr.bf16.mxu1 %v26371_v59 }
 0xf48   :  { %21726 = vmatpush1.bf16.msra.mxu1 %v26377_v29 }
 0xf49   :  { %21728 = vmatprep.subr.bf16.mxu1 %v26383_v31 }
 0xf4c   :  { %21730 = vmatpush1.bf16.msra.mxu1 %v26388_v15 }
 0xf4d   :  { %21732 = vmatprep.subr.bf16.mxu1 %v26393_v44 }
 0xf50   :  { %21734 = vmatpush1.bf16.msra.mxu1 %v26398_v12 }
 0xf51   :  { %21736 = vmatprep.subr.bf16.mxu1 %v26078_v32 }
 0xf53   :  { %7880 = vmatmul.mubr.f32.vlgmr.msra.gmra.mrb[0].mxu1 %v7619_v54 }
 0xf54   :  { %21738 = vmatpush1.bf16.msra.mxu1 %v26162_v43  ;;  %7966 = vmatprep.mubr.f32.mxu1 %v29187_v48 }
 0xf55   :  { %21740 = vmatprep.subr.bf16.mxu1 %v26168_v17 }
 0xf58   :  { %21742 = vmatpush1.bf16.msra.mxu1 %v26189_v45 }
 0xf59   :  { %21744 = vmatprep.subr.bf16.mxu1 %v26191_v22 }
 0xf5c   :  { %21746 = vmatpush1.bf16.msra.mxu1 %v26215_v8 }
 0xf5d   :  { %21748 = vmatprep.subr.bf16.mxu1 %v26220_v37 }
 0xf60   :  { %21750 = vmatpush1.bf16.msra.mxu1 %v26225_v28 }
 0xf61   :  { %21752 = vmatprep.subr.bf16.mxu1 %v26070_v10 }
 0xf63   :  { %7970 = vmatmul.mubr.f32.vlgmr.msra.gmra.mrb[0].mxu1 %v7620_v21 }
 0xf64   :  { %21754 = vmatpush1.bf16.msra.mxu1 %v26416_v53  ;;  %8088 = vmatprep.mubr.f32.mxu1 %v29187_v48 }
 0xf65   :  { %21756 = vmatprep.subr.bf16.mxu1 %v26423_v5 }
 0xf68   :  { %21758 = vmatpush1.bf16.msra.mxu1 %v26431_v49 }
 0xf69   :  { %21760 = vmatprep.subr.bf16.mxu1 %v26439_v4 }
 0xf6c   :  { %21762 = vmatpush1.bf16.msra.mxu1 %v26446_v0 }
 0xf6d   :  { %21764 = vmatprep.subr.bf16.mxu1 %v26453_v46 }
 0xf70   :  { %21766 = vmatpush1.bf16.msra.mxu1 %v26460_v60 }
 0xf71   :  { %21768 = vmatprep.subr.bf16.mxu1 %v26078_v32 }
 0xf73   :  { %8090 = vmatmul.mubr.f32.vlgmr.msra.gmra.mrb[0].mxu1 %v7618_v16 }
 0xf74   :  { %21770 = vmatpush1.bf16.msra.mxu1 %v26162_v43  ;;  %8176 = vmatprep.mubr.f32.mxu1 %v29187_v48 }
 0xf75   :  { %21772 = vmatprep.subr.bf16.mxu1 %v26168_v17 }
 0xf78   :  { %21774 = vmatpush1.bf16.msra.mxu1 %v26189_v45 }
 0xf79   :  { %21776 = vmatprep.subr.bf16.mxu1 %v26191_v22 }
 0xf7c   :  { %21778 = vmatpush1.bf16.msra.mxu1 %v26215_v8 }
 0xf7d   :  { %21780 = vmatprep.subr.bf16.mxu1 %v26220_v37 }
 0xf80   :  { %21782 = vmatpush1.bf16.msra.mxu1 %v26225_v28 }
 0xf81   :  { %21784 = vmatprep.subr.bf16.mxu1 %v26078_v32 }
 0xf83   :  { %8178 = vmatmul.mubr.f32.vlgmr.msra.gmra.mrb[0].mxu1 %v7618_v16 }
 0xf84   :  { %21786 = vmatpush1.bf16.msra.mxu1 %v26162_v43  ;;  %8308 = vmatprep.mubr.f32.mxu1 %v29187_v48 }
 0xf85   :  { %21788 = vmatprep.subr.bf16.mxu1 %v26168_v17 }
 0xf88   :  { %21790 = vmatpush1.bf16.msra.mxu1 %v26189_v45 }
 0xf89   :  { %21792 = vmatprep.subr.bf16.mxu1 %v26191_v22 }
 0xf8c   :  { %21794 = vmatpush1.bf16.msra.mxu1 %v26215_v8 }
 0xf8d   :  { %21796 = vmatprep.subr.bf16.mxu1 %v26220_v37 }
 0xf90   :  { %21798 = vmatpush1.bf16.msra.mxu1 %v26225_v28 }
 0xf91   :  { %21800 = vmatprep.subr.bf16.mxu1 %v26228_v19 }
0x1056   :  { %v8179_v13 = vpop.f32.mrb[0].mxu1 }
0x1057   :  { %v8181_v25 = vpop.f32.mrb[1].mxu1  ;;  %v23166_v1 = vadd.f32 %v26809_v58, %v8179_v13 }
0x1058   :  { %v23168_v61 = vadd.f32 %v26803_v14, %v8181_v25 }
0x1059   :  { %v20647_v27 = vmul.f32 -1.442695, %v23166_v1 }
0x105a   :  { %24255 = vtanh.f32 %v23168_v61  ;;  %v20648_v34 = vmul.f32 -1.442695, %v23168_v61 }
0x105b   :  { %24257 = vpow2.f32 %v20647_v27 }
0x1064   :  { %v24256_v57 = vpop.eup %24255 }
0x1065   :  { %8203 = vrot.lane.b32.xlu0 %v24256_v57, %s24500_s7  ;;  %v24258_v18 = vpop.eup %24257 }
0x1066   :  { %v8194_v51 = vadd.f32 1.0, %v24258_v18 }
0x1068   :  { %24259 = vrcp.f32 %v8194_v51 }
0x1072   :  { %v24260_v63 = vpop.eup %24259 }
0x1073   :  { %v8201_v24 = vmul.f32 %v24260_v63, %v26737_v40 }
0x10d7   :  { %v8204_v23 = vpop.permute.xlu0 %8203 }
0x10d8   :  { %v8206_v2 = vmul.f32 %v24260_v63, %v8204_v23 }
0x10da   :  { %8208 = vrot.lane.b32.xlu1 %v8206_v2, %s24500_s7 }
0x114c   :  { %v8209_v11 = vpop.permute.xlu1 %8208 }
0x114d   :  { %v26814_v39 = vadd.f32 %v8209_v11, %v8201_v24 }
0x114f   :  { %24261 = vtanh.f32 %v26814_v39 }
0x1150   :  { %24263 = vpow2.f32 %v20648_v34 }
0x1159   :  { %v24262_v41 = vpop.eup %24261 }
0x115a   :  { %8214 = vrot.lane.b32.xlu0 %v24262_v41, %s24500_s7  ;;  %v24264_v52 = vpop.eup %24263 }
0x115b   :  { %v8195_v16 = vadd.f32 1.0, %v24264_v52 }
0x115d   :  { %24265 = vrcp.f32 %v8195_v16 }
0x1167   :  { %v24266_v54 = vpop.eup %24265 }
0x11cc   :  { %v8215_v21 = vpop.permute.xlu0 %8214 }
0x11cd   :  { %v26818_v35 = vmul.f32 %v24266_v54, %v8215_v21 }
0x11cf   :  { %8218 = vst.msk [vmem:[#allocation4 + $0x20] sm:$0xff] %vm5453_vm2, %v26818_v35  ;;  %v8226_v40 = vsel %vm4768_vm0, %v26818_v35, 0 }
0x11d0   :  { %v8309_v9 = vand.u32 4294901760, %v8226_v40 }
0x11d2   :  { %v8310_v13 = vsub.f32 %v8226_v40, %v8309_v9 }
0x11d4   :  { %v8311_v25 = vand.u32 4294901760, %v8310_v13 }
0x11d6   :  { %v8312_v57 = vsub.f32 %v8310_v13, %v8311_v25 }
0x11d8   :  { %v8313_v1 = vand.u32 4294901760, %v8312_v57 }
0x11da   :  { %8314 = vmatmul.mubr.f32.vlgmr.msra.gmra.mrb[2].mxu1 %v8313_v1 }
0x11db   :  { %21802 = vmatpush1.bf16.msra.mxu1 %v26317_v6  ;;  %8464 = vmatprep.mubr.f32.mxu1 %v29187_v48 }
0x11dc   :  { %21804 = vmatprep.subr.bf16.mxu1 %v26319_v30 }
0x11df   :  { %21806 = vmatpush1.bf16.msra.mxu1 %v26336_v7 }
0x11e0   :  { %21808 = vmatprep.subr.bf16.mxu1 %v26347_v42 }
0x11e3   :  { %21810 = vmatpush1.bf16.msra.mxu1 %v26350_v62 }
0x11e4   :  { %21812 = vmatprep.subr.bf16.mxu1 %v26353_v47 }
0x11e7   :  { %21814 = vmatpush1.bf16.msra.mxu1 %v26356_v36 }
0x11e8   :  { %21816 = vmatprep.subr.bf16.mxu1 %v26361_v3 }
0x11ea   :  { %8466 = vmatmul.mubr.f32.vlgmr.msra.gmra.mrb[2].mxu1 %v8309_v9 }
0x11eb   :  { %21818 = vmatpush1.bf16.msra.mxu1 %v26366_v33  ;;  %8568 = vmatprep.mubr.f32.mxu1 %v29187_v48 }
0x11ec   :  { %21820 = vmatprep.subr.bf16.mxu1 %v26371_v59 }
0x11ef   :  { %21822 = vmatpush1.bf16.msra.mxu1 %v26377_v29 }
0x11f0   :  { %21824 = vmatprep.subr.bf16.mxu1 %v26383_v31 }
0x11f3   :  { %21826 = vmatpush1.bf16.msra.mxu1 %v26388_v15 }
0x11f4   :  { %21828 = vmatprep.subr.bf16.mxu1 %v26393_v44 }
0x11f7   :  { %21830 = vmatpush1.bf16.msra.mxu1 %v26398_v12 }
0x11f8   :  { %21832 = vmatprep.subr.bf16.mxu1 %v26078_v32 }
0x11fa   :  { %8571 = vmatmul.mubr.f32.vlgmr.msra.gmra.mrb[2].mxu1 %v8310_v13 }
0x11fb   :  { %21834 = vmatpush1.bf16.msra.mxu1 %v26162_v43  ;;  %8657 = vmatprep.mubr.f32.mxu1 %v29187_v48 }
0x11fc   :  { %21836 = vmatprep.subr.bf16.mxu1 %v26168_v17 }
0x11ff   :  { %21838 = vmatpush1.bf16.msra.mxu1 %v26189_v45 }
0x1200   :  { %21840 = vmatprep.subr.bf16.mxu1 %v26191_v22 }
0x1203   :  { %21842 = vmatpush1.bf16.msra.mxu1 %v26215_v8 }
0x1204   :  { %21844 = vmatprep.subr.bf16.mxu1 %v26220_v37 }
0x1207   :  { %21846 = vmatpush1.bf16.msra.mxu1 %v26225_v28 }
0x1208   :  { %21848 = vmatprep.subr.bf16.mxu1 %v26070_v10 }
0x120a   :  { %8661 = vmatmul.mubr.f32.vlgmr.msra.gmra.mrb[2].mxu1 %v8311_v25 }
0x120b   :  { %21850 = vmatpush1.bf16.msra.mxu1 %v26416_v53  ;;  %8779 = vmatprep.mubr.f32.mxu1 %v29187_v48 }
0x120c   :  { %21852 = vmatprep.subr.bf16.mxu1 %v26423_v5 }
0x120f   :  { %21854 = vmatpush1.bf16.msra.mxu1 %v26431_v49 }
0x1210   :  { %21856 = vmatprep.subr.bf16.mxu1 %v26439_v4 }
0x1213   :  { %21858 = vmatpush1.bf16.msra.mxu1 %v26446_v0 }
0x1214   :  { %21860 = vmatprep.subr.bf16.mxu1 %v26453_v46 }
0x1217   :  { %21862 = vmatpush1.bf16.msra.mxu1 %v26460_v60 }
0x1218   :  { %21864 = vmatprep.subr.bf16.mxu1 %v26078_v32 }
0x121a   :  { %8781 = vmatmul.mubr.f32.vlgmr.msra.gmra.mrb[2].mxu1 %v8309_v9 }
0x121b   :  { %21866 = vmatpush1.bf16.msra.mxu1 %v26162_v43  ;;  %8867 = vmatprep.mubr.f32.mxu1 %v29187_v48 }
0x121c   :  { %21868 = vmatprep.subr.bf16.mxu1 %v26168_v17 }
0x121f   :  { %21870 = vmatpush1.bf16.msra.mxu1 %v26189_v45 }
0x1220   :  { %21872 = vmatprep.subr.bf16.mxu1 %v26191_v22 }
0x1223   :  { %21874 = vmatpush1.bf16.msra.mxu1 %v26215_v8 }
0x1224   :  { %21876 = vmatprep.subr.bf16.mxu1 %v26220_v37 }
0x1227   :  { %21878 = vmatpush1.bf16.msra.mxu1 %v26225_v28 }
0x1228   :  { %21880 = vmatprep.subr.bf16.mxu1 %v26078_v32 }
0x122a   :  { %8869 = vmatmul.mubr.f32.vlgmr.msra.gmra.mrb[2].mxu1 %v8309_v9 }
0x122b   :  { %21882 = vmatpush1.bf16.msra.mxu1 %v26162_v43  ;;  %8999 = vmatprep.mubr.f32.mxu1 %v29187_v48 }
0x122c   :  { %21884 = vmatprep.subr.bf16.mxu1 %v26168_v17 }
0x122f   :  { %21886 = vmatpush1.bf16.msra.mxu1 %v26189_v45 }
0x1230   :  { %21888 = vmatprep.subr.bf16.mxu1 %v26191_v22 }
0x1233   :  { %21890 = vmatpush1.bf16.msra.mxu1 %v26215_v8 }
0x1234   :  { %21892 = vmatprep.subr.bf16.mxu1 %v26220_v37 }
0x1237   :  { %21894 = vmatpush1.bf16.msra.mxu1 %v26225_v28 }
0x1238   :  { %21896 = vmatprep.subr.bf16.mxu1 %v26228_v19 }
0x12fd   :  { %v8870_v61 = vpop.f32.mrb[2].mxu1 }
0x12fe   :  { %v8872_v27 = vpop.f32.mrb[3].mxu1  ;;  %v23170_v63 = vadd.f32 %v26809_v58, %v8870_v61 }
0x12ff   :  { %v23172_v18 = vadd.f32 %v26803_v14, %v8872_v27 }
0x1300   :  { %v20649_v23 = vmul.f32 -1.442695, %v23170_v63 }
0x1301   :  { %24267 = vtanh.f32 %v23172_v18  ;;  %v20650_v40 = vmul.f32 -1.442695, %v23172_v18 }
0x1302   :  { %24269 = vpow2.f32 %v20649_v23 }
0x130b   :  { %v24268_v51 = vpop.eup %24267 }
0x130c   :  { %8894 = vrot.lane.b32.xlu1 %v24268_v51, %s24500_s7  ;;  %v24270_v2 = vpop.eup %24269 }
0x130d   :  { %v8885_v24 = vadd.f32 1.0, %v24270_v2 }
0x130f   :  { %24271 = vrcp.f32 %v8885_v24 }
0x1319   :  { %v24272_v11 = vpop.eup %24271 }
0x131a   :  { %v8892_v52 = vmul.f32 %v24272_v11, %v26814_v39 }
0x137e   :  { %v8895_v41 = vpop.permute.xlu1 %8894 }
0x137f   :  { %v8897_v34 = vmul.f32 %v24272_v11, %v8895_v41 }
0x1381   :  { %8899 = vrot.lane.b32.xlu0 %v8897_v34, %s24500_s7 }
0x13f3   :  { %v8900_v16 = vpop.permute.xlu0 %8899 }
0x13f4   :  { %v26883_v54 = vadd.f32 %v8900_v16, %v8892_v52 }
0x13f6   :  { %24273 = vtanh.f32 %v26883_v54 }
0x13f7   :  { %24275 = vpow2.f32 %v20650_v40 }
0x1400   :  { %v24274_v21 = vpop.eup %24273 }
0x1401   :  { %8905 = vrot.lane.b32.xlu1 %v24274_v21, %s24500_s7  ;;  %v24276_v9 = vpop.eup %24275 }
0x1402   :  { %v8886_v13 = vadd.f32 1.0, %v24276_v9 }
0x1404   :  { %24277 = vrcp.f32 %v8886_v13 }
0x140e   :  { %v24278_v25 = vpop.eup %24277 }
0x1473   :  { %v8906_v57 = vpop.permute.xlu1 %8905 }
0x1474   :  { %v26887_v1 = vmul.f32 %v24278_v25, %v8906_v57 }
0x1476   :  { %8909 = vst.msk [vmem:[#allocation4 + $0x28] sm:$0xff] %vm5453_vm2, %v26887_v1  ;;  %v8917_v39 = vsel %vm4768_vm0, %v26887_v1, 0 }
0x1477   :  { %v9000_v61 = vand.u32 4294901760, %v8917_v39 }
0x1479   :  { %v9001_v27 = vsub.f32 %v8917_v39, %v9000_v61 }
0x147b   :  { %v9002_v51 = vand.u32 4294901760, %v9001_v27 }
0x147d   :  { %v9003_v63 = vsub.f32 %v9001_v27, %v9002_v51 }
0x147f   :  { %v9004_v23 = vand.u32 4294901760, %v9003_v63 }
0x1481   :  { %9005 = vmatmul.mubr.f32.vlgmr.msra.gmra.mrb[4].mxu1 %v9004_v23 }
0x1482   :  { %21898 = vmatpush1.bf16.msra.mxu1 %v26317_v6  ;;  %9155 = vmatprep.mubr.f32.mxu1 %v29187_v48 }
0x1483   :  { %21900 = vmatprep.subr.bf16.mxu1 %v26319_v30 }
0x1486   :  { %21902 = vmatpush1.bf16.msra.mxu1 %v26336_v7 }
0x1487   :  { %21904 = vmatprep.subr.bf16.mxu1 %v26347_v42 }
0x148a   :  { %21906 = vmatpush1.bf16.msra.mxu1 %v26350_v62 }
0x148b   :  { %21908 = vmatprep.subr.bf16.mxu1 %v26353_v47 }
0x148e   :  { %21910 = vmatpush1.bf16.msra.mxu1 %v26356_v36 }
0x148f   :  { %21912 = vmatprep.subr.bf16.mxu1 %v26361_v3 }
0x1491   :  { %9157 = vmatmul.mubr.f32.vlgmr.msra.gmra.mrb[4].mxu1 %v9000_v61 }
0x1492   :  { %21914 = vmatpush1.bf16.msra.mxu1 %v26366_v33  ;;  %9259 = vmatprep.mubr.f32.mxu1 %v29187_v48 }
0x1493   :  { %21916 = vmatprep.subr.bf16.mxu1 %v26371_v59 }
0x1496   :  { %21918 = vmatpush1.bf16.msra.mxu1 %v26377_v29 }
0x1497   :  { %21920 = vmatprep.subr.bf16.mxu1 %v26383_v31 }
0x149a   :  { %21922 = vmatpush1.bf16.msra.mxu1 %v26388_v15 }
0x149b   :  { %21924 = vmatprep.subr.bf16.mxu1 %v26393_v44 }
0x149e   :  { %21926 = vmatpush1.bf16.msra.mxu1 %v26398_v12 }
0x149f   :  { %21928 = vmatprep.subr.bf16.mxu1 %v26078_v32 }
0x14a1   :  { %9262 = vmatmul.mubr.f32.vlgmr.msra.gmra.mrb[4].mxu1 %v9001_v27 }
0x14a2   :  { %21930 = vmatpush1.bf16.msra.mxu1 %v26162_v43  ;;  %9348 = vmatprep.mubr.f32.mxu1 %v29187_v48 }
0x14a3   :  { %21932 = vmatprep.subr.bf16.mxu1 %v26168_v17 }
0x14a6   :  { %21934 = vmatpush1.bf16.msra.mxu1 %v26189_v45 }
0x14a7   :  { %21936 = vmatprep.subr.bf16.mxu1 %v26191_v22 }
0x14aa   :  { %21938 = vmatpush1.bf16.msra.mxu1 %v26215_v8 }
0x14ab   :  { %21940 = vmatprep.subr.bf16.mxu1 %v26220_v37 }
0x14ae   :  { %21942 = vmatpush1.bf16.msra.mxu1 %v26225_v28 }
0x14af   :  { %21944 = vmatprep.subr.bf16.mxu1 %v26070_v10 }
0x14b1   :  { %9352 = vmatmul.mubr.f32.vlgmr.msra.gmra.mrb[4].mxu1 %v9002_v51 }
0x14b2   :  { %21946 = vmatpush1.bf16.msra.mxu1 %v26416_v53  ;;  %9470 = vmatprep.mubr.f32.mxu1 %v29187_v48 }
0x14b3   :  { %21948 = vmatprep.subr.bf16.mxu1 %v26423_v5 }
0x14b6   :  { %21950 = vmatpush1.bf16.msra.mxu1 %v26431_v49 }
0x14b7   :  { %21952 = vmatprep.subr.bf16.mxu1 %v26439_v4 }
0x14ba   :  { %21954 = vmatpush1.bf16.msra.mxu1 %v26446_v0 }
0x14bb   :  { %21956 = vmatprep.subr.bf16.mxu1 %v26453_v46 }
0x14be   :  { %21958 = vmatpush1.bf16.msra.mxu1 %v26460_v60 }
0x14bf   :  { %21960 = vmatprep.subr.bf16.mxu1 %v26078_v32 }
0x14c1   :  { %9472 = vmatmul.mubr.f32.vlgmr.msra.gmra.mrb[4].mxu1 %v9000_v61 }
0x14c2   :  { %21962 = vmatpush1.bf16.msra.mxu1 %v26162_v43  ;;  %9558 = vmatprep.mubr.f32.mxu1 %v29187_v48 }
0x14c3   :  { %21964 = vmatprep.subr.bf16.mxu1 %v26168_v17 }
0x14c6   :  { %21966 = vmatpush1.bf16.msra.mxu1 %v26189_v45 }
0x14c7   :  { %21968 = vmatprep.subr.bf16.mxu1 %v26191_v22 }
0x14ca   :  { %21970 = vmatpush1.bf16.msra.mxu1 %v26215_v8 }
0x14cb   :  { %21972 = vmatprep.subr.bf16.mxu1 %v26220_v37 }
0x14ce   :  { %21974 = vmatpush1.bf16.msra.mxu1 %v26225_v28 }
0x14cf   :  { %21976 = vmatprep.subr.bf16.mxu1 %v26078_v32 }
0x14d1   :  { %9560 = vmatmul.mubr.f32.vlgmr.msra.gmra.mrb[4].mxu1 %v9000_v61 }
0x14d2   :  { %21978 = vmatpush1.bf16.msra.mxu1 %v26162_v43  ;;  %9690 = vmatprep.mubr.f32.mxu1 %v29187_v48 }
0x14d3   :  { %21980 = vmatprep.subr.bf16.mxu1 %v26168_v17 }
0x14d6   :  { %21982 = vmatpush1.bf16.msra.mxu1 %v26189_v45 }
0x14d7   :  { %21984 = vmatprep.subr.bf16.mxu1 %v26191_v22 }
0x14da   :  { %21986 = vmatpush1.bf16.msra.mxu1 %v26215_v8 }
0x14db   :  { %21988 = vmatprep.subr.bf16.mxu1 %v26220_v37 }
0x14de   :  { %21990 = vmatpush1.bf16.msra.mxu1 %v26225_v28 }
0x14df   :  { %21992 = vmatprep.subr.bf16.mxu1 %v26228_v19 }
0x15a4   :  { %v9561_v18 = vpop.f32.mrb[4].mxu1 }
0x15a5   :  { %v9563_v2 = vpop.f32.mrb[5].mxu1  ;;  %v23174_v41 = vadd.f32 %v26809_v58, %v9561_v18 }
0x15a6   :  { %v23176_v24 = vadd.f32 %v26803_v14, %v9563_v2 }
0x15a7   :  { %v20651_v34 = vmul.f32 -1.442695, %v23174_v41 }
0x15a8   :  { %24279 = vtanh.f32 %v23176_v24  ;;  %v20652_v39 = vmul.f32 -1.442695, %v23176_v24 }
0x15a9   :  { %24281 = vpow2.f32 %v20651_v34 }
0x15b2   :  { %v24280_v11 = vpop.eup %24279 }
0x15b3   :  { %9585 = vrot.lane.b32.xlu0 %v24280_v11, %s24500_s7  ;;  %v24282_v52 = vpop.eup %24281 }
0x15b4   :  { %v9576_v16 = vadd.f32 1.0, %v24282_v52  ;;  %v10327_v52 = vld [vmem:[%s29089_s8 + $0x70] sm:$0xff] }
0x15b6   :  { %24283 = vrcp.f32 %v9576_v16 }
0x15c0   :  { %v24284_v21 = vpop.eup %24283 }
0x15c1   :  { %v9583_v19 = vmul.f32 %v24284_v21, %v26883_v54 }
0x1625   :  { %v9586_v40 = vpop.permute.xlu0 %9585 }
0x1626   :  { %v9588_v9 = vmul.f32 %v24284_v21, %v9586_v40 }
0x1628   :  { %9590 = vrot.lane.b32.xlu1 %v9588_v9, %s24500_s7  ;;  %v10367_v9 = vand.u32 4294901760, %v10327_v52 }
0x169a   :  { %v9591_v13 = vpop.permute.xlu1 %9590 }
0x169b   :  { %v26952_v25 = vadd.f32 %v9591_v13, %v9583_v19 }
0x169d   :  { %24285 = vtanh.f32 %v26952_v25 }
0x169e   :  { %24287 = vpow2.f32 %v20652_v39 }
0x16a7   :  { %v24286_v57 = vpop.eup %24285 }
0x16a8   :  { %9596 = vrot.lane.b32.xlu0 %v24286_v57, %s24500_s7  ;;  %v24288_v61 = vpop.eup %24287 }
0x16a9   :  { %v9577_v27 = vadd.f32 1.0, %v24288_v61 }
0x16ab   :  { %24289 = vrcp.f32 %v9577_v27  ;;  %v27068_v27 = vsub.f32 %v10327_v52, %v10367_v9 }
0x16b5   :  { %v24290_v51 = vpop.eup %24289 }
0x171a   :  { %v9597_v63 = vpop.permute.xlu0 %9596 }
0x171b   :  { %v26956_v23 = vmul.f32 %v24290_v51, %v9597_v63 }
0x171d   :  { %9600 = vst.msk [vmem:[#allocation4 + $0x30] sm:$0xff] %vm5453_vm2, %v26956_v23  ;;  %v9608_v54 = vsel %vm4768_vm0, %v26956_v23, 0 }
0x171e   :  { %v9691_v18 = vand.u32 4294901760, %v9608_v54 }
0x1720   :  { %v9692_v2 = vsub.f32 %v9608_v54, %v9691_v18 }
0x1722   :  { %v9693_v11 = vand.u32 4294901760, %v9692_v2 }
0x1724   :  { %v9694_v41 = vsub.f32 %v9692_v2, %v9693_v11 }
0x1726   :  { %v9695_v34 = vand.u32 4294901760, %v9694_v41 }
0x1728   :  { %9696 = vmatmul.mubr.f32.vlgmr.msra.gmra.mrb[6].mxu1 %v9695_v34 }
0x1729   :  { %21994 = vmatpush1.bf16.msra.mxu1 %v26317_v6  ;;  %9846 = vmatprep.mubr.f32.mxu1 %v29187_v48 }
0x172a   :  { %21996 = vmatprep.subr.bf16.mxu1 %v26319_v30 }
0x172d   :  { %21998 = vmatpush1.bf16.msra.mxu1 %v26336_v7 }
0x172e   :  { %22000 = vmatprep.subr.bf16.mxu1 %v26347_v42 }
0x1731   :  { %22002 = vmatpush1.bf16.msra.mxu1 %v26350_v62 }
0x1732   :  { %22004 = vmatprep.subr.bf16.mxu1 %v26353_v47 }
0x1735   :  { %22006 = vmatpush1.bf16.msra.mxu1 %v26356_v36 }
0x1736   :  { %22008 = vmatprep.subr.bf16.mxu1 %v26361_v3 }
0x1738   :  { %9848 = vmatmul.mubr.f32.vlgmr.msra.gmra.mrb[6].mxu1 %v9691_v18 }
0x1739   :  { %22010 = vmatpush1.bf16.msra.mxu1 %v26366_v33  ;;  %9950 = vmatprep.mubr.f32.mxu1 %v29187_v48 }
0x173a   :  { %22012 = vmatprep.subr.bf16.mxu1 %v26371_v59  ;;  %v10322_v59 = vld [vmem:[%s29089_s8 + $0x48] sm:$0xff] }
0x173d   :  { %22014 = vmatpush1.bf16.msra.mxu1 %v26377_v29  ;;  %v10324_v29 = vld [vmem:[%s29089_s8 + $0x58] sm:$0xff] }
0x173e   :  { %22016 = vmatprep.subr.bf16.mxu1 %v26383_v31  ;;  %v10321_v31 = vld [vmem:[%s29089_s8 + $0x40] sm:$0xff] }
0x1741   :  { %22018 = vmatpush1.bf16.msra.mxu1 %v26388_v15  ;;  %v10353_v15 = vand.u32 4294901760, %v10322_v59 }
0x1742   :  { %22020 = vmatprep.subr.bf16.mxu1 %v26393_v44  ;;  %v10357_v44 = vand.u32 4294901760, %v10324_v29 }
0x1745   :  { %22022 = vmatpush1.bf16.msra.mxu1 %v26398_v12  ;;  %v10323_v12 = vld [vmem:[%s29089_s8 + $0x50] sm:$0xff] }
0x1746   :  { %22024 = vmatprep.subr.bf16.mxu1 %v26078_v32 }
0x1748   :  { %9953 = vmatmul.mubr.f32.vlgmr.msra.gmra.mrb[6].mxu1 %v9692_v2 }
0x1749   :  { %22026 = vmatpush1.bf16.msra.mxu1 %v26162_v43  ;;  %10039 = vmatprep.mubr.f32.mxu1 %v29187_v48 }
0x174a   :  { %22028 = vmatprep.subr.bf16.mxu1 %v26168_v17 }
0x174d   :  { %22030 = vmatpush1.bf16.msra.mxu1 %v26189_v45 }
0x174e   :  { %22032 = vmatprep.subr.bf16.mxu1 %v26191_v22 }
0x1751   :  { %22034 = vmatpush1.bf16.msra.mxu1 %v26215_v8 }
0x1752   :  { %22036 = vmatprep.subr.bf16.mxu1 %v26220_v37 }
0x1755   :  { %22038 = vmatpush1.bf16.msra.mxu1 %v26225_v28 }
0x1756   :  { %22040 = vmatprep.subr.bf16.mxu1 %v26070_v10 }
0x1758   :  { %10043 = vmatmul.mubr.f32.vlgmr.msra.gmra.mrb[6].mxu1 %v9693_v11 }
0x1759   :  { %22042 = vmatpush1.bf16.msra.mxu1 %v26416_v53  ;;  %10161 = vmatprep.mubr.f32.mxu1 %v29187_v48  ;;  %v10355_v53 = vand.u32 4294901760, %v10321_v31 }
0x175a   :  { %22044 = vmatprep.subr.bf16.mxu1 %v26423_v5  ;;  %v10359_v5 = vand.u32 4294901760, %v10323_v12 }
0x175d   :  { %22046 = vmatpush1.bf16.msra.mxu1 %v26431_v49  ;;  %v27032_v49 = vpack.c.bf16 %v10357_v44, %v10353_v15 }
0x175e   :  { %22048 = vmatprep.subr.bf16.mxu1 %v26439_v4  ;;  %v27034_v4 = vsub.f32 %v10321_v31, %v10355_v53 }
0x175f   :  { %22072 = vmatprep.subr.bf16.mxu0 %v27032_v49 }
0x1761   :  { %22050 = vmatpush1.bf16.msra.mxu1 %v26446_v0  ;;  %v27036_v0 = vpack.c.bf16 %v10359_v5, %v10355_v53 }
0x1762   :  { %22052 = vmatprep.subr.bf16.mxu1 %v26453_v46  ;;  %v27038_v46 = vsub.f32 %v10323_v12, %v10359_v5 }
0x1763   :  { %22074 = vmatpush1.bf16.msra.mxu0 %v27036_v0 }
0x1765   :  { %22054 = vmatpush1.bf16.msra.mxu1 %v26460_v60  ;;  %v27042_v60 = vsub.f32 %v10322_v59, %v10353_v15  ;;  %v22089_v15 = vpack.c.bf16 %v27038_v46, %v27034_v4 }
0x1766   :  { %22056 = vmatprep.subr.bf16.mxu1 %v26078_v32 }
0x1767   :  { %v10516_v51 = vand.u32 4294901760, %v27042_v60 }
0x1768   :  { %10163 = vmatmul.mubr.f32.vlgmr.msra.gmra.mrb[6].mxu1 %v9691_v18 }
0x1769   :  { %22058 = vmatpush1.bf16.msra.mxu1 %v26162_v43  ;;  %10249 = vmatprep.mubr.f32.mxu1 %v29187_v48  ;;  %v10517_v54 = vsub.f32 %v27042_v60, %v10516_v51 }
0x176a   :  { %22060 = vmatprep.subr.bf16.mxu1 %v26168_v17 }
0x176b   :  { %v10518_v2 = vand.u32 4294901760, %v10517_v54 }
0x176d   :  { %22062 = vmatpush1.bf16.msra.mxu1 %v26189_v45 }
0x176e   :  { %22064 = vmatprep.subr.bf16.mxu1 %v26191_v22 }
0x1771   :  { %22066 = vmatpush1.bf16.msra.mxu1 %v26215_v8 }
0x1772   :  { %22068 = vmatprep.subr.bf16.mxu1 %v26220_v37 }
0x1775   :  { %22070 = vmatpush1.bf16.msra.mxu1 %v26225_v28 }
0x1778   :  { %10251 = vmatmul.mubr.f32.vlgmr.msra.gmra.mrb[6].mxu1 %v9691_v18 }
0x1779   :  { %21019 = vmatprep.mubr.msk.f32.mxu1 %vm24503_vm9, %v29187_v48 }
0x184b   :  { %v10252_v10 = vpop.f32.mrb[6].mxu1 }
0x184c   :  { %v10254_v32 = vpop.f32.mrb[7].mxu1  ;;  %v23178_v17 = vadd.f32 %v26809_v58, %v10252_v10  ;;  %v27053_v58 = vsub.f32 %v10324_v29, %v10357_v44  ;;  %v10522_v10 = vand.u32 4294901760, %v27034_v4 }
0x184d   :  { %v23180_v6 = vadd.f32 %v26803_v14, %v10254_v32  ;;  %v10325_v14 = vld [vmem:[%s29089_s8 + $0x60] sm:$0xff]  ;;  %v10534_v32 = vand.u32 4294901760, %v27038_v46 }
0x184e   :  { %v20653_v45 = vmul.f32 -1.442695, %v23178_v17  ;;  %v10363_v16 = vand.u32 4294901760, %v10325_v14  ;;  %v10528_v63 = vand.u32 4294901760, %v27053_v58  ;;  %v22087_v31 = vpack.c.bf16 %v27053_v58, %v27042_v60 }
0x184f   :  { %24291 = vtanh.f32 %v23180_v6  ;;  %v20654_v62 = vmul.f32 -1.442695, %v23180_v6  ;;  %v10523_v6 = vsub.f32 %v27034_v4, %v10522_v10  ;;  %v22105_v60 = vpack.c.bf16 %v10534_v32, %v10522_v10  ;;  %v10316_v4 = vld [vmem:[%s29089_s8 + $0x18] sm:$0xff]  ;;  %v10318_v10 = vld [vmem:[%s29089_s8 + $0x28] sm:$0xff] }
0x1850   :  { %24293 = vpow2.f32 %v20653_v45  ;;  %v27064_v39 = vpack.c.bf16 %v10367_v9, %v10363_v16  ;;  %v27066_v61 = vsub.f32 %v10325_v14, %v10363_v16  ;;  %v10529_v18 = vsub.f32 %v27053_v58, %v10528_v63 }
0x1851   :  { %v10524_v17 = vand.u32 4294901760, %v10523_v6 }
0x1852   :  { %v10530_v11 = vand.u32 4294901760, %v10529_v18  ;;  %v22093_v12 = vpack.c.bf16 %v27068_v27, %v27066_v61 }
0x1854   :  { %v22079_v34 = vpack.c.bf16 %v10530_v11, %v10518_v2 }
0x1859   :  { %v24292_v43 = vpop.eup %24291 }
0x185a   :  { %10276 = vrot.lane.b32.xlu1 %v24292_v43, %s24500_s7  ;;  %v24294_v22 = vpop.eup %24293 }
0x185b   :  { %v10267_v30 = vadd.f32 1.0, %v24294_v22 }
0x185d   :  { %24295 = vrcp.f32 %v10267_v30 }
0x1867   :  { %v24296_v8 = vpop.eup %24295 }
0x1868   :  { %v10274_v28 = vmul.f32 %v24296_v8, %v26952_v25 }
0x18cc   :  { %v10277_v37 = vpop.permute.xlu1 %10276 }
0x18cd   :  { %v10279_v47 = vmul.f32 %v24296_v8, %v10277_v37 }
0x18cf   :  { %10281 = vrot.lane.b32.xlu0 %v10279_v47, %s24500_s7 }
0x1941   :  { %v10282_v36 = vpop.permute.xlu0 %10281 }
0x1942   :  { %v10284_v7 = vadd.f32 %v10282_v36, %v10274_v28  ;;  %v10546_v28 = vand.u32 4294901760, %v27066_v61 }
0x1944   :  { %24297 = vtanh.f32 %v10284_v7 }
0x1945   :  { %24299 = vpow2.f32 %v20654_v62 }
0x194e   :  { %v24298_v42 = vpop.eup %24297 }
0x194f   :  { %10287 = vrot.lane.b32.xlu1 %v24298_v42, %s24500_s7  ;;  %v24300_v3 = vpop.eup %24299  ;;  %v10547_v42 = vsub.f32 %v27066_v61, %v10546_v28  ;;  %v10315_v61 = vld [vmem:[%s29089_s8 + $0x10] sm:$0xff] }
0x1950   :  { %v10268_v33 = vadd.f32 1.0, %v24300_v3 }
0x1952   :  { %24301 = vrcp.f32 %v10268_v33  ;;  %v10548_v33 = vand.u32 4294901760, %v10547_v42 }
0x1953   :  { %9602 = vrot.lane.b32.xlu1 %v26956_v23, %s24501_s0 }
0x1957   :  { %8220 = vrot.lane.b32.xlu1 %v26818_v35, %s24501_s0 }
0x195b   :  { %6838 = vrot.lane.b32.xlu1 %v26668_v50, %s24501_s0  ;;  %v10328_v50 = vld [vmem:[%s29089_s8 + $0x78] sm:$0xff] }
0x195c   :  { %v10365_v24 = vand.u32 4294901760, %v10328_v50  ;;  %v24302_v21 = vpop.eup %24301 }
0x195e   :  { %v27062_v57 = vsub.f32 %v10328_v50, %v10365_v24 }
0x195f   :  { %5456 = vrot.lane.b32.xlu1 %v26514_v20, %s24501_s0  ;;  %v10326_v20 = vld [vmem:[%s29089_s8 + $0x68] sm:$0xff] }
0x1960   :  { %v10361_v35 = vand.u32 4294901760, %v10326_v20  ;;  %v10552_v8 = vand.u32 4294901760, %v27062_v57 }
0x1962   :  { %v27058_v13 = vpack.c.bf16 %v10365_v24, %v10361_v35  ;;  %v27060_v25 = vsub.f32 %v10326_v20, %v10361_v35  ;;  %v10553_v47 = vsub.f32 %v27062_v57, %v10552_v8 }
0x1964   :  { %22076 = vmatprep.subr.bf16.mxu0 %v27058_v13  ;;  %v10554_v7 = vand.u32 4294901760, %v10553_v47  ;;  %v22091_v44 = vpack.c.bf16 %v27062_v57, %v27060_v25 }
0x1965   :  { %22078 = vmatpush1.bf16.msra.mxu0 %v27064_v39 }
0x1966   :  { %22080 = vmatprep.subr.bf16.mxu0 %v22079_v34 }
0x19c1   :  { %v10288_v40 = vpop.permute.xlu1 %10287 }
0x19c2   :  { %v10290_v19 = vmul.f32 %v24302_v21, %v10288_v40 }
0x19c4   :  { %10291 = vst.msk [vmem:[#allocation4 + $0x38] sm:$0xff] %vm5453_vm2, %v10290_v19  ;;  %10293 = vrot.lane.b32.xlu0 %v10290_v19, %s24501_s0 }
0x19c5   :  { %v9603_v23 = vpop.permute.xlu1 %9602 }
0x19c6   :  { %9605 = vst.msk [vmem:[#allocation5 + $0x8] sm:$0xff] %vm5453_vm2, %v9603_v23 }
0x19c8   :  { %8911 = vrot.lane.b32.xlu0 %v26887_v1, %s24501_s0  ;;  %v10535_v1 = vsub.f32 %v27038_v46, %v10534_v32  ;;  %v10320_v32 = vld [vmem:[%s29089_s8 + $0x38] sm:$0xff] }
0x19c9   :  { %v8221_v41 = vpop.permute.xlu1 %8220 }
0x19ca   :  { %8223 = vst.msk [vmem:[#allocation5 + $0x18] sm:$0xff] %vm5453_vm2, %v8221_v41  ;;  %v10536_v45 = vand.u32 4294901760, %v10535_v1 }
0x19cc   :  { %7529 = vrot.lane.b32.xlu0 %v26741_v55, %s24501_s0  ;;  %v22081_v22 = vpack.c.bf16 %v10536_v45, %v10524_v17  ;;  %v10540_v55 = vand.u32 4294901760, %v27060_v25 }
0x19cd   :  { %v6839_v43 = vpop.permute.xlu1 %6838  ;;  %v10306_v5 = vld [vmem:[#allocation5 + $0x8] sm:$0xff] }
0x19ce   :  { %6841 = vst.msk [vmem:[#allocation5 + $0x28] sm:$0xff] %vm5453_vm2, %v6839_v43  ;;  %v10541_v37 = vsub.f32 %v27060_v25, %v10540_v55  ;;  %v10333_v20 = vsel %vm5453_vm2, %v10306_v5, 0  ;;  %v22107_v58 = vpack.c.bf16 %v10552_v8, %v10540_v55  ;;  %v11267_v25 = vand.u32 4294901760, %v10316_v4 }
0x19cf   :  { %v27127_v14 = vand.u32 4294901760, %v10333_v20  ;;  %v11269_v8 = vand.u32 4294901760, %v10315_v61 }
0x19d0   :  { %6147 = vrot.lane.b32.xlu0 %v26591_v26, %s24501_s0  ;;  %v10558_v26 = vand.u32 4294901760, %v27068_v27  ;;  %v10542_v36 = vand.u32 4294901760, %v10541_v37 }
0x19d1   :  { %v5457_v30 = vpop.permute.xlu1 %5456  ;;  %v10308_v35 = vld [vmem:[#allocation5 + $0x18] sm:$0xff]  ;;  %v27134_v40 = vsub.f32 %v10333_v20, %v27127_v14 }
0x19d2   :  { %5459 = vst.msk [vmem:[#allocation5 + $0x38] sm:$0xff] %vm5453_vm2, %v5457_v30  ;;  %v10559_v62 = vsub.f32 %v27068_v27, %v10558_v26  ;;  %v22083_v3 = vpack.c.bf16 %v10554_v7, %v10542_v36  ;;  %v10339_v9 = vsel %vm5453_vm2, %v10308_v35, 0 }
0x19d3   :  { %v27142_v2 = vand.u32 4294901760, %v10339_v9  ;;  %v27148_v41 = vand.u32 4294901760, %v27134_v40 }
0x19d4   :  { %v10560_v59 = vand.u32 4294901760, %v10559_v62 }
0x19d5   :  { %29234 = vst [vmem:[#allocation19_spill] sm:$0xff] %v27148_v41  ;;  %v10310_v17 = vld [vmem:[#allocation5 + $0x28] sm:$0xff]  ;;  %v27158_v45 = vsub.f32 %v10339_v9, %v27142_v2  ;;  %v10440_v47 = vsub.f32 %v27134_v40, %v27148_v41 }
0x19d6   :  { %v22085_v29 = vpack.c.bf16 %v10560_v59, %v10548_v33  ;;  %v10345_v42 = vsel %vm5453_vm2, %v10310_v17, 0 }
0x19d7   :  { %v27174_v33 = vand.u32 4294901760, %v27158_v45  ;;  %v27176_v59 = vand.u32 4294901760, %v10440_v47  ;;  %v27183_v20 = vand.u32 4294901760, %v10345_v42 }
0x19d9   :  { %29236 = vst [vmem:[#allocation21_spill] sm:$0xff] %v27174_v33  ;;  %v10462_v35 = vsub.f32 %v27158_v45, %v27174_v33 }
0x1a36   :  { %v10294_v53 = vpop.permute.xlu0 %10293 }
0x1a37   :  { %10296 = vst.msk [vmem:[#allocation5] sm:$0xff] %vm5453_vm2, %v10294_v53 }
0x1a3a   :  { %v8912_v50 = vpop.permute.xlu0 %8911 }
0x1a3b   :  { %8914 = vst.msk [vmem:[#allocation5 + $0x10] sm:$0xff] %vm5453_vm2, %v8912_v50 }
0x1a3e   :  { %v7530_v24 = vpop.permute.xlu0 %7529  ;;  %v10305_v52 = vld [vmem:[#allocation5] sm:$0xff] }
0x1a3f   :  { %7532 = vst.msk [vmem:[#allocation5 + $0x20] sm:$0xff] %vm5453_vm2, %v7530_v24  ;;  %v10330_v16 = vsel %vm5453_vm2, %v10305_v52, 0  ;;  %v27196_v52 = vsub.f32 %v10345_v42, %v27183_v20 }
0x1a40   :  { %v27131_v21 = vand.u32 4294901760, %v10330_v16 }
0x1a41   :  { %29238 = vst [vmem:[#allocation24_spill] sm:$0xff] %v27196_v52 }
0x1a42   :  { %v6148_v19 = vpop.permute.xlu0 %6147  ;;  %v27138_v23 = vsub.f32 %v10330_v16, %v27131_v21  ;;  %v10307_v54 = vld [vmem:[#allocation5 + $0x10] sm:$0xff] }
0x1a43   :  { %6150 = vst.msk [vmem:[#allocation5 + $0x30] sm:$0xff] %vm5453_vm2, %v6148_v19  ;;  %v10336_v18 = vsel %vm5453_vm2, %v10307_v54, 0  ;;  %v27203_v19 = vand.u32 4294901760, %v10462_v35  ;;  %v27208_v54 = vand.u32 4294901760, %v27196_v52 }
0x1a44   :  { %v27145_v11 = vand.u32 4294901760, %v27138_v23  ;;  %v27150_v34 = vand.u32 4294901760, %v10336_v18 }
0x1a45   :  { %29239 = vst [vmem:[#allocation22_spill] sm:$0xff] %v27208_v54 }
0x1a46   :  { %29233 = vst [vmem:[#allocation18_spill] sm:$0xff] %v27145_v11  ;;  %v10429_v6 = vsub.f32 %v27138_v23, %v27145_v11  ;;  %v27155_v1 = vsub.f32 %v10336_v18, %v27150_v34  ;;  %v10309_v43 = vld [vmem:[#allocation5 + $0x20] sm:$0xff] }
0x1a47   :  { %v10342_v30 = vsel %vm5453_vm2, %v10309_v43, 0  ;;  %v10484_v43 = vsub.f32 %v27196_v52, %v27208_v54 }
0x1a48   :  { %v27161_v37 = vand.u32 4294901760, %v10429_v6  ;;  %v27166_v36 = vand.u32 4294901760, %v27155_v1  ;;  %v27168_v7 = vand.u32 4294901760, %v10342_v30 }
0x1a49   :  { %v27229_v47 = vand.u32 4294901760, %v10484_v43 }
0x1a4a   :  { %29235 = vst [vmem:[#allocation20_spill] sm:$0xff] %v27166_v36  ;;  %10431 = vmatmul.mubr.f32.vlgmr.msra.gmra.mrb[16].mxu0 %v27161_v37  ;;  %v10311_v62 = vld [vmem:[#allocation5 + $0x30] sm:$0xff]  ;;  %v10451_v53 = vsub.f32 %v27155_v1, %v27166_v36  ;;  %v27181_v5 = vsub.f32 %v10342_v30, %v27168_v7 }
0x1a4b   :  { %22082 = vmatpush1.bf16.msra.mxu0 %v22081_v22  ;;  %10436 = vmatprep.mubr.f32.mxu0 %v29187_v48  ;;  %v10348_v50 = vsel %vm5453_vm2, %v10311_v62, 0  ;;  %v10312_v22 = vld [vmem:[#allocation5 + $0x38] sm:$0xff] }
0x1a4c   :  { %22084 = vmatprep.subr.bf16.mxu0 %v22083_v3  ;;  %v27190_v24 = vand.u32 4294901760, %v10451_v53  ;;  %v27193_v3 = vand.u32 4294901760, %v27181_v5  ;;  %v27198_v16 = vand.u32 4294901760, %v10348_v50  ;;  %v10351_v9 = vsel %vm5453_vm2, %v10312_v22, 0 }
0x1a4d   :  { %v27213_v6 = vand.u32 4294901760, %v10351_v9 }
0x1a4e   :  { %10442 = vmatmul.mubr.f32.gmra.mrb[18].mxu0 %v27176_v59  ;;  %29237 = vst [vmem:[#allocation23_spill] sm:$0xff] %v27193_v3  ;;  %v27211_v18 = vsub.f32 %v10348_v50, %v27198_v16 }
0x1a4f   :  { %10447 = vmatprep.mubr.f32.mxu0 %v29187_v48  ;;  %22086 = vmatpush1.bf16.msra.mxu0 %v22085_v29  ;;  %v10473_v29 = vsub.f32 %v27181_v5, %v27193_v3  ;;  %v27225_v30 = vsub.f32 %v10351_v9, %v27213_v6 }
0x1a50   :  { %22088 = vmatprep.subr.bf16.mxu0 %v22087_v31  ;;  %29240 = vst [vmem:[#allocation25_spill] sm:$0xff] %v27211_v18  ;;  %v27222_v17 = vand.u32 4294901760, %v27211_v18 }
0x1a51   :  { %v27217_v31 = vand.u32 4294901760, %v10473_v29  ;;  %29242 = vst [vmem:[#allocation27_spill] sm:$0xff] %v27225_v30  ;;  %v27234_v62 = vand.u32 4294901760, %v27225_v30 }
0x1a52   :  { %10453 = vmatmul.mubr.f32.gmra.mrb[20].mxu0 %v27190_v24  ;;  %29241 = vst [vmem:[#allocation26_spill] sm:$0xff] %v27222_v17  ;;  %v10495_v42 = vsub.f32 %v27211_v18, %v27222_v17 }
0x1a53   :  { %10458 = vmatprep.mubr.f32.mxu0 %v29187_v48  ;;  %29243 = vst [vmem:[#allocation28_spill] sm:$0xff] %v27234_v62  ;;  %v10506_v50 = vsub.f32 %v27225_v30, %v27234_v62 }
0x1a54   :  { %v27238_v53 = vand.u32 4294901760, %v10495_v42 }
0x1a55   :  { %v27244_v22 = vand.u32 4294901760, %v10506_v50 }
0x1a56   :  { %10464 = vmatmul.mubr.f32.gmra.mrb[22].mxu0 %v27203_v19 }
0x1a57   :  { %10469 = vmatprep.mubr.f32.mxu0 %v29187_v48 }
0x1a5a   :  { %10475 = vmatmul.mubr.f32.gmra.mrb[24].mxu0 %v27217_v31 }
0x1a5b   :  { %10480 = vmatprep.mubr.f32.mxu0 %v29187_v48 }
0x1a5e   :  { %10486 = vmatmul.mubr.f32.gmra.mrb[26].mxu0 %v27229_v47 }
0x1a5f   :  { %10491 = vmatprep.mubr.f32.mxu0 %v29187_v48 }
0x1a62   :  { %10497 = vmatmul.mubr.f32.gmra.mrb[28].mxu0 %v27238_v53 }
0x1a63   :  { %10502 = vmatprep.mubr.f32.mxu0 %v29187_v48 }
0x1a66   :  { %10508 = vmatmul.mubr.f32.gmra.mrb[30].mxu0 %v27244_v22 }
0x1a67   :  { %10618 = vmatprep.mubr.f32.mxu0 %v29187_v48 }
0x1a6a   :  { %10620 = vmatmul.mubr.f32.vlgmr.msra.gmra.mrb[16].mxu0 %v27131_v21 }
0x1a6b   :  { %22090 = vmatpush1.bf16.msra.mxu0 %v22089_v15  ;;  %10625 = vmatprep.mubr.f32.mxu0 %v29187_v48  ;;  %v22103_v15 = vpack.c.bf16 %v10528_v63, %v10516_v51  ;;  %v22109_v51 = vpack.c.bf16 %v10558_v26, %v10546_v28  ;;  %v11271_v28 = vand.u32 4294901760, %v10318_v10  ;;  %v11275_v26 = vand.u32 4294901760, %v10320_v32 }
0x1a6c   :  { %22092 = vmatprep.subr.bf16.mxu0 %v22091_v44  ;;  %v10317_v44 = vld [vmem:[%s29089_s8 + $0x20] sm:$0xff] }
0x1a6d   :  { %v11273_v43 = vand.u32 4294901760, %v10317_v44  ;;  %v27386_v50 = vpack.c.bf16 %v11275_v26, %v11271_v28 }
0x1a6e   :  { %10627 = vmatmul.mubr.f32.gmra.mrb[18].mxu0 %v27127_v14 }
0x1a6f   :  { %10632 = vmatprep.mubr.f32.mxu0 %v29187_v48  ;;  %22094 = vmatpush1.bf16.msra.mxu0 %v22093_v12  ;;  %v10319_v12 = vld [vmem:[%s29089_s8 + $0x30] sm:$0xff] }
0x1a70   :  { %22096 = vmatprep.subr.bf16.mxu0 %v27032_v49  ;;  %v11277_v42 = vand.u32 4294901760, %v10319_v12 }
0x1a72   :  { %10634 = vmatmul.mubr.f32.gmra.mrb[20].mxu0 %v27150_v34 }
0x1a73   :  { %10639 = vmatprep.mubr.f32.mxu0 %v29187_v48 }
0x1a76   :  { %10641 = vmatmul.mubr.f32.gmra.mrb[22].mxu0 %v27142_v2 }
0x1a77   :  { %10646 = vmatprep.mubr.f32.mxu0 %v29187_v48 }
0x1a7a   :  { %10648 = vmatmul.mubr.f32.gmra.mrb[24].mxu0 %v27168_v7 }
0x1a7b   :  { %10653 = vmatprep.mubr.f32.mxu0 %v29187_v48 }
0x1a7e   :  { %10655 = vmatmul.mubr.f32.gmra.mrb[26].mxu0 %v27183_v20 }
0x1a7f   :  { %10660 = vmatprep.mubr.f32.mxu0 %v29187_v48 }
0x1a82   :  { %10662 = vmatmul.mubr.f32.gmra.mrb[28].mxu0 %v27198_v16 }
0x1a83   :  { %10667 = vmatprep.mubr.f32.mxu0 %v29187_v48 }
0x1a86   :  { %10669 = vmatmul.mubr.f32.gmra.mrb[30].mxu0 %v27213_v6 }
0x1a87   :  { %10755 = vmatprep.mubr.f32.mxu0 %v29187_v48 }
0x1a8a   :  { %10758 = vmatmul.mubr.f32.vlgmr.msra.gmra.mrb[16].mxu0 %v27138_v23 }
0x1a8b   :  { %22098 = vmatpush1.bf16.msra.mxu0 %v27036_v0  ;;  %10763 = vmatprep.mubr.f32.mxu0 %v29187_v48 }
0x1a8c   :  { %22100 = vmatprep.subr.bf16.mxu0 %v27058_v13 }
0x1a8e   :  { %10766 = vmatmul.mubr.f32.gmra.mrb[18].mxu0 %v27134_v40 }
0x1a8f   :  { %10771 = vmatprep.mubr.f32.mxu0 %v29187_v48  ;;  %22102 = vmatpush1.bf16.msra.mxu0 %v27064_v39 }
0x1a90   :  { %22104 = vmatprep.subr.bf16.mxu0 %v22103_v15 }
0x1a92   :  { %10774 = vmatmul.mubr.f32.gmra.mrb[20].mxu0 %v27155_v1 }
0x1a93   :  { %10779 = vmatprep.mubr.f32.mxu0 %v29187_v48 }
0x1a96   :  { %10782 = vmatmul.mubr.f32.gmra.mrb[22].mxu0 %v27158_v45 }
0x1a97   :  { %10787 = vmatprep.mubr.f32.mxu0 %v29187_v48 }
0x1a9a   :  { %10790 = vmatmul.mubr.f32.gmra.mrb[24].mxu0 %v27181_v5 }
0x1a9b   :  { %10795 = vmatprep.mubr.f32.mxu0 %v29187_v48 }
0x1a9e   :  { %10798 = vmatmul.mubr.f32.gmra.mrb[26].mxu0 %v27196_v52  ;;  %v10303_v52 = vld [vmem:[#allocation4 + $0x30] sm:$0xff] }
0x1a9f   :  { %10803 = vmatprep.mubr.f32.mxu0 %v29187_v48 }
0x1aa2   :  { %10806 = vmatmul.mubr.f32.gmra.mrb[28].mxu0 %v27211_v18 }
0x1aa3   :  { %10811 = vmatprep.mubr.f32.mxu0 %v29187_v48 }
0x1aa6   :  { %10814 = vmatmul.mubr.f32.gmra.mrb[30].mxu0 %v27225_v30 }
0x1aa7   :  { %10892 = vmatprep.mubr.f32.mxu0 %v29187_v48 }
0x1aaa   :  { %10896 = vmatmul.mubr.f32.vlgmr.msra.gmra.mrb[16].mxu0 %v27145_v11 }
0x1aab   :  { %22106 = vmatpush1.bf16.msra.mxu0 %v22105_v60  ;;  %10901 = vmatprep.mubr.f32.mxu0 %v29187_v48 }
0x1aac   :  { %22108 = vmatprep.subr.bf16.mxu0 %v22107_v58  ;;  %v27391_v58 = vpack.c.bf16 %v11277_v42, %v11273_v43 }
0x1aae   :  { %10905 = vmatmul.mubr.f32.gmra.mrb[18].mxu0 %v27148_v41 }
0x1aaf   :  { %10910 = vmatprep.mubr.f32.mxu0 %v29187_v48  ;;  %22110 = vmatpush1.bf16.msra.mxu0 %v22109_v51 }
0x1ab0   :  { %22112 = vmatprep.subr.bf16.mxu0 %v27032_v49  ;;  %v10314_v49 = vld [vmem:[%s29089_s8 + $0x8] sm:$0xff] }
0x1ab1   :  { %v11263_v46 = vand.u32 4294901760, %v10314_v49 }
0x1ab2   :  { %10914 = vmatmul.mubr.f32.gmra.mrb[20].mxu0 %v27166_v36 }
0x1ab3   :  { %10919 = vmatprep.mubr.f32.mxu0 %v29187_v48  ;;  %v27336_v57 = vpack.c.bf16 %v11267_v25, %v11263_v46 }
0x1ab6   :  { %10923 = vmatmul.mubr.f32.gmra.mrb[22].mxu0 %v27174_v33 }
0x1ab7   :  { %10928 = vmatprep.mubr.f32.mxu0 %v29187_v48 }
0x1aba   :  { %10932 = vmatmul.mubr.f32.gmra.mrb[24].mxu0 %v27193_v3 }
0x1abb   :  { %10937 = vmatprep.mubr.f32.mxu0 %v29187_v48 }
0x1abe   :  { %10941 = vmatmul.mubr.f32.gmra.mrb[26].mxu0 %v27208_v54 }
0x1abf   :  { %10946 = vmatprep.mubr.f32.mxu0 %v29187_v48 }
0x1ac2   :  { %10950 = vmatmul.mubr.f32.gmra.mrb[28].mxu0 %v27222_v17 }
0x1ac3   :  { %10955 = vmatprep.mubr.f32.mxu0 %v29187_v48 }
0x1ac6   :  { %10959 = vmatmul.mubr.f32.gmra.mrb[30].mxu0 %v27234_v62 }
0x1ac7   :  { %11053 = vmatprep.mubr.f32.mxu0 %v29187_v48 }
0x1aca   :  { %11055 = vmatmul.mubr.f32.vlgmr.msra.gmra.mrb[16].mxu0 %v27131_v21 }
0x1acb   :  { %22114 = vmatpush1.bf16.msra.mxu0 %v27036_v0  ;;  %11060 = vmatprep.mubr.f32.mxu0 %v29187_v48  ;;  %v27348_v0 = vsub.f32 %v10314_v49, %v11263_v46  ;;  %v10297_v49 = vld [vmem:[#allocation4] sm:$0xff] }
0x1acc   :  { %22116 = vmatprep.subr.bf16.mxu0 %v27058_v13  ;;  %v27350_v13 = vsub.f32 %v10316_v4, %v11267_v25  ;;  %v10298_v4 = vld [vmem:[#allocation4 + $0x8] sm:$0xff]  ;;  %v11240_v46 = vsel %vm5453_vm2, %v10297_v49, 0  ;;  %v10299_v49 = vld [vmem:[#allocation4 + $0x10] sm:$0xff] }
0x1acd   :  { %v29135_v27 = vand.u32 4294901760, %v27348_v0 }
0x1ace   :  { %11062 = vmatmul.mubr.f32.gmra.mrb[18].mxu0 %v27127_v14  ;;  %v29134_v63 = vand.u32 4294901760, %v27350_v13 }
0x1acf   :  { %11067 = vmatprep.mubr.f32.mxu0 %v29187_v48  ;;  %22118 = vmatpush1.bf16.msra.mxu0 %v27064_v39  ;;  %v10313_v39 = vld [vmem:[%s29089_s8] sm:$0xff]  ;;  %v11427_v35 = vsub.f32 %v27348_v0, %v29135_v27  ;;  %v27416_v27 = vsub.f32 %v10317_v44, %v11273_v43 }
0x1ad0   :  { %22120 = vmatprep.subr.bf16.mxu0 %v27336_v57  ;;  %v11265_v55 = vand.u32 4294901760, %v10313_v39  ;;  %v11439_v9 = vsub.f32 %v27350_v13, %v29134_v63 }
0x1ad1   :  { %v11428_v15 = vand.u32 4294901760, %v11427_v35  ;;  %v27403_v35 = vsub.f32 %v10315_v61, %v11269_v8  ;;  %v29246_v62 = vand.u32 4294901760, %v27416_v27 }
0x1ad2   :  { %11069 = vmatmul.mubr.f32.gmra.mrb[20].mxu0 %v27150_v34  ;;  %v27384_v29 = vpack.c.bf16 %v11269_v8, %v11265_v55  ;;  %v11440_v60 = vand.u32 4294901760, %v11439_v9  ;;  %v27401_v25 = vsub.f32 %v10313_v39, %v11265_v55  ;;  %v11243_v9 = vsel %vm5453_vm2, %v10298_v4, 0  ;;  %v10300_v55 = vld [vmem:[#allocation4 + $0x18] sm:$0xff] }
0x1ad3   :  { %11074 = vmatprep.mubr.f32.mxu0 %v29187_v48  ;;  %v27414_v63 = vand.u32 4294901760, %v11243_v9  ;;  %v27418_v39 = vsub.f32 %v10319_v12, %v11277_v42  ;;  %v11249_v12 = vsel %vm5453_vm2, %v10300_v55, 0 }
0x1ad4   :  { %v22127_v51 = vpack.c.bf16 %v11440_v60, %v11428_v15  ;;  %v27407_v15 = vsub.f32 %v10318_v10, %v11271_v28  ;;  %v27409_v60 = vsub.f32 %v10320_v32, %v11275_v26  ;;  %v29136_v61 = vand.u32 4294901760, %v27401_v25 }
0x1ad5   :  { %v29137_v10 = vand.u32 4294901760, %v27403_v35  ;;  %v11246_v26 = vsel %vm5453_vm2, %v10299_v49, 0  ;;  %v27431_v44 = vsub.f32 %v11243_v9, %v27414_v63  ;;  %v27458_v4 = vand.u32 4294901760, %v11249_v12 }
0x1ad6   :  { %11076 = vmatmul.mubr.f32.gmra.mrb[22].mxu0 %v27142_v2  ;;  %v29142_v8 = vand.u32 4294901760, %v27407_v15  ;;  %v29144_v28 = vand.u32 4294901760, %v27409_v60  ;;  %v11433_v43 = vsub.f32 %v27401_v25, %v29136_v61  ;;  %v27446_v9 = vand.u32 4294901760, %v11246_v26 }
0x1ad7   :  { %11081 = vmatprep.mubr.f32.mxu0 %v29187_v48  ;;  %v11445_v42 = vsub.f32 %v27403_v35, %v29137_v10  ;;  %v27456_v10 = vand.u32 4294901760, %v27431_v44  ;;  %v29247_v17 = vand.u32 4294901760, %v27418_v39 }
0x1ad8   :  { %v11451_v55 = vsub.f32 %v27407_v15, %v29142_v8  ;;  %v11463_v61 = vsub.f32 %v27409_v60, %v29144_v28  ;;  %v11434_v38 = vand.u32 4294901760, %v11433_v43  ;;  %v11457_v8 = vsub.f32 %v27416_v27, %v29246_v62  ;;  %v10302_v62 = vld [vmem:[#allocation4 + $0x28] sm:$0xff] }
0x1ad9   :  { %29245 = vst [vmem:[#allocation30_spill] sm:$0xff] %v27456_v10  ;;  %v11446_v56 = vand.u32 4294901760, %v11445_v42  ;;  %v11469_v28 = vsub.f32 %v27418_v39, %v29247_v17  ;;  %v27470_v3 = vsub.f32 %v11246_v26, %v27446_v9  ;;  %v11350_v43 = vsub.f32 %v27431_v44, %v27456_v10 }
0x1ada   :  { %11083 = vmatmul.mubr.f32.gmra.mrb[24].mxu0 %v27168_v7  ;;  %v11452_v33 = vand.u32 4294901760, %v11451_v55  ;;  %v11464_v36 = vand.u32 4294901760, %v11463_v61  ;;  %v27478_v17 = vsub.f32 %v11249_v12, %v27458_v4  ;;  %v11458_v11 = vand.u32 4294901760, %v11457_v8 }
0x1adb   :  { %11088 = vmatprep.mubr.f32.mxu0 %v29187_v48  ;;  %v22129_v42 = vpack.c.bf16 %v11446_v56, %v11434_v38  ;;  %v11470_v30 = vand.u32 4294901760, %v11469_v28  ;;  %v27483_v61 = vand.u32 4294901760, %v27470_v3  ;;  %v11255_v18 = vsel %vm5453_vm2, %v10302_v62, 0 }
0x1adc   :  { %v27490_v38 = vand.u32 4294901760, %v11350_v43  ;;  %v27493_v56 = vand.u32 4294901760, %v27478_v17  ;;  %v22135_v28 = vpack.c.bf16 %v27350_v13, %v27348_v0  ;;  %v11258_v12 = vsel %vm5453_vm2, %v10303_v52, 0  ;;  %v10304_v43 = vld [vmem:[#allocation4 + $0x38] sm:$0xff] }
0x1add   :  { %29249 = vst [vmem:[#allocation32_spill] sm:$0xff] %v27483_v61  ;;  %v11361_v8 = vsub.f32 %v27470_v3, %v27483_v61  ;;  %v11261_v52 = vsel %vm5453_vm2, %v10304_v43, 0 }
0x1ade   :  { %11090 = vmatmul.mubr.f32.gmra.mrb[26].mxu0 %v27183_v20  ;;  %29250 = vst [vmem:[#allocation33_spill] sm:$0xff] %v27490_v38  ;;  %29251 = vst [vmem:[#allocation34_spill] sm:$0xff] %v27493_v56 }
0x1adf   :  { %11095 = vmatprep.mubr.f32.mxu0 %v29187_v48 }
0x1ae2   :  { %11097 = vmatmul.mubr.f32.gmra.mrb[28].mxu0 %v27198_v16 }
0x1ae3   :  { %11102 = vmatprep.mubr.f32.mxu0 %v29187_v48 }
0x1ae6   :  { %11104 = vmatmul.mubr.f32.gmra.mrb[30].mxu0 %v27213_v6 }
0x1ae7   :  { %11182 = vmatprep.mubr.f32.mxu0 %v29187_v48 }
0x1aea   :  { %11184 = vmatmul.mubr.f32.vlgmr.msra.gmra.mrb[16].mxu0 %v27131_v21 }
0x1aeb   :  { %22122 = vmatpush1.bf16.msra.mxu0 %v27384_v29  ;;  %11189 = vmatprep.mubr.f32.mxu0 %v29187_v48 }
0x1aec   :  { %22124 = vmatprep.subr.bf16.mxu0 %v27386_v50 }
0x1aee   :  { %11191 = vmatmul.mubr.f32.gmra.mrb[18].mxu0 %v27127_v14 }
0x1aef   :  { %11196 = vmatprep.mubr.f32.mxu0 %v29187_v48  ;;  %22126 = vmatpush1.bf16.msra.mxu0 %v27391_v58 }
0x1af0   :  { %22128 = vmatprep.subr.bf16.mxu0 %v22127_v51  ;;  %v27411_v51 = vand.u32 4294901760, %v11240_v46 }
0x1af2   :  { %11198 = vmatmul.mubr.f32.gmra.mrb[20].mxu0 %v27150_v34  ;;  %v27424_v32 = vsub.f32 %v11240_v46, %v27411_v51  ;;  %v10301_v46 = vld [vmem:[#allocation4 + $0x20] sm:$0xff] }
0x1af3   :  { %11203 = vmatprep.mubr.f32.mxu0 %v29187_v48  ;;  %v11252_v41 = vsel %vm5453_vm2, %v10301_v46, 0  ;;  %v22131_v46 = vpack.c.bf16 %v11464_v36, %v11452_v33  ;;  %v27500_v33 = vand.u32 4294901760, %v11255_v18 }
0x1af4   :  { %v27444_v49 = vand.u32 4294901760, %v27424_v32  ;;  %v27485_v55 = vand.u32 4294901760, %v11252_v41 }
0x1af5   :  { %v27515_v62 = vsub.f32 %v11255_v18, %v27500_v33 }
0x1af6   :  { %11205 = vmatmul.mubr.f32.gmra.mrb[22].mxu0 %v27142_v2  ;;  %29244 = vst [vmem:[#allocation29_spill] sm:$0xff] %v27444_v49  ;;  %v11339_v54 = vsub.f32 %v27424_v32, %v27444_v49  ;;  %v27498_v36 = vsub.f32 %v11252_v41, %v27485_v55 }
0x1af7   :  { %11210 = vmatprep.mubr.f32.mxu0 %v29187_v48  ;;  %29255 = vst [vmem:[#allocation38_spill] sm:$0xff] %v27515_v62 }
0x1af8   :  { %v27480_v26 = vand.u32 4294901760, %v11339_v54  ;;  %v22133_v54 = vpack.c.bf16 %v11470_v30, %v11458_v11  ;;  %29252 = vst [vmem:[#allocation35_spill] sm:$0xff] %v27498_v36  ;;  %v11372_v11 = vsub.f32 %v27478_v17, %v27493_v56  ;;  %v27509_v30 = vand.u32 4294901760, %v11361_v8 }
0x1af9   :  { %v27512_v41 = vand.u32 4294901760, %v27498_v36  ;;  %v27527_v8 = vand.u32 4294901760, %v27515_v62 }
0x1afa   :  { %11212 = vmatmul.mubr.f32.gmra.mrb[24].mxu0 %v27168_v7  ;;  %29248 = vst [vmem:[#allocation31_spill] sm:$0xff] %v27480_v26  ;;  %29253 = vst [vmem:[#allocation36_spill] sm:$0xff] %v27509_v30 }
0x1afb   :  { %11217 = vmatprep.mubr.f32.mxu0 %v29187_v48  ;;  %29254 = vst [vmem:[#allocation37_spill] sm:$0xff] %v27512_v41  ;;  %29257 = vst [vmem:[#allocation40_spill] sm:$0xff] %v27527_v8  ;;  %v11394_v43 = vsub.f32 %v27515_v62, %v27527_v8 }
0x1afe   :  { %11219 = vmatmul.mubr.f32.gmra.mrb[26].mxu0 %v27183_v20 }
0x1aff   :  { %11224 = vmatprep.mubr.f32.mxu0 %v29187_v48 }
0x1b02   :  { %11226 = vmatmul.mubr.f32.gmra.mrb[28].mxu0 %v27198_v16 }
0x1b03   :  { %11231 = vmatprep.mubr.f32.mxu0 %v29187_v48 }
0x1b06   :  { %11233 = vmatmul.mubr.f32.gmra.mrb[30].mxu0 %v27213_v6 }
0x1b07   :  { %11335 = vmatprep.mubr.f32.mxu0 %v29187_v48 }
0x1b0a   :  { %11341 = vmatmul.mubr.f32.vlgmr.msra.gmra.mrb[16].mxu0 %v27480_v26 }
0x1b0b   :  { %22130 = vmatpush1.bf16.msra.mxu0 %v22129_v42  ;;  %11346 = vmatprep.mubr.f32.mxu0 %v29187_v48  ;;  %v27517_v42 = vand.u32 4294901760, %v11258_v12 }
0x1b0c   :  { %22132 = vmatprep.subr.bf16.mxu0 %v22131_v46  ;;  %v27522_v46 = vand.u32 4294901760, %v11372_v11 }
0x1b0d   :  { %v27530_v18 = vsub.f32 %v11258_v12, %v27517_v42  ;;  %v27548_v12 = vand.u32 4294901760, %v11394_v43 }
0x1b0e   :  { %11352 = vmatmul.mubr.f32.gmra.mrb[18].mxu0 %v27490_v38  ;;  %29256 = vst [vmem:[#allocation39_spill] sm:$0xff] %v27522_v46  ;;  %v27532_v38 = vand.u32 4294901760, %v11261_v52 }
0x1b0f   :  { %11357 = vmatprep.mubr.f32.mxu0 %v29187_v48  ;;  %22134 = vmatpush1.bf16.msra.mxu0 %v22133_v54  ;;  %v11383_v54 = vsub.f32 %v27498_v36, %v27512_v41  ;;  %29258 = vst [vmem:[#allocation41_spill] sm:$0xff] %v27530_v18  ;;  %v27541_v11 = vand.u32 4294901760, %v27530_v18  ;;  %29261 = vst [vmem:[#allocation44_spill] sm:$0xff] %v27548_v12 }
0x1b10   :  { %22136 = vmatprep.subr.bf16.mxu0 %v22135_v28 }
0x1b11   :  { %v27536_v28 = vand.u32 4294901760, %v11383_v54  ;;  %29259 = vst [vmem:[#allocation42_spill] sm:$0xff] %v27541_v11 }
0x1b12   :  { %11363 = vmatmul.mubr.f32.gmra.mrb[20].mxu0 %v27509_v30  ;;  %v27544_v30 = vsub.f32 %v11261_v52, %v27532_v38 }
0x1b13   :  { %11368 = vmatprep.mubr.f32.mxu0 %v29187_v48 }
0x1b14   :  { %29260 = vst [vmem:[#allocation43_spill] sm:$0xff] %v27544_v30  ;;  %v27553_v54 = vand.u32 4294901760, %v27544_v30 }
0x1b16   :  { %11374 = vmatmul.mubr.f32.gmra.mrb[22].mxu0 %v27522_v46  ;;  %v11405_v46 = vsub.f32 %v27530_v18, %v27541_v11  ;;  %29262 = vst [vmem:[#allocation45_spill] sm:$0xff] %v27553_v54  ;;  %v11416_v52 = vsub.f32 %v27544_v30, %v27553_v54 }
0x1b17   :  { %11379 = vmatprep.mubr.f32.mxu0 %v29187_v48 }
0x1b18   :  { %v27557_v26 = vand.u32 4294901760, %v11405_v46  ;;  %v27563_v43 = vand.u32 4294901760, %v11416_v52  ;;  %v22139_v46 = vpack.c.bf16 %v27409_v60, %v27407_v15 }
0x1b1a   :  { %11385 = vmatmul.mubr.f32.gmra.mrb[24].mxu0 %v27536_v28  ;;  %29263 = vst [vmem:[#allocation46_spill] sm:$0xff] %v27557_v26 }
0x1b1b   :  { %11390 = vmatprep.mubr.f32.mxu0 %v29187_v48 }
0x1b1e   :  { %11396 = vmatmul.mubr.f32.gmra.mrb[26].mxu0 %v27548_v12  ;;  %v22137_v12 = vpack.c.bf16 %v27403_v35, %v27401_v25 }
0x1b1f   :  { %11401 = vmatprep.mubr.f32.mxu0 %v29187_v48 }
0x1b22   :  { %11407 = vmatmul.mubr.f32.gmra.mrb[28].mxu0 %v27557_v26  ;;  %v22141_v26 = vpack.c.bf16 %v27418_v39, %v27416_v27 }
0x1b23   :  { %11412 = vmatprep.mubr.f32.mxu0 %v29187_v48 }
0x1b26   :  { %11418 = vmatmul.mubr.f32.gmra.mrb[30].mxu0 %v27563_v43 }
0x1b27   :  { %11528 = vmatprep.mubr.f32.mxu0 %v29187_v48 }
0x1b2a   :  { %11530 = vmatmul.mubr.f32.vlgmr.msra.gmra.mrb[16].mxu0 %v27411_v51 }
0x1b2b   :  { %22138 = vmatpush1.bf16.msra.mxu0 %v22137_v12  ;;  %11535 = vmatprep.mubr.f32.mxu0 %v29187_v48  ;;  %v29265_v12 = vand.u32 4294901760, %v27350_v13  ;;  %v29267_v13 = vand.u32 4294901760, %v27403_v35 }
0x1b2c   :  { %22140 = vmatprep.subr.bf16.mxu0 %v22139_v46 }
0x1b2e   :  { %11537 = vmatmul.mubr.f32.gmra.mrb[18].mxu0 %v27414_v63 }
0x1b2f   :  { %11542 = vmatprep.mubr.f32.mxu0 %v29187_v48  ;;  %22142 = vmatpush1.bf16.msra.mxu0 %v22141_v26  ;;  %v29264_v26 = vand.u32 4294901760, %v27348_v0  ;;  %v29266_v0 = vand.u32 4294901760, %v27401_v25 }
0x1b30   :  { %22144 = vmatprep.subr.bf16.mxu0 %v27336_v57 }
0x1b31   :  { %v22151_v52 = vpack.c.bf16 %v29265_v12, %v29264_v26  ;;  %v22153_v46 = vpack.c.bf16 %v29267_v13, %v29266_v0  ;;  %v29268_v26 = vand.u32 4294901760, %v27407_v15  ;;  %v29269_v12 = vand.u32 4294901760, %v27409_v60  ;;  %v12203_v60 = vld [vmem:[%s29090_s9 + $0x50] sm:$0xff] }
0x1b32   :  { %11544 = vmatmul.mubr.f32.gmra.mrb[20].mxu0 %v27446_v9  ;;  %v12215_v13 = vand.u32 4294901760, %v12203_v60 }
0x1b33   :  { %11549 = vmatprep.mubr.f32.mxu0 %v29187_v48 }
0x1b36   :  { %11551 = vmatmul.mubr.f32.gmra.mrb[22].mxu0 %v27458_v4 }
0x1b37   :  { %11556 = vmatprep.mubr.f32.mxu0 %v29187_v48 }
0x1b3a   :  { %11558 = vmatmul.mubr.f32.gmra.mrb[24].mxu0 %v27485_v55 }
0x1b3b   :  { %11563 = vmatprep.mubr.f32.mxu0 %v29187_v48 }
0x1b3e   :  { %11565 = vmatmul.mubr.f32.gmra.mrb[26].mxu0 %v27500_v33 }
0x1b3f   :  { %11570 = vmatprep.mubr.f32.mxu0 %v29187_v48 }
0x1b42   :  { %11572 = vmatmul.mubr.f32.gmra.mrb[28].mxu0 %v27517_v42 }
0x1b43   :  { %11577 = vmatprep.mubr.f32.mxu0 %v29187_v48 }
0x1b46   :  { %11579 = vmatmul.mubr.f32.gmra.mrb[30].mxu0 %v27532_v38 }
0x1b47   :  { %11665 = vmatprep.mubr.f32.mxu0 %v29187_v48 }
0x1b4a   :  { %11668 = vmatmul.mubr.f32.vlgmr.msra.gmra.mrb[16].mxu0 %v27424_v32 }
0x1b4b   :  { %22146 = vmatpush1.bf16.msra.mxu0 %v27384_v29  ;;  %11673 = vmatprep.mubr.f32.mxu0 %v29187_v48 }
0x1b4c   :  { %22148 = vmatprep.subr.bf16.mxu0 %v27386_v50 }
0x1b4e   :  { %11676 = vmatmul.mubr.f32.gmra.mrb[18].mxu0 %v27431_v44 }
0x1b4f   :  { %11681 = vmatprep.mubr.f32.mxu0 %v29187_v48  ;;  %22150 = vmatpush1.bf16.msra.mxu0 %v27391_v58 }
0x1b50   :  { %22152 = vmatprep.subr.bf16.mxu0 %v22151_v52  ;;  %v22155_v52 = vpack.c.bf16 %v29269_v12, %v29268_v26  ;;  %v12205_v12 = vld [vmem:[%s29090_s9 + $0x60] sm:$0xff] }
0x1b52   :  { %11684 = vmatmul.mubr.f32.gmra.mrb[20].mxu0 %v27470_v3 }
0x1b53   :  { %11689 = vmatprep.mubr.f32.mxu0 %v29187_v48 }
0x1b56   :  { %11692 = vmatmul.mubr.f32.gmra.mrb[22].mxu0 %v27478_v17 }
0x1b57   :  { %11697 = vmatprep.mubr.f32.mxu0 %v29187_v48 }
0x1b5a   :  { %11700 = vmatmul.mubr.f32.gmra.mrb[24].mxu0 %v27498_v36 }
0x1b5b   :  { %11705 = vmatprep.mubr.f32.mxu0 %v29187_v48 }
0x1b5e   :  { %11708 = vmatmul.mubr.f32.gmra.mrb[26].mxu0 %v27515_v62 }
0x1b5f   :  { %11713 = vmatprep.mubr.f32.mxu0 %v29187_v48 }
0x1b62   :  { %11716 = vmatmul.mubr.f32.gmra.mrb[28].mxu0 %v27530_v18  ;;  %v29270_v18 = vand.u32 4294901760, %v27416_v27  ;;  %v12204_v27 = vld [vmem:[%s29090_s9 + $0x58] sm:$0xff] }
0x1b63   :  { %11721 = vmatprep.mubr.f32.mxu0 %v29187_v48  ;;  %v12213_v35 = vand.u32 4294901760, %v12204_v27 }
0x1b66   :  { %11724 = vmatmul.mubr.f32.gmra.mrb[30].mxu0 %v27544_v30  ;;  %v29271_v30 = vand.u32 4294901760, %v27418_v39 }
0x1b67   :  { %11802 = vmatprep.mubr.f32.mxu0 %v29187_v48 }
0x1b68   :  { %v22157_v62 = vpack.c.bf16 %v29271_v30, %v29270_v18  ;;  %v12208_v18 = vld [vmem:[%s29090_s9 + $0x78] sm:$0xff] }
0x1b69   :  { %v12221_v26 = vand.u32 4294901760, %v12208_v18 }
0x1b6a   :  { %11806 = vmatmul.mubr.f32.vlgmr.msra.gmra.mrb[16].mxu0 %v27444_v49 }
0x1b6b   :  { %22154 = vmatpush1.bf16.msra.mxu0 %v22153_v46  ;;  %11811 = vmatprep.mubr.f32.mxu0 %v29187_v48 }
0x1b6c   :  { %22156 = vmatprep.subr.bf16.mxu0 %v22155_v52  ;;  %v12207_v52 = vld [vmem:[%s29090_s9 + $0x70] sm:$0xff] }
0x1b6e   :  { %11815 = vmatmul.mubr.f32.gmra.mrb[18].mxu0 %v27456_v10 }
0x1b6f   :  { %11820 = vmatprep.mubr.f32.mxu0 %v29187_v48  ;;  %22158 = vmatpush1.bf16.msra.mxu0 %v22157_v62  ;;  %v12206_v62 = vld [vmem:[%s29090_s9 + $0x68] sm:$0xff] }
0x1b70   :  { %22160 = vmatprep.subr.bf16.mxu0 %v27336_v57  ;;  %v12202_v57 = vld [vmem:[%s29090_s9 + $0x48] sm:$0xff]  ;;  %v12217_v46 = vand.u32 4294901760, %v12206_v62 }
0x1b71   :  { %v12209_v25 = vand.u32 4294901760, %v12202_v57 }
0x1b72   :  { %11824 = vmatmul.mubr.f32.gmra.mrb[20].mxu0 %v27483_v61 }
0x1b73   :  { %11829 = vmatprep.mubr.f32.mxu0 %v29187_v48  ;;  %v27652_v15 = vpack.c.bf16 %v12213_v35, %v12209_v25 }
0x1b76   :  { %11833 = vmatmul.mubr.f32.gmra.mrb[22].mxu0 %v27493_v56 }
0x1b77   :  { %11838 = vmatprep.mubr.f32.mxu0 %v29187_v48 }
0x1b7a   :  { %11842 = vmatmul.mubr.f32.gmra.mrb[24].mxu0 %v27512_v41 }
0x1b7b   :  { %11847 = vmatprep.mubr.f32.mxu0 %v29187_v48 }
0x1b7e   :  { %11851 = vmatmul.mubr.f32.gmra.mrb[26].mxu0 %v27527_v8 }
0x1b7f   :  { %11856 = vmatprep.mubr.f32.mxu0 %v29187_v48 }
0x1b82   :  { %11860 = vmatmul.mubr.f32.gmra.mrb[28].mxu0 %v27541_v11  ;;  %v27702_v11 = vpack.c.bf16 %v12221_v26, %v12217_v46 }
0x1b83   :  { %11865 = vmatprep.mubr.f32.mxu0 %v29187_v48 }
0x1b86   :  { %11869 = vmatmul.mubr.f32.gmra.mrb[30].mxu0 %v27553_v54  ;;  %v12223_v54 = vand.u32 4294901760, %v12207_v52 }
0x1b87   :  { %11963 = vmatprep.mubr.f32.mxu0 %v29187_v48 }
0x1b88   :  { %v27730_v56 = vsub.f32 %v12207_v52, %v12223_v54 }
0x1b8a   :  { %11965 = vmatmul.mubr.f32.vlgmr.msra.gmra.mrb[16].mxu0 %v27411_v51 }
0x1b8b   :  { %22162 = vmatpush1.bf16.msra.mxu0 %v27384_v29  ;;  %11970 = vmatprep.mubr.f32.mxu0 %v29187_v48  ;;  %v27664_v29 = vsub.f32 %v12202_v57, %v12209_v25 }
0x1b8c   :  { %22164 = vmatprep.subr.bf16.mxu0 %v27386_v50  ;;  %v27666_v50 = vsub.f32 %v12204_v27, %v12213_v35  ;;  %v12219_v35 = vand.u32 4294901760, %v12205_v12 }
0x1b8d   :  { %v29167_v39 = vand.u32 4294901760, %v27664_v29 }
0x1b8e   :  { %11972 = vmatmul.mubr.f32.gmra.mrb[18].mxu0 %v27414_v63  ;;  %v29168_v30 = vand.u32 4294901760, %v27666_v50 }
0x1b8f   :  { %11977 = vmatprep.mubr.f32.mxu0 %v29187_v48  ;;  %22166 = vmatpush1.bf16.msra.mxu0 %v27391_v58  ;;  %v12201_v58 = vld [vmem:[%s29090_s9 + $0x40] sm:$0xff]  ;;  %v12373_v57 = vsub.f32 %v27664_v29, %v29167_v39  ;;  %v27707_v39 = vpack.c.bf16 %v12223_v54, %v12219_v35 }
0x1b90   :  { %22168 = vmatprep.subr.bf16.mxu0 %v27652_v15  ;;  %v12211_v0 = vand.u32 4294901760, %v12201_v58  ;;  %v12385_v27 = vsub.f32 %v27666_v50, %v29168_v30 }
0x1b91   :  { %v12374_v8 = vand.u32 4294901760, %v12373_v57 }
0x1b92   :  { %11979 = vmatmul.mubr.f32.gmra.mrb[20].mxu0 %v27446_v9  ;;  %v27700_v25 = vpack.c.bf16 %v12215_v13, %v12211_v0  ;;  %v12386_v41 = vand.u32 4294901760, %v12385_v27  ;;  %v27718_v57 = vsub.f32 %v12201_v58, %v12211_v0  ;;  %v27725_v27 = vsub.f32 %v12208_v18, %v12221_v26 }
0x1b93   :  { %11984 = vmatprep.mubr.f32.mxu0 %v29187_v48 }
0x1b94   :  { %v22175_v30 = vpack.c.bf16 %v12386_v41, %v12374_v8  ;;  %v27720_v41 = vsub.f32 %v12203_v60, %v12215_v13  ;;  %v27723_v8 = vsub.f32 %v12206_v62, %v12217_v46  ;;  %v29172_v61 = vand.u32 4294901760, %v27718_v57 }
0x1b95   :  { %v29177_v0 = vand.u32 4294901760, %v27725_v27  ;;  %v12414_v13 = vand.u32 4294901760, %v27730_v56 }
0x1b96   :  { %11986 = vmatmul.mubr.f32.gmra.mrb[22].mxu0 %v27458_v4  ;;  %v29171_v58 = vand.u32 4294901760, %v27720_v41  ;;  %v29173_v60 = vand.u32 4294901760, %v27723_v8  ;;  %v12379_v62 = vsub.f32 %v27718_v57, %v29172_v61 }
0x1b97   :  { %11991 = vmatprep.mubr.f32.mxu0 %v29187_v48  ;;  %v12409_v26 = vsub.f32 %v27725_v27, %v29177_v0 }
0x1b98   :  { %v12391_v54 = vsub.f32 %v27720_v41, %v29171_v58  ;;  %v12397_v46 = vsub.f32 %v27723_v8, %v29173_v60  ;;  %v12415_v58 = vsub.f32 %v27730_v56, %v12414_v13 }
0x1b99   :  { %v12410_v60 = vand.u32 4294901760, %v12409_v26  ;;  %v12198_v26 = vld [vmem:[%s29090_s9 + $0x28] sm:$0xff] }
0x1b9a   :  { %11993 = vmatmul.mubr.f32.gmra.mrb[24].mxu0 %v27485_v55  ;;  %v12392_v52 = vand.u32 4294901760, %v12391_v54  ;;  %v12398_v61 = vand.u32 4294901760, %v12397_v46  ;;  %v12416_v36 = vand.u32 4294901760, %v12415_v58  ;;  %v22183_v54 = vpack.c.bf16 %v27666_v50, %v27664_v29 }
0x1b9b   :  { %11998 = vmatprep.mubr.f32.mxu0 %v29187_v48 }
0x1b9c   :  { %v22179_v0 = vpack.c.bf16 %v12410_v60, %v12398_v61  ;;  %v29281_v61 = vld [vmem:[#allocation18_spill] sm:$0xff] }
0x1b9e   :  { %12000 = vmatmul.mubr.f32.gmra.mrb[26].mxu0 %v27500_v33 }
0x1b9f   :  { %12005 = vmatprep.mubr.f32.mxu0 %v29187_v48 }
0x1ba2   :  { %12007 = vmatmul.mubr.f32.gmra.mrb[28].mxu0 %v27517_v42 }
0x1ba3   :  { %12012 = vmatprep.mubr.f32.mxu0 %v29187_v48 }
0x1ba6   :  { %12014 = vmatmul.mubr.f32.gmra.mrb[30].mxu0 %v27532_v38 }
0x1ba7   :  { %12092 = vmatprep.mubr.f32.mxu0 %v29187_v48 }
0x1baa   :  { %12094 = vmatmul.mubr.f32.vlgmr.msra.gmra.mrb[16].mxu0 %v27411_v51 }
0x1bab   :  { %22170 = vmatpush1.bf16.msra.mxu0 %v27700_v25  ;;  %12099 = vmatprep.mubr.f32.mxu0 %v29187_v48 }
0x1bac   :  { %22172 = vmatprep.subr.bf16.mxu0 %v27702_v11 }
0x1bae   :  { %12101 = vmatmul.mubr.f32.gmra.mrb[18].mxu0 %v27414_v63 }
0x1baf   :  { %12106 = vmatprep.mubr.f32.mxu0 %v29187_v48  ;;  %22174 = vmatpush1.bf16.msra.mxu0 %v27707_v39 }
0x1bb0   :  { %22176 = vmatprep.subr.bf16.mxu0 %v22175_v30  ;;  %v27728_v30 = vsub.f32 %v12205_v12, %v12219_v35  ;;  %v12380_v12 = vand.u32 4294901760, %v12379_v62 }
0x1bb2   :  { %12108 = vmatmul.mubr.f32.gmra.mrb[20].mxu0 %v27446_v9  ;;  %v12402_v18 = vand.u32 4294901760, %v27728_v30  ;;  %v22177_v10 = vpack.c.bf16 %v12392_v52, %v12380_v12  ;;  %v12200_v12 = vld [vmem:[%s29090_s9 + $0x38] sm:$0xff] }
0x1bb3   :  { %12113 = vmatprep.mubr.f32.mxu0 %v29187_v48 }
0x1bb4   :  { %v12403_v35 = vsub.f32 %v27728_v30, %v12402_v18 }
0x1bb6   :  { %12115 = vmatmul.mubr.f32.gmra.mrb[22].mxu0 %v27458_v4  ;;  %v12404_v49 = vand.u32 4294901760, %v12403_v35 }
0x1bb7   :  { %12120 = vmatprep.mubr.f32.mxu0 %v29187_v48 }
0x1bb8   :  { %v22181_v62 = vpack.c.bf16 %v12416_v36, %v12404_v49  ;;  %v22205_v36 = vpack.c.bf16 %v12414_v13, %v12402_v18  ;;  %v12195_v18 = vld [vmem:[%s29090_s9 + $0x10] sm:$0xff] }
0x1bb9   :  { %v13101_v35 = vand.u32 4294901760, %v12195_v18 }
0x1bba   :  { %12122 = vmatmul.mubr.f32.gmra.mrb[24].mxu0 %v27485_v55 }
0x1bbb   :  { %12127 = vmatprep.mubr.f32.mxu0 %v29187_v48 }
0x1bbe   :  { %12129 = vmatmul.mubr.f32.gmra.mrb[26].mxu0 %v27500_v33 }
0x1bbf   :  { %12134 = vmatprep.mubr.f32.mxu0 %v29187_v48 }
0x1bc2   :  { %12136 = vmatmul.mubr.f32.gmra.mrb[28].mxu0 %v27517_v42 }
0x1bc3   :  { %12141 = vmatprep.mubr.f32.mxu0 %v29187_v48 }
0x1bc6   :  { %12143 = vmatmul.mubr.f32.gmra.mrb[30].mxu0 %v27532_v38 }
0x1bc7   :  { %12281 = vmatprep.mubr.f32.mxu0 %v29187_v48 }
0x1bce   :  { %12287 = vmatmul.mubr.f32.vlgmr.msra.gmra.mrb[30].mxu0 %v27161_v37  ;;  %v22185_v37 = vpack.c.bf16 %v27720_v41, %v27718_v57 }
0x1bcf   :  { %22178 = vmatpush1.bf16.msra.mxu0 %v22177_v10  ;;  %12292 = vmatprep.mubr.f32.mxu0 %v29187_v48  ;;  %v29280_v10 = vand.u32 4294901760, %v27725_v27 }
0x1bd0   :  { %22180 = vmatprep.subr.bf16.mxu0 %v22179_v0 }
0x1bd2   :  { %12298 = vmatmul.mubr.f32.gmra.mrb[28].mxu0 %v27176_v59  ;;  %v22187_v59 = vpack.c.bf16 %v27725_v27, %v27723_v8  ;;  %v12196_v27 = vld [vmem:[%s29090_s9 + $0x18] sm:$0xff] }
0x1bd3   :  { %12303 = vmatprep.mubr.f32.mxu0 %v29187_v48  ;;  %22182 = vmatpush1.bf16.msra.mxu0 %v22181_v62  ;;  %v13099_v60 = vand.u32 4294901760, %v12196_v27  ;;  %v13103_v62 = vand.u32 4294901760, %v12198_v26 }
0x1bd4   :  { %22184 = vmatprep.subr.bf16.mxu0 %v22183_v54  ;;  %v13107_v54 = vand.u32 4294901760, %v12200_v12 }
0x1bd6   :  { %12309 = vmatmul.mubr.f32.gmra.mrb[26].mxu0 %v27190_v24  ;;  %v22189_v24 = vpack.c.bf16 %v27730_v56, %v27728_v30  ;;  %v29286_v56 = vld [vmem:[#allocation22_spill] sm:$0xff]  ;;  %v29288_v30 = vld [vmem:[#allocation28_spill] sm:$0xff] }
0x1bd7   :  { %12314 = vmatprep.mubr.f32.mxu0 %v29187_v48 }
0x1bda   :  { %12320 = vmatmul.mubr.f32.gmra.mrb[24].mxu0 %v27203_v19  ;;  %v29272_v19 = vand.u32 4294901760, %v27664_v29  ;;  %v29282_v29 = vld [vmem:[#allocation19_spill] sm:$0xff] }
0x1bdb   :  { %12325 = vmatprep.mubr.f32.mxu0 %v29187_v48 }
0x1bde   :  { %12331 = vmatmul.mubr.f32.gmra.mrb[22].mxu0 %v27217_v31  ;;  %v29273_v31 = vand.u32 4294901760, %v27666_v50  ;;  %v29283_v50 = vld [vmem:[#allocation20_spill] sm:$0xff] }
0x1bdf   :  { %12336 = vmatprep.mubr.f32.mxu0 %v29187_v48 }
0x1be2   :  { %12342 = vmatmul.mubr.f32.gmra.mrb[20].mxu0 %v27229_v47  ;;  %v22199_v47 = vpack.c.bf16 %v29273_v31, %v29272_v19 }
0x1be3   :  { %12347 = vmatprep.mubr.f32.mxu0 %v29187_v48 }
0x1be6   :  { %12353 = vmatmul.mubr.f32.gmra.mrb[18].mxu0 %v27238_v53  ;;  %v29276_v53 = vld [vmem:[#allocation27_spill] sm:$0xff] }
0x1be7   :  { %12358 = vmatprep.mubr.f32.mxu0 %v29187_v48 }
0x1bea   :  { %12364 = vmatmul.mubr.f32.gmra.mrb[16].mxu0 %v27244_v22 }
0x1beb   :  { %12474 = vmatprep.mubr.f32.mxu0 %v29187_v48 }
0x1bee   :  { %12476 = vmatmul.mubr.f32.vlgmr.msra.gmra.mrb[30].mxu0 %v27131_v21 }
0x1bef   :  { %22186 = vmatpush1.bf16.msra.mxu0 %v22185_v37  ;;  %12481 = vmatprep.mubr.f32.mxu0 %v29187_v48  ;;  %v12197_v37 = vld [vmem:[%s29090_s9 + $0x20] sm:$0xff] }
0x1bf0   :  { %22188 = vmatprep.subr.bf16.mxu0 %v22187_v59  ;;  %v12199_v59 = vld [vmem:[%s29090_s9 + $0x30] sm:$0xff] }
0x1bf2   :  { %12483 = vmatmul.mubr.f32.gmra.mrb[28].mxu0 %v27127_v14 }
0x1bf3   :  { %12488 = vmatprep.mubr.f32.mxu0 %v29187_v48  ;;  %22190 = vmatpush1.bf16.msra.mxu0 %v22189_v24 }
0x1bf4   :  { %22192 = vmatprep.subr.bf16.mxu0 %v27652_v15 }
0x1bf6   :  { %12490 = vmatmul.mubr.f32.gmra.mrb[26].mxu0 %v27150_v34 }
0x1bf7   :  { %12495 = vmatprep.mubr.f32.mxu0 %v29187_v48 }
0x1bfa   :  { %12497 = vmatmul.mubr.f32.gmra.mrb[24].mxu0 %v27142_v2 }
0x1bfb   :  { %12502 = vmatprep.mubr.f32.mxu0 %v29187_v48 }
0x1bfe   :  { %12504 = vmatmul.mubr.f32.gmra.mrb[22].mxu0 %v27168_v7 }
0x1bff   :  { %12509 = vmatprep.mubr.f32.mxu0 %v29187_v48 }
0x1c02   :  { %12511 = vmatmul.mubr.f32.gmra.mrb[20].mxu0 %v27183_v20 }
0x1c03   :  { %12516 = vmatprep.mubr.f32.mxu0 %v29187_v48 }
0x1c06   :  { %12518 = vmatmul.mubr.f32.gmra.mrb[18].mxu0 %v27198_v16 }
0x1c07   :  { %12523 = vmatprep.mubr.f32.mxu0 %v29187_v48 }
0x1c0a   :  { %12525 = vmatmul.mubr.f32.gmra.mrb[16].mxu0 %v27213_v6 }
0x1c0b   :  { %12611 = vmatprep.mubr.f32.mxu0 %v29187_v48 }
0x1c0e   :  { %12614 = vmatmul.mubr.f32.vlgmr.msra.gmra.mrb[30].mxu0 %v27138_v23  ;;  %v29274_v23 = vld [vmem:[#allocation24_spill] sm:$0xff] }
0x1c0f   :  { %22194 = vmatpush1.bf16.msra.mxu0 %v27700_v25  ;;  %12619 = vmatprep.mubr.f32.mxu0 %v29187_v48 }
0x1c10   :  { %22196 = vmatprep.subr.bf16.mxu0 %v27702_v11 }
0x1c12   :  { %12622 = vmatmul.mubr.f32.gmra.mrb[28].mxu0 %v27134_v40  ;;  %v29275_v40 = vld [vmem:[#allocation25_spill] sm:$0xff] }
0x1c13   :  { %12627 = vmatprep.mubr.f32.mxu0 %v29187_v48  ;;  %22198 = vmatpush1.bf16.msra.mxu0 %v27707_v39 }
0x1c14   :  { %22200 = vmatprep.subr.bf16.mxu0 %v22199_v47  ;;  %v13105_v47 = vand.u32 4294901760, %v12197_v37 }
0x1c16   :  { %12630 = vmatmul.mubr.f32.gmra.mrb[26].mxu0 %v27155_v1  ;;  %v29277_v1 = vand.u32 4294901760, %v27718_v57  ;;  %v29284_v57 = vld [vmem:[#allocation21_spill] sm:$0xff] }
0x1c17   :  { %12635 = vmatprep.mubr.f32.mxu0 %v29187_v48 }
0x1c1a   :  { %12638 = vmatmul.mubr.f32.gmra.mrb[24].mxu0 %v27158_v45  ;;  %v29278_v45 = vand.u32 4294901760, %v27720_v41  ;;  %v29285_v41 = vld [vmem:[#allocation23_spill] sm:$0xff] }
0x1c1b   :  { %12643 = vmatprep.mubr.f32.mxu0 %v29187_v48 }
0x1c1c   :  { %v22201_v22 = vpack.c.bf16 %v29278_v45, %v29277_v1 }
0x1c1e   :  { %12646 = vmatmul.mubr.f32.gmra.mrb[22].mxu0 %v27181_v5  ;;  %v29279_v5 = vand.u32 4294901760, %v27723_v8  ;;  %v29287_v8 = vld [vmem:[#allocation26_spill] sm:$0xff] }
0x1c1f   :  { %12651 = vmatprep.mubr.f32.mxu0 %v29187_v48 }
0x1c20   :  { %v22203_v49 = vpack.c.bf16 %v29280_v10, %v29279_v5  ;;  %v27930_v5 = vsub.f32 %v12195_v18, %v13101_v35  ;;  %v27933_v10 = vsub.f32 %v12198_v26, %v13103_v62 }
0x1c22   :  { %12654 = vmatmul.mubr.f32.gmra.mrb[20].mxu0 %v29274_v23  ;;  %v13109_v23 = vand.u32 4294901760, %v12199_v59 }
0x1c23   :  { %12659 = vmatprep.mubr.f32.mxu0 %v29187_v48 }
0x1c24   :  { %v27919_v45 = vpack.c.bf16 %v13109_v23, %v13105_v47 }
0x1c26   :  { %12662 = vmatmul.mubr.f32.gmra.mrb[18].mxu0 %v29275_v40  ;;  %v27914_v40 = vpack.c.bf16 %v13107_v54, %v13103_v62  ;;  %v29290_v62 = vld [vmem:[#allocation33_spill] sm:$0xff] }
0x1c27   :  { %12667 = vmatprep.mubr.f32.mxu0 %v29187_v48 }
0x1c2a   :  { %12670 = vmatmul.mubr.f32.gmra.mrb[16].mxu0 %v29276_v53 }
0x1c2b   :  { %12748 = vmatprep.mubr.f32.mxu0 %v29187_v48 }
0x1c2e   :  { %12752 = vmatmul.mubr.f32.vlgmr.msra.gmra.mrb[30].mxu0 %v29281_v61  ;;  %v27940_v61 = vsub.f32 %v12199_v59, %v13109_v23  ;;  %v29294_v59 = vld [vmem:[#allocation46_spill] sm:$0xff]  ;;  %v14026_v23 = vld [vmem:[%s29093_s12 + $0x8] sm:$0xff] }
0x1c2f   :  { %22202 = vmatpush1.bf16.msra.mxu0 %v22201_v22  ;;  %12757 = vmatprep.mubr.f32.mxu0 %v29187_v48 }
0x1c30   :  { %22204 = vmatprep.subr.bf16.mxu0 %v22203_v49  ;;  %v27938_v49 = vsub.f32 %v12197_v37, %v13105_v47  ;;  %v29293_v37 = vld [vmem:[#allocation44_spill] sm:$0xff]  ;;  %v29300_v47 = vld [vmem:[#allocation30_spill] sm:$0xff] }
0x1c32   :  { %12761 = vmatmul.mubr.f32.gmra.mrb[28].mxu0 %v29282_v29 }
0x1c33   :  { %12766 = vmatprep.mubr.f32.mxu0 %v29187_v48  ;;  %22206 = vmatpush1.bf16.msra.mxu0 %v22205_v36  ;;  %v13282_v36 = vand.u32 4294901760, %v27933_v10 }
0x1c34   :  { %22208 = vmatprep.subr.bf16.mxu0 %v27652_v15  ;;  %v12194_v15 = vld [vmem:[%s29090_s9 + $0x8] sm:$0xff] }
0x1c35   :  { %v13095_v58 = vand.u32 4294901760, %v12194_v15 }
0x1c36   :  { %12770 = vmatmul.mubr.f32.gmra.mrb[26].mxu0 %v29283_v50 }
0x1c37   :  { %12775 = vmatprep.mubr.f32.mxu0 %v29187_v48  ;;  %v27864_v0 = vpack.c.bf16 %v13099_v60, %v13095_v58 }
0x1c3a   :  { %12779 = vmatmul.mubr.f32.gmra.mrb[24].mxu0 %v29284_v57  ;;  %v13288_v57 = vand.u32 4294901760, %v27938_v49 }
0x1c3b   :  { %12784 = vmatprep.mubr.f32.mxu0 %v29187_v48 }
0x1c3e   :  { %12788 = vmatmul.mubr.f32.gmra.mrb[22].mxu0 %v29285_v41  ;;  %v13300_v41 = vand.u32 4294901760, %v27940_v61 }
0x1c3f   :  { %12793 = vmatprep.mubr.f32.mxu0 %v29187_v48 }
0x1c42   :  { %12797 = vmatmul.mubr.f32.gmra.mrb[20].mxu0 %v29286_v56  ;;  %v13283_v56 = vsub.f32 %v27933_v10, %v13282_v36 }
0x1c43   :  { %12802 = vmatprep.mubr.f32.mxu0 %v29187_v48 }
0x1c46   :  { %12806 = vmatmul.mubr.f32.gmra.mrb[18].mxu0 %v29287_v8 }
0x1c47   :  { %12811 = vmatprep.mubr.f32.mxu0 %v29187_v48 }
0x1c4a   :  { %12815 = vmatmul.mubr.f32.gmra.mrb[16].mxu0 %v29288_v30  ;;  %v13301_v30 = vsub.f32 %v27940_v61, %v13300_v41 }
0x1c4b   :  { %12909 = vmatprep.mubr.f32.mxu0 %v29187_v48 }
0x1c4c   :  { %v13302_v18 = vand.u32 4294901760, %v13301_v30  ;;  %v14036_v30 = vld [vmem:[%s29093_s12 + $0x58] sm:$0xff] }
0x1c4e   :  { %12911 = vmatmul.mubr.f32.vlgmr.msra.gmra.mrb[30].mxu0 %v27131_v21 }
0x1c4f   :  { %22210 = vmatpush1.bf16.msra.mxu0 %v27700_v25  ;;  %12916 = vmatprep.mubr.f32.mxu0 %v29187_v48  ;;  %v27878_v25 = vsub.f32 %v12196_v27, %v13099_v60  ;;  %v13289_v27 = vsub.f32 %v27938_v49, %v13288_v57 }
0x1c50   :  { %22212 = vmatprep.subr.bf16.mxu0 %v27702_v11  ;;  %v27876_v11 = vsub.f32 %v12194_v15, %v13095_v58  ;;  %v13284_v58 = vand.u32 4294901760, %v13283_v56  ;;  %v28119_v56 = vld [vmem:[%s29093_s12 + $0x20] sm:$0xff] }
0x1c51   :  { %v13270_v46 = vand.u32 4294901760, %v27878_v25 }
0x1c52   :  { %12918 = vmatmul.mubr.f32.gmra.mrb[28].mxu0 %v27127_v14  ;;  %v13258_v13 = vand.u32 4294901760, %v27876_v11 }
0x1c53   :  { %12923 = vmatprep.mubr.f32.mxu0 %v29187_v48  ;;  %22214 = vmatpush1.bf16.msra.mxu0 %v27707_v39  ;;  %v12193_v39 = vld [vmem:[%s29090_s9] sm:$0xff]  ;;  %v13271_v19 = vsub.f32 %v27878_v25, %v13270_v46 }
0x1c54   :  { %22216 = vmatprep.subr.bf16.mxu0 %v27864_v0  ;;  %v13097_v52 = vand.u32 4294901760, %v12193_v39  ;;  %v13259_v24 = vsub.f32 %v27876_v11, %v13258_v13 }
0x1c55   :  { %v13272_v1 = vand.u32 4294901760, %v13271_v19  ;;  %v22237_v19 = vpack.c.bf16 %v27940_v61, %v27938_v49  ;;  %v29303_v61 = vld [vmem:[#allocation37_spill] sm:$0xff] }
0x1c56   :  { %12925 = vmatmul.mubr.f32.gmra.mrb[26].mxu0 %v27150_v34  ;;  %v27912_v31 = vpack.c.bf16 %v13101_v35, %v13097_v52  ;;  %v13260_v53 = vand.u32 4294901760, %v13259_v24  ;;  %v22231_v35 = vpack.c.bf16 %v27878_v25, %v27876_v11  ;;  %v29296_v11 = vld [vmem:[#allocation38_spill] sm:$0xff]  ;;  %v29298_v25 = vld [vmem:[#allocation43_spill] sm:$0xff] }
0x1c57   :  { %12930 = vmatprep.mubr.f32.mxu0 %v29187_v48 }
0x1c58   :  { %v22223_v22 = vpack.c.bf16 %v13272_v1, %v13260_v53  ;;  %v14028_v53 = vld [vmem:[%s29093_s12 + $0x18] sm:$0xff]  ;;  %v29301_v1 = vld [vmem:[#allocation32_spill] sm:$0xff] }
0x1c5a   :  { %12932 = vmatmul.mubr.f32.gmra.mrb[24].mxu0 %v27142_v2 }
0x1c5b   :  { %12937 = vmatprep.mubr.f32.mxu0 %v29187_v48 }
0x1c5e   :  { %12939 = vmatmul.mubr.f32.gmra.mrb[22].mxu0 %v27168_v7 }
0x1c5f   :  { %12944 = vmatprep.mubr.f32.mxu0 %v29187_v48 }
0x1c62   :  { %12946 = vmatmul.mubr.f32.gmra.mrb[20].mxu0 %v27183_v20 }
0x1c63   :  { %12951 = vmatprep.mubr.f32.mxu0 %v29187_v48 }
0x1c66   :  { %12953 = vmatmul.mubr.f32.gmra.mrb[18].mxu0 %v27198_v16 }
0x1c67   :  { %12958 = vmatprep.mubr.f32.mxu0 %v29187_v48 }
0x1c6a   :  { %12960 = vmatmul.mubr.f32.gmra.mrb[16].mxu0 %v27213_v6 }
0x1c6b   :  { %13038 = vmatprep.mubr.f32.mxu0 %v29187_v48 }
0x1c6e   :  { %13040 = vmatmul.mubr.f32.vlgmr.msra.gmra.mrb[30].mxu0 %v27131_v21  ;;  %v27928_v21 = vsub.f32 %v12193_v39, %v13097_v52 }
0x1c6f   :  { %22218 = vmatpush1.bf16.msra.mxu0 %v27912_v31  ;;  %13045 = vmatprep.mubr.f32.mxu0 %v29187_v48 }
0x1c70   :  { %22220 = vmatprep.subr.bf16.mxu0 %v27914_v40  ;;  %v22233_v24 = vpack.c.bf16 %v27930_v5, %v27928_v21 }
0x1c72   :  { %13047 = vmatmul.mubr.f32.gmra.mrb[28].mxu0 %v27127_v14  ;;  %v27935_v14 = vsub.f32 %v12200_v12, %v13107_v54  ;;  %v29289_v12 = vld [vmem:[#allocation31_spill] sm:$0xff] }
0x1c73   :  { %13052 = vmatprep.mubr.f32.mxu0 %v29187_v48  ;;  %22222 = vmatpush1.bf16.msra.mxu0 %v27919_v45  ;;  %v29292_v54 = vld [vmem:[#allocation39_spill] sm:$0xff] }
0x1c74   :  { %22224 = vmatprep.subr.bf16.mxu0 %v22223_v22  ;;  %v13294_v29 = vand.u32 4294901760, %v27935_v14  ;;  %v14043_v22 = vand.u32 4294901760, %v14026_v23 }
0x1c76   :  { %13054 = vmatmul.mubr.f32.gmra.mrb[26].mxu0 %v27150_v34  ;;  %v13276_v34 = vand.u32 4294901760, %v27930_v5 }
0x1c77   :  { %13059 = vmatprep.mubr.f32.mxu0 %v29187_v48 }
0x1c78   :  { %v13277_v50 = vsub.f32 %v27930_v5, %v13276_v34  ;;  %v28062_v5 = vsub.f32 %v14026_v23, %v14043_v22 }
0x1c7a   :  { %13061 = vmatmul.mubr.f32.gmra.mrb[24].mxu0 %v27142_v2  ;;  %v13264_v2 = vand.u32 4294901760, %v27928_v21  ;;  %v13278_v15 = vand.u32 4294901760, %v13277_v50  ;;  %v14032_v50 = vld [vmem:[%s29093_s12 + $0x38] sm:$0xff] }
0x1c7b   :  { %13066 = vmatprep.mubr.f32.mxu0 %v29187_v48 }
0x1c7e   :  { %13068 = vmatmul.mubr.f32.gmra.mrb[22].mxu0 %v27168_v7  ;;  %v13265_v7 = vsub.f32 %v27928_v21, %v13264_v2  ;;  %v14047_v21 = vand.u32 4294901760, %v14028_v53 }
0x1c7f   :  { %13073 = vmatprep.mubr.f32.mxu0 %v29187_v48 }
0x1c80   :  { %v13266_v8 = vand.u32 4294901760, %v13265_v7  ;;  %v28088_v7 = vpack.c.bf16 %v14047_v21, %v14043_v22 }
0x1c82   :  { %13075 = vmatmul.mubr.f32.gmra.mrb[20].mxu0 %v27183_v20  ;;  %v13295_v20 = vsub.f32 %v27935_v14, %v13294_v29  ;;  %v22225_v39 = vpack.c.bf16 %v13278_v15, %v13266_v8  ;;  %v14055_v8 = vand.u32 4294901760, %v14032_v50  ;;  %v14031_v15 = vld [vmem:[%s29093_s12 + $0x30] sm:$0xff] }
0x1c83   :  { %13080 = vmatprep.mubr.f32.mxu0 %v29187_v48 }
0x1c84   :  { %v13296_v60 = vand.u32 4294901760, %v13295_v20 }
0x1c86   :  { %13082 = vmatmul.mubr.f32.gmra.mrb[18].mxu0 %v27198_v16  ;;  %v13290_v16 = vand.u32 4294901760, %v13289_v27  ;;  %v22227_v26 = vpack.c.bf16 %v13296_v60, %v13284_v58  ;;  %v14034_v27 = vld [vmem:[%s29093_s12 + $0x48] sm:$0xff]  ;;  %v14053_v60 = vand.u32 4294901760, %v28119_v56 }
0x1c87   :  { %13087 = vmatprep.mubr.f32.mxu0 %v29187_v48 }
0x1c88   :  { %v22229_v52 = vpack.c.bf16 %v13302_v18, %v13290_v16  ;;  %v14059_v16 = vand.u32 4294901760, %v14034_v27  ;;  %v14063_v18 = vand.u32 4294901760, %v14036_v30 }
0x1c8a   :  { %13089 = vmatmul.mubr.f32.gmra.mrb[16].mxu0 %v27213_v6  ;;  %v29291_v6 = vld [vmem:[#allocation36_spill] sm:$0xff] }
0x1c8b   :  { %13167 = vmatprep.mubr.f32.mxu0 %v29187_v48 }
0x1c8e   :  { %13173 = vmatmul.mubr.f32.vlgmr.msra.gmra.mrb[30].mxu0 %v29289_v12  ;;  %v14033_v12 = vld [vmem:[%s29093_s12 + $0x40] sm:$0xff] }
0x1c8f   :  { %22226 = vmatpush1.bf16.msra.mxu0 %v22225_v39  ;;  %13178 = vmatprep.mubr.f32.mxu0 %v29187_v48  ;;  %v14057_v39 = vand.u32 4294901760, %v14031_v15 }
0x1c90   :  { %22228 = vmatprep.subr.bf16.mxu0 %v22227_v26 }
0x1c92   :  { %13184 = vmatmul.mubr.f32.gmra.mrb[28].mxu0 %v29290_v62  ;;  %v28151_v62 = vld [vmem:[%s29093_s12 + $0x78] sm:$0xff] }
0x1c93   :  { %13189 = vmatprep.mubr.f32.mxu0 %v29187_v48  ;;  %22230 = vmatpush1.bf16.msra.mxu0 %v22229_v52  ;;  %v14035_v52 = vld [vmem:[%s29093_s12 + $0x50] sm:$0xff] }
0x1c94   :  { %22232 = vmatprep.subr.bf16.mxu0 %v22231_v35  ;;  %v28146_v35 = vld [vmem:[%s29093_s12 + $0x68] sm:$0xff] }
0x1c96   :  { %13195 = vmatmul.mubr.f32.gmra.mrb[26].mxu0 %v29291_v6  ;;  %v28156_v6 = vpack.c.bf16 %v14057_v39, %v14053_v60 }
0x1c97   :  { %13200 = vmatprep.mubr.f32.mxu0 %v29187_v48 }
0x1c9a   :  { %13206 = vmatmul.mubr.f32.gmra.mrb[24].mxu0 %v29292_v54  ;;  %v28158_v54 = vpack.c.bf16 %v14063_v18, %v14059_v16 }
0x1c9b   :  { %13211 = vmatprep.mubr.f32.mxu0 %v29187_v48 }
0x1c9e   :  { %13217 = vmatmul.mubr.f32.gmra.mrb[22].mxu0 %v27536_v28  ;;  %v22235_v28 = vpack.c.bf16 %v27935_v14, %v27933_v10  ;;  %v28064_v10 = vsub.f32 %v14028_v53, %v14047_v21  ;;  %v29302_v14 = vld [vmem:[#allocation34_spill] sm:$0xff]  ;;  %v28208_v53 = vsub.f32 %v14032_v50, %v14055_v8 }
0x1c9f   :  { %13222 = vmatprep.mubr.f32.mxu0 %v29187_v48 }
0x1ca0   :  { %v14149_v49 = vand.u32 4294901760, %v28064_v10  ;;  %v14173_v21 = vand.u32 4294901760, %v28208_v53 }
0x1ca2   :  { %13228 = vmatmul.mubr.f32.gmra.mrb[20].mxu0 %v29293_v37  ;;  %v14061_v37 = vand.u32 4294901760, %v14033_v12 }
0x1ca3   :  { %13233 = vmatprep.mubr.f32.mxu0 %v29187_v48 }
0x1ca6   :  { %13239 = vmatmul.mubr.f32.gmra.mrb[18].mxu0 %v29294_v59  ;;  %v14065_v59 = vand.u32 4294901760, %v14035_v52 }
0x1ca7   :  { %13244 = vmatprep.mubr.f32.mxu0 %v29187_v48 }
0x1caa   :  { %13250 = vmatmul.mubr.f32.gmra.mrb[16].mxu0 %v27563_v43  ;;  %v22247_v43 = vpack.c.bf16 %v13270_v46, %v13258_v13  ;;  %v29299_v13 = vld [vmem:[#allocation29_spill] sm:$0xff]  ;;  %v22253_v46 = vpack.c.bf16 %v13300_v41, %v13288_v57 }
0x1cab   :  { %13360 = vmatprep.mubr.f32.mxu0 %v29187_v48 }
0x1cae   :  { %13362 = vmatmul.mubr.f32.vlgmr.msra.gmra.mrb[30].mxu0 %v27411_v51 }
0x1caf   :  { %22234 = vmatpush1.bf16.msra.mxu0 %v22233_v24  ;;  %13367 = vmatprep.mubr.f32.mxu0 %v29187_v48  ;;  %v14067_v24 = vand.u32 4294901760, %v28146_v35 }
0x1cb0   :  { %22236 = vmatprep.subr.bf16.mxu0 %v22235_v28  ;;  %v14071_v28 = vand.u32 4294901760, %v28151_v62 }
0x1cb2   :  { %13369 = vmatmul.mubr.f32.gmra.mrb[28].mxu0 %v27414_v63 }
0x1cb3   :  { %13374 = vmatprep.mubr.f32.mxu0 %v29187_v48  ;;  %22238 = vmatpush1.bf16.msra.mxu0 %v22237_v19  ;;  %v28171_v19 = vld [vmem:[%s29093_s12 + $0x70] sm:$0xff] }
0x1cb4   :  { %22240 = vmatprep.subr.bf16.mxu0 %v27864_v0 }
0x1cb6   :  { %13376 = vmatmul.mubr.f32.gmra.mrb[26].mxu0 %v27446_v9 }
0x1cb7   :  { %13381 = vmatprep.mubr.f32.mxu0 %v29187_v48 }
0x1cba   :  { %13383 = vmatmul.mubr.f32.gmra.mrb[24].mxu0 %v27458_v4 }
0x1cbb   :  { %13388 = vmatprep.mubr.f32.mxu0 %v29187_v48 }
0x1cbe   :  { %13390 = vmatmul.mubr.f32.gmra.mrb[22].mxu0 %v27485_v55 }
0x1cbf   :  { %13395 = vmatprep.mubr.f32.mxu0 %v29187_v48 }
0x1cc2   :  { %13397 = vmatmul.mubr.f32.gmra.mrb[20].mxu0 %v27500_v33 }
0x1cc3   :  { %13402 = vmatprep.mubr.f32.mxu0 %v29187_v48 }
0x1cc6   :  { %13404 = vmatmul.mubr.f32.gmra.mrb[18].mxu0 %v27517_v42 }
0x1cc7   :  { %13409 = vmatprep.mubr.f32.mxu0 %v29187_v48 }
0x1cca   :  { %13411 = vmatmul.mubr.f32.gmra.mrb[16].mxu0 %v27532_v38 }
0x1ccb   :  { %13497 = vmatprep.mubr.f32.mxu0 %v29187_v48 }
0x1cce   :  { %13500 = vmatmul.mubr.f32.vlgmr.msra.gmra.mrb[30].mxu0 %v27424_v32  ;;  %v29295_v32 = vld [vmem:[#allocation35_spill] sm:$0xff] }
0x1ccf   :  { %22242 = vmatpush1.bf16.msra.mxu0 %v27912_v31  ;;  %13505 = vmatprep.mubr.f32.mxu0 %v29187_v48 }
0x1cd0   :  { %22244 = vmatprep.subr.bf16.mxu0 %v27914_v40 }
0x1cd2   :  { %13508 = vmatmul.mubr.f32.gmra.mrb[28].mxu0 %v27431_v44  ;;  %v29297_v44 = vld [vmem:[#allocation41_spill] sm:$0xff] }
0x1cd3   :  { %13513 = vmatprep.mubr.f32.mxu0 %v29187_v48  ;;  %22246 = vmatpush1.bf16.msra.mxu0 %v27919_v45 }
0x1cd4   :  { %22248 = vmatprep.subr.bf16.mxu0 %v22247_v43 }
0x1cd6   :  { %13516 = vmatmul.mubr.f32.gmra.mrb[26].mxu0 %v27470_v3  ;;  %v22249_v3 = vpack.c.bf16 %v13276_v34, %v13264_v2  ;;  %v29304_v34 = vld [vmem:[#allocation40_spill] sm:$0xff] }
0x1cd7   :  { %13521 = vmatprep.mubr.f32.mxu0 %v29187_v48 }
0x1cda   :  { %13524 = vmatmul.mubr.f32.gmra.mrb[24].mxu0 %v27478_v17  ;;  %v22251_v17 = vpack.c.bf16 %v13294_v29, %v13282_v36  ;;  %v29305_v36 = vld [vmem:[#allocation42_spill] sm:$0xff]  ;;  %v29306_v29 = vld [vmem:[#allocation45_spill] sm:$0xff] }
0x1cdb   :  { %13529 = vmatprep.mubr.f32.mxu0 %v29187_v48 }
0x1cde   :  { %13532 = vmatmul.mubr.f32.gmra.mrb[22].mxu0 %v29295_v32  ;;  %v14150_v32 = vsub.f32 %v28064_v10, %v14149_v49 }
0x1cdf   :  { %13537 = vmatprep.mubr.f32.mxu0 %v29187_v48 }
0x1ce2   :  { %13540 = vmatmul.mubr.f32.gmra.mrb[20].mxu0 %v29296_v11  ;;  %v28182_v11 = vpack.c.bf16 %v14065_v59, %v14061_v37 }
0x1ce3   :  { %13545 = vmatprep.mubr.f32.mxu0 %v29187_v48 }
0x1ce6   :  { %13548 = vmatmul.mubr.f32.gmra.mrb[18].mxu0 %v29297_v44 }
0x1ce7   :  { %13553 = vmatprep.mubr.f32.mxu0 %v29187_v48 }
0x1cea   :  { %13556 = vmatmul.mubr.f32.gmra.mrb[16].mxu0 %v29298_v25  ;;  %v14073_v25 = vand.u32 4294901760, %v28171_v19 }
0x1ceb   :  { %13634 = vmatprep.mubr.f32.mxu0 %v29187_v48 }
0x1cee   :  { %13638 = vmatmul.mubr.f32.vlgmr.msra.gmra.mrb[30].mxu0 %v29299_v13  ;;  %v14151_v13 = vand.u32 4294901760, %v14150_v32 }
0x1cef   :  { %22250 = vmatpush1.bf16.msra.mxu0 %v22249_v3  ;;  %13643 = vmatprep.mubr.f32.mxu0 %v29187_v48  ;;  %v28187_v3 = vpack.c.bf16 %v14071_v28, %v14067_v24 }
0x1cf0   :  { %22252 = vmatprep.subr.bf16.mxu0 %v22251_v17 }
0x1cf2   :  { %13647 = vmatmul.mubr.f32.gmra.mrb[28].mxu0 %v29300_v47 }
0x1cf3   :  { %13652 = vmatprep.mubr.f32.mxu0 %v29187_v48  ;;  %22254 = vmatpush1.bf16.msra.mxu0 %v22253_v46 }
0x1cf4   :  { %22256 = vmatprep.subr.bf16.mxu0 %v27864_v0  ;;  %v14137_v0 = vand.u32 4294901760, %v28062_v5 }
0x1cf6   :  { %13656 = vmatmul.mubr.f32.gmra.mrb[26].mxu0 %v29301_v1  ;;  %v28076_v2 = vpack.c.bf16 %v14149_v49, %v14137_v0  ;;  %v14138_v43 = vsub.f32 %v28062_v5, %v14137_v0  ;;  %v28222_v0 = vsub.f32 %v14034_v27, %v14059_v16  ;;  %v28224_v49 = vsub.f32 %v14036_v30, %v14063_v18 }
0x1cf7   :  { %13661 = vmatprep.mubr.f32.mxu0 %v29187_v48 }
0x1cf8   :  { %v14139_v17 = vand.u32 4294901760, %v14138_v43  ;;  %v14197_v50 = vand.u32 4294901760, %v28224_v49 }
0x1cfa   :  { %13665 = vmatmul.mubr.f32.gmra.mrb[24].mxu0 %v29302_v14  ;;  %v28195_v46 = vpack.c.bf16 %v14151_v13, %v14139_v17  ;;  %v28217_v14 = vsub.f32 %v28119_v56, %v14053_v60 }
0x1cfb   :  { %13670 = vmatprep.mubr.f32.mxu0 %v29187_v48 }
0x1cfe   :  { %13674 = vmatmul.mubr.f32.gmra.mrb[22].mxu0 %v29303_v61 }
0x1cff   :  { %13679 = vmatprep.mubr.f32.mxu0 %v29187_v48 }
0x1d02   :  { %13683 = vmatmul.mubr.f32.gmra.mrb[20].mxu0 %v29304_v34 }
0x1d03   :  { %13688 = vmatprep.mubr.f32.mxu0 %v29187_v48 }
0x1d06   :  { %13692 = vmatmul.mubr.f32.gmra.mrb[18].mxu0 %v29305_v36  ;;  %v14174_v36 = vsub.f32 %v28208_v53, %v14173_v21 }
0x1d07   :  { %13697 = vmatprep.mubr.f32.mxu0 %v29187_v48 }
0x1d0a   :  { %13701 = vmatmul.mubr.f32.gmra.mrb[16].mxu0 %v29306_v29  ;;  %v14167_v29 = vand.u32 4294901760, %v28217_v14 }
0x1d0b   :  { %13795 = vmatprep.mubr.f32.mxu0 %v29187_v48 }
0x1d0c   :  { %v14168_v27 = vsub.f32 %v28217_v14, %v14167_v29 }
0x1d0e   :  { %13797 = vmatmul.mubr.f32.vlgmr.msra.gmra.mrb[30].mxu0 %v27411_v51 }
0x1d0f   :  { %22258 = vmatpush1.bf16.msra.mxu0 %v27912_v31  ;;  %13802 = vmatprep.mubr.f32.mxu0 %v29187_v48  ;;  %v14025_v31 = vld [vmem:[%s29093_s12] sm:$0xff] }
0x1d10   :  { %22260 = vmatprep.subr.bf16.mxu0 %v27914_v40  ;;  %v14027_v40 = vld [vmem:[%s29093_s12 + $0x10] sm:$0xff]  ;;  %v14045_v57 = vand.u32 4294901760, %v14025_v31 }
0x1d11   :  { %v14049_v41 = vand.u32 4294901760, %v14027_v40 }
0x1d12   :  { %13804 = vmatmul.mubr.f32.gmra.mrb[28].mxu0 %v27414_v63  ;;  %v28201_v47 = vsub.f32 %v14025_v31, %v14045_v57 }
0x1d13   :  { %13809 = vmatprep.mubr.f32.mxu0 %v29187_v48  ;;  %22262 = vmatpush1.bf16.msra.mxu0 %v27919_v45  ;;  %v14030_v45 = vld [vmem:[%s29093_s12 + $0x28] sm:$0xff]  ;;  %v28131_v58 = vpack.c.bf16 %v14049_v41, %v14045_v57  ;;  %v28249_v57 = vsub.f32 %v28146_v35, %v14067_v24 }
0x1d14   :  { %22264 = vmatprep.subr.bf16.mxu0 %v28088_v7  ;;  %v14051_v20 = vand.u32 4294901760, %v14030_v45 }
0x1d16   :  { %13811 = vmatmul.mubr.f32.gmra.mrb[26].mxu0 %v27446_v9  ;;  %v28135_v26 = vpack.c.bf16 %v14055_v8, %v14051_v20  ;;  %v28206_v23 = vsub.f32 %v14030_v45, %v14051_v20  ;;  %v28244_v45 = vsub.f32 %v14035_v52, %v14065_v59  ;;  %v14209_v52 = vand.u32 4294901760, %v28249_v57 }
0x1d17   :  { %13816 = vmatprep.mubr.f32.mxu0 %v29187_v48  ;;  %v14169_v59 = vand.u32 4294901760, %v14168_v27 }
0x1d18   :  { %v14161_v22 = vand.u32 4294901760, %v28206_v23 }
0x1d1a   :  { %13818 = vmatmul.mubr.f32.gmra.mrb[24].mxu0 %v27458_v4  ;;  %v14162_v34 = vsub.f32 %v28206_v23, %v14161_v22 }
0x1d1b   :  { %13823 = vmatprep.mubr.f32.mxu0 %v29187_v48 }
0x1d1c   :  { %v14163_v8 = vand.u32 4294901760, %v14162_v34 }
0x1d1e   :  { %13825 = vmatmul.mubr.f32.gmra.mrb[22].mxu0 %v27485_v55 }
0x1d1f   :  { %13830 = vmatprep.mubr.f32.mxu0 %v29187_v48 }
0x1d22   :  { %13832 = vmatmul.mubr.f32.gmra.mrb[20].mxu0 %v27500_v33 }
0x1d23   :  { %13837 = vmatprep.mubr.f32.mxu0 %v29187_v48 }
0x1d26   :  { %13839 = vmatmul.mubr.f32.gmra.mrb[18].mxu0 %v27517_v42 }
0x1d27   :  { %13844 = vmatprep.mubr.f32.mxu0 %v29187_v48 }
0x1d2a   :  { %13846 = vmatmul.mubr.f32.gmra.mrb[16].mxu0 %v27532_v38 }
0x1d2b   :  { %13924 = vmatprep.mubr.f32.mxu0 %v29187_v48 }
0x1d2e   :  { %13926 = vmatmul.mubr.f32.vlgmr.msra.gmra.mrb[30].mxu0 %v27411_v51  ;;  %v28166_v51 = vld [vmem:[%s29093_s12 + $0x60] sm:$0xff] }
0x1d2f   :  { %22266 = vmatpush1.bf16.msra.mxu0 %v28131_v58  ;;  %13931 = vmatprep.mubr.f32.mxu0 %v29187_v48  ;;  %v14069_v44 = vand.u32 4294901760, %v28166_v51 }
0x1d30   :  { %22268 = vmatprep.subr.bf16.mxu0 %v28135_v26 }
0x1d31   :  { %v28265_v16 = vsub.f32 %v28166_v51, %v14069_v44 }
0x1d32   :  { %13933 = vmatmul.mubr.f32.gmra.mrb[28].mxu0 %v27414_v63  ;;  %v28192_v63 = vpack.c.bf16 %v14073_v25, %v14069_v44 }
0x1d33   :  { %13938 = vmatprep.mubr.f32.mxu0 %v29187_v48  ;;  %22270 = vmatpush1.bf16.msra.mxu0 %v28156_v6 }
0x1d34   :  { %22272 = vmatprep.subr.bf16.mxu0 %v28158_v54 }
0x1d36   :  { %13940 = vmatmul.mubr.f32.gmra.mrb[26].mxu0 %v27446_v9  ;;  %v28203_v9 = vsub.f32 %v14027_v40, %v14049_v41  ;;  %v28242_v40 = vsub.f32 %v14033_v12, %v14061_v37  ;;  %v28252_v41 = vsub.f32 %v28151_v62, %v14071_v28  ;;  %v14198_v12 = vsub.f32 %v28224_v49, %v14197_v50 }
0x1d37   :  { %13945 = vmatprep.mubr.f32.mxu0 %v29187_v48  ;;  %22274 = vmatpush1.bf16.msra.mxu0 %v28182_v11 }
0x1d38   :  { %22276 = vmatprep.subr.bf16.mxu0 %v28187_v3  ;;  %v14155_v1 = vand.u32 4294901760, %v28203_v9  ;;  %v14191_v60 = vand.u32 4294901760, %v28242_v40  ;;  %v14221_v35 = vand.u32 4294901760, %v28252_v41  ;;  %v14199_v44 = vand.u32 4294901760, %v14198_v12 }
0x1d3a   :  { %13947 = vmatmul.mubr.f32.gmra.mrb[24].mxu0 %v27458_v4  ;;  %v14143_v4 = vand.u32 4294901760, %v28201_v47  ;;  %v14192_v28 = vsub.f32 %v28242_v40, %v14191_v60  ;;  %v14222_v17 = vsub.f32 %v28252_v41, %v14221_v35 }
0x1d3b   :  { %13952 = vmatprep.mubr.f32.mxu0 %v29187_v48  ;;  %22278 = vmatpush1.bf16.msra.mxu0 %v28192_v63 }
0x1d3c   :  { %22280 = vmatprep.subr.bf16.mxu0 %v28195_v46  ;;  %v14144_v61 = vsub.f32 %v28201_v47, %v14143_v4 }
0x1d3e   :  { %13954 = vmatmul.mubr.f32.gmra.mrb[22].mxu0 %v27485_v55  ;;  %v28219_v55 = vsub.f32 %v14031_v15, %v14057_v39  ;;  %v14145_v56 = vand.u32 4294901760, %v14144_v61  ;;  %v14175_v15 = vand.u32 4294901760, %v14174_v36  ;;  %v14203_v39 = vand.u32 4294901760, %v28244_v45 }
0x1d3f   :  { %13959 = vmatprep.mubr.f32.mxu0 %v29187_v48  ;;  %v14193_v61 = vand.u32 4294901760, %v14192_v28  ;;  %v28332_v28 = vpack.c.bf16 %v28208_v53, %v28206_v23  ;;  %v28414_v53 = vpack.c.bf16 %v14221_v35, %v14209_v52 }
0x1d40   :  { %v14179_v31 = vand.u32 4294901760, %v28219_v55  ;;  %v28280_v37 = vpack.c.bf16 %v14175_v15, %v14163_v8  ;;  %v14204_v51 = vsub.f32 %v28244_v45, %v14203_v39  ;;  %v14223_v8 = vand.u32 4294901760, %v14222_v17 }
0x1d41   :  { %v28384_v17 = vpack.c.bf16 %v14173_v21, %v14161_v22  ;;  %v28407_v23 = vpack.c.bf16 %v14203_v39, %v14191_v60  ;;  %v29307_v22 = vld [vmem:[#allocation17_spill] sm:$0xff] }
0x1d42   :  { %13961 = vmatmul.mubr.f32.gmra.mrb[20].mxu0 %v27500_v33  ;;  %v14156_v33 = vsub.f32 %v28203_v9, %v14155_v1  ;;  %v14180_v30 = vsub.f32 %v28219_v55, %v14179_v31 }
0x1d43   :  { %13966 = vmatprep.mubr.f32.mxu0 %v29187_v48 }
0x1d44   :  { %v14157_v20 = vand.u32 4294901760, %v14156_v33  ;;  %v14181_v24 = vand.u32 4294901760, %v14180_v30  ;;  %v14205_v33 = vand.u32 4294901760, %v14204_v51  ;;  %v28349_v51 = vpack.c.bf16 %v28244_v45, %v28242_v40  ;;  %v29308_v45 = vld [vmem:[#allocation16_spill] sm:$0xff] }
0x1d46   :  { %13968 = vmatmul.mubr.f32.gmra.mrb[18].mxu0 %v27517_v42  ;;  %v14185_v42 = vand.u32 4294901760, %v28222_v0  ;;  %v28278_v62 = vpack.c.bf16 %v14157_v20, %v14145_v56  ;;  %v28297_v13 = vpack.c.bf16 %v14181_v24, %v14169_v59  ;;  %v28311_v15 = vpack.c.bf16 %v14205_v33, %v14193_v61 }
0x1d47   :  { %13973 = vmatprep.mubr.f32.mxu0 %v29187_v48  ;;  %v28322_v59 = vpack.c.bf16 %v28064_v10, %v28062_v5  ;;  %v28327_v24 = vpack.c.bf16 %v28203_v9, %v28201_v47  ;;  %v28338_v5 = vpack.c.bf16 %v28219_v55, %v28217_v14  ;;  %v28344_v10 = vpack.c.bf16 %v28224_v49, %v28222_v0  ;;  %v24400_v14 = vld [vmem:[%s29092_s11] sm:$0x3]  ;;  %s20589_s11 = sshll.u32 %s24504_s4, 4  ;;  %s20590_s11 = int_to_ptr.vmem [resolvable:$true] %s20589_s11 }
0x1d48   :  { %v14186_v18 = vsub.f32 %v28222_v0, %v14185_v42  ;;  %v28392_v47 = vpack.c.bf16 %v14179_v31, %v14167_v29  ;;  %v28400_v9 = vpack.c.bf16 %v14197_v50, %v14185_v42  ;;  %v13990_v55 = vrot.slane %v24400_v14, %v29307_v22  ;;  %s24467_s20 = scalar_lea.vmem %s20590_s11, 32  ;;  %p24472_p11 = scmp.lt.s32.totalorder %s20590_s11, %s20590_s11 }
0x1d49   :  { %p24468_p10 = scmp.ne.s32.totalorder %s20590_s11, %s24467_s20  ;;  %p24473_p12 = scmp.lt.s32.totalorder %s24467_s20, %s24467_s20 }
0x1d4a   :  { %13975 = vmatmul.mubr.f32.gmra.mrb[16].mxu0 %v27532_v38  ;;  %v28268_v38 = vsub.f32 %v28171_v19, %v14073_v25  ;;  %v14215_v19 = vand.u32 4294901760, %v28265_v16  ;;  %v14187_v32 = vand.u32 4294901760, %v14186_v18  ;;  %v14210_v25 = vsub.f32 %v28249_v57, %v14209_v52 }
0x1d4b   :  { %14123 = vmatprep.mubr.f32.mxu0 %v29187_v48  ;;  %p24474_p13 = por %p24473_p12, %p24472_p11 }
0x1d4c   :  { %v14227_v43 = vand.u32 4294901760, %v28268_v38  ;;  %v14216_v34 = vsub.f32 %v28265_v16, %v14215_v19  ;;  %v28308_v56 = vpack.c.bf16 %v14199_v44, %v14187_v32  ;;  %v14211_v20 = vand.u32 4294901760, %v14210_v25 }
0x1d4d   :  { %v28354_v32 = vpack.c.bf16 %v28252_v41, %v28249_v57  ;;  %v28359_v44 = vpack.c.bf16 %v28268_v38, %v28265_v16  ;;  %v28377_v25 = vpack.c.bf16 %v14155_v1, %v14143_v4  ;;  %v24399_v1 = vld [vmem:[#allocation11] sm:$0x3]  ;;  %p24475_p0 = pnand %p24474_p13, %p24468_p10 }
0x1d4e   :  { %v14228_v36 = vsub.f32 %v28268_v38, %v14227_v43  ;;  %v14217_v27 = vand.u32 4294901760, %v14216_v34  ;;  %v28314_v18 = vpack.c.bf16 %v14223_v8, %v14211_v20  ;;  %v28421_v4 = vpack.c.bf16 %v14227_v43, %v14215_v19 }
0x1d4f   :  { %v12158_v21 = vrot.slane %v24399_v1, %v29307_v22 }
0x1d50   :  { %v14229_v30 = vand.u32 4294901760, %v14228_v36 }
0x1d51   :  { %v28451_v0 = vadd.f32 %v13990_v55, %v12158_v21 }
0x1d52   :  { %14129 = vmatmul.mubr.f32.vlgmr.msra.gmra.mrb[16].mxu0 %v29187_v48  ;;  %v28317_v12 = vpack.c.bf16 %v14229_v30, %v14217_v27 }
0x1d53   :  { %22282 = vmatpush1.bf16.msra.mxu0 %v28278_v62  ;;  %14279 = vmatprep.mubr.f32.mxu0 %v29187_v48 }
0x1d54   :  { %22284 = vmatprep.subr.bf16.mxu0 %v28280_v37 }
0x1d57   :  { %22286 = vmatpush1.bf16.msra.mxu0 %v28297_v13 }
0x1d58   :  { %22288 = vmatprep.subr.bf16.mxu0 %v28308_v56 }
0x1d5b   :  { %22290 = vmatpush1.bf16.msra.mxu0 %v28311_v15 }
0x1d5c   :  { %22292 = vmatprep.subr.bf16.mxu0 %v28314_v18 }
0x1d5f   :  { %22294 = vmatpush1.bf16.msra.mxu0 %v28317_v12 }
0x1d60   :  { %22296 = vmatprep.subr.bf16.mxu0 %v28322_v59 }
0x1d62   :  { %14281 = vmatmul.mubr.f32.vlgmr.msra.gmra.mrb[16].mxu0 %v29187_v48 }
0x1d63   :  { %22298 = vmatpush1.bf16.msra.mxu0 %v28327_v24  ;;  %14383 = vmatprep.mubr.f32.mxu0 %v29187_v48 }
0x1d64   :  { %22300 = vmatprep.subr.bf16.mxu0 %v28332_v28 }
0x1d67   :  { %22302 = vmatpush1.bf16.msra.mxu0 %v28338_v5 }
0x1d68   :  { %22304 = vmatprep.subr.bf16.mxu0 %v28344_v10 }
0x1d6b   :  { %22306 = vmatpush1.bf16.msra.mxu0 %v28349_v51 }
0x1d6c   :  { %22308 = vmatprep.subr.bf16.mxu0 %v28354_v32 }
0x1d6f   :  { %22310 = vmatpush1.bf16.msra.mxu0 %v28359_v44 }
0x1d70   :  { %22312 = vmatprep.subr.bf16.mxu0 %v28088_v7 }
0x1d72   :  { %14386 = vmatmul.mubr.f32.vlgmr.msra.gmra.mrb[16].mxu0 %v29187_v48 }
0x1d73   :  { %22314 = vmatpush1.bf16.msra.mxu0 %v28131_v58  ;;  %14472 = vmatprep.mubr.f32.mxu0 %v29187_v48 }
0x1d74   :  { %22316 = vmatprep.subr.bf16.mxu0 %v28135_v26 }
0x1d77   :  { %22318 = vmatpush1.bf16.msra.mxu0 %v28156_v6 }
0x1d78   :  { %22320 = vmatprep.subr.bf16.mxu0 %v28158_v54 }
0x1d7b   :  { %22322 = vmatpush1.bf16.msra.mxu0 %v28182_v11 }
0x1d7c   :  { %22324 = vmatprep.subr.bf16.mxu0 %v28187_v3 }
0x1d7f   :  { %22326 = vmatpush1.bf16.msra.mxu0 %v28192_v63 }
0x1d80   :  { %22328 = vmatprep.subr.bf16.mxu0 %v28076_v2 }
0x1d82   :  { %14476 = vmatmul.mubr.f32.vlgmr.msra.gmra.mrb[16].mxu0 %v29187_v48 }
0x1d83   :  { %22330 = vmatpush1.bf16.msra.mxu0 %v28377_v25  ;;  %14594 = vmatprep.mubr.f32.mxu0 %v29187_v48 }
0x1d84   :  { %22332 = vmatprep.subr.bf16.mxu0 %v28384_v17 }
0x1d87   :  { %22334 = vmatpush1.bf16.msra.mxu0 %v28392_v47 }
0x1d88   :  { %22336 = vmatprep.subr.bf16.mxu0 %v28400_v9 }
0x1d8b   :  { %22338 = vmatpush1.bf16.msra.mxu0 %v28407_v23 }
0x1d8c   :  { %22340 = vmatprep.subr.bf16.mxu0 %v28414_v53 }
0x1d8f   :  { %22342 = vmatpush1.bf16.msra.mxu0 %v28421_v4 }
0x1d90   :  { %22344 = vmatprep.subr.bf16.mxu0 %v28088_v7 }
0x1d92   :  { %14596 = vmatmul.mubr.f32.vlgmr.msra.gmra.mrb[16].mxu0 %v29187_v48 }
0x1d93   :  { %22346 = vmatpush1.bf16.msra.mxu0 %v28131_v58  ;;  %14682 = vmatprep.mubr.f32.mxu0 %v29187_v48 }
0x1d94   :  { %22348 = vmatprep.subr.bf16.mxu0 %v28135_v26 }
0x1d97   :  { %22350 = vmatpush1.bf16.msra.mxu0 %v28156_v6 }
0x1d98   :  { %22352 = vmatprep.subr.bf16.mxu0 %v28158_v54 }
0x1d9b   :  { %22354 = vmatpush1.bf16.msra.mxu0 %v28182_v11 }
0x1d9c   :  { %22356 = vmatprep.subr.bf16.mxu0 %v28187_v3 }
0x1d9f   :  { %22358 = vmatpush1.bf16.msra.mxu0 %v28192_v63 }
0x1da0   :  { %22360 = vmatprep.subr.bf16.mxu0 %v28088_v7 }
0x1da2   :  { %14684 = vmatmul.mubr.f32.vlgmr.msra.gmra.mrb[16].mxu0 %v29187_v48 }
0x1da3   :  { %22362 = vmatpush1.bf16.msra.mxu0 %v28131_v58  ;;  %14809 = vmatprep.mubr.f32.mxu0 %v29187_v48 }
0x1da4   :  { %22364 = vmatprep.subr.bf16.mxu0 %v28135_v26 }
0x1da7   :  { %22366 = vmatpush1.bf16.msra.mxu0 %v28156_v6 }
0x1da8   :  { %22368 = vmatprep.subr.bf16.mxu0 %v28158_v54 }
0x1dab   :  { %22370 = vmatpush1.bf16.msra.mxu0 %v28182_v11 }
0x1dac   :  { %22372 = vmatprep.subr.bf16.mxu0 %v28187_v3 }
0x1daf   :  { %22374 = vmatpush1.bf16.msra.mxu0 %v28192_v63 }
0x1db0   :  { %22376 = vmatprep.subr.bf16.mxu0 %v28195_v46 }
0x1e75   :  { %v14685_v49 = vpop.f32.mrb[16].mxu0 }
0x1e76   :  { %v14687_v29 = vpop.f32.mrb[17].mxu0  ;;  %v23182_v42 = vadd.f32 %v29308_v45, %v14685_v49 }
0x1e77   :  { %v23184_v31 = vadd.f32 %v28451_v0, %v14687_v29 }
0x1e78   :  { %v20655_v50 = vmul.f32 -1.442695, %v23182_v42 }
0x1e79   :  { %24303 = vtanh.f32 %v23184_v31  ;;  %v20656_v43 = vmul.f32 -1.442695, %v23184_v31 }
0x1e7a   :  { %24305 = vpow2.f32 %v20655_v50 }
0x1e83   :  { %v24304_v40 = vpop.eup %24303 }
0x1e84   :  { %14709 = vrot.lane.b32.xlu0 %v24304_v40, %s24500_s7  ;;  %v24306_v57 = vpop.eup %24305 }
0x1e85   :  { %v14700_v41 = vadd.f32 1.0, %v24306_v57 }
0x1e87   :  { %24307 = vrcp.f32 %v14700_v41 }
0x1e91   :  { %v24308_v60 = vpop.eup %24307 }
0x1e92   :  { %v14707_v38 = vmul.f32 0.0, %v24308_v60 }
0x1ef6   :  { %v14710_v39 = vpop.permute.xlu0 %14709 }
0x1ef7   :  { %v14712_v16 = vmul.f32 %v24308_v60, %v14710_v39 }
0x1ef9   :  { %14714 = vrot.lane.b32.xlu1 %v14712_v16, %s24500_s7 }
0x1f6b   :  { %v14715_v52 = vpop.permute.xlu1 %14714 }
0x1f6c   :  { %v28457_v35 = vadd.f32 %v14715_v52, %v14707_v38 }
0x1f6e   :  { %24309 = vtanh.f32 %v28457_v35 }
0x1f6f   :  { %24311 = vpow2.f32 %v20656_v43 }
0x1f78   :  { %v24310_v19 = vpop.eup %24309 }
0x1f79   :  { %14720 = vrot.lane.b32.xlu0 %v24310_v19, %s24500_s7  ;;  %v24312_v61 = vpop.eup %24311 }
0x1f7a   :  { %v14701_v33 = vadd.f32 1.0, %v24312_v61 }
0x1f7c   :  { %24313 = vrcp.f32 %v14701_v33 }
0x1f86   :  { %v24314_v34 = vpop.eup %24313 }
0x1feb   :  { %v14721_v36 = vpop.permute.xlu0 %14720 }
0x1fec   :  { %v14723_v20 = vmul.f32 %v24314_v34, %v14721_v36 }
0x1fee   :  { %v14727_v8 = vsel %vm4768_vm0, %v14723_v20, 0 }
0x1fef   :  { %v14810_v27 = vand.u32 4294901760, %v14727_v8 }
0x1ff1   :  { %v14811_v30 = vsub.f32 %v14727_v8, %v14810_v27 }
0x1ff3   :  { %v14812_v1 = vand.u32 4294901760, %v14811_v30 }
0x1ff5   :  { %v14813_v22 = vsub.f32 %v14811_v30, %v14812_v1 }
0x1ff7   :  { %v14814_v21 = vand.u32 4294901760, %v14813_v22 }
0x1ff9   :  { %14815 = vmatmul.mubr.f32.vlgmr.msra.gmra.mrb[18].mxu0 %v14814_v21 }
0x1ffa   :  { %22378 = vmatpush1.bf16.msra.mxu0 %v28278_v62  ;;  %14965 = vmatprep.mubr.f32.mxu0 %v29187_v48 }
0x1ffb   :  { %22380 = vmatprep.subr.bf16.mxu0 %v28280_v37 }
0x1ffe   :  { %22382 = vmatpush1.bf16.msra.mxu0 %v28297_v13 }
0x1fff   :  { %22384 = vmatprep.subr.bf16.mxu0 %v28308_v56 }
0x2002   :  { %22386 = vmatpush1.bf16.msra.mxu0 %v28311_v15 }
0x2003   :  { %22388 = vmatprep.subr.bf16.mxu0 %v28314_v18 }
0x2006   :  { %22390 = vmatpush1.bf16.msra.mxu0 %v28317_v12 }
0x2007   :  { %22392 = vmatprep.subr.bf16.mxu0 %v28322_v59 }
0x2009   :  { %14967 = vmatmul.mubr.f32.vlgmr.msra.gmra.mrb[18].mxu0 %v14810_v27 }
0x200a   :  { %22394 = vmatpush1.bf16.msra.mxu0 %v28327_v24  ;;  %15069 = vmatprep.mubr.f32.mxu0 %v29187_v48 }
0x200b   :  { %22396 = vmatprep.subr.bf16.mxu0 %v28332_v28 }
0x200e   :  { %22398 = vmatpush1.bf16.msra.mxu0 %v28338_v5 }
0x200f   :  { %22400 = vmatprep.subr.bf16.mxu0 %v28344_v10 }
0x2012   :  { %22402 = vmatpush1.bf16.msra.mxu0 %v28349_v51 }
0x2013   :  { %22404 = vmatprep.subr.bf16.mxu0 %v28354_v32 }
0x2016   :  { %22406 = vmatpush1.bf16.msra.mxu0 %v28359_v44 }
0x2017   :  { %22408 = vmatprep.subr.bf16.mxu0 %v28088_v7 }
0x2019   :  { %15072 = vmatmul.mubr.f32.vlgmr.msra.gmra.mrb[18].mxu0 %v14811_v30 }
0x201a   :  { %22410 = vmatpush1.bf16.msra.mxu0 %v28131_v58  ;;  %15158 = vmatprep.mubr.f32.mxu0 %v29187_v48 }
0x201b   :  { %22412 = vmatprep.subr.bf16.mxu0 %v28135_v26 }
0x201e   :  { %22414 = vmatpush1.bf16.msra.mxu0 %v28156_v6 }
0x201f   :  { %22416 = vmatprep.subr.bf16.mxu0 %v28158_v54 }
0x2022   :  { %22418 = vmatpush1.bf16.msra.mxu0 %v28182_v11 }
0x2023   :  { %22420 = vmatprep.subr.bf16.mxu0 %v28187_v3 }
0x2026   :  { %22422 = vmatpush1.bf16.msra.mxu0 %v28192_v63 }
0x2027   :  { %22424 = vmatprep.subr.bf16.mxu0 %v28076_v2 }
0x2029   :  { %15162 = vmatmul.mubr.f32.vlgmr.msra.gmra.mrb[18].mxu0 %v14812_v1 }
0x202a   :  { %22426 = vmatpush1.bf16.msra.mxu0 %v28377_v25  ;;  %15280 = vmatprep.mubr.f32.mxu0 %v29187_v48 }
0x202b   :  { %22428 = vmatprep.subr.bf16.mxu0 %v28384_v17 }
0x202e   :  { %22430 = vmatpush1.bf16.msra.mxu0 %v28392_v47 }
0x202f   :  { %22432 = vmatprep.subr.bf16.mxu0 %v28400_v9 }
0x2032   :  { %22434 = vmatpush1.bf16.msra.mxu0 %v28407_v23 }
0x2033   :  { %22436 = vmatprep.subr.bf16.mxu0 %v28414_v53 }
0x2036   :  { %22438 = vmatpush1.bf16.msra.mxu0 %v28421_v4 }
0x2037   :  { %22440 = vmatprep.subr.bf16.mxu0 %v28088_v7 }
0x2039   :  { %15282 = vmatmul.mubr.f32.vlgmr.msra.gmra.mrb[18].mxu0 %v14810_v27 }
0x203a   :  { %22442 = vmatpush1.bf16.msra.mxu0 %v28131_v58  ;;  %15368 = vmatprep.mubr.f32.mxu0 %v29187_v48 }
0x203b   :  { %22444 = vmatprep.subr.bf16.mxu0 %v28135_v26 }
0x203e   :  { %22446 = vmatpush1.bf16.msra.mxu0 %v28156_v6 }
0x203f   :  { %22448 = vmatprep.subr.bf16.mxu0 %v28158_v54 }
0x2042   :  { %22450 = vmatpush1.bf16.msra.mxu0 %v28182_v11 }
0x2043   :  { %22452 = vmatprep.subr.bf16.mxu0 %v28187_v3 }
0x2046   :  { %22454 = vmatpush1.bf16.msra.mxu0 %v28192_v63 }
0x2047   :  { %22456 = vmatprep.subr.bf16.mxu0 %v28088_v7 }
0x2049   :  { %15370 = vmatmul.mubr.f32.vlgmr.msra.gmra.mrb[18].mxu0 %v14810_v27 }
0x204a   :  { %22458 = vmatpush1.bf16.msra.mxu0 %v28131_v58  ;;  %15495 = vmatprep.mubr.f32.mxu0 %v29187_v48 }
0x204b   :  { %22460 = vmatprep.subr.bf16.mxu0 %v28135_v26 }
0x204e   :  { %22462 = vmatpush1.bf16.msra.mxu0 %v28156_v6 }
0x204f   :  { %22464 = vmatprep.subr.bf16.mxu0 %v28158_v54 }
0x2052   :  { %22466 = vmatpush1.bf16.msra.mxu0 %v28182_v11 }
0x2053   :  { %22468 = vmatprep.subr.bf16.mxu0 %v28187_v3 }
0x2056   :  { %22470 = vmatpush1.bf16.msra.mxu0 %v28192_v63 }
0x2057   :  { %22472 = vmatprep.subr.bf16.mxu0 %v28195_v46 }
0x211c   :  { %v15371_v14 = vpop.f32.mrb[18].mxu0 }
0x211d   :  { %v15373_v55 = vpop.f32.mrb[19].mxu0  ;;  %v23186_v31 = vadd.f32 %v29308_v45, %v15371_v14 }
0x211e   :  { %v23188_v49 = vadd.f32 %v28451_v0, %v15373_v55 }
0x211f   :  { %v20657_v40 = vmul.f32 -1.442695, %v23186_v31 }
0x2120   :  { %24315 = vtanh.f32 %v23188_v49  ;;  %v20658_v19 = vmul.f32 -1.442695, %v23188_v49 }
0x2121   :  { %24317 = vpow2.f32 %v20657_v40 }
0x212a   :  { %v24316_v29 = vpop.eup %24315 }
0x212b   :  { %15395 = vrot.lane.b32.xlu1 %v24316_v29, %s24500_s7  ;;  %v24318_v42 = vpop.eup %24317 }
0x212c   :  { %v15386_v50 = vadd.f32 1.0, %v24318_v42 }
0x212e   :  { %24319 = vrcp.f32 %v15386_v50 }
0x2138   :  { %v24320_v57 = vpop.eup %24319 }
0x2139   :  { %v15393_v39 = vmul.f32 %v24320_v57, %v28457_v35 }
0x219d   :  { %v15396_v41 = vpop.permute.xlu1 %15395 }
0x219e   :  { %v15398_v60 = vmul.f32 %v24320_v57, %v15396_v41 }
0x21a0   :  { %15400 = vrot.lane.b32.xlu0 %v15398_v60, %s24500_s7 }
0x2212   :  { %v15401_v16 = vpop.permute.xlu0 %15400 }
0x2213   :  { %v28521_v38 = vadd.f32 %v15401_v16, %v15393_v39 }
0x2215   :  { %24321 = vtanh.f32 %v28521_v38 }
0x2216   :  { %24323 = vpow2.f32 %v20658_v19 }
0x221f   :  { %v24322_v52 = vpop.eup %24321 }
0x2220   :  { %15406 = vrot.lane.b32.xlu1 %v24322_v52, %s24500_s7  ;;  %v24324_v43 = vpop.eup %24323 }
0x2221   :  { %v15387_v61 = vadd.f32 1.0, %v24324_v43 }
0x2223   :  { %24325 = vrcp.f32 %v15387_v61 }
0x222d   :  { %v24326_v33 = vpop.eup %24325 }
0x2292   :  { %v15407_v34 = vpop.permute.xlu1 %15406 }
0x2293   :  { %v15409_v36 = vmul.f32 %v24326_v33, %v15407_v34 }
0x2295   :  { %v15413_v20 = vsel %vm4768_vm0, %v15409_v36, 0 }
0x2296   :  { %v15496_v8 = vand.u32 4294901760, %v15413_v20 }
0x2298   :  { %v15497_v35 = vsub.f32 %v15413_v20, %v15496_v8 }
0x229a   :  { %v15498_v27 = vand.u32 4294901760, %v15497_v35 }
0x229c   :  { %v15499_v30 = vsub.f32 %v15497_v35, %v15498_v27 }
0x229e   :  { %v15500_v1 = vand.u32 4294901760, %v15499_v30 }
0x22a0   :  { %15501 = vmatmul.mubr.f32.vlgmr.msra.gmra.mrb[20].mxu0 %v15500_v1 }
0x22a1   :  { %22474 = vmatpush1.bf16.msra.mxu0 %v28278_v62  ;;  %15651 = vmatprep.mubr.f32.mxu0 %v29187_v48 }
0x22a2   :  { %22476 = vmatprep.subr.bf16.mxu0 %v28280_v37 }
0x22a5   :  { %22478 = vmatpush1.bf16.msra.mxu0 %v28297_v13 }
0x22a6   :  { %22480 = vmatprep.subr.bf16.mxu0 %v28308_v56 }
0x22a9   :  { %22482 = vmatpush1.bf16.msra.mxu0 %v28311_v15 }
0x22aa   :  { %22484 = vmatprep.subr.bf16.mxu0 %v28314_v18 }
0x22ad   :  { %22486 = vmatpush1.bf16.msra.mxu0 %v28317_v12 }
0x22ae   :  { %22488 = vmatprep.subr.bf16.mxu0 %v28322_v59 }
0x22b0   :  { %15653 = vmatmul.mubr.f32.vlgmr.msra.gmra.mrb[20].mxu0 %v15496_v8 }
0x22b1   :  { %22490 = vmatpush1.bf16.msra.mxu0 %v28327_v24  ;;  %15755 = vmatprep.mubr.f32.mxu0 %v29187_v48 }
0x22b2   :  { %22492 = vmatprep.subr.bf16.mxu0 %v28332_v28 }
0x22b5   :  { %22494 = vmatpush1.bf16.msra.mxu0 %v28338_v5 }
0x22b6   :  { %22496 = vmatprep.subr.bf16.mxu0 %v28344_v10 }
0x22b9   :  { %22498 = vmatpush1.bf16.msra.mxu0 %v28349_v51 }
0x22ba   :  { %22500 = vmatprep.subr.bf16.mxu0 %v28354_v32 }
0x22bd   :  { %22502 = vmatpush1.bf16.msra.mxu0 %v28359_v44 }
0x22be   :  { %22504 = vmatprep.subr.bf16.mxu0 %v28088_v7 }
0x22c0   :  { %15758 = vmatmul.mubr.f32.vlgmr.msra.gmra.mrb[20].mxu0 %v15497_v35 }
0x22c1   :  { %22506 = vmatpush1.bf16.msra.mxu0 %v28131_v58  ;;  %15844 = vmatprep.mubr.f32.mxu0 %v29187_v48 }
0x22c2   :  { %22508 = vmatprep.subr.bf16.mxu0 %v28135_v26 }
0x22c5   :  { %22510 = vmatpush1.bf16.msra.mxu0 %v28156_v6 }
0x22c6   :  { %22512 = vmatprep.subr.bf16.mxu0 %v28158_v54 }
0x22c9   :  { %22514 = vmatpush1.bf16.msra.mxu0 %v28182_v11 }
0x22ca   :  { %22516 = vmatprep.subr.bf16.mxu0 %v28187_v3 }
0x22cd   :  { %22518 = vmatpush1.bf16.msra.mxu0 %v28192_v63 }
0x22ce   :  { %22520 = vmatprep.subr.bf16.mxu0 %v28076_v2 }
0x22d0   :  { %15848 = vmatmul.mubr.f32.vlgmr.msra.gmra.mrb[20].mxu0 %v15498_v27 }
0x22d1   :  { %22522 = vmatpush1.bf16.msra.mxu0 %v28377_v25  ;;  %15966 = vmatprep.mubr.f32.mxu0 %v29187_v48 }
0x22d2   :  { %22524 = vmatprep.subr.bf16.mxu0 %v28384_v17 }
0x22d5   :  { %22526 = vmatpush1.bf16.msra.mxu0 %v28392_v47 }
0x22d6   :  { %22528 = vmatprep.subr.bf16.mxu0 %v28400_v9 }
0x22d9   :  { %22530 = vmatpush1.bf16.msra.mxu0 %v28407_v23 }
0x22da   :  { %22532 = vmatprep.subr.bf16.mxu0 %v28414_v53 }
0x22dd   :  { %22534 = vmatpush1.bf16.msra.mxu0 %v28421_v4 }
0x22de   :  { %22536 = vmatprep.subr.bf16.mxu0 %v28088_v7 }
0x22e0   :  { %15968 = vmatmul.mubr.f32.vlgmr.msra.gmra.mrb[20].mxu0 %v15496_v8 }
0x22e1   :  { %22538 = vmatpush1.bf16.msra.mxu0 %v28131_v58  ;;  %16054 = vmatprep.mubr.f32.mxu0 %v29187_v48 }
0x22e2   :  { %22540 = vmatprep.subr.bf16.mxu0 %v28135_v26 }
0x22e5   :  { %22542 = vmatpush1.bf16.msra.mxu0 %v28156_v6 }
0x22e6   :  { %22544 = vmatprep.subr.bf16.mxu0 %v28158_v54 }
0x22e9   :  { %22546 = vmatpush1.bf16.msra.mxu0 %v28182_v11 }
0x22ea   :  { %22548 = vmatprep.subr.bf16.mxu0 %v28187_v3 }
0x22ed   :  { %22550 = vmatpush1.bf16.msra.mxu0 %v28192_v63 }
0x22ee   :  { %22552 = vmatprep.subr.bf16.mxu0 %v28088_v7 }
0x22f0   :  { %16056 = vmatmul.mubr.f32.vlgmr.msra.gmra.mrb[20].mxu0 %v15496_v8 }
0x22f1   :  { %22554 = vmatpush1.bf16.msra.mxu0 %v28131_v58  ;;  %16181 = vmatprep.mubr.f32.mxu0 %v29187_v48 }
0x22f2   :  { %22556 = vmatprep.subr.bf16.mxu0 %v28135_v26 }
0x22f5   :  { %22558 = vmatpush1.bf16.msra.mxu0 %v28156_v6 }
0x22f6   :  { %22560 = vmatprep.subr.bf16.mxu0 %v28158_v54 }
0x22f9   :  { %22562 = vmatpush1.bf16.msra.mxu0 %v28182_v11 }
0x22fa   :  { %22564 = vmatprep.subr.bf16.mxu0 %v28187_v3 }
0x22fd   :  { %22566 = vmatpush1.bf16.msra.mxu0 %v28192_v63 }
0x22fe   :  { %22568 = vmatprep.subr.bf16.mxu0 %v28195_v46 }
0x23c3   :  { %v16057_v22 = vpop.f32.mrb[20].mxu0 }
0x23c4   :  { %v16059_v21 = vpop.f32.mrb[21].mxu0  ;;  %v23190_v49 = vadd.f32 %v29308_v45, %v16057_v22 }
0x23c5   :  { %v23192_v14 = vadd.f32 %v28451_v0, %v16059_v21 }
0x23c6   :  { %v20659_v29 = vmul.f32 -1.442695, %v23190_v49 }
0x23c7   :  { %24327 = vtanh.f32 %v23192_v14  ;;  %v20660_v52 = vmul.f32 -1.442695, %v23192_v14 }
0x23c8   :  { %24329 = vpow2.f32 %v20659_v29 }
0x23d1   :  { %v24328_v55 = vpop.eup %24327 }
0x23d2   :  { %16081 = vrot.lane.b32.xlu0 %v24328_v55, %s24500_s7  ;;  %v24330_v31 = vpop.eup %24329 }
0x23d3   :  { %v16072_v40 = vadd.f32 1.0, %v24330_v31 }
0x23d5   :  { %24331 = vrcp.f32 %v16072_v40 }
0x23df   :  { %v24332_v42 = vpop.eup %24331 }
0x23e0   :  { %v16079_v41 = vmul.f32 %v24332_v42, %v28521_v38 }
0x2444   :  { %v16082_v50 = vpop.permute.xlu0 %16081 }
0x2445   :  { %v16084_v57 = vmul.f32 %v24332_v42, %v16082_v50 }
0x2447   :  { %16086 = vrot.lane.b32.xlu1 %v16084_v57, %s24500_s7 }
0x24b9   :  { %v16087_v60 = vpop.permute.xlu1 %16086 }
0x24ba   :  { %v28585_v39 = vadd.f32 %v16087_v60, %v16079_v41 }
0x24bc   :  { %24333 = vtanh.f32 %v28585_v39 }
0x24bd   :  { %24335 = vpow2.f32 %v20660_v52 }
0x24c6   :  { %v24334_v16 = vpop.eup %24333 }
0x24c7   :  { %16092 = vrot.lane.b32.xlu0 %v24334_v16, %s24500_s7  ;;  %v24336_v19 = vpop.eup %24335 }
0x24c8   :  { %v16073_v43 = vadd.f32 1.0, %v24336_v19 }
0x24ca   :  { %24337 = vrcp.f32 %v16073_v43 }
0x24d4   :  { %v24338_v61 = vpop.eup %24337 }
0x2539   :  { %v16093_v33 = vpop.permute.xlu0 %16092 }
0x253a   :  { %v16095_v34 = vmul.f32 %v24338_v61, %v16093_v33 }
0x253c   :  { %v16099_v36 = vsel %vm4768_vm0, %v16095_v34, 0 }
0x253d   :  { %v16182_v20 = vand.u32 4294901760, %v16099_v36 }
0x253f   :  { %v16183_v38 = vsub.f32 %v16099_v36, %v16182_v20 }
0x2541   :  { %v16184_v8 = vand.u32 4294901760, %v16183_v38 }
0x2543   :  { %v16185_v35 = vsub.f32 %v16183_v38, %v16184_v8 }
0x2545   :  { %v16186_v27 = vand.u32 4294901760, %v16185_v35 }
0x2547   :  { %16187 = vmatmul.mubr.f32.vlgmr.msra.gmra.mrb[22].mxu0 %v16186_v27 }
0x2548   :  { %22570 = vmatpush1.bf16.msra.mxu0 %v28278_v62  ;;  %16337 = vmatprep.mubr.f32.mxu0 %v29187_v48 }
0x2549   :  { %22572 = vmatprep.subr.bf16.mxu0 %v28280_v37 }
0x254c   :  { %22574 = vmatpush1.bf16.msra.mxu0 %v28297_v13 }
0x254d   :  { %22576 = vmatprep.subr.bf16.mxu0 %v28308_v56 }
0x2550   :  { %22578 = vmatpush1.bf16.msra.mxu0 %v28311_v15 }
0x2551   :  { %22580 = vmatprep.subr.bf16.mxu0 %v28314_v18 }
0x2554   :  { %22582 = vmatpush1.bf16.msra.mxu0 %v28317_v12 }
0x2555   :  { %22584 = vmatprep.subr.bf16.mxu0 %v28322_v59 }
0x2557   :  { %16339 = vmatmul.mubr.f32.vlgmr.msra.gmra.mrb[22].mxu0 %v16182_v20 }
0x2558   :  { %22586 = vmatpush1.bf16.msra.mxu0 %v28327_v24  ;;  %16441 = vmatprep.mubr.f32.mxu0 %v29187_v48 }
0x2559   :  { %22588 = vmatprep.subr.bf16.mxu0 %v28332_v28 }
0x255c   :  { %22590 = vmatpush1.bf16.msra.mxu0 %v28338_v5 }
0x255d   :  { %22592 = vmatprep.subr.bf16.mxu0 %v28344_v10 }
0x2560   :  { %22594 = vmatpush1.bf16.msra.mxu0 %v28349_v51 }
0x2561   :  { %22596 = vmatprep.subr.bf16.mxu0 %v28354_v32 }
0x2564   :  { %22598 = vmatpush1.bf16.msra.mxu0 %v28359_v44 }
0x2565   :  { %22600 = vmatprep.subr.bf16.mxu0 %v28088_v7 }
0x2567   :  { %16444 = vmatmul.mubr.f32.vlgmr.msra.gmra.mrb[22].mxu0 %v16183_v38 }
0x2568   :  { %22602 = vmatpush1.bf16.msra.mxu0 %v28131_v58  ;;  %16530 = vmatprep.mubr.f32.mxu0 %v29187_v48 }
0x2569   :  { %22604 = vmatprep.subr.bf16.mxu0 %v28135_v26 }
0x256c   :  { %22606 = vmatpush1.bf16.msra.mxu0 %v28156_v6 }
0x256d   :  { %22608 = vmatprep.subr.bf16.mxu0 %v28158_v54 }
0x2570   :  { %22610 = vmatpush1.bf16.msra.mxu0 %v28182_v11 }
0x2571   :  { %22612 = vmatprep.subr.bf16.mxu0 %v28187_v3 }
0x2574   :  { %22614 = vmatpush1.bf16.msra.mxu0 %v28192_v63 }
0x2575   :  { %22616 = vmatprep.subr.bf16.mxu0 %v28076_v2 }
0x2577   :  { %16534 = vmatmul.mubr.f32.vlgmr.msra.gmra.mrb[22].mxu0 %v16184_v8 }
0x2578   :  { %22618 = vmatpush1.bf16.msra.mxu0 %v28377_v25  ;;  %16652 = vmatprep.mubr.f32.mxu0 %v29187_v48 }
0x2579   :  { %22620 = vmatprep.subr.bf16.mxu0 %v28384_v17 }
0x257c   :  { %22622 = vmatpush1.bf16.msra.mxu0 %v28392_v47 }
0x257d   :  { %22624 = vmatprep.subr.bf16.mxu0 %v28400_v9 }
0x2580   :  { %22626 = vmatpush1.bf16.msra.mxu0 %v28407_v23 }
0x2581   :  { %22628 = vmatprep.subr.bf16.mxu0 %v28414_v53 }
0x2584   :  { %22630 = vmatpush1.bf16.msra.mxu0 %v28421_v4 }
0x2585   :  { %22632 = vmatprep.subr.bf16.mxu0 %v28088_v7 }
0x2587   :  { %16654 = vmatmul.mubr.f32.vlgmr.msra.gmra.mrb[22].mxu0 %v16182_v20 }
0x2588   :  { %22634 = vmatpush1.bf16.msra.mxu0 %v28131_v58  ;;  %16740 = vmatprep.mubr.f32.mxu0 %v29187_v48 }
0x2589   :  { %22636 = vmatprep.subr.bf16.mxu0 %v28135_v26 }
0x258c   :  { %22638 = vmatpush1.bf16.msra.mxu0 %v28156_v6 }
0x258d   :  { %22640 = vmatprep.subr.bf16.mxu0 %v28158_v54 }
0x2590   :  { %22642 = vmatpush1.bf16.msra.mxu0 %v28182_v11 }
0x2591   :  { %22644 = vmatprep.subr.bf16.mxu0 %v28187_v3 }
0x2594   :  { %22646 = vmatpush1.bf16.msra.mxu0 %v28192_v63 }
0x2595   :  { %22648 = vmatprep.subr.bf16.mxu0 %v28088_v7 }
0x2597   :  { %16742 = vmatmul.mubr.f32.vlgmr.msra.gmra.mrb[22].mxu0 %v16182_v20 }
0x2598   :  { %22650 = vmatpush1.bf16.msra.mxu0 %v28131_v58  ;;  %16867 = vmatprep.mubr.f32.mxu0 %v29187_v48 }
0x2599   :  { %22652 = vmatprep.subr.bf16.mxu0 %v28135_v26 }
0x259c   :  { %22654 = vmatpush1.bf16.msra.mxu0 %v28156_v6 }
0x259d   :  { %22656 = vmatprep.subr.bf16.mxu0 %v28158_v54 }
0x25a0   :  { %22658 = vmatpush1.bf16.msra.mxu0 %v28182_v11 }
0x25a1   :  { %22660 = vmatprep.subr.bf16.mxu0 %v28187_v3 }
0x25a4   :  { %22662 = vmatpush1.bf16.msra.mxu0 %v28192_v63 }
0x25a5   :  { %22664 = vmatprep.subr.bf16.mxu0 %v28195_v46 }
0x266a   :  { %v16743_v30 = vpop.f32.mrb[22].mxu0 }
0x266b   :  { %v16745_v1 = vpop.f32.mrb[23].mxu0  ;;  %v23194_v14 = vadd.f32 %v29308_v45, %v16743_v30 }
0x266c   :  { %v23196_v22 = vadd.f32 %v28451_v0, %v16745_v1 }
0x266d   :  { %v20661_v55 = vmul.f32 -1.442695, %v23194_v14 }
0x266e   :  { %24339 = vtanh.f32 %v23196_v22  ;;  %v20662_v16 = vmul.f32 -1.442695, %v23196_v22 }
0x266f   :  { %24341 = vpow2.f32 %v20661_v55 }
0x2678   :  { %v24340_v21 = vpop.eup %24339 }
0x2679   :  { %16767 = vrot.lane.b32.xlu1 %v24340_v21, %s24500_s7  ;;  %v24342_v49 = vpop.eup %24341 }
0x267a   :  { %v16758_v29 = vadd.f32 1.0, %v24342_v49 }
0x267c   :  { %24343 = vrcp.f32 %v16758_v29 }
0x2686   :  { %v24344_v31 = vpop.eup %24343 }
0x2687   :  { %v16765_v50 = vmul.f32 %v24344_v31, %v28585_v39 }
0x26eb   :  { %v16768_v40 = vpop.permute.xlu1 %16767 }
0x26ec   :  { %v16770_v42 = vmul.f32 %v24344_v31, %v16768_v40 }
0x26ee   :  { %16772 = vrot.lane.b32.xlu0 %v16770_v42, %s24500_s7 }
0x2760   :  { %v16773_v57 = vpop.permute.xlu0 %16772 }
0x2761   :  { %v28649_v41 = vadd.f32 %v16773_v57, %v16765_v50 }
0x2763   :  { %24345 = vtanh.f32 %v28649_v41 }
0x2764   :  { %24347 = vpow2.f32 %v20662_v16 }
0x276d   :  { %v24346_v60 = vpop.eup %24345 }
0x276e   :  { %16778 = vrot.lane.b32.xlu1 %v24346_v60, %s24500_s7  ;;  %v24348_v52 = vpop.eup %24347 }
0x276f   :  { %v16759_v19 = vadd.f32 1.0, %v24348_v52 }
0x2771   :  { %24349 = vrcp.f32 %v16759_v19 }
0x277b   :  { %v24350_v43 = vpop.eup %24349 }
0x27e0   :  { %v16779_v61 = vpop.permute.xlu1 %16778 }
0x27e1   :  { %v16781_v33 = vmul.f32 %v24350_v43, %v16779_v61 }
0x27e3   :  { %v16785_v34 = vsel %vm4768_vm0, %v16781_v33, 0 }
0x27e4   :  { %v16868_v36 = vand.u32 4294901760, %v16785_v34 }
0x27e6   :  { %v16869_v39 = vsub.f32 %v16785_v34, %v16868_v36 }
0x27e8   :  { %v16870_v20 = vand.u32 4294901760, %v16869_v39 }
0x27ea   :  { %v16871_v38 = vsub.f32 %v16869_v39, %v16870_v20 }
0x27ec   :  { %v16872_v8 = vand.u32 4294901760, %v16871_v38 }
0x27ee   :  { %16873 = vmatmul.mubr.f32.vlgmr.msra.gmra.mrb[24].mxu0 %v16872_v8 }
0x27ef   :  { %22666 = vmatpush1.bf16.msra.mxu0 %v28278_v62  ;;  %17023 = vmatprep.mubr.f32.mxu0 %v29187_v48 }
0x27f0   :  { %22668 = vmatprep.subr.bf16.mxu0 %v28280_v37 }
0x27f3   :  { %22670 = vmatpush1.bf16.msra.mxu0 %v28297_v13 }
0x27f4   :  { %22672 = vmatprep.subr.bf16.mxu0 %v28308_v56 }
0x27f7   :  { %22674 = vmatpush1.bf16.msra.mxu0 %v28311_v15 }
0x27f8   :  { %22676 = vmatprep.subr.bf16.mxu0 %v28314_v18 }
0x27fb   :  { %22678 = vmatpush1.bf16.msra.mxu0 %v28317_v12 }
0x27fc   :  { %22680 = vmatprep.subr.bf16.mxu0 %v28322_v59 }
0x27fe   :  { %17025 = vmatmul.mubr.f32.vlgmr.msra.gmra.mrb[24].mxu0 %v16868_v36 }
0x27ff   :  { %22682 = vmatpush1.bf16.msra.mxu0 %v28327_v24  ;;  %17127 = vmatprep.mubr.f32.mxu0 %v29187_v48 }
0x2800   :  { %22684 = vmatprep.subr.bf16.mxu0 %v28332_v28 }
0x2803   :  { %22686 = vmatpush1.bf16.msra.mxu0 %v28338_v5 }
0x2804   :  { %22688 = vmatprep.subr.bf16.mxu0 %v28344_v10 }
0x2807   :  { %22690 = vmatpush1.bf16.msra.mxu0 %v28349_v51 }
0x2808   :  { %22692 = vmatprep.subr.bf16.mxu0 %v28354_v32 }
0x280b   :  { %22694 = vmatpush1.bf16.msra.mxu0 %v28359_v44 }
0x280c   :  { %22696 = vmatprep.subr.bf16.mxu0 %v28088_v7 }
0x280e   :  { %17130 = vmatmul.mubr.f32.vlgmr.msra.gmra.mrb[24].mxu0 %v16869_v39 }
0x280f   :  { %22698 = vmatpush1.bf16.msra.mxu0 %v28131_v58  ;;  %17216 = vmatprep.mubr.f32.mxu0 %v29187_v48 }
0x2810   :  { %22700 = vmatprep.subr.bf16.mxu0 %v28135_v26 }
0x2813   :  { %22702 = vmatpush1.bf16.msra.mxu0 %v28156_v6 }
0x2814   :  { %22704 = vmatprep.subr.bf16.mxu0 %v28158_v54 }
0x2817   :  { %22706 = vmatpush1.bf16.msra.mxu0 %v28182_v11 }
0x2818   :  { %22708 = vmatprep.subr.bf16.mxu0 %v28187_v3 }
0x281b   :  { %22710 = vmatpush1.bf16.msra.mxu0 %v28192_v63 }
0x281c   :  { %22712 = vmatprep.subr.bf16.mxu0 %v28076_v2 }
0x281e   :  { %17220 = vmatmul.mubr.f32.vlgmr.msra.gmra.mrb[24].mxu0 %v16870_v20 }
0x281f   :  { %22714 = vmatpush1.bf16.msra.mxu0 %v28377_v25  ;;  %17338 = vmatprep.mubr.f32.mxu0 %v29187_v48 }
0x2820   :  { %22716 = vmatprep.subr.bf16.mxu0 %v28384_v17 }
0x2823   :  { %22718 = vmatpush1.bf16.msra.mxu0 %v28392_v47 }
0x2824   :  { %22720 = vmatprep.subr.bf16.mxu0 %v28400_v9 }
0x2827   :  { %22722 = vmatpush1.bf16.msra.mxu0 %v28407_v23 }
0x2828   :  { %22724 = vmatprep.subr.bf16.mxu0 %v28414_v53 }
0x282b   :  { %22726 = vmatpush1.bf16.msra.mxu0 %v28421_v4 }
0x282c   :  { %22728 = vmatprep.subr.bf16.mxu0 %v28088_v7 }
0x282e   :  { %17340 = vmatmul.mubr.f32.vlgmr.msra.gmra.mrb[24].mxu0 %v16868_v36 }
0x282f   :  { %22730 = vmatpush1.bf16.msra.mxu0 %v28131_v58  ;;  %17426 = vmatprep.mubr.f32.mxu0 %v29187_v48 }
0x2830   :  { %22732 = vmatprep.subr.bf16.mxu0 %v28135_v26 }
0x2833   :  { %22734 = vmatpush1.bf16.msra.mxu0 %v28156_v6 }
0x2834   :  { %22736 = vmatprep.subr.bf16.mxu0 %v28158_v54 }
0x2837   :  { %22738 = vmatpush1.bf16.msra.mxu0 %v28182_v11 }
0x2838   :  { %22740 = vmatprep.subr.bf16.mxu0 %v28187_v3 }
0x283b   :  { %22742 = vmatpush1.bf16.msra.mxu0 %v28192_v63 }
0x283c   :  { %22744 = vmatprep.subr.bf16.mxu0 %v28088_v7 }
0x283e   :  { %17428 = vmatmul.mubr.f32.vlgmr.msra.gmra.mrb[24].mxu0 %v16868_v36 }
0x283f   :  { %22746 = vmatpush1.bf16.msra.mxu0 %v28131_v58  ;;  %17553 = vmatprep.mubr.f32.mxu0 %v29187_v48 }
0x2840   :  { %22748 = vmatprep.subr.bf16.mxu0 %v28135_v26 }
0x2843   :  { %22750 = vmatpush1.bf16.msra.mxu0 %v28156_v6 }
0x2844   :  { %22752 = vmatprep.subr.bf16.mxu0 %v28158_v54 }
0x2847   :  { %22754 = vmatpush1.bf16.msra.mxu0 %v28182_v11 }
0x2848   :  { %22756 = vmatprep.subr.bf16.mxu0 %v28187_v3 }
0x284b   :  { %22758 = vmatpush1.bf16.msra.mxu0 %v28192_v63 }
0x284c   :  { %22760 = vmatprep.subr.bf16.mxu0 %v28195_v46 }
0x2911   :  { %v17429_v35 = vpop.f32.mrb[24].mxu0 }
0x2912   :  { %v17431_v27 = vpop.f32.mrb[25].mxu0  ;;  %v23198_v22 = vadd.f32 %v29308_v45, %v17429_v35 }
0x2913   :  { %v23200_v30 = vadd.f32 %v28451_v0, %v17431_v27 }
0x2914   :  { %v20663_v21 = vmul.f32 -1.442695, %v23198_v22 }
0x2915   :  { %24351 = vtanh.f32 %v23200_v30  ;;  %v20664_v60 = vmul.f32 -1.442695, %v23200_v30 }
0x2916   :  { %24353 = vpow2.f32 %v20663_v21 }
0x291f   :  { %v24352_v1 = vpop.eup %24351 }
0x2920   :  { %17453 = vrot.lane.b32.xlu0 %v24352_v1, %s24500_s7  ;;  %v24354_v14 = vpop.eup %24353 }
0x2921   :  { %v17444_v55 = vadd.f32 1.0, %v24354_v14 }
0x2923   :  { %24355 = vrcp.f32 %v17444_v55 }
0x292d   :  { %v24356_v49 = vpop.eup %24355 }
0x292e   :  { %v17451_v40 = vmul.f32 %v24356_v49, %v28649_v41 }
0x2992   :  { %v17454_v29 = vpop.permute.xlu0 %17453 }
0x2993   :  { %v17456_v31 = vmul.f32 %v24356_v49, %v17454_v29 }
0x2995   :  { %17458 = vrot.lane.b32.xlu1 %v17456_v31, %s24500_s7 }
0x2a07   :  { %v17459_v42 = vpop.permute.xlu1 %17458 }
0x2a08   :  { %v28713_v50 = vadd.f32 %v17459_v42, %v17451_v40 }
0x2a0a   :  { %24357 = vtanh.f32 %v28713_v50 }
0x2a0b   :  { %24359 = vpow2.f32 %v20664_v60 }
0x2a14   :  { %v24358_v57 = vpop.eup %24357 }
0x2a15   :  { %17464 = vrot.lane.b32.xlu0 %v24358_v57, %s24500_s7  ;;  %v24360_v16 = vpop.eup %24359 }
0x2a16   :  { %v17445_v52 = vadd.f32 1.0, %v24360_v16 }
0x2a18   :  { %24361 = vrcp.f32 %v17445_v52 }
0x2a22   :  { %v24362_v19 = vpop.eup %24361 }
0x2a87   :  { %v17465_v43 = vpop.permute.xlu0 %17464 }
0x2a88   :  { %v17467_v61 = vmul.f32 %v24362_v19, %v17465_v43 }
0x2a8a   :  { %v17471_v33 = vsel %vm4768_vm0, %v17467_v61, 0 }
0x2a8b   :  { %v17554_v34 = vand.u32 4294901760, %v17471_v33 }
0x2a8d   :  { %v17555_v41 = vsub.f32 %v17471_v33, %v17554_v34 }
0x2a8f   :  { %v17556_v36 = vand.u32 4294901760, %v17555_v41 }
0x2a91   :  { %v17557_v39 = vsub.f32 %v17555_v41, %v17556_v36 }
0x2a93   :  { %v17558_v20 = vand.u32 4294901760, %v17557_v39 }
0x2a95   :  { %17559 = vmatmul.mubr.f32.vlgmr.msra.gmra.mrb[26].mxu0 %v17558_v20 }
0x2a96   :  { %22762 = vmatpush1.bf16.msra.mxu0 %v28278_v62  ;;  %17709 = vmatprep.mubr.f32.mxu0 %v29187_v48 }
0x2a97   :  { %22764 = vmatprep.subr.bf16.mxu0 %v28280_v37 }
0x2a9a   :  { %22766 = vmatpush1.bf16.msra.mxu0 %v28297_v13 }
0x2a9b   :  { %22768 = vmatprep.subr.bf16.mxu0 %v28308_v56 }
0x2a9e   :  { %22770 = vmatpush1.bf16.msra.mxu0 %v28311_v15 }
0x2a9f   :  { %22772 = vmatprep.subr.bf16.mxu0 %v28314_v18 }
0x2aa2   :  { %22774 = vmatpush1.bf16.msra.mxu0 %v28317_v12 }
0x2aa3   :  { %22776 = vmatprep.subr.bf16.mxu0 %v28322_v59 }
0x2aa5   :  { %17711 = vmatmul.mubr.f32.vlgmr.msra.gmra.mrb[26].mxu0 %v17554_v34 }
0x2aa6   :  { %22778 = vmatpush1.bf16.msra.mxu0 %v28327_v24  ;;  %17813 = vmatprep.mubr.f32.mxu0 %v29187_v48 }
0x2aa7   :  { %22780 = vmatprep.subr.bf16.mxu0 %v28332_v28 }
0x2aaa   :  { %22782 = vmatpush1.bf16.msra.mxu0 %v28338_v5 }
0x2aab   :  { %22784 = vmatprep.subr.bf16.mxu0 %v28344_v10 }
0x2aae   :  { %22786 = vmatpush1.bf16.msra.mxu0 %v28349_v51 }
0x2aaf   :  { %22788 = vmatprep.subr.bf16.mxu0 %v28354_v32 }
0x2ab2   :  { %22790 = vmatpush1.bf16.msra.mxu0 %v28359_v44 }
0x2ab3   :  { %22792 = vmatprep.subr.bf16.mxu0 %v28088_v7 }
0x2ab5   :  { %17816 = vmatmul.mubr.f32.vlgmr.msra.gmra.mrb[26].mxu0 %v17555_v41 }
0x2ab6   :  { %22794 = vmatpush1.bf16.msra.mxu0 %v28131_v58  ;;  %17902 = vmatprep.mubr.f32.mxu0 %v29187_v48 }
0x2ab7   :  { %22796 = vmatprep.subr.bf16.mxu0 %v28135_v26 }
0x2aba   :  { %22798 = vmatpush1.bf16.msra.mxu0 %v28156_v6 }
0x2abb   :  { %22800 = vmatprep.subr.bf16.mxu0 %v28158_v54 }
0x2abe   :  { %22802 = vmatpush1.bf16.msra.mxu0 %v28182_v11 }
0x2abf   :  { %22804 = vmatprep.subr.bf16.mxu0 %v28187_v3 }
0x2ac2   :  { %22806 = vmatpush1.bf16.msra.mxu0 %v28192_v63 }
0x2ac3   :  { %22808 = vmatprep.subr.bf16.mxu0 %v28076_v2 }
0x2ac5   :  { %17906 = vmatmul.mubr.f32.vlgmr.msra.gmra.mrb[26].mxu0 %v17556_v36 }
0x2ac6   :  { %22810 = vmatpush1.bf16.msra.mxu0 %v28377_v25  ;;  %18024 = vmatprep.mubr.f32.mxu0 %v29187_v48 }
0x2ac7   :  { %22812 = vmatprep.subr.bf16.mxu0 %v28384_v17 }
0x2aca   :  { %22814 = vmatpush1.bf16.msra.mxu0 %v28392_v47 }
0x2acb   :  { %22816 = vmatprep.subr.bf16.mxu0 %v28400_v9 }
0x2ace   :  { %22818 = vmatpush1.bf16.msra.mxu0 %v28407_v23 }
0x2acf   :  { %22820 = vmatprep.subr.bf16.mxu0 %v28414_v53 }
0x2ad2   :  { %22822 = vmatpush1.bf16.msra.mxu0 %v28421_v4 }
0x2ad3   :  { %22824 = vmatprep.subr.bf16.mxu0 %v28088_v7 }
0x2ad5   :  { %18026 = vmatmul.mubr.f32.vlgmr.msra.gmra.mrb[26].mxu0 %v17554_v34 }
0x2ad6   :  { %22826 = vmatpush1.bf16.msra.mxu0 %v28131_v58  ;;  %18112 = vmatprep.mubr.f32.mxu0 %v29187_v48 }
0x2ad7   :  { %22828 = vmatprep.subr.bf16.mxu0 %v28135_v26 }
0x2ada   :  { %22830 = vmatpush1.bf16.msra.mxu0 %v28156_v6 }
0x2adb   :  { %22832 = vmatprep.subr.bf16.mxu0 %v28158_v54 }
0x2ade   :  { %22834 = vmatpush1.bf16.msra.mxu0 %v28182_v11 }
0x2adf   :  { %22836 = vmatprep.subr.bf16.mxu0 %v28187_v3 }
0x2ae2   :  { %22838 = vmatpush1.bf16.msra.mxu0 %v28192_v63 }
0x2ae3   :  { %22840 = vmatprep.subr.bf16.mxu0 %v28088_v7 }
0x2ae5   :  { %18114 = vmatmul.mubr.f32.vlgmr.msra.gmra.mrb[26].mxu0 %v17554_v34 }
0x2ae6   :  { %22842 = vmatpush1.bf16.msra.mxu0 %v28131_v58  ;;  %18239 = vmatprep.mubr.f32.mxu0 %v29187_v48 }
0x2ae7   :  { %22844 = vmatprep.subr.bf16.mxu0 %v28135_v26 }
0x2aea   :  { %22846 = vmatpush1.bf16.msra.mxu0 %v28156_v6 }
0x2aeb   :  { %22848 = vmatprep.subr.bf16.mxu0 %v28158_v54 }
0x2aee   :  { %22850 = vmatpush1.bf16.msra.mxu0 %v28182_v11 }
0x2aef   :  { %22852 = vmatprep.subr.bf16.mxu0 %v28187_v3 }
0x2af2   :  { %22854 = vmatpush1.bf16.msra.mxu0 %v28192_v63 }
0x2af3   :  { %22856 = vmatprep.subr.bf16.mxu0 %v28195_v46 }
0x2bb8   :  { %v18115_v38 = vpop.f32.mrb[26].mxu0 }
0x2bb9   :  { %v18117_v8 = vpop.f32.mrb[27].mxu0  ;;  %v23202_v30 = vadd.f32 %v29308_v45, %v18115_v38 }
0x2bba   :  { %v23204_v35 = vadd.f32 %v28451_v0, %v18117_v8 }
0x2bbb   :  { %v20665_v1 = vmul.f32 -1.442695, %v23202_v30 }
0x2bbc   :  { %24363 = vtanh.f32 %v23204_v35  ;;  %v20666_v57 = vmul.f32 -1.442695, %v23204_v35 }
0x2bbd   :  { %24365 = vpow2.f32 %v20665_v1 }
0x2bc6   :  { %v24364_v27 = vpop.eup %24363 }
0x2bc7   :  { %18139 = vrot.lane.b32.xlu1 %v24364_v27, %s24500_s7  ;;  %v24366_v22 = vpop.eup %24365 }
0x2bc8   :  { %v18130_v21 = vadd.f32 1.0, %v24366_v22 }
0x2bca   :  { %24367 = vrcp.f32 %v18130_v21 }
0x2bd4   :  { %v24368_v14 = vpop.eup %24367 }
0x2bd5   :  { %v18137_v29 = vmul.f32 %v24368_v14, %v28713_v50 }
0x2c39   :  { %v18140_v55 = vpop.permute.xlu1 %18139 }
0x2c3a   :  { %v18142_v49 = vmul.f32 %v24368_v14, %v18140_v55 }
0x2c3c   :  { %18144 = vrot.lane.b32.xlu0 %v18142_v49, %s24500_s7 }
0x2cae   :  { %v18145_v31 = vpop.permute.xlu0 %18144 }
0x2caf   :  { %v28777_v40 = vadd.f32 %v18145_v31, %v18137_v29 }
0x2cb1   :  { %24369 = vtanh.f32 %v28777_v40 }
0x2cb2   :  { %24371 = vpow2.f32 %v20666_v57 }
0x2cbb   :  { %v24370_v42 = vpop.eup %24369 }
0x2cbc   :  { %18150 = vrot.lane.b32.xlu1 %v24370_v42, %s24500_s7  ;;  %v24372_v60 = vpop.eup %24371 }
0x2cbd   :  { %v18131_v16 = vadd.f32 1.0, %v24372_v60 }
0x2cbf   :  { %24373 = vrcp.f32 %v18131_v16 }
0x2cc9   :  { %v24374_v52 = vpop.eup %24373 }
0x2d2e   :  { %v18151_v19 = vpop.permute.xlu1 %18150 }
0x2d2f   :  { %v18153_v43 = vmul.f32 %v24374_v52, %v18151_v19 }
0x2d31   :  { %v18157_v61 = vsel %vm4768_vm0, %v18153_v43, 0 }
0x2d32   :  { %v18240_v33 = vand.u32 4294901760, %v18157_v61 }
0x2d34   :  { %v18241_v50 = vsub.f32 %v18157_v61, %v18240_v33 }
0x2d36   :  { %v18242_v34 = vand.u32 4294901760, %v18241_v50 }
0x2d38   :  { %v18243_v41 = vsub.f32 %v18241_v50, %v18242_v34 }
0x2d3a   :  { %v18244_v36 = vand.u32 4294901760, %v18243_v41 }
0x2d3c   :  { %18245 = vmatmul.mubr.f32.vlgmr.msra.gmra.mrb[28].mxu0 %v18244_v36 }
0x2d3d   :  { %22858 = vmatpush1.bf16.msra.mxu0 %v28278_v62  ;;  %18395 = vmatprep.mubr.f32.mxu0 %v29187_v48 }
0x2d3e   :  { %22860 = vmatprep.subr.bf16.mxu0 %v28280_v37 }
0x2d41   :  { %22862 = vmatpush1.bf16.msra.mxu0 %v28297_v13 }
0x2d42   :  { %22864 = vmatprep.subr.bf16.mxu0 %v28308_v56 }
0x2d45   :  { %22866 = vmatpush1.bf16.msra.mxu0 %v28311_v15 }
0x2d46   :  { %22868 = vmatprep.subr.bf16.mxu0 %v28314_v18 }
0x2d49   :  { %22870 = vmatpush1.bf16.msra.mxu0 %v28317_v12 }
0x2d4a   :  { %22872 = vmatprep.subr.bf16.mxu0 %v28322_v59 }
0x2d4c   :  { %18397 = vmatmul.mubr.f32.vlgmr.msra.gmra.mrb[28].mxu0 %v18240_v33 }
0x2d4d   :  { %22874 = vmatpush1.bf16.msra.mxu0 %v28327_v24  ;;  %18499 = vmatprep.mubr.f32.mxu0 %v29187_v48 }
0x2d4e   :  { %22876 = vmatprep.subr.bf16.mxu0 %v28332_v28 }
0x2d51   :  { %22878 = vmatpush1.bf16.msra.mxu0 %v28338_v5 }
0x2d52   :  { %22880 = vmatprep.subr.bf16.mxu0 %v28344_v10 }
0x2d55   :  { %22882 = vmatpush1.bf16.msra.mxu0 %v28349_v51 }
0x2d56   :  { %22884 = vmatprep.subr.bf16.mxu0 %v28354_v32 }
0x2d59   :  { %22886 = vmatpush1.bf16.msra.mxu0 %v28359_v44 }
0x2d5a   :  { %22888 = vmatprep.subr.bf16.mxu0 %v28088_v7 }
0x2d5c   :  { %18502 = vmatmul.mubr.f32.vlgmr.msra.gmra.mrb[28].mxu0 %v18241_v50 }
0x2d5d   :  { %22890 = vmatpush1.bf16.msra.mxu0 %v28131_v58  ;;  %18588 = vmatprep.mubr.f32.mxu0 %v29187_v48 }
0x2d5e   :  { %22892 = vmatprep.subr.bf16.mxu0 %v28135_v26 }
0x2d61   :  { %22894 = vmatpush1.bf16.msra.mxu0 %v28156_v6 }
0x2d62   :  { %22896 = vmatprep.subr.bf16.mxu0 %v28158_v54 }
0x2d65   :  { %22898 = vmatpush1.bf16.msra.mxu0 %v28182_v11 }
0x2d66   :  { %22900 = vmatprep.subr.bf16.mxu0 %v28187_v3 }
0x2d69   :  { %22902 = vmatpush1.bf16.msra.mxu0 %v28192_v63 }
0x2d6a   :  { %22904 = vmatprep.subr.bf16.mxu0 %v28076_v2 }
0x2d6c   :  { %18592 = vmatmul.mubr.f32.vlgmr.msra.gmra.mrb[28].mxu0 %v18242_v34  ;;  %v19533_v34 = vld [vmem:[%s29094_s13 + $0x38] sm:$0xff] }
0x2d6d   :  { %22906 = vmatpush1.bf16.msra.mxu0 %v28377_v25  ;;  %18710 = vmatprep.mubr.f32.mxu0 %v29187_v48  ;;  %v19566_v36 = vand.u32 4294901760, %v19533_v34 }
0x2d6e   :  { %22908 = vmatprep.subr.bf16.mxu0 %v28384_v17 }
0x2d71   :  { %22910 = vmatpush1.bf16.msra.mxu0 %v28392_v47 }
0x2d72   :  { %22912 = vmatprep.subr.bf16.mxu0 %v28400_v9 }
0x2d75   :  { %22914 = vmatpush1.bf16.msra.mxu0 %v28407_v23 }
0x2d76   :  { %22916 = vmatprep.subr.bf16.mxu0 %v28414_v53 }
0x2d79   :  { %22918 = vmatpush1.bf16.msra.mxu0 %v28421_v4 }
0x2d7a   :  { %22920 = vmatprep.subr.bf16.mxu0 %v28088_v7 }
0x2d7c   :  { %18712 = vmatmul.mubr.f32.vlgmr.msra.gmra.mrb[28].mxu0 %v18240_v33 }
0x2d7d   :  { %22922 = vmatpush1.bf16.msra.mxu0 %v28131_v58  ;;  %18798 = vmatprep.mubr.f32.mxu0 %v29187_v48 }
0x2d7e   :  { %22924 = vmatprep.subr.bf16.mxu0 %v28135_v26 }
0x2d81   :  { %22926 = vmatpush1.bf16.msra.mxu0 %v28156_v6 }
0x2d82   :  { %22928 = vmatprep.subr.bf16.mxu0 %v28158_v54 }
0x2d85   :  { %22930 = vmatpush1.bf16.msra.mxu0 %v28182_v11 }
0x2d86   :  { %22932 = vmatprep.subr.bf16.mxu0 %v28187_v3 }
0x2d89   :  { %22934 = vmatpush1.bf16.msra.mxu0 %v28192_v63 }
0x2d8a   :  { %22936 = vmatprep.subr.bf16.mxu0 %v28088_v7 }
0x2d8c   :  { %18800 = vmatmul.mubr.f32.vlgmr.msra.gmra.mrb[28].mxu0 %v18240_v33 }
0x2d8d   :  { %22938 = vmatpush1.bf16.msra.mxu0 %v28131_v58  ;;  %18925 = vmatprep.mubr.f32.mxu0 %v29187_v48 }
0x2d8e   :  { %22940 = vmatprep.subr.bf16.mxu0 %v28135_v26 }
0x2d91   :  { %22942 = vmatpush1.bf16.msra.mxu0 %v28156_v6 }
0x2d92   :  { %22944 = vmatprep.subr.bf16.mxu0 %v28158_v54 }
0x2d95   :  { %22946 = vmatpush1.bf16.msra.mxu0 %v28182_v11 }
0x2d96   :  { %22948 = vmatprep.subr.bf16.mxu0 %v28187_v3 }
0x2d99   :  { %22950 = vmatpush1.bf16.msra.mxu0 %v28192_v63 }
0x2d9a   :  { %22952 = vmatprep.subr.bf16.mxu0 %v28195_v46 }
0x2e5f   :  { %v18801_v39 = vpop.f32.mrb[28].mxu0 }
0x2e60   :  { %v18803_v20 = vpop.f32.mrb[29].mxu0  ;;  %v23206_v35 = vadd.f32 %v29308_v45, %v18801_v39 }
0x2e61   :  { %v23208_v38 = vadd.f32 %v28451_v0, %v18803_v20 }
0x2e62   :  { %v20667_v27 = vmul.f32 -1.442695, %v23206_v35 }
0x2e63   :  { %24375 = vtanh.f32 %v23208_v38  ;;  %v20668_v31 = vmul.f32 -1.442695, %v23208_v38 }
0x2e64   :  { %24377 = vpow2.f32 %v20667_v27 }
0x2e6d   :  { %v24376_v8 = vpop.eup %24375 }
0x2e6e   :  { %18825 = vrot.lane.b32.xlu0 %v24376_v8, %s24500_s7  ;;  %v24378_v30 = vpop.eup %24377 }
0x2e6f   :  { %v18816_v1 = vadd.f32 1.0, %v24378_v30 }
0x2e71   :  { %24379 = vrcp.f32 %v18816_v1 }
0x2e7b   :  { %v24380_v22 = vpop.eup %24379 }
0x2e7c   :  { %v18823_v46 = vmul.f32 %v24380_v22, %v28777_v40 }
0x2ee0   :  { %v18826_v21 = vpop.permute.xlu0 %18825 }
0x2ee1   :  { %v18828_v14 = vmul.f32 %v24380_v22, %v18826_v21  ;;  %v28953_v22 = vsub.f32 %v19533_v34, %v19566_v36 }
0x2ee3   :  { %18830 = vrot.lane.b32.xlu1 %v18828_v14, %s24500_s7 }
0x2f55   :  { %v18831_v55 = vpop.permute.xlu1 %18830 }
0x2f56   :  { %v28841_v49 = vadd.f32 %v18831_v55, %v18823_v46 }
0x2f58   :  { %24381 = vtanh.f32 %v28841_v49 }
0x2f59   :  { %24383 = vpow2.f32 %v20668_v31 }
0x2f62   :  { %v24382_v29 = vpop.eup %24381 }
0x2f63   :  { %18836 = vrot.lane.b32.xlu0 %v24382_v29, %s24500_s7  ;;  %v24384_v42 = vpop.eup %24383 }
0x2f64   :  { %v18817_v57 = vadd.f32 1.0, %v24384_v42 }
0x2f66   :  { %24385 = vrcp.f32 %v18817_v57 }
0x2f70   :  { %v24386_v60 = vpop.eup %24385 }
0x2fd5   :  { %v18837_v16 = vpop.permute.xlu0 %18836 }
0x2fd6   :  { %v18839_v52 = vmul.f32 %v24386_v60, %v18837_v16 }
0x2fd8   :  { %v18843_v19 = vsel %vm4768_vm0, %v18839_v52, 0 }
0x2fd9   :  { %v18926_v43 = vand.u32 4294901760, %v18843_v19 }
0x2fdb   :  { %v18927_v40 = vsub.f32 %v18843_v19, %v18926_v43 }
0x2fdd   :  { %v18928_v61 = vand.u32 4294901760, %v18927_v40 }
0x2fdf   :  { %v18929_v33 = vsub.f32 %v18927_v40, %v18928_v61 }
0x2fe1   :  { %v18930_v50 = vand.u32 4294901760, %v18929_v33 }
0x2fe3   :  { %18931 = vmatmul.mubr.f32.vlgmr.msra.gmra.mrb[30].mxu0 %v18930_v50 }
0x2fe4   :  { %22954 = vmatpush1.bf16.msra.mxu0 %v28278_v62  ;;  %19081 = vmatprep.mubr.f32.mxu0 %v29187_v48 }
0x2fe5   :  { %22956 = vmatprep.subr.bf16.mxu0 %v28280_v37 }
0x2fe8   :  { %22958 = vmatpush1.bf16.msra.mxu0 %v28297_v13  ;;  %v19526_v13 = vld [vmem:[%s29094_s13] sm:$0xff] }
0x2fe9   :  { %22960 = vmatprep.subr.bf16.mxu0 %v28308_v56  ;;  %v19527_v56 = vld [vmem:[%s29094_s13 + $0x8] sm:$0xff] }
0x2fec   :  { %22962 = vmatpush1.bf16.msra.mxu0 %v28311_v15  ;;  %v24502_v15 = vmov 0.0|0.0  }
0x2fed   :  { %22964 = vmatprep.subr.bf16.mxu0 %v28314_v18  ;;  %23031 = vmatprep.subr.bf16.mxu1 %v24502_v15  ;;  %v19545_v18 = vand.u32 4294901760, %v19526_v13 }
0x2ff0   :  { %22966 = vmatpush1.bf16.msra.mxu0 %v28317_v12  ;;  %v19548_v12 = vand.u32 4294901760, %v19527_v56 }
0x2ff1   :  { %22968 = vmatprep.subr.bf16.mxu0 %v28322_v59 }
0x2ff2   :  { %v28904_v59 = vpack.c.bf16 %v19548_v12, %v19545_v18 }
0x2ff3   :  { %19083 = vmatmul.mubr.f32.vlgmr.msra.gmra.mrb[30].mxu0 %v18926_v43 }
0x2ff4   :  { %22970 = vmatpush1.bf16.msra.mxu0 %v28327_v24  ;;  %19185 = vmatprep.mubr.f32.mxu0 %v29187_v48  ;;  %v28906_v24 = vsub.f32 %v19526_v13, %v19545_v18 }
0x2ff5   :  { %22972 = vmatprep.subr.bf16.mxu0 %v28332_v28  ;;  %v28908_v28 = vsub.f32 %v19527_v56, %v19548_v12  ;;  %23033 = vmatpush3.bf16.msra.mxu1 %v28904_v59 }
0x2ff6   :  { %23034 = vmatprep.subr.bf16.mxu1 %v24502_v15  ;;  %v19630_v39 = vand.u32 4294901760, %v28906_v24 }
0x2ff7   :  { %v19637_v20 = vand.u32 4294901760, %v28908_v28 }
0x2ff8   :  { %22974 = vmatpush1.bf16.msra.mxu0 %v28338_v5  ;;  %v19528_v5 = vld [vmem:[%s29094_s13 + $0x10] sm:$0xff]  ;;  %v19631_v21 = vsub.f32 %v28906_v24, %v19630_v39 }
0x2ff9   :  { %22976 = vmatprep.subr.bf16.mxu0 %v28344_v10  ;;  %v19529_v10 = vld [vmem:[%s29094_s13 + $0x18] sm:$0xff]  ;;  %v19638_v14 = vsub.f32 %v28908_v28, %v19637_v20  ;;  %v23080_v12 = vpack.c.bf16 %v19637_v20, %v19630_v39  ;;  %v20084_v20 = vld [vmem:[%s29096_s15 + $0x10] sm:$0xff] }
0x2ffb   :  { %v19639_v29 = vand.u32 4294901760, %v19638_v14 }
0x2ffc   :  { %22978 = vmatpush1.bf16.msra.mxu0 %v28349_v51  ;;  %v19551_v51 = vand.u32 4294901760, %v19528_v5 }
0x2ffd   :  { %22980 = vmatprep.subr.bf16.mxu0 %v28354_v32  ;;  %v19554_v32 = vand.u32 4294901760, %v19529_v10 }
0x2ffe   :  { %v28941_v38 = vsub.f32 %v19528_v5, %v19551_v51 }
0x2fff   :  { %v28943_v8 = vsub.f32 %v19529_v10, %v19554_v32 }
0x3000   :  { %22982 = vmatpush1.bf16.msra.mxu0 %v28359_v44  ;;  %v19644_v46 = vand.u32 4294901760, %v28941_v38 }
0x3001   :  { %22984 = vmatprep.subr.bf16.mxu0 %v28088_v7  ;;  %v19651_v55 = vand.u32 4294901760, %v28943_v8  ;;  %v23059_v13 = vpack.c.bf16 %v28943_v8, %v28941_v38 }
0x3002   :  { %v19645_v42 = vsub.f32 %v28941_v38, %v19644_v46  ;;  %v20085_v38 = vld [vmem:[%s29096_s15 + $0x18] sm:$0xff] }
0x3003   :  { %19188 = vmatmul.mubr.f32.vlgmr.msra.gmra.mrb[30].mxu0 %v18927_v40  ;;  %v19652_v57 = vsub.f32 %v28943_v8, %v19651_v55  ;;  %v23083_v5 = vpack.c.bf16 %v19651_v55, %v19644_v46  ;;  %v20103_v8 = vand.u32 4294901760, %v20084_v20 }
0x3004   :  { %22986 = vmatpush1.bf16.msra.mxu0 %v28131_v58  ;;  %19274 = vmatprep.mubr.f32.mxu0 %v29187_v48  ;;  %v19646_v16 = vand.u32 4294901760, %v19645_v42 }
0x3005   :  { %22988 = vmatprep.subr.bf16.mxu0 %v28135_v26  ;;  %v19653_v52 = vand.u32 4294901760, %v19652_v57 }
0x3007   :  { %v23047_v40 = vpack.c.bf16 %v19653_v52, %v19646_v16 }
0x3008   :  { %22990 = vmatpush1.bf16.msra.mxu0 %v28156_v6 }
0x3009   :  { %22992 = vmatprep.subr.bf16.mxu0 %v28158_v54 }
0x300c   :  { %22994 = vmatpush1.bf16.msra.mxu0 %v28182_v11 }
0x300d   :  { %22996 = vmatprep.subr.bf16.mxu0 %v28187_v3 }
0x3010   :  { %22998 = vmatpush1.bf16.msra.mxu0 %v28192_v63 }
0x3011   :  { %23000 = vmatprep.subr.bf16.mxu0 %v28076_v2 }
0x3013   :  { %19278 = vmatmul.mubr.f32.vlgmr.msra.gmra.mrb[30].mxu0 %v18928_v61 }
0x3014   :  { %23002 = vmatpush1.bf16.msra.mxu0 %v28377_v25  ;;  %19396 = vmatprep.mubr.f32.mxu0 %v29187_v48 }
0x3015   :  { %23004 = vmatprep.subr.bf16.mxu0 %v28384_v17  ;;  %v28919_v17 = vpack.c.bf16 %v19554_v32, %v19551_v51 }
0x3017   :  { %23036 = vmatpush3.bf16.msra.mxu1 %v28919_v17 }
0x3018   :  { %23006 = vmatpush1.bf16.msra.mxu0 %v28392_v47  ;;  %23037 = vmatprep.subr.bf16.mxu1 %v24502_v15 }
0x3019   :  { %23008 = vmatprep.subr.bf16.mxu0 %v28400_v9  ;;  %v19530_v9 = vld [vmem:[%s29094_s13 + $0x20] sm:$0xff] }
0x301c   :  { %23010 = vmatpush1.bf16.msra.mxu0 %v28407_v23  ;;  %v19531_v23 = vld [vmem:[%s29094_s13 + $0x28] sm:$0xff] }
0x301d   :  { %23012 = vmatprep.subr.bf16.mxu0 %v28414_v53  ;;  %v19557_v53 = vand.u32 4294901760, %v19530_v9 }
0x301f   :  { %v28945_v35 = vsub.f32 %v19530_v9, %v19557_v53 }
0x3020   :  { %23014 = vmatpush1.bf16.msra.mxu0 %v28421_v4  ;;  %v19560_v4 = vand.u32 4294901760, %v19531_v23 }
0x3021   :  { %23016 = vmatprep.subr.bf16.mxu0 %v28088_v7  ;;  %v19658_v19 = vand.u32 4294901760, %v28945_v35 }
0x3022   :  { %v28947_v27 = vsub.f32 %v19531_v23, %v19560_v4 }
0x3023   :  { %19398 = vmatmul.mubr.f32.vlgmr.msra.gmra.mrb[30].mxu0 %v18926_v43  ;;  %v19659_v61 = vsub.f32 %v28945_v35, %v19658_v19 }
0x3024   :  { %23018 = vmatpush1.bf16.msra.mxu0 %v28131_v58  ;;  %19484 = vmatprep.mubr.f32.mxu0 %v29187_v48  ;;  %v23062_v56 = vpack.c.bf16 %v28947_v27, %v28945_v35  ;;  %v20106_v35 = vand.u32 4294901760, %v20085_v38 }
0x3025   :  { %23020 = vmatprep.subr.bf16.mxu0 %v28135_v26  ;;  %v19660_v50 = vand.u32 4294901760, %v19659_v61 }
0x3028   :  { %23022 = vmatpush1.bf16.msra.mxu0 %v28156_v6 }
0x3029   :  { %23024 = vmatprep.subr.bf16.mxu0 %v28158_v54 }
0x302c   :  { %23026 = vmatpush1.bf16.msra.mxu0 %v28182_v11 }
0x302d   :  { %23028 = vmatprep.subr.bf16.mxu0 %v28187_v3 }
0x3030   :  { %23030 = vmatpush1.bf16.msra.mxu0 %v28192_v63 }
0x3033   :  { %19486 = vmatmul.mubr.f32.vlgmr.msra.gmra.mrb[30].mxu0 %v18926_v43  ;;  %v19665_v43 = vand.u32 4294901760, %v28947_v27 }
0x3035   :  { %v19666_v33 = vsub.f32 %v28947_v27, %v19665_v43  ;;  %v23086_v10 = vpack.c.bf16 %v19665_v43, %v19658_v19 }
0x3106   :  { %v19487_v2 = vpop.f32.mrb[30].mxu0 }
0x3107   :  { %v19489_v7 = vpop.f32.mrb[31].mxu0  ;;  %v23210_v26 = vadd.f32 %v29308_v45, %v19487_v2  ;;  %v19532_v45 = vld [vmem:[%s29094_s13 + $0x30] sm:$0xff]  ;;  %v19667_v2 = vand.u32 4294901760, %v19666_v33 }
0x3108   :  { %v28891_v62 = vadd.f32 %v28451_v0, %v19489_v7  ;;  %v28929_v0 = vpack.c.bf16 %v19560_v4, %v19557_v53  ;;  %v19563_v41 = vand.u32 4294901760, %v19532_v45 }
0x3109   :  { %v20669_v6 = vmul.f32 -1.442695, %v23210_v26  ;;  %v23050_v26 = vpack.c.bf16 %v19667_v2, %v19660_v50  ;;  %v20671_v50 = vld [vmem:[%s29095_s14] ss:$0 sm:$0xff] }
0x310a   :  { %24387 = vtanh.f32 %v28891_v62  ;;  %23039 = vmatpush3.bf16.msra.mxu1 %v28929_v0  ;;  %v28949_v30 = vpack.c.bf16 %v19566_v36, %v19563_v41  ;;  %v28951_v1 = vsub.f32 %v19532_v45, %v19563_v41  ;;  %v20670_v32 = vmul.f32 -1.442695, %v28891_v62  ;;  %v20082_v62 = vld [vmem:[%s29096_s15] sm:$0xff] }
0x310b   :  { %24389 = vpow2.f32 %v20669_v6  ;;  %23040 = vmatprep.subr.bf16.mxu1 %v24502_v15 }
0x310c   :  { %v19672_v7 = vand.u32 4294901760, %v28951_v1  ;;  %v23065_v18 = vpack.c.bf16 %v28953_v22, %v28951_v1 }
0x310e   :  { %23042 = vmatpush3.bf16.msra.mxu1 %v28949_v30  ;;  %v19673_v6 = vsub.f32 %v28951_v1, %v19672_v7  ;;  %v23107_v1 = vpack.c.bf16 %v20106_v35, %v20103_v8 }
0x310f   :  { %23043 = vmatprep.subr.bf16.mxu1 %v24502_v15 }
0x3114   :  { %v24388_v58 = vpop.eup %24387 }
0x3115   :  { %19511 = vrot.lane.b32.xlu1 %v24388_v58, %s24500_s7  ;;  %v24390_v54 = vpop.eup %24389  ;;  %v19679_v58 = vand.u32 4294901760, %v28953_v22 }
0x3116   :  { %v19502_v11 = vadd.f32 1.0, %v24390_v54 }
0x3117   :  { %v19680_v54 = vsub.f32 %v28953_v22, %v19679_v58  ;;  %v23089_v51 = vpack.c.bf16 %v19679_v58, %v19672_v7  ;;  %v20191_v22 = vsub.f32 %v20084_v20, %v20103_v8 }
0x3118   :  { %24391 = vrcp.f32 %v19502_v11  ;;  %v19674_v11 = vand.u32 4294901760, %v19673_v6 }
0x3122   :  { %v24392_v3 = vpop.eup %24391 }
0x3123   :  { %v19509_v44 = vmul.f32 %v24392_v3, %v28841_v49  ;;  %v19632_v49 = vand.u32 4294901760, %v19631_v21  ;;  %v20198_v21 = vsub.f32 %v20085_v38, %v20106_v35 }
0x3125   :  { %v23044_v60 = vpack.c.bf16 %v19639_v29, %v19632_v49  ;;  %v20192_v49 = vand.u32 4294901760, %v20191_v22  ;;  %v20199_v29 = vand.u32 4294901760, %v20198_v21 }
0x3127   :  { %v20193_v42 = vsub.f32 %v20191_v22, %v20192_v49  ;;  %v20200_v57 = vsub.f32 %v20198_v21, %v20199_v29  ;;  %v23131_v33 = vpack.c.bf16 %v20199_v29, %v20192_v49 }
0x3129   :  { %v20194_v16 = vand.u32 4294901760, %v20193_v42  ;;  %v20201_v52 = vand.u32 4294901760, %v20200_v57 }
0x312b   :  { %v23113_v19 = vpack.c.bf16 %v20201_v52, %v20194_v16 }
0x3187   :  { %v19512_v63 = vpop.permute.xlu1 %19511 }
0x3188   :  { %v19514_v37 = vmul.f32 %v24392_v3, %v19512_v63  ;;  %v19681_v3 = vand.u32 4294901760, %v19680_v54 }
0x318a   :  { %19516 = vrot.lane.b32.xlu0 %v19514_v37, %s24500_s7  ;;  %v23053_v63 = vpack.c.bf16 %v19681_v3, %v19674_v11  ;;  %v23056_v37 = vpack.c.bf16 %v28908_v28, %v28906_v24 }
0x31fc   :  { %v19517_v25 = vpop.permute.xlu0 %19516 }
0x31fd   :  { %v19519_v47 = vadd.f32 %v19517_v25, %v19509_v44 }
0x31ff   :  { %24393 = vtanh.f32 %v19519_v47 }
0x3200   :  { %24395 = vpow2.f32 %v20670_v32 }
0x3209   :  { %v24394_v31 = vpop.eup %24393 }
0x320a   :  { %19522 = vrot.lane.b32.xlu1 %v24394_v31, %s24500_s7  ;;  %v24396_v44 = vpop.eup %24395 }
0x320b   :  { %v19503_v25 = vadd.f32 1.0, %v24396_v44 }
0x320d   :  { %24397 = vrcp.f32 %v19503_v25 }
0x3217   :  { %v24398_v24 = vpop.eup %24397 }
0x327c   :  { %v19523_v28 = vpop.permute.xlu1 %19522 }
0x327d   :  { %v19525_v47 = vmul.f32 %v24398_v24, %v19523_v28 }
0x327f   :  { %v19542_v9 = vsel %vm4768_vm0, %v19525_v47, 0 }
0x3280   :  { %v19617_v23 = vand.u32 4294901760, %v19542_v9 }
0x3282   :  { %v19618_v53 = vsub.f32 %v19542_v9, %v19617_v23 }
0x3284   :  { %v19619_v4 = vand.u32 4294901760, %v19618_v53 }
0x3286   :  { %v19620_v45 = vsub.f32 %v19618_v53, %v19619_v4 }
0x3288   :  { %v19621_v34 = vand.u32 4294901760, %v19620_v45 }
0x328a   :  { %21020 = vmatmul.mubr.f32.vlgmr.msra.gmra.mrb[16].mxu1 %v19621_v34 }
0x328b   :  { %23045 = vmatpush3.bf16.msra.mxu1 %v23044_v60  ;;  %21038 = vmatprep.mubr.msk.f32.mxu1 %vm24503_vm9, %v29187_v48 }
0x328c   :  { %23046 = vmatprep.subr.bf16.mxu1 %v24502_v15 }
0x328f   :  { %23048 = vmatpush3.bf16.msra.mxu1 %v23047_v40  ;;  %v23119_v40 = vpack.c.bf16 %v20198_v21, %v20191_v22 }
0x3290   :  { %23049 = vmatprep.subr.bf16.mxu1 %v24502_v15 }
0x3293   :  { %23051 = vmatpush3.bf16.msra.mxu1 %v23050_v26 }
0x3294   :  { %23052 = vmatprep.subr.bf16.mxu1 %v24502_v15 }
0x3297   :  { %23054 = vmatpush3.bf16.msra.mxu1 %v23053_v63 }
0x3298   :  { %23055 = vmatprep.subr.bf16.mxu1 %v24502_v15 }
0x329a   :  { %21039 = vmatmul.mubr.f32.vlgmr.msra.gmra.mrb[16].mxu1 %v19617_v23 }
0x329b   :  { %23057 = vmatpush3.bf16.msra.mxu1 %v23056_v37  ;;  %21057 = vmatprep.mubr.msk.f32.mxu1 %vm24503_vm9, %v29187_v48 }
0x329c   :  { %23058 = vmatprep.subr.bf16.mxu1 %v24502_v15 }
0x329f   :  { %23060 = vmatpush3.bf16.msra.mxu1 %v23059_v13  ;;  %v20672_v13 = vld [vmem:[%s29097_s16] ss:$0 sm:$0xff] }
0x32a0   :  { %23061 = vmatprep.subr.bf16.mxu1 %v24502_v15 }
0x32a3   :  { %23063 = vmatpush3.bf16.msra.mxu1 %v23062_v56 }
0x32a4   :  { %23064 = vmatprep.subr.bf16.mxu1 %v24502_v15 }
0x32a7   :  { %23066 = vmatpush3.bf16.msra.mxu1 %v23065_v18 }
0x32a8   :  { %23067 = vmatprep.subr.bf16.mxu1 %v24502_v15 }
0x32aa   :  { %21058 = vmatmul.mubr.f32.vlgmr.msra.gmra.mrb[16].mxu1 %v19618_v53 }
0x32ab   :  { %23069 = vmatpush3.bf16.msra.mxu1 %v28904_v59  ;;  %21076 = vmatprep.mubr.msk.f32.mxu1 %vm24503_vm9, %v29187_v48 }
0x32ac   :  { %23070 = vmatprep.subr.bf16.mxu1 %v24502_v15 }
0x32af   :  { %23072 = vmatpush3.bf16.msra.mxu1 %v28919_v17 }
0x32b0   :  { %23073 = vmatprep.subr.bf16.mxu1 %v24502_v15 }
0x32b3   :  { %23075 = vmatpush3.bf16.msra.mxu1 %v28929_v0 }
0x32b4   :  { %23076 = vmatprep.subr.bf16.mxu1 %v24502_v15 }
0x32b7   :  { %23078 = vmatpush3.bf16.msra.mxu1 %v28949_v30 }
0x32b8   :  { %23079 = vmatprep.subr.bf16.mxu1 %v24502_v15 }
0x32ba   :  { %21077 = vmatmul.mubr.f32.vlgmr.msra.gmra.mrb[16].mxu1 %v19619_v4 }
0x32bb   :  { %23081 = vmatpush3.bf16.msra.mxu1 %v23080_v12  ;;  %21095 = vmatprep.mubr.msk.f32.mxu1 %vm24503_vm9, %v29187_v48 }
0x32bc   :  { %23082 = vmatprep.subr.bf16.mxu1 %v24502_v15 }
0x32bf   :  { %23084 = vmatpush3.bf16.msra.mxu1 %v23083_v5 }
0x32c0   :  { %23085 = vmatprep.subr.bf16.mxu1 %v24502_v15 }
0x32c3   :  { %23087 = vmatpush3.bf16.msra.mxu1 %v23086_v10 }
0x32c4   :  { %23088 = vmatprep.subr.bf16.mxu1 %v24502_v15 }
0x32c7   :  { %23090 = vmatpush3.bf16.msra.mxu1 %v23089_v51 }
0x32c8   :  { %23091 = vmatprep.subr.bf16.mxu1 %v24502_v15 }
0x32ca   :  { %21096 = vmatmul.mubr.f32.vlgmr.msra.gmra.mrb[16].mxu1 %v19617_v23 }
0x32cb   :  { %23093 = vmatpush3.bf16.msra.mxu1 %v28904_v59  ;;  %21114 = vmatprep.mubr.msk.f32.mxu1 %vm24503_vm9, %v29187_v48  ;;  %v20083_v59 = vld [vmem:[%s29096_s15 + $0x8] sm:$0xff] }
0x32cc   :  { %23094 = vmatprep.subr.bf16.mxu1 %v24502_v15 }
0x32cf   :  { %23096 = vmatpush3.bf16.msra.mxu1 %v28919_v17  ;;  %v20097_v17 = vand.u32 4294901760, %v20082_v62 }
0x32d0   :  { %23097 = vmatprep.subr.bf16.mxu1 %v24502_v15 }
0x32d1   :  { %v20177_v36 = vsub.f32 %v20082_v62, %v20097_v17 }
0x32d3   :  { %23099 = vmatpush3.bf16.msra.mxu1 %v28929_v0  ;;  %v20100_v0 = vand.u32 4294901760, %v20083_v59  ;;  %v20178_v27 = vand.u32 4294901760, %v20177_v36 }
0x32d4   :  { %23100 = vmatprep.subr.bf16.mxu1 %v24502_v15 }
0x32d5   :  { %v29030_v41 = vpack.c.bf16 %v20100_v0, %v20097_v17  ;;  %v20184_v39 = vsub.f32 %v20083_v59, %v20100_v0  ;;  %v20179_v14 = vsub.f32 %v20177_v36, %v20178_v27 }
0x32d7   :  { %23102 = vmatpush3.bf16.msra.mxu1 %v28949_v30  ;;  %v20185_v30 = vand.u32 4294901760, %v20184_v39  ;;  %v20180_v55 = vand.u32 4294901760, %v20179_v14  ;;  %v23116_v43 = vpack.c.bf16 %v20184_v39, %v20177_v36 }
0x32d8   :  { %23103 = vmatprep.subr.bf16.mxu1 %v24502_v15 }
0x32d9   :  { %v20186_v46 = vsub.f32 %v20184_v39, %v20185_v30  ;;  %v23128_v61 = vpack.c.bf16 %v20185_v30, %v20178_v27 }
0x32da   :  { %21115 = vmatmul.mubr.f32.vlgmr.msra.gmra.mrb[16].mxu1 %v19617_v23 }
0x32db   :  { %21125 = vmatprep.mubr.msk.f32.mxu1 %vm24503_vm9, %v29187_v48  ;;  %23105 = vmatpush3.bf16.msra.mxu1 %v29030_v41  ;;  %v20187_v31 = vand.u32 4294901760, %v20186_v46 }
0x32dc   :  { %23106 = vmatprep.subr.bf16.mxu1 %v24502_v15 }
0x32dd   :  { %v23110_v60 = vpack.c.bf16 %v20187_v31, %v20180_v55 }
0x32df   :  { %23108 = vmatpush3.bf16.msra.mxu1 %v23107_v1 }
0x32e0   :  { %23109 = vmatprep.subr.bf16.mxu1 %v24502_v15 }
0x33ad   :  { %v20077_v2 = vpop.f32.mrb[16].mxu1 }
0x33ae   :  { %v23213_v7 = vadd.f32 %v20671_v50, %v20077_v2  ;;  %v21116_v58 = vpop.f32.mrb[17].mxu1 }
0x33b0   :  { %v20081_v26 = vmax.f32 %v23213_v7, 0.0 }
0x33b2   :  { %v20094_v6 = vsel %vm5453_vm2, %v20081_v26, 0 }
0x33b3   :  { %v20165_v54 = vand.u32 4294901760, %v20094_v6 }
0x33b5   :  { %v20166_v11 = vsub.f32 %v20094_v6, %v20165_v54 }
0x33b7   :  { %v20167_v3 = vand.u32 4294901760, %v20166_v11 }
0x33b9   :  { %v20168_v63 = vsub.f32 %v20166_v11, %v20167_v3 }
0x33bb   :  { %v20169_v37 = vand.u32 4294901760, %v20168_v63 }
0x33bd   :  { %21126 = vmatmul.mubr.f32.vlgmr.msra.gmra.mrb[18].mxu1 %v20169_v37 }
0x33be   :  { %23111 = vmatpush3.bf16.msra.mxu1 %v23110_v60  ;;  %21136 = vmatprep.mubr.msk.f32.mxu1 %vm24503_vm9, %v29187_v48 }
0x33bf   :  { %23112 = vmatprep.subr.bf16.mxu1 %v24502_v15 }
0x33c2   :  { %23114 = vmatpush3.bf16.msra.mxu1 %v23113_v19 }
0x33c3   :  { %23115 = vmatprep.subr.bf16.mxu1 %v24502_v15 }
0x33c5   :  { %21137 = vmatmul.mubr.f32.vlgmr.msra.gmra.mrb[18].mxu1 %v20165_v54 }
0x33c6   :  { %23117 = vmatpush3.bf16.msra.mxu1 %v23116_v43  ;;  %21147 = vmatprep.mubr.msk.f32.mxu1 %vm24503_vm9, %v29187_v48 }
0x33c7   :  { %23118 = vmatprep.subr.bf16.mxu1 %v24502_v15 }
0x33ca   :  { %23120 = vmatpush3.bf16.msra.mxu1 %v23119_v40 }
0x33cb   :  { %23121 = vmatprep.subr.bf16.mxu1 %v24502_v15 }
0x33cd   :  { %21148 = vmatmul.mubr.f32.vlgmr.msra.gmra.mrb[18].mxu1 %v20166_v11 }
0x33ce   :  { %23123 = vmatpush3.bf16.msra.mxu1 %v29030_v41  ;;  %21158 = vmatprep.mubr.msk.f32.mxu1 %vm24503_vm9, %v29187_v48 }
0x33cf   :  { %23124 = vmatprep.subr.bf16.mxu1 %v24502_v15 }
0x33d2   :  { %23126 = vmatpush3.bf16.msra.mxu1 %v23107_v1 }
0x33d3   :  { %23127 = vmatprep.subr.bf16.mxu1 %v24502_v15 }
0x33d5   :  { %21159 = vmatmul.mubr.f32.vlgmr.msra.gmra.mrb[18].mxu1 %v20167_v3 }
0x33d6   :  { %23129 = vmatpush3.bf16.msra.mxu1 %v23128_v61  ;;  %21169 = vmatprep.mubr.msk.f32.mxu1 %vm24503_vm9, %v29187_v48 }
0x33d7   :  { %23130 = vmatprep.subr.bf16.mxu1 %v24502_v15 }
0x33da   :  { %23132 = vmatpush3.bf16.msra.mxu1 %v23131_v33 }
0x33db   :  { %23133 = vmatprep.subr.bf16.mxu1 %v24502_v15 }
0x33dd   :  { %21170 = vmatmul.mubr.f32.vlgmr.msra.gmra.mrb[18].mxu1 %v20165_v54 }
0x33de   :  { %23135 = vmatpush3.bf16.msra.mxu1 %v29030_v41  ;;  %21180 = vmatprep.mubr.msk.f32.mxu1 %vm24503_vm9, %v29187_v48 }
0x33df   :  { %23136 = vmatprep.subr.bf16.mxu1 %v24502_v15 }
0x33e2   :  { %23138 = vmatpush3.bf16.msra.mxu1 %v23107_v1 }
0x33e5   :  { %21181 = vmatmul.mubr.f32.vlgmr.msra.gmra.mrb[18].mxu1 %v20165_v54 }
0x34b8   :  { %v20577_v56 = vpop.f32.mrb[18].mxu1 }
0x34b9   :  { %v23214_v18 = vadd.f32 %v20672_v13, %v20577_v56  ;;  %v21182_v12 = vpop.f32.mrb[19].mxu1 }
0x34bb   :  { %20582 = vst.msk [vmem:[#allocation12] sm:$0x3] %vm20581_vm10, %v23214_v18 }
0x34bc   :  { %24478 = shalt.err (!%p24475_p0)
}
0x34bd   :  { %s24479_s8 = scalar_lea.hbm %s29098_s17, 32 }
0x34be   :  { %p24480_p1 = scmp.ne.s32.totalorder %s29098_s17, %s24479_s8  ;;  %p24483_p2 = scmp.lt.u32.totalorder %s24479_s8, %s29098_s17 }
0x34c0   :  { %p24485_p3 = pnand %p24483_p2, %p24480_p1 }
0x34c2   :  { %24488 = shalt.err (!%p24485_p3)
}
0x34c3   :  { %20592 = dma.vmem_to_hbm [thread:$0]  %s20590_s11, 32, %s29098_s17, [#allocation8]  }
0x34c4   :  { %24493 = dma.done.wait [#allocation8], 32  }
0x34c5   :  { %24494 = vsyncadd [#allocation8], 4294967264 }
0x34c6   :  { %20596 = vsyncpa [#allocation7], 1 }
0x34c7   :  { %20597 = vsyncpa [#allocation10], 1 }
0x34c8   :  { %20598 = vsyncpa [#allocation8], 1 }

</bundles_post_ra>
